<compile_context>
chip_gen: v7x
topology: tpu7x:2x2x1
jax: 0.10.0
libtpu: 0.0.40
codegen_flags: <defaults>
</compile_context>

<pallas_src>
import functools
import math

import jax
import jax.numpy as jnp
from jax.experimental import pallas as pl
from jax.experimental.pallas import tpu as pltpu


# ----------------------------- fused Pallas kernel ---------------------------

def _wide_basic_kernel(x_ref, s1_ref, b1_ref, w1_ref, s2_ref, b2_ref, w2_ref,
                       *rest, s, has_proj):
    """out = conv2(relu(bn2(conv1(relu(bn1(x))))), stride=s) + shortcut(x).

    One batch image per grid step.  Everything between x and out stays in VMEM.

    x_ref   : (1, H, W, Cin) f32
    w1_ref  : (9*Cin, P)     bf16   conv1 weights, im2col row order (dh, dw, cin)
    w2_ref  : (9*P, P)       bf16   conv2 weights, im2col row order (dh, dw, cin)
    ws_ref  : (Cin, P)       bf16   1x1 shortcut weights (only when has_proj)
    o_ref   : (1, Ho, Wo, P) f32
    pad1_ref: VMEM (H+2, W+2, Cin)   bf16   zero-padded relu(bn1(x))
    im1_ref : VMEM (H*W, 9*Cin)      bf16   conv1 im2col
    h2ps_ref: VMEM (s, Hq, s, Wq, P) bf16   phase-split zero-padded h2:
              h2ps[r, A, r', B, :] == zero_pad(h2)[s*A + r, s*B + r', :]
    im2_ref : VMEM (Ho*Wo, 9*P)      bf16   conv2 im2col
    """
    if has_proj:
        ws_ref, o_ref, pad1_ref, im1_ref, h2ps_ref, im2_ref = rest
    else:
        ws_ref = None
        o_ref, pad1_ref, im1_ref, h2ps_ref, im2_ref = rest

    _, H, W, Cin = x_ref.shape
    P = w2_ref.shape[-1]
    Ho, Wo = H // s, W // s
    Hq, Wq = h2ps_ref.shape[1], h2ps_ref.shape[3]
    bf16 = jnp.bfloat16

    # ---------------- bn1 + relu prologue (stays in registers) ---------------
    x = x_ref[0]                                                 # (H, W, Cin) f32
    h1 = jnp.maximum(x * s1_ref[...].reshape(1, 1, Cin)
                     + b1_ref[...].reshape(1, 1, Cin), 0.0)

    # ---------------- conv1 input: padded bf16 scratch, halo-only zero -------
    zrow = jnp.zeros((1, W + 2, Cin), bf16)
    pad1_ref[pl.ds(0, 1), :, :] = zrow
    pad1_ref[pl.ds(H + 1, 1), :, :] = zrow
    zcol = jnp.zeros((H, 1, Cin), bf16)
    pad1_ref[pl.ds(1, H), pl.ds(0, 1), :] = zcol
    pad1_ref[pl.ds(1, H), pl.ds(W + 1, 1), :] = zcol
    pad1_ref[pl.ds(1, H), pl.ds(1, W), :] = h1.astype(bf16)      # cast ONCE

    # conv1 (3x3, stride 1, pad 1) as ONE deep-K matmul: (H*W, 9*Cin) @ (9*Cin, P)
    for dh in range(3):
        for dw in range(3):
            t = dh * 3 + dw
            tap = pad1_ref[pl.ds(dh, H), pl.ds(dw, W), :]        # (H, W, Cin) bf16
            im1_ref[:, pl.ds(t * Cin, Cin)] = tap.reshape(H * W, Cin)
    acc1 = jnp.dot(im1_ref[...], w1_ref[...],
                   preferred_element_type=jnp.float32)           # (H*W, P) f32

    # ---------------- bn2 + relu, phase-split padded bf16 scratch ------------
    # TODO(synk): training-mode dropout (random mask + 1/(1-p) rescale) not implemented.
    h2 = jnp.maximum(acc1 * s2_ref[...] + b2_ref[...], 0.0).astype(bf16)  # cast ONCE

    # halo-only zero: top padded row / left padded col are always read by the
    # dh=0 / dw=0 taps; the bottom/right padded row/col are only read when s==1.
    zr2 = jnp.zeros((1, 1, s, Wq, P), bf16)
    zc2 = jnp.zeros((s, Hq, 1, 1, P), bf16)
    h2ps_ref[pl.ds(0, 1), pl.ds(0, 1), :, :, :] = zr2
    h2ps_ref[:, :, pl.ds(0, 1), pl.ds(0, 1), :] = zc2
    if s == 1:
        h2ps_ref[pl.ds(0, 1), pl.ds(H + 1, 1), :, :, :] = zr2
        h2ps_ref[:, :, pl.ds(0, 1), pl.ds(W + 1, 1), :] = zc2

    # scatter h2 phases:  h2 row s*a+p / col s*b+q lands at padded coords +1,
    # i.e. phase (p+1)%s, quotient offset (p+1)//s (same for columns).
    if s == 1:
        phases = {(0, 0): h2.reshape(Ho, Wo, P)}
    else:
        h2r = h2.reshape(Ho, s, Wo, s, P)
        phases = {(p, q): h2r[:, p, :, q, :] for p in range(s) for q in range(s)}
    for (p, q), v in phases.items():
        rh, oh0 = (p + 1) % s, (p + 1) // s
        rw, ow0 = (q + 1) % s, (q + 1) // s
        h2ps_ref[pl.ds(rh, 1), pl.ds(oh0, Ho),
                 pl.ds(rw, 1), pl.ds(ow0, Wo), :] = v.reshape(1, Ho, 1, Wo, P)

    # conv2 (3x3, stride s, pad 1) as ONE deep-K matmul: (Ho*Wo, 9*P) @ (9*P, P).
    # Every stride-s tap is a static, contiguous slice of the phase-split scratch.
    for dh in range(3):
        for dw in range(3):
            t = dh * 3 + dw
            tap = h2ps_ref[pl.ds(dh % s, 1), pl.ds(dh // s, Ho),
                           pl.ds(dw % s, 1), pl.ds(dw // s, Wo), :]
            im2_ref[:, pl.ds(t * P, P)] = tap.reshape(Ho * Wo, P)
    acc2 = jnp.dot(im2_ref[...], w2_ref[...],
                   preferred_element_type=jnp.float32)           # (Ho*Wo, P) f32

    # ---------------- fused shortcut (1x1 stride-s conv or identity) ----------
    if s == 1:
        xs = x.reshape(Ho * Wo, Cin)
    else:
        xs = x.reshape(Ho, s, Wo, s, Cin)[:, 0, :, 0, :].reshape(Ho * Wo, Cin)
    if has_proj:
        acc2 = acc2 + jnp.dot(xs.astype(bf16), ws_ref[...],
                              preferred_element_type=jnp.float32)
    else:
        acc2 = acc2 + xs                                         # identity, f32

    o_ref[0] = acc2.reshape(Ho, Wo, P).astype(o_ref.dtype)


# ------------------------------ pallas_call wrapper ---------------------------

def wide_basic_forward(x_nhwc, params, stride, dropout_rate=0.0):
    """Pallas implementation of wide_basic.forward (inference mode), NHWC."""
    eps = 1e-5
    N, H, W, Cin = x_nhwc.shape
    planes = params["conv1_w"].shape[-1]
    s = stride
    assert H % s == 0 and W % s == 0
    has_proj = (s != 1) or (Cin != planes)
    if not has_proj:
        assert s == 1 and Cin == planes, \
            "identity shortcut requires stride == 1 and in_planes == planes"

    # fold BatchNorm (running stats) into per-channel scale/shift
    scale1 = params["bn1_gamma"] / jnp.sqrt(params["bn1_var"] + eps)
    shift1 = params["bn1_beta"] - params["bn1_mean"] * scale1
    scale2 = params["bn2_gamma"] / jnp.sqrt(params["bn2_var"] + eps)
    shift2 = params["bn2_beta"] - params["bn2_mean"] * scale2

    # conv weights in im2col row order (dh, dw, cin) -> bf16 MXU operands
    w1 = params["conv1_w"].reshape(9 * Cin, planes).astype(jnp.bfloat16)
    w2 = params["conv2_w"].reshape(9 * planes, planes).astype(jnp.bfloat16)

    Ho, Wo = H // s, W // s
    Hq = pl.cdiv(H + 2, s)
    Wq = pl.cdiv(W + 2, s)

    in_specs = [
        pl.BlockSpec((1, H, W, Cin), lambda n: (n, 0, 0, 0)),
        pl.BlockSpec((1, Cin), lambda n: (0, 0)),
        pl.BlockSpec((1, Cin), lambda n: (0, 0)),
        pl.BlockSpec((9 * Cin, planes), lambda n: (0, 0)),
        pl.BlockSpec((1, planes), lambda n: (0, 0)),
        pl.BlockSpec((1, planes), lambda n: (0, 0)),
        pl.BlockSpec((9 * planes, planes), lambda n: (0, 0)),
    ]
    args = [x_nhwc,
            scale1.reshape(1, Cin), shift1.reshape(1, Cin), w1,
            scale2.reshape(1, planes), shift2.reshape(1, planes), w2]
    if has_proj:
        in_specs.append(pl.BlockSpec((Cin, planes), lambda n: (0, 0)))
        args.append(params["shortcut_w"].reshape(Cin, planes).astype(jnp.bfloat16))

    kernel = functools.partial(_wide_basic_kernel, s=s, has_proj=has_proj)
    return pl.pallas_call(
        kernel,
        out_shape=jax.ShapeDtypeStruct((N, Ho, Wo, planes), jnp.float32),
        grid=(N,),
        in_specs=in_specs,
        out_specs=pl.BlockSpec((1, Ho, Wo, planes), lambda n: (n, 0, 0, 0)),
        scratch_shapes=[
            pltpu.VMEM((H + 2, W + 2, Cin), jnp.bfloat16),      # padded relu(bn1(x))
            pltpu.VMEM((H * W, 9 * Cin), jnp.bfloat16),         # conv1 im2col
            pltpu.VMEM((s, Hq, s, Wq, planes), jnp.bfloat16),   # phase-split padded h2
            pltpu.VMEM((Ho * Wo, 9 * planes), jnp.bfloat16),    # conv2 im2col
        ],
        compiler_params=pltpu.CompilerParams(
            dimension_semantics=("parallel",),
            # explicit VMEM budget: safe on v5e/v6e/v7x and far above the demo
            # footprint; re-derive (and tile cout) at real WideResNet widths.
            vmem_limit_bytes=32 * 1024 * 1024,
        ),
    )(*args)


# ------------------------------ params + reference ---------------------------

def init_params(key, in_planes, planes, stride):
    """Deterministic synthetic parameters (shapes from wide_basic.__init__)."""
    ks = jax.random.split(key, 12)
    p = {
        "bn1_gamma": jax.random.uniform(ks[0], (in_planes,), jnp.float32, 0.5, 1.5),
        "bn1_beta": 0.1 * jax.random.normal(ks[1], (in_planes,), jnp.float32),
        "bn1_mean": 0.1 * jax.random.normal(ks[2], (in_planes,), jnp.float32),
        "bn1_var": jax.random.uniform(ks[3], (in_planes,), jnp.float32, 0.5, 1.5),
        # conv weights stored HWIO: (kh, kw, cin, cout)
        "conv1_w": jax.random.normal(ks[4], (3, 3, in_planes, planes), jnp.float32)
                   * (1.0 / math.sqrt(9 * in_planes)),
        "bn2_gamma": jax.random.uniform(ks[5], (planes,), jnp.float32, 0.5, 1.5),
        "bn2_beta": 0.1 * jax.random.normal(ks[6], (planes,), jnp.float32),
        "bn2_mean": 0.1 * jax.random.normal(ks[7], (planes,), jnp.float32),
        "bn2_var": jax.random.uniform(ks[8], (planes,), jnp.float32, 0.5, 1.5),
        "conv2_w": jax.random.normal(ks[9], (3, 3, planes, planes), jnp.float32)
                   * (1.0 / math.sqrt(9 * planes)),
    }
    if stride != 1 or in_planes != planes:
        p["shortcut_w"] = (jax.random.normal(ks[10], (1, 1, in_planes, planes),
                                             jnp.float32)
                           * (1.0 / math.sqrt(in_planes)))
    return p


def reference_forward(x, params, stride, eps=1e-5):
    def bn_relu_ref(v, g, b, m, var):
        return jnp.maximum((v - m) / jnp.sqrt(var + eps) * g + b, 0.0)

    def conv(v, w, s, pad):
        return jax.lax.conv_general_dilated(
            v, w, window_strides=(s, s), padding=[(pad, pad), (pad, pad)],
            dimension_numbers=("NHWC", "HWIO", "NHWC"))

    h1 = bn_relu_ref(x, params["bn1_gamma"], params["bn1_beta"],
                     params["bn1_mean"], params["bn1_var"])
    out1 = conv(h1, params["conv1_w"], 1, 1)
    h2 = bn_relu_ref(out1, params["bn2_gamma"], params["bn2_beta"],
                     params["bn2_mean"], params["bn2_var"])
    out2 = conv(h2, params["conv2_w"], stride, 1)
    in_planes, planes = x.shape[-1], params["conv1_w"].shape[-1]
    if stride != 1 or in_planes != planes:
        sc = conv(x, params["shortcut_w"], stride, 0)
    else:
        sc = x
    return out2 + sc


# --------------------------------- main ---------------------------------------

if __name__ == "__main__":
    key = jax.random.PRNGKey(0)
    kx, kp = jax.random.split(key)

    # Small shapes consistent with the module: batch=2, in_planes=4, 16x16 spatial,
    # planes=8, stride=2 (so the 1x1 shortcut-conv path is exercised).
    N, Cin, H, W = 2, 4, 16, 16
    planes, stride, dropout_rate = 8, 2, 0.0

    x_nchw = jax.random.normal(kx, (N, Cin, H, W), jnp.float32)   # PyTorch layout
    x_nhwc = jnp.transpose(x_nchw, (0, 2, 3, 1))                  # kernel layout

    params = init_params(kp, Cin, planes, stride)

    out = wide_basic_forward(x_nhwc, params, stride, dropout_rate)
    out = jax.block_until_ready(out)

    ref = reference_forward(x_nhwc, params, stride)
    assert out.shape == (N, H // stride, W // stride, planes), out.shape
    # bf16 MXU operands (incl. the 1x1 shortcut matmul) with f32 accumulation ->
    # compare against the f32 reference with a correspondingly loose tolerance.
    assert jnp.allclose(out, ref, atol=3e-2, rtol=3e-2), "mismatch vs JAX reference"

    print("KERNEL_OK")
</pallas_src>

<mosaic_0001>
module attributes {stable_mosaic.version = 11 : i64} {
  func.func @_wide_basic_kernel(%arg0: i32, %arg1: memref<1x16x16x4xf32, #tpu.memory_space<vmem>>, %arg2: memref<1x4xf32, #tpu.memory_space<vmem>>, %arg3: memref<1x4xf32, #tpu.memory_space<vmem>>, %arg4: memref<36x8xbf16, #tpu.memory_space<vmem>>, %arg5: memref<1x8xf32, #tpu.memory_space<vmem>>, %arg6: memref<1x8xf32, #tpu.memory_space<vmem>>, %arg7: memref<72x8xbf16, #tpu.memory_space<vmem>>, %arg8: memref<4x8xbf16, #tpu.memory_space<vmem>>, %arg9: memref<1x8x8x8xf32, #tpu.memory_space<vmem>>, %arg10: memref<18x18x4xbf16, #tpu.memory_space<vmem>>, %arg11: memref<256x36xbf16, #tpu.memory_space<vmem>>, %arg12: memref<2x9x2x9x8xbf16, #tpu.memory_space<vmem>>, %arg13: memref<64x72xbf16, #tpu.memory_space<vmem>>) attributes {dimension_semantics = [#tpu.dimension_semantics<parallel>], iteration_bounds = array<i64: 2>, scalar_prefetch = 0 : i64, scratch_operands = 4 : i64, tpu.core_type = #tpu.core_type<tc>, window_params = [{transform_indices = @transform_0, window_bounds = array<i64: 1, 16, 16, 4>}, {pipeline_mode = #tpu.pipeline_mode<synchronous>, transform_indices = @transform_1, window_bounds = array<i64: 1, 4>}, {pipeline_mode = #tpu.pipeline_mode<synchronous>, transform_indices = @transform_2, window_bounds = array<i64: 1, 4>}, {pipeline_mode = #tpu.pipeline_mode<synchronous>, transform_indices = @transform_3, window_bounds = array<i64: 36, 8>}, {pipeline_mode = #tpu.pipeline_mode<synchronous>, transform_indices = @transform_4, window_bounds = array<i64: 1, 8>}, {pipeline_mode = #tpu.pipeline_mode<synchronous>, transform_indices = @transform_5, window_bounds = array<i64: 1, 8>}, {pipeline_mode = #tpu.pipeline_mode<synchronous>, transform_indices = @transform_6, window_bounds = array<i64: 72, 8>}, {pipeline_mode = #tpu.pipeline_mode<synchronous>, transform_indices = @transform_7, window_bounds = array<i64: 4, 8>}, {transform_indices = @transform_8, window_bounds = array<i64: 1, 8, 8, 8>}]} {
    %c0 = arith.constant 0 : index
    %c0_0 = arith.constant 0 : index
    %c0_1 = arith.constant 0 : index
    %c0_2 = arith.constant 0 : index
    %0 = vector.load %arg1[%c0, %c0_0, %c0_1, %c0_2] : memref<1x16x16x4xf32, #tpu.memory_space<vmem>>, vector<1x16x16x4xf32>
    %1 = vector.shape_cast %0 : vector<1x16x16x4xf32> to vector<16x16x4xf32>
    %c0_3 = arith.constant 0 : index
    %c0_4 = arith.constant 0 : index
    %2 = vector.load %arg2[%c0_3, %c0_4] : memref<1x4xf32, #tpu.memory_space<vmem>>, vector<1x4xf32>
    %3 = vector.shape_cast %2 : vector<1x4xf32> to vector<1x1x4xf32>
    %4 = vector.broadcast %3 : vector<1x1x4xf32> to vector<16x16x4xf32>
    %5 = arith.mulf %1, %4 : vector<16x16x4xf32>
    %c0_5 = arith.constant 0 : index
    %c0_6 = arith.constant 0 : index
    %6 = vector.load %arg3[%c0_5, %c0_6] : memref<1x4xf32, #tpu.memory_space<vmem>>, vector<1x4xf32>
    %7 = vector.shape_cast %6 : vector<1x4xf32> to vector<1x1x4xf32>
    %8 = vector.broadcast %7 : vector<1x1x4xf32> to vector<16x16x4xf32>
    %9 = arith.addf %5, %8 : vector<16x16x4xf32>
    %cst = arith.constant 0.000000e+00 : f32
    %10 = vector.broadcast %cst : f32 to vector<16x16x4xf32>
    %11 = arith.maximumf %9, %10 : vector<16x16x4xf32>
    %cst_7 = arith.constant 0.000000e+00 : bf16
    %12 = vector.broadcast %cst_7 : bf16 to vector<1x18x4xbf16>
    %c0_8 = arith.constant 0 : index
    %c0_9 = arith.constant 0 : index
    %c0_10 = arith.constant 0 : index
    %13 = vector.load %arg10[%c0_8, %c0_9, %c0_10] : memref<18x18x4xbf16, #tpu.memory_space<vmem>>, vector<1x18x4xbf16>
    tpu.vector_store %arg10[%c0_8, %c0_9, %c0_10], %12 {strides = array<i32>} : memref<18x18x4xbf16, #tpu.memory_space<vmem>>, vector<1x18x4xbf16>,
    %c17 = arith.constant 17 : index
    %c0_11 = arith.constant 0 : index
    %c0_12 = arith.constant 0 : index
    %14 = vector.load %arg10[%c17, %c0_11, %c0_12] : memref<18x18x4xbf16, #tpu.memory_space<vmem>>, vector<1x18x4xbf16>
    tpu.vector_store %arg10[%c17, %c0_11, %c0_12], %12 {strides = array<i32>} : memref<18x18x4xbf16, #tpu.memory_space<vmem>>, vector<1x18x4xbf16>,
    %cst_13 = arith.constant 0.000000e+00 : bf16
    %15 = vector.broadcast %cst_13 : bf16 to vector<16x1x4xbf16>
    %c1 = arith.constant 1 : index
    %c0_14 = arith.constant 0 : index
    %c0_15 = arith.constant 0 : index
    %16 = vector.load %arg10[%c1, %c0_14, %c0_15] : memref<18x18x4xbf16, #tpu.memory_space<vmem>>, vector<16x1x4xbf16>
    tpu.vector_store %arg10[%c1, %c0_14, %c0_15], %15 {strides = array<i32>} : memref<18x18x4xbf16, #tpu.memory_space<vmem>>, vector<16x1x4xbf16>,
    %c1_16 = arith.constant 1 : index
    %c17_17 = arith.constant 17 : index
    %c0_18 = arith.constant 0 : index
    %17 = vector.load %arg10[%c1_16, %c17_17, %c0_18] : memref<18x18x4xbf16, #tpu.memory_space<vmem>>, vector<16x1x4xbf16>
    tpu.vector_store %arg10[%c1_16, %c17_17, %c0_18], %15 {strides = array<i32>} : memref<18x18x4xbf16, #tpu.memory_space<vmem>>, vector<16x1x4xbf16>,
    %18 = arith.truncf %11 : vector<16x16x4xf32> to vector<16x16x4xbf16>
    %c1_19 = arith.constant 1 : index
    %c1_20 = arith.constant 1 : index
    %c0_21 = arith.constant 0 : index
    %19 = vector.load %arg10[%c1_19, %c1_20, %c0_21] : memref<18x18x4xbf16, #tpu.memory_space<vmem>>, vector<16x16x4xbf16>
    tpu.vector_store %arg10[%c1_19, %c1_20, %c0_21], %18 {strides = array<i32>} : memref<18x18x4xbf16, #tpu.memory_space<vmem>>, vector<16x16x4xbf16>,
    %c0_22 = arith.constant 0 : index
    %c0_23 = arith.constant 0 : index
    %c0_24 = arith.constant 0 : index
    %20 = vector.load %arg10[%c0_22, %c0_23, %c0_24] : memref<18x18x4xbf16, #tpu.memory_space<vmem>>, vector<16x16x4xbf16>
    %21 = vector.shape_cast %20 : vector<16x16x4xbf16> to vector<256x4xbf16>
    %c0_25 = arith.constant 0 : index
    %c0_26 = arith.constant 0 : index
    %22 = vector.load %arg11[%c0_25, %c0_26] : memref<256x36xbf16, #tpu.memory_space<vmem>>, vector<256x4xbf16>
    tpu.vector_store %arg11[%c0_25, %c0_26], %21 {strides = array<i32>} : memref<256x36xbf16, #tpu.memory_space<vmem>>, vector<256x4xbf16>,
    %c0_27 = arith.constant 0 : index
    %c1_28 = arith.constant 1 : index
    %c0_29 = arith.constant 0 : index
    %23 = vector.load %arg10[%c0_27, %c1_28, %c0_29] : memref<18x18x4xbf16, #tpu.memory_space<vmem>>, vector<16x16x4xbf16>
    %24 = vector.shape_cast %23 : vector<16x16x4xbf16> to vector<256x4xbf16>
    %c0_30 = arith.constant 0 : index
    %c4 = arith.constant 4 : index
    %25 = vector.load %arg11[%c0_30, %c4] : memref<256x36xbf16, #tpu.memory_space<vmem>>, vector<256x4xbf16>
    tpu.vector_store %arg11[%c0_30, %c4], %24 {strides = array<i32>} : memref<256x36xbf16, #tpu.memory_space<vmem>>, vector<256x4xbf16>,
    %c0_31 = arith.constant 0 : index
    %c2 = arith.constant 2 : index
    %c0_32 = arith.constant 0 : index
    %26 = vector.load %arg10[%c0_31, %c2, %c0_32] : memref<18x18x4xbf16, #tpu.memory_space<vmem>>, vector<16x16x4xbf16>
    %27 = vector.shape_cast %26 : vector<16x16x4xbf16> to vector<256x4xbf16>
    %c0_33 = arith.constant 0 : index
    %c8 = arith.constant 8 : index
    %28 = vector.load %arg11[%c0_33, %c8] : memref<256x36xbf16, #tpu.memory_space<vmem>>, vector<256x4xbf16>
    tpu.vector_store %arg11[%c0_33, %c8], %27 {strides = array<i32>} : memref<256x36xbf16, #tpu.memory_space<vmem>>, vector<256x4xbf16>,
    %c1_34 = arith.constant 1 : index
    %c0_35 = arith.constant 0 : index
    %c0_36 = arith.constant 0 : index
    %29 = vector.load %arg10[%c1_34, %c0_35, %c0_36] : memref<18x18x4xbf16, #tpu.memory_space<vmem>>, vector<16x16x4xbf16>
    %30 = vector.shape_cast %29 : vector<16x16x4xbf16> to vector<256x4xbf16>
    %c0_37 = arith.constant 0 : index
    %c12 = arith.constant 12 : index
    %31 = vector.load %arg11[%c0_37, %c12] : memref<256x36xbf16, #tpu.memory_space<vmem>>, vector<256x4xbf16>
    tpu.vector_store %arg11[%c0_37, %c12], %30 {strides = array<i32>} : memref<256x36xbf16, #tpu.memory_space<vmem>>, vector<256x4xbf16>,
    %c1_38 = arith.constant 1 : index
    %c1_39 = arith.constant 1 : index
    %c0_40 = arith.constant 0 : index
    %32 = vector.load %arg10[%c1_38, %c1_39, %c0_40] : memref<18x18x4xbf16, #tpu.memory_space<vmem>>, vector<16x16x4xbf16>
    %33 = vector.shape_cast %32 : vector<16x16x4xbf16> to vector<256x4xbf16>
    %c0_41 = arith.constant 0 : index
    %c16 = arith.constant 16 : index
    %34 = vector.load %arg11[%c0_41, %c16] : memref<256x36xbf16, #tpu.memory_space<vmem>>, vector<256x4xbf16>
    tpu.vector_store %arg11[%c0_41, %c16], %33 {strides = array<i32>} : memref<256x36xbf16, #tpu.memory_space<vmem>>, vector<256x4xbf16>,
    %c1_42 = arith.constant 1 : index
    %c2_43 = arith.constant 2 : index
    %c0_44 = arith.constant 0 : index
    %35 = vector.load %arg10[%c1_42, %c2_43, %c0_44] : memref<18x18x4xbf16, #tpu.memory_space<vmem>>, vector<16x16x4xbf16>
    %36 = vector.shape_cast %35 : vector<16x16x4xbf16> to vector<256x4xbf16>
    %c0_45 = arith.constant 0 : index
    %c20 = arith.constant 20 : index
    %37 = vector.load %arg11[%c0_45, %c20] : memref<256x36xbf16, #tpu.memory_space<vmem>>, vector<256x4xbf16>
    tpu.vector_store %arg11[%c0_45, %c20], %36 {strides = array<i32>} : memref<256x36xbf16, #tpu.memory_space<vmem>>, vector<256x4xbf16>,
    %c2_46 = arith.constant 2 : index
    %c0_47 = arith.constant 0 : index
    %c0_48 = arith.constant 0 : index
    %38 = vector.load %arg10[%c2_46, %c0_47, %c0_48] : memref<18x18x4xbf16, #tpu.memory_space<vmem>>, vector<16x16x4xbf16>
    %39 = vector.shape_cast %38 : vector<16x16x4xbf16> to vector<256x4xbf16>
    %c0_49 = arith.constant 0 : index
    %c24 = arith.constant 24 : index
    %40 = vector.load %arg11[%c0_49, %c24] : memref<256x36xbf16, #tpu.memory_space<vmem>>, vector<256x4xbf16>
    tpu.vector_store %arg11[%c0_49, %c24], %39 {strides = array<i32>} : memref<256x36xbf16, #tpu.memory_space<vmem>>, vector<256x4xbf16>,
    %c2_50 = arith.constant 2 : index
    %c1_51 = arith.constant 1 : index
    %c0_52 = arith.constant 0 : index
    %41 = vector.load %arg10[%c2_50, %c1_51, %c0_52] : memref<18x18x4xbf16, #tpu.memory_space<vmem>>, vector<16x16x4xbf16>
    %42 = vector.shape_cast %41 : vector<16x16x4xbf16> to vector<256x4xbf16>
    %c0_53 = arith.constant 0 : index
    %c28 = arith.constant 28 : index
    %43 = vector.load %arg11[%c0_53, %c28] : memref<256x36xbf16, #tpu.memory_space<vmem>>, vector<256x4xbf16>
    tpu.vector_store %arg11[%c0_53, %c28], %42 {strides = array<i32>} : memref<256x36xbf16, #tpu.memory_space<vmem>>, vector<256x4xbf16>,
    %c2_54 = arith.constant 2 : index
    %c2_55 = arith.constant 2 : index
    %c0_56 = arith.constant 0 : index
    %44 = vector.load %arg10[%c2_54, %c2_55, %c0_56] : memref<18x18x4xbf16, #tpu.memory_space<vmem>>, vector<16x16x4xbf16>
    %45 = vector.shape_cast %44 : vector<16x16x4xbf16> to vector<256x4xbf16>
    %c0_57 = arith.constant 0 : index
    %c32 = arith.constant 32 : index
    %46 = vector.load %arg11[%c0_57, %c32] : memref<256x36xbf16, #tpu.memory_space<vmem>>, vector<256x4xbf16>
    tpu.vector_store %arg11[%c0_57, %c32], %45 {strides = array<i32>} : memref<256x36xbf16, #tpu.memory_space<vmem>>, vector<256x4xbf16>,
    %c0_58 = arith.constant 0 : index
    %c0_59 = arith.constant 0 : index
    %47 = vector.load %arg11[%c0_58, %c0_59] : memref<256x36xbf16, #tpu.memory_space<vmem>>, vector<256x36xbf16>
    %c0_60 = arith.constant 0 : index
    %c0_61 = arith.constant 0 : index
    %48 = vector.load %arg4[%c0_60, %c0_61] : memref<36x8xbf16, #tpu.memory_space<vmem>>, vector<36x8xbf16>
    %cst_62 = arith.constant dense<0.000000e+00> : vector<256x8xf32>
    %49 = tpu.matmul %47, %48, %cst_62 {dimension_numbers = #tpu.dot_dimension_numbers<[1], [0], [0], [1], [0, 0, 1, 1], [], []>} : vector<256x36xbf16>, vector<36x8xbf16>, vector<256x8xf32> -> vector<256x8xf32>
    %c0_63 = arith.constant 0 : index
    %c0_64 = arith.constant 0 : index
    %50 = vector.load %arg5[%c0_63, %c0_64] : memref<1x8xf32, #tpu.memory_space<vmem>>, vector<1x8xf32>
    %51 = vector.broadcast %50 : vector<1x8xf32> to vector<256x8xf32>
    %52 = arith.mulf %49, %51 : vector<256x8xf32>
    %c0_65 = arith.constant 0 : index
    %c0_66 = arith.constant 0 : index
    %53 = vector.load %arg6[%c0_65, %c0_66] : memref<1x8xf32, #tpu.memory_space<vmem>>, vector<1x8xf32>
    %54 = vector.broadcast %53 : vector<1x8xf32> to vector<256x8xf32>
    %55 = arith.addf %52, %54 : vector<256x8xf32>
    %cst_67 = arith.constant 0.000000e+00 : f32
    %56 = vector.broadcast %cst_67 : f32 to vector<256x8xf32>
    %57 = arith.maximumf %55, %56 : vector<256x8xf32>
    %58 = arith.truncf %57 : vector<256x8xf32> to vector<256x8xbf16>
    %cst_68 = arith.constant 0.000000e+00 : bf16
    %59 = vector.broadcast %cst_68 : bf16 to vector<1x1x2x9x8xbf16>
    %cst_69 = arith.constant 0.000000e+00 : bf16
    %60 = vector.broadcast %cst_69 : bf16 to vector<2x9x1x1x8xbf16>
    %c0_70 = arith.constant 0 : index
    %c0_71 = arith.constant 0 : index
    %c0_72 = arith.constant 0 : index
    %c0_73 = arith.constant 0 : index
    %c0_74 = arith.constant 0 : index
    %61 = vector.load %arg12[%c0_70, %c0_71, %c0_72, %c0_73, %c0_74] : memref<2x9x2x9x8xbf16, #tpu.memory_space<vmem>>, vector<1x1x2x9x8xbf16>
    tpu.vector_store %arg12[%c0_70, %c0_71, %c0_72, %c0_73, %c0_74], %59 {strides = array<i32>} : memref<2x9x2x9x8xbf16, #tpu.memory_space<vmem>>, vector<1x1x2x9x8xbf16>,
    %c0_75 = arith.constant 0 : index
    %c0_76 = arith.constant 0 : index
    %c0_77 = arith.constant 0 : index
    %c0_78 = arith.constant 0 : index
    %c0_79 = arith.constant 0 : index
    %62 = vector.load %arg12[%c0_75, %c0_76, %c0_77, %c0_78, %c0_79] : memref<2x9x2x9x8xbf16, #tpu.memory_space<vmem>>, vector<2x9x1x1x8xbf16>
    tpu.vector_store %arg12[%c0_75, %c0_76, %c0_77, %c0_78, %c0_79], %60 {strides = array<i32>} : memref<2x9x2x9x8xbf16, #tpu.memory_space<vmem>>, vector<2x9x1x1x8xbf16>,
    %63 = vector.shape_cast %58 : vector<256x8xbf16> to vector<8x2x8x2x8xbf16>
    %64 = vector.extract_strided_slice %63 {offsets = [0, 0, 0, 0, 0], sizes = [8, 1, 8, 1, 8], strides = [1, 1, 1, 1, 1]} : vector<8x2x8x2x8xbf16> to vector<8x1x8x1x8xbf16>
    %65 = vector.shape_cast %64 : vector<8x1x8x1x8xbf16> to vector<8x8x8xbf16>
    %66 = vector.extract_strided_slice %63 {offsets = [0, 0, 0, 1, 0], sizes = [8, 1, 8, 1, 8], strides = [1, 1, 1, 1, 1]} : vector<8x2x8x2x8xbf16> to vector<8x1x8x1x8xbf16>
    %67 = vector.shape_cast %66 : vector<8x1x8x1x8xbf16> to vector<8x8x8xbf16>
    %68 = vector.extract_strided_slice %63 {offsets = [0, 1, 0, 0, 0], sizes = [8, 1, 8, 1, 8], strides = [1, 1, 1, 1, 1]} : vector<8x2x8x2x8xbf16> to vector<8x1x8x1x8xbf16>
    %69 = vector.shape_cast %68 : vector<8x1x8x1x8xbf16> to vector<8x8x8xbf16>
    %70 = vector.extract_strided_slice %63 {offsets = [0, 1, 0, 1, 0], sizes = [8, 1, 8, 1, 8], strides = [1, 1, 1, 1, 1]} : vector<8x2x8x2x8xbf16> to vector<8x1x8x1x8xbf16>
    %71 = vector.shape_cast %70 : vector<8x1x8x1x8xbf16> to vector<8x8x8xbf16>
    %72 = vector.shape_cast %65 : vector<8x8x8xbf16> to vector<1x8x1x8x8xbf16>
    %c1_80 = arith.constant 1 : index
    %c0_81 = arith.constant 0 : index
    %c1_82 = arith.constant 1 : index
    %c0_83 = arith.constant 0 : index
    %c0_84 = arith.constant 0 : index
    %73 = vector.load %arg12[%c1_80, %c0_81, %c1_82, %c0_83, %c0_84] : memref<2x9x2x9x8xbf16, #tpu.memory_space<vmem>>, vector<1x8x1x8x8xbf16>
    tpu.vector_store %arg12[%c1_80, %c0_81, %c1_82, %c0_83, %c0_84], %72 {strides = array<i32>} : memref<2x9x2x9x8xbf16, #tpu.memory_space<vmem>>, vector<1x8x1x8x8xbf16>,
    %74 = vector.shape_cast %67 : vector<8x8x8xbf16> to vector<1x8x1x8x8xbf16>
    %c1_85 = arith.constant 1 : index
    %c0_86 = arith.constant 0 : index
    %c0_87 = arith.constant 0 : index
    %c1_88 = arith.constant 1 : index
    %c0_89 = arith.constant 0 : index
    %75 = vector.load %arg12[%c1_85, %c0_86, %c0_87, %c1_88, %c0_89] : memref<2x9x2x9x8xbf16, #tpu.memory_space<vmem>>, vector<1x8x1x8x8xbf16>
    tpu.vector_store %arg12[%c1_85, %c0_86, %c0_87, %c1_88, %c0_89], %74 {strides = array<i32>} : memref<2x9x2x9x8xbf16, #tpu.memory_space<vmem>>, vector<1x8x1x8x8xbf16>,
    %76 = vector.shape_cast %69 : vector<8x8x8xbf16> to vector<1x8x1x8x8xbf16>
    %c0_90 = arith.constant 0 : index
    %c1_91 = arith.constant 1 : index
    %c1_92 = arith.constant 1 : index
    %c0_93 = arith.constant 0 : index
    %c0_94 = arith.constant 0 : index
    %77 = vector.load %arg12[%c0_90, %c1_91, %c1_92, %c0_93, %c0_94] : memref<2x9x2x9x8xbf16, #tpu.memory_space<vmem>>, vector<1x8x1x8x8xbf16>
    tpu.vector_store %arg12[%c0_90, %c1_91, %c1_92, %c0_93, %c0_94], %76 {strides = array<i32>} : memref<2x9x2x9x8xbf16, #tpu.memory_space<vmem>>, vector<1x8x1x8x8xbf16>,
    %78 = vector.shape_cast %71 : vector<8x8x8xbf16> to vector<1x8x1x8x8xbf16>
    %c0_95 = arith.constant 0 : index
    %c1_96 = arith.constant 1 : index
    %c0_97 = arith.constant 0 : index
    %c1_98 = arith.constant 1 : index
    %c0_99 = arith.constant 0 : index
    %79 = vector.load %arg12[%c0_95, %c1_96, %c0_97, %c1_98, %c0_99] : memref<2x9x2x9x8xbf16, #tpu.memory_space<vmem>>, vector<1x8x1x8x8xbf16>
    tpu.vector_store %arg12[%c0_95, %c1_96, %c0_97, %c1_98, %c0_99], %78 {strides = array<i32>} : memref<2x9x2x9x8xbf16, #tpu.memory_space<vmem>>, vector<1x8x1x8x8xbf16>,
    %c0_100 = arith.constant 0 : index
    %c0_101 = arith.constant 0 : index
    %c0_102 = arith.constant 0 : index
    %c0_103 = arith.constant 0 : index
    %c0_104 = arith.constant 0 : index
    %80 = vector.load %arg12[%c0_100, %c0_101, %c0_102, %c0_103, %c0_104] : memref<2x9x2x9x8xbf16, #tpu.memory_space<vmem>>, vector<1x8x1x8x8xbf16>
    %81 = vector.shape_cast %80 : vector<1x8x1x8x8xbf16> to vector<64x8xbf16>
    %c0_105 = arith.constant 0 : index
    %c0_106 = arith.constant 0 : index
    %82 = vector.load %arg13[%c0_105, %c0_106] : memref<64x72xbf16, #tpu.memory_space<vmem>>, vector<64x8xbf16>
    tpu.vector_store %arg13[%c0_105, %c0_106], %81 {strides = array<i32>} : memref<64x72xbf16, #tpu.memory_space<vmem>>, vector<64x8xbf16>,
    %c0_107 = arith.constant 0 : index
    %c0_108 = arith.constant 0 : index
    %c1_109 = arith.constant 1 : index
    %c0_110 = arith.constant 0 : index
    %c0_111 = arith.constant 0 : index
    %83 = vector.load %arg12[%c0_107, %c0_108, %c1_109, %c0_110, %c0_111] : memref<2x9x2x9x8xbf16, #tpu.memory_space<vmem>>, vector<1x8x1x8x8xbf16>
    %84 = vector.shape_cast %83 : vector<1x8x1x8x8xbf16> to vector<64x8xbf16>
    %c0_112 = arith.constant 0 : index
    %c8_113 = arith.constant 8 : index
    %85 = vector.load %arg13[%c0_112, %c8_113] : memref<64x72xbf16, #tpu.memory_space<vmem>>, vector<64x8xbf16>
    tpu.vector_store %arg13[%c0_112, %c8_113], %84 {strides = array<i32>} : memref<64x72xbf16, #tpu.memory_space<vmem>>, vector<64x8xbf16>,
    %c0_114 = arith.constant 0 : index
    %c0_115 = arith.constant 0 : index
    %c0_116 = arith.constant 0 : index
    %c1_117 = arith.constant 1 : index
    %c0_118 = arith.constant 0 : index
    %86 = vector.load %arg12[%c0_114, %c0_115, %c0_116, %c1_117, %c0_118] : memref<2x9x2x9x8xbf16, #tpu.memory_space<vmem>>, vector<1x8x1x8x8xbf16>
    %87 = vector.shape_cast %86 : vector<1x8x1x8x8xbf16> to vector<64x8xbf16>
    %c0_119 = arith.constant 0 : index
    %c16_120 = arith.constant 16 : index
    %88 = vector.load %arg13[%c0_119, %c16_120] : memref<64x72xbf16, #tpu.memory_space<vmem>>, vector<64x8xbf16>
    tpu.vector_store %arg13[%c0_119, %c16_120], %87 {strides = array<i32>} : memref<64x72xbf16, #tpu.memory_space<vmem>>, vector<64x8xbf16>,
    %c1_121 = arith.constant 1 : index
    %c0_122 = arith.constant 0 : index
    %c0_123 = arith.constant 0 : index
    %c0_124 = arith.constant 0 : index
    %c0_125 = arith.constant 0 : index
    %89 = vector.load %arg12[%c1_121, %c0_122, %c0_123, %c0_124, %c0_125] : memref<2x9x2x9x8xbf16, #tpu.memory_space<vmem>>, vector<1x8x1x8x8xbf16>
    %90 = vector.shape_cast %89 : vector<1x8x1x8x8xbf16> to vector<64x8xbf16>
    %c0_126 = arith.constant 0 : index
    %c24_127 = arith.constant 24 : index
    %91 = vector.load %arg13[%c0_126, %c24_127] : memref<64x72xbf16, #tpu.memory_space<vmem>>, vector<64x8xbf16>
    tpu.vector_store %arg13[%c0_126, %c24_127], %90 {strides = array<i32>} : memref<64x72xbf16, #tpu.memory_space<vmem>>, vector<64x8xbf16>,
    %c1_128 = arith.constant 1 : index
    %c0_129 = arith.constant 0 : index
    %c1_130 = arith.constant 1 : index
    %c0_131 = arith.constant 0 : index
    %c0_132 = arith.constant 0 : index
    %92 = vector.load %arg12[%c1_128, %c0_129, %c1_130, %c0_131, %c0_132] : memref<2x9x2x9x8xbf16, #tpu.memory_space<vmem>>, vector<1x8x1x8x8xbf16>
    %93 = vector.shape_cast %92 : vector<1x8x1x8x8xbf16> to vector<64x8xbf16>
    %c0_133 = arith.constant 0 : index
    %c32_134 = arith.constant 32 : index
    %94 = vector.load %arg13[%c0_133, %c32_134] : memref<64x72xbf16, #tpu.memory_space<vmem>>, vector<64x8xbf16>
    tpu.vector_store %arg13[%c0_133, %c32_134], %93 {strides = array<i32>} : memref<64x72xbf16, #tpu.memory_space<vmem>>, vector<64x8xbf16>,
    %c1_135 = arith.constant 1 : index
    %c0_136 = arith.constant 0 : index
    %c0_137 = arith.constant 0 : index
    %c1_138 = arith.constant 1 : index
    %c0_139 = arith.constant 0 : index
    %95 = vector.load %arg12[%c1_135, %c0_136, %c0_137, %c1_138, %c0_139] : memref<2x9x2x9x8xbf16, #tpu.memory_space<vmem>>, vector<1x8x1x8x8xbf16>
    %96 = vector.shape_cast %95 : vector<1x8x1x8x8xbf16> to vector<64x8xbf16>
    %c0_140 = arith.constant 0 : index
    %c40 = arith.constant 40 : index
    %97 = vector.load %arg13[%c0_140, %c40] : memref<64x72xbf16, #tpu.memory_space<vmem>>, vector<64x8xbf16>
    tpu.vector_store %arg13[%c0_140, %c40], %96 {strides = array<i32>} : memref<64x72xbf16, #tpu.memory_space<vmem>>, vector<64x8xbf16>,
    %c0_141 = arith.constant 0 : index
    %c1_142 = arith.constant 1 : index
    %c0_143 = arith.constant 0 : index
    %c0_144 = arith.constant 0 : index
    %c0_145 = arith.constant 0 : index
    %98 = vector.load %arg12[%c0_141, %c1_142, %c0_143, %c0_144, %c0_145] : memref<2x9x2x9x8xbf16, #tpu.memory_space<vmem>>, vector<1x8x1x8x8xbf16>
    %99 = vector.shape_cast %98 : vector<1x8x1x8x8xbf16> to vector<64x8xbf16>
    %c0_146 = arith.constant 0 : index
    %c48 = arith.constant 48 : index
    %100 = vector.load %arg13[%c0_146, %c48] : memref<64x72xbf16, #tpu.memory_space<vmem>>, vector<64x8xbf16>
    tpu.vector_store %arg13[%c0_146, %c48], %99 {strides = array<i32>} : memref<64x72xbf16, #tpu.memory_space<vmem>>, vector<64x8xbf16>,
    %c0_147 = arith.constant 0 : index
    %c1_148 = arith.constant 1 : index
    %c1_149 = arith.constant 1 : index
    %c0_150 = arith.constant 0 : index
    %c0_151 = arith.constant 0 : index
    %101 = vector.load %arg12[%c0_147, %c1_148, %c1_149, %c0_150, %c0_151] : memref<2x9x2x9x8xbf16, #tpu.memory_space<vmem>>, vector<1x8x1x8x8xbf16>
    %102 = vector.shape_cast %101 : vector<1x8x1x8x8xbf16> to vector<64x8xbf16>
    %c0_152 = arith.constant 0 : index
    %c56 = arith.constant 56 : index
    %103 = vector.load %arg13[%c0_152, %c56] : memref<64x72xbf16, #tpu.memory_space<vmem>>, vector<64x8xbf16>
    tpu.vector_store %arg13[%c0_152, %c56], %102 {strides = array<i32>} : memref<64x72xbf16, #tpu.memory_space<vmem>>, vector<64x8xbf16>,
    %c0_153 = arith.constant 0 : index
    %c1_154 = arith.constant 1 : index
    %c0_155 = arith.constant 0 : index
    %c1_156 = arith.constant 1 : index
    %c0_157 = arith.constant 0 : index
    %104 = vector.load %arg12[%c0_153, %c1_154, %c0_155, %c1_156, %c0_157] : memref<2x9x2x9x8xbf16, #tpu.memory_space<vmem>>, vector<1x8x1x8x8xbf16>
    %105 = vector.shape_cast %104 : vector<1x8x1x8x8xbf16> to vector<64x8xbf16>
    %c0_158 = arith.constant 0 : index
    %c64 = arith.constant 64 : index
    %106 = vector.load %arg13[%c0_158, %c64] : memref<64x72xbf16, #tpu.memory_space<vmem>>, vector<64x8xbf16>
    tpu.vector_store %arg13[%c0_158, %c64], %105 {strides = array<i32>} : memref<64x72xbf16, #tpu.memory_space<vmem>>, vector<64x8xbf16>,
    %c0_159 = arith.constant 0 : index
    %c0_160 = arith.constant 0 : index
    %107 = vector.load %arg13[%c0_159, %c0_160] : memref<64x72xbf16, #tpu.memory_space<vmem>>, vector<64x72xbf16>
    %c0_161 = arith.constant 0 : index
    %c0_162 = arith.constant 0 : index
    %108 = vector.load %arg7[%c0_161, %c0_162] : memref<72x8xbf16, #tpu.memory_space<vmem>>, vector<72x8xbf16>
    %cst_163 = arith.constant dense<0.000000e+00> : vector<64x8xf32>
    %109 = tpu.matmul %107, %108, %cst_163 {dimension_numbers = #tpu.dot_dimension_numbers<[1], [0], [0], [1], [0, 0, 1, 1], [], []>} : vector<64x72xbf16>, vector<72x8xbf16>, vector<64x8xf32> -> vector<64x8xf32>
    %110 = vector.shape_cast %1 : vector<16x16x4xf32> to vector<8x2x8x2x4xf32>
    %111 = vector.extract_strided_slice %110 {offsets = [0, 0, 0, 0, 0], sizes = [8, 1, 8, 1, 4], strides = [1, 1, 1, 1, 1]} : vector<8x2x8x2x4xf32> to vector<8x1x8x1x4xf32>
    %112 = vector.shape_cast %111 : vector<8x1x8x1x4xf32> to vector<8x8x4xf32>
    %113 = vector.shape_cast %112 : vector<8x8x4xf32> to vector<64x4xf32>
    %114 = arith.truncf %113 : vector<64x4xf32> to vector<64x4xbf16>
    %c0_164 = arith.constant 0 : index
    %c0_165 = arith.constant 0 : index
    %115 = vector.load %arg8[%c0_164, %c0_165] : memref<4x8xbf16, #tpu.memory_space<vmem>>, vector<4x8xbf16>
    %cst_166 = arith.constant dense<0.000000e+00> : vector<64x8xf32>
    %116 = tpu.matmul %114, %115, %cst_166 {dimension_numbers = #tpu.dot_dimension_numbers<[1], [0], [0], [1], [0, 0, 1, 1], [], []>} : vector<64x4xbf16>, vector<4x8xbf16>, vector<64x8xf32> -> vector<64x8xf32>
    %117 = arith.addf %109, %116 : vector<64x8xf32>
    %118 = vector.shape_cast %117 : vector<64x8xf32> to vector<8x8x8xf32>
    %c0_167 = arith.constant 0 : index
    %c0_168 = arith.constant 0 : index
    %c0_169 = arith.constant 0 : index
    %c0_170 = arith.constant 0 : index
    %119 = vector.load %arg9[%c0_167, %c0_168, %c0_169, %c0_170] : memref<1x8x8x8xf32, #tpu.memory_space<vmem>>, vector<1x8x8x8xf32>
    %120 = vector.shape_cast %119 : vector<1x8x8x8xf32> to vector<8x8x8xf32>
    %121 = vector.shape_cast %118 : vector<8x8x8xf32> to vector<1x8x8x8xf32>
    tpu.vector_store %arg9[%c0_167, %c0_168, %c0_169, %c0_170], %121 {strides = array<i32>} : memref<1x8x8x8xf32, #tpu.memory_space<vmem>>, vector<1x8x8x8xf32>,
    return
  }
  func.func @transform_0(%arg0: i32) -> (i32, i32, i32, i32) {
    %c0_i32 = arith.constant 0 : i32
    %c0_i32_0 = arith.constant 0 : i32
    %c0_i32_1 = arith.constant 0 : i32
    %c0_i32_2 = arith.constant 0 : i32
    return %arg0, %c0_i32, %c0_i32_0, %c0_i32_1 : i32, i32, i32, i32
  }
  func.func @transform_1(%arg0: i32) -> (i32, i32) {
    %c0_i32 = arith.constant 0 : i32
    %c0_i32_0 = arith.constant 0 : i32
    %c0_i32_1 = arith.constant 0 : i32
    return %c0_i32, %c0_i32_0 : i32, i32
  }
  func.func @transform_2(%arg0: i32) -> (i32, i32) {
    %c0_i32 = arith.constant 0 : i32
    %c0_i32_0 = arith.constant 0 : i32
    %c0_i32_1 = arith.constant 0 : i32
    return %c0_i32, %c0_i32_0 : i32, i32
  }
  func.func @transform_3(%arg0: i32) -> (i32, i32) {
    %c0_i32 = arith.constant 0 : i32
    %c0_i32_0 = arith.constant 0 : i32
    %c0_i32_1 = arith.constant 0 : i32
    return %c0_i32, %c0_i32_0 : i32, i32
  }
  func.func @transform_4(%arg0: i32) -> (i32, i32) {
    %c0_i32 = arith.constant 0 : i32
    %c0_i32_0 = arith.constant 0 : i32
    %c0_i32_1 = arith.constant 0 : i32
    return %c0_i32, %c0_i32_0 : i32, i32
  }
  func.func @transform_5(%arg0: i32) -> (i32, i32) {
    %c0_i32 = arith.constant 0 : i32
    %c0_i32_0 = arith.constant 0 : i32
    %c0_i32_1 = arith.constant 0 : i32
    return %c0_i32, %c0_i32_0 : i32, i32
  }
  func.func @transform_6(%arg0: i32) -> (i32, i32) {
    %c0_i32 = arith.constant 0 : i32
    %c0_i32_0 = arith.constant 0 : i32
    %c0_i32_1 = arith.constant 0 : i32
    return %c0_i32, %c0_i32_0 : i32, i32
  }
  func.func @transform_7(%arg0: i32) -> (i32, i32) {
    %c0_i32 = arith.constant 0 : i32
    %c0_i32_0 = arith.constant 0 : i32
    %c0_i32_1 = arith.constant 0 : i32
    return %c0_i32, %c0_i32_0 : i32, i32
  }
  func.func @transform_8(%arg0: i32) -> (i32, i32, i32, i32) {
    %c0_i32 = arith.constant 0 : i32
    %c0_i32_0 = arith.constant 0 : i32
    %c0_i32_1 = arith.constant 0 : i32
    %c0_i32_2 = arith.constant 0 : i32
    return %arg0, %c0_i32, %c0_i32_0, %c0_i32_1 : i32, i32, i32, i32
  }
}

</mosaic_0001>

<bundles_post_ra>
// kernel: tpu_custom_call.1
= control target key start
LH: loop header
LB: loop body
LE: loop exit
PB: predicated region body
PF: predicated region fallthrough
CT: control target
= control target key end

     0   :  { %13 = vsyncpa [#allocation7], 0  ;;  %s13407_s0 = inlined_call_operand.vmem [shape: f32[2,16,16,4], index: 0, kind: input, shape index: {}]   ;;  %s13408_s1 = inlined_call_operand.vmem [shape: f32[1,4], index: 1, kind: input, shape index: {}]   ;;  %s13409_s2 = inlined_call_operand.vmem [shape: f32[1,4], index: 2, kind: input, shape index: {}]   ;;  %s13410_s3 = inlined_call_operand.vmem [shape: bf16[36,8], index: 3, kind: input, shape index: {}]   ;;  %s13411_s4 = inlined_call_operand.vmem [shape: f32[1,8], index: 4, kind: input, shape index: {}]   ;;  %s13412_s5 = inlined_call_operand.vmem [shape: f32[1,8], index: 5, kind: input, shape index: {}]   ;;  %s13413_s6 = inlined_call_operand.vmem [shape: bf16[72,8], index: 6, kind: input, shape index: {}]   ;;  %s13414_s7 = inlined_call_operand.vmem [shape: bf16[4,8], index: 7, kind: input, shape index: {}]   ;;  %s13415_s8 = inlined_call_operand.hbm [shape: f32[2,8,8,8], index: 8, kind: output, shape index: {}]  }
   0x1   :  { %15 = vsyncpa [#allocation7 + $0x1], 0  ;;  %s10345_s27 = smov 0   ;;  %s10347_s28 = smov 0  }
   0x2   :  { %s10349_s29 = smov 0   ;;  %s10351_s30 = smov 0  }
   0x3 LB: > { %s10366_s9 = sadd.s32 4294967295, %s10280_s30   ;;  %s9577_s10 = sadd.s32 4294967294, %s10280_s30   ;;  %s10280_s30 = sphi %s10351_s30, %s13517_s30   ;;  %s10276_s29 = sphi %s10349_s29, %s13516_s29   ;;  %s10272_s28 = sphi %s10347_s28, %s13515_s28   ;;  %s10268_s27 = sphi %s10345_s27, %s13514_s27  }
   0x4   : > { %s10370_s11 = sadd.s32 1, %s10280_s30   ;;  %s201_s12 = sadd.s32 1, %s10276_s29 }
   0x5   : > { %s198_s13 = ssub.s32 %s10280_s30, %s10370_s11  ;;  %p211_p0 = scmp.ne.s32.totalorder %s10276_s29, %s10272_s28 }
   0x6   : > { %p199_p1 = scmp.eq.s32.totalorder %s198_s13, 0  ;;  %p212_p2 = scmp.eq.s32.totalorder %s10366_s9, 1 }
   0x7   : > { %p217_p3 = scmp.ne.s32.totalorder %s10272_s28, %s10268_s27  ;;  %p218_p4 = scmp.eq.s32.totalorder %s9577_s10, 1 }
   0x8   : > { %s10381_s14 = scalar_select %p199_p1, %s10276_s29, %s201_s12  }
   0x9   : > { %p10383_p5 = por %p212_p2, %p211_p0  ;;  %p10387_p6 = por %p218_p4, %p217_p3 }
   0xa   : > { %p9580_p7 = scmp.ge.s32.totalorder %s10280_s30, 1  ;;  %p265_p8 = scmp.lt.s32.totalorder %s10280_s30, 3 }
   0xc   : > { %p266_p9 = pnand %p9580_p7, %p265_p8 }
   0xd   : > { %vm447_vm0 = vcmask (!%p266_p9), 27648   ;;  %vm450_vm1 = vcmask (!%p266_p9), 24576   ;;  %vm13418_vm2 = vsmask.f32 (!%p266_p9), 256  ;;  %v10282_v0 = vmov (!%p266_p9), 0   ;;  %p299_p10 = scmp.lt.s32.totalorder (!%p266_p9), %s10366_s9, 1 }
   0xe   : > { %269 = sbr.rel (%p266_p9) target bundleno = 1291 (0x50b), region = 52  ;;  %448 = vst.msk [vmem:[#allocation2] sm:$0xf] (!%p266_p9), %vm447_vm0, %v10282_v0  ;;  %449 = vst.msk [vmem:[#allocation2 + $0x4] sm:$0xf] (!%p266_p9), %vm447_vm0, %v10282_v0  ;;  %vm13416_vm4 = vcmask (!%p266_p9), 60416  }
   0xf   : > { %451 = vst.msk [vmem:[#allocation2 + $0x8] sm:$0x1] (!%p266_p9), %vm450_vm1, %v10282_v0  ;;  %vm13417_vm3 = vsmask.f32 (!%p266_p9), 7938  ;;  %455 = vst.msk [vmem:[#allocation2 + $0xd4] sm:$0x1] (!%p266_p9), %vm450_vm1, %v10282_v0 }
  0x10   : > { %453 = vst.msk [vmem:[#allocation2 + $0xcc] sm:$0xf] (!%p266_p9), %vm447_vm0, %v10282_v0  ;;  %454 = vst.msk [vmem:[#allocation2 + $0xd0] sm:$0xf] (!%p266_p9), %vm447_vm0, %v10282_v0  ;;  %vm1879_vm6 = vcmask (!%p266_p9), 1042432   ;;  %vm1880_vm8 = vcmask (!%p266_p9), 1046532  }
  0x11   : > { %vm10401_vm5 = vmand (!%p266_p9), %vm450_vm1, %vm13418_vm2  ;;  %4571 = vst.msk [vmem:[#allocation4] sm:$0xf] (!%p266_p9), %vm13416_vm4, %v10282_v0  ;;  %v463_v3 = vld [vmem:[#allocation2 + $0x18] sm:$0x1] (!%p266_p9)  ;;  %v460_v4 = vld [vmem:[#allocation2 + $0xc] sm:$0x1] (!%p266_p9) }
  0x12   : > { %4577 = vst.msk [vmem:[#allocation4 + $0x8] sm:$0xf] (!%p266_p9), %vm13416_vm4, %v10282_v0  ;;  %vm10410_vm7 = vmand (!%p266_p9), %vm450_vm1, %vm13417_vm3  ;;  %vm1283_vm9 = vsmask.f32 (!%p266_p9), 3328  ;;  %v464_v5 = vsel (!%p266_p9), %vm10401_vm5, 0, %v463_v3  ;;  %v461_v6 = vsel (!%p266_p9), %vm10401_vm5, 0, %v460_v4 }
  0x13   : > { %v466_v7 = vld [vmem:[#allocation2 + $0x24] sm:$0x1] (!%p266_p9)  ;;  %465 = vst [vmem:[#allocation2 + $0x18] sm:$0x1] (!%p266_p9), %v464_v5  ;;  %462 = vst [vmem:[#allocation2 + $0xc] sm:$0x1] (!%p266_p9), %v461_v6 }
  0x14   : > { %v467_v8 = vsel (!%p266_p9), %vm10401_vm5, 0, %v466_v7  ;;  %v469_v9 = vld [vmem:[#allocation2 + $0x30] sm:$0x1] (!%p266_p9)  ;;  %v510_v10 = vld [vmem:[#allocation2 + $0x14] sm:$0x1] (!%p266_p9)  ;;  %vm10422_vm10 = vmor (!%p266_p9), %vm1879_vm6, %vm1880_vm8  ;;  %s10283_s26 = smov (!%p266_p9), 8  }
  0x15   : > { %s300_s17 = scalar_select %p299_p10, %s10366_s9, 1  ;;  %vm1284_vm11 = vsmask.f32 7440  ;;  %v10434_v12 = vld [vmem:[%s13408_s1] ss:$0 sm:$0xff]  ;;  %v470_v13 = vsel %vm10401_vm5, 0, %v469_v9  ;;  %vm10482_vm14 = vmand %vm447_vm0, %vm13417_vm3 }
  0x16   : > { %468 = vst [vmem:[#allocation2 + $0x24] sm:$0x1] %v467_v8  ;;  %v511_v14 = vsel %vm10410_vm7, 0, %v510_v10  ;;  %v1783_v15 = vld [vmem:[#allocation2] sm:$0xe]  ;;  %vm10461_vm13 = vmor %vm1283_vm9, %vm1284_vm11  ;;  %s10284_s10 = smov 4  }
  0x17   : > { %s9901_s18 = sshll.u32 %s300_s17, 8  ;;  %v1784_v16 = vld [vmem:[#allocation2 + $0x4] sm:$0xf]  ;;  %v1785_v17 = vld [vmem:[#allocation2 + $0x8] sm:$0x1]  ;;  %v9650_v19 = vrot.slane %v1783_v15, 9 }
  0x18   : > { %s10429_s21 = scalar_lea.vmem %s13407_s0, %s9901_s18  ;;  %v10443_v18 = vld [vmem:[%s13409_s2] ss:$0 sm:$0xff]  ;;  %471 = vst [vmem:[#allocation2 + $0x30] sm:$0x1] %v470_v13  ;;  %512 = vst [vmem:[#allocation2 + $0x14] sm:$0x1] %v511_v14 }
  0x19   : > { %v1884_v20 = vrot.slane %v1784_v16, 5  ;;  %v1887_v21 = vrot.slane %v1785_v17, 5  ;;  %v1235_v22 = vld [vmem:[#allocation2] sm:$0xf]  ;;  %v307_v23 = vld [vmem:[%s10429_s21 + $0x10] sm:$0xff]  ;;  %v308_v33 = vld [vmem:[%s10429_s21 + $0x18] sm:$0xff] }
  0x1a   : > { %v1236_v24 = vld [vmem:[#allocation2 + $0x4] sm:$0xf]  ;;  %v1237_v25 = vld [vmem:[#allocation2 + $0x8] sm:$0x1]  ;;  %v1287_v26 = vshrl.u32 %v1235_v22, 16  ;;  %v1290_v27 = vshll.u32 %v1235_v22, 16  ;;  %v346_v28 = vmul.f32 %v10434_v12, %v307_v23  ;;  %v347_v37 = vmul.f32 %v10434_v12, %v308_v33 }
  0x1b   : > { %v1885_v29 = vsel %vm10422_vm10, %v9650_v19, %v1884_v20  ;;  %v1886_v30 = vrot.slane %v1884_v20, 4  ;;  %v1296_v31 = vshll.u32 %v1236_v24, 16  ;;  %v1300_v32 = vshrl.u32 %v1236_v24, 16  ;;  %v305_v38 = vld [vmem:[%s10429_s21] sm:$0xff]  ;;  %v306_v39 = vld [vmem:[%s10429_s21 + $0x8] sm:$0xff]  ;;  %v311_v9 = vld [vmem:[%s10429_s21 + $0x30] sm:$0xff] }
  0x1c   : > { %v1289_v34 = vrot.slane %v1287_v26, 4  ;;  %v1292_v35 = vrot.slane %v1290_v27, 5  ;;  %v1306_v36 = vshll.u32 %v1237_v25, 16  ;;  %vm654_vm12 = vsmask.f32 4368  ;;  %v309_v44 = vld [vmem:[%s10429_s21 + $0x20] sm:$0xff] }
  0x1d   : > { %v1888_v40 = vsel %vm10422_vm10, %v1886_v30, %v1887_v21  ;;  %v1298_v41 = vrot.slane %v1296_v31, 5  ;;  %v1302_v42 = vrot.slane %v1300_v32, 4  ;;  %v385_v43 = vadd.f32 %v10443_v18, %v346_v28  ;;  %v310_v45 = vld [vmem:[%s10429_s21 + $0x28] sm:$0xff]  ;;  %v312_v10 = vld [vmem:[%s10429_s21 + $0x38] sm:$0xff]  ;;  %vm10493_vm15 = vmor %vm13418_vm2, %vm654_vm12  ;;  %s10285_s12 = smov 12   ;;  %s10286_s13 = smov 24  }
  0x1e   : > { %v9666_v46 = vcombine.low %v1885_v29, %v1888_v40  ;;  %v1293_v47 = vor.u32 %v1292_v35, %v1289_v34  ;;  %v1308_v48 = vrot.slane %v1306_v36, 5  ;;  %v386_v49 = vadd.f32 %v10443_v18, %v347_v37  ;;  %v985_v19 = vld [vmem:[#allocation2 + $0x18] sm:$0xf]  ;;  %v978_v36 = vld [vmem:[#allocation2 + $0xc] sm:$0xf]  ;;  %s10287_s17 = smov 20  }
  0x1f   : > { %v1303_v51 = vor.u32 %v1302_v42, %v1298_v41  ;;  %v417_v52 = vmax.f32 %v385_v43, 0.0  ;;  %v344_v53 = vmul.f32 %v10434_v12, %v305_v38  ;;  %v345_v54 = vmul.f32 %v10434_v12, %v306_v39  ;;  %v513_v42 = vld [vmem:[#allocation2 + $0x20] sm:$0x1]  ;;  %s10288_s18 = smov 32   ;;  %s10289_s19 = smov 16  }
  0x20   : > { %2042 = vrot.lane.b32.xlu1 %v9666_v46, %s10283_s26  ;;  %v1294_v55 = vrot.slane %v1293_v47, 4  ;;  %v418_v56 = vmax.f32 %v386_v49, 0.0  ;;  %v348_v57 = vmul.f32 %v10434_v12, %v309_v44  ;;  %v349_v58 = vmul.f32 %v10434_v12, %v310_v45  ;;  %s10290_s20 = smov 28   ;;  %s10293_s24 = smov 48  }
  0x21   : > { %v1304_v59 = vrot.slane %v1303_v51, 4  ;;  %v9904_v60 = vpack.c.bf16 %v417_v52, %v417_v52  ;;  %v383_v61 = vadd.f32 %v10443_v18, %v344_v53  ;;  %v384_v62 = vadd.f32 %v10443_v18, %v345_v54  ;;  %v516_v52 = vld [vmem:[#allocation2 + $0x2c] sm:$0x1]  ;;  %v519_v53 = vld [vmem:[#allocation2 + $0x38] sm:$0x1]  ;;  %s10294_s25 = smov 56  }
  0x22   : > { %v1299_v63 = vsel %vm10461_vm13, %v1294_v55, %v1298_v41  ;;  %v9905_v0 = vpack.c.bf16 %v418_v56, %v418_v56  ;;  %v387_v3 = vadd.f32 %v10443_v18, %v348_v57  ;;  %v388_v4 = vadd.f32 %v10443_v18, %v349_v58  ;;  %v982_v41 = vld [vmem:[#allocation2 + $0x14] sm:$0x1]  ;;  %v992_v58 = vld [vmem:[#allocation2 + $0x24] sm:$0xf]  ;;  %s10296_s23 = smov 40  }
  0x23   : > { %v1309_v5 = vsel %vm10461_vm13, %v1304_v59, %v1308_v48  ;;  %v674_v6 = vshrl.u32 %v9904_v60, 16  ;;  %v677_v7 = vshll.u32 %v9904_v60, 16  ;;  %v415_v8 = vmax.f32 %v383_v61, 0.0 }
  0x24   : > { %v9634_v13 = vcombine.low %v1299_v63, %v1309_v5  ;;  %v682_v14 = vshrl.u32 %v9905_v0, 16  ;;  %v685_v15 = vshll.u32 %v9905_v0, 16  ;;  %v416_v16 = vmax.f32 %v384_v62, 0.0 }
  0x25   : > { %v676_v17 = vrot.slane %v674_v6, 7  ;;  %v9902_v20 = vpack.c.bf16 %v415_v8, %v415_v8  ;;  %v419_v21 = vmax.f32 %v387_v3, 0.0  ;;  %v420_v22 = vmax.f32 %v388_v4, 0.0 }
  0x26   : > { %1718 = vrot.lane.b32.xlu0 %v9634_v13, %s10284_s10  ;;  %v10487_v24 = vrot.slane %v682_v14, 7  ;;  %v9903_v25 = vpack.c.bf16 %v416_v16, %v416_v16  ;;  %v350_v26 = vmul.f32 %v10434_v12, %v311_v9  ;;  %v351_v27 = vmul.f32 %v10434_v12, %v312_v10  ;;  %v313_v14 = vld [vmem:[%s10429_s21 + $0x40] sm:$0xff] }
  0x27   : > { %v679_v29 = vor.u32 %v677_v7, %v676_v17  ;;  %v680_v30 = vrot.slane %v676_v17, 4  ;;  %v657_v31 = vshrl.u32 %v9902_v20, 16  ;;  %v660_v32 = vshll.u32 %v9902_v20, 16  ;;  %v314_v20 = vld [vmem:[%s10429_s21 + $0x48] sm:$0xff] }
  0x28   : > { %v687_v33 = vor.u32 %v685_v15, %v10487_v24  ;;  %v665_v34 = vshrl.u32 %v9903_v25, 16  ;;  %v668_v35 = vshll.u32 %v9903_v25, 16  ;;  %v9906_v39 = vpack.c.bf16 %v419_v21, %v419_v21  ;;  %v472_v15 = vld [vmem:[#allocation2 + $0x3c] sm:$0x1]  ;;  %v315_v21 = vld [vmem:[%s10429_s21 + $0x50] sm:$0xff] }
  0x29   : > { %v986_v37 = vsel %vm10482_vm14, %v679_v29, %v985_v19  ;;  %v659_v38 = vrot.slane %v657_v31, 7  ;;  %v9907_v40 = vpack.c.bf16 %v420_v22, %v420_v22  ;;  %v389_v45 = vadd.f32 %v10443_v18, %v350_v26 }
  0x2a   : > { %v688_v43 = vsel %vm10493_vm15, %v680_v30, %v687_v33  ;;  %987 = vst [vmem:[#allocation2 + $0x18] sm:$0xf] %v986_v37  ;;  %v667_v44 = vrot.slane %v665_v34, 7  ;;  %v390_v46 = vadd.f32 %v10443_v18, %v351_v27  ;;  %v691_v49 = vshrl.u32 %v9906_v39, 16  ;;  %v999_v27 = vld [vmem:[#allocation2 + $0x30] sm:$0xf] }
  0x2b   : > { %988 = vst.msk [vmem:[#allocation2 + $0x1c] sm:$0xf] %vm447_vm0, %v688_v43  ;;  %v662_v47 = vor.u32 %v660_v32, %v659_v38  ;;  %v663_v48 = vrot.slane %v659_v38, 4  ;;  %v694_v51 = vshll.u32 %v9906_v39, 16  ;;  %v699_v56 = vshrl.u32 %v9907_v40, 16  ;;  %v316_v33 = vld [vmem:[%s10429_s21 + $0x58] sm:$0xff] }
  0x2c   : > { %v670_v54 = vor.u32 %v668_v35, %v667_v44  ;;  %v672_v55 = vrot.slane %v667_v44, 4  ;;  %v702_v57 = vshll.u32 %v9907_v40, 16  ;;  %v693_v60 = vrot.slane %v691_v49, 7  ;;  %v317_v38 = vld [vmem:[%s10429_s21 + $0x60] sm:$0xff] }
  0x2d   : > { %v979_v59 = vsel %vm10482_vm14, %v662_v47, %v978_v36  ;;  %v421_v61 = vmax.f32 %v389_v45, 0.0  ;;  %v422_v62 = vmax.f32 %v390_v46, 0.0  ;;  %v10509_v0 = vrot.slane %v699_v56, 7 }
  0x2e   : > { %v671_v63 = vsel %vm10493_vm15, %v663_v48, %v670_v54  ;;  %980 = vst [vmem:[#allocation2 + $0xc] sm:$0xf] %v979_v59  ;;  %v983_v3 = vsel %vm10401_vm5, %v672_v55, %v982_v41  ;;  %v514_v4 = vsel %vm10410_vm7, 0, %v513_v42  ;;  %v696_v5 = vor.u32 %v694_v51, %v693_v60 }
  0x2f   : > { %981 = vst.msk [vmem:[#allocation2 + $0x10] sm:$0xf] %vm447_vm0, %v671_v63  ;;  %v697_v6 = vrot.slane %v693_v60, 4  ;;  %v9908_v7 = vpack.c.bf16 %v421_v61, %v421_v61  ;;  %v9909_v8 = vpack.c.bf16 %v422_v62, %v422_v62  ;;  %984 = vst [vmem:[#allocation2 + $0x14] sm:$0x1] %v983_v3  ;;  %v704_v9 = vor.u32 %v702_v57, %v10509_v0  ;;  %v318_v57 = vld [vmem:[%s10429_s21 + $0x68] sm:$0xff] }
  0x30   : > { %515 = vst [vmem:[#allocation2 + $0x20] sm:$0x1] %v514_v4  ;;  %v517_v10 = vsel %vm10410_vm7, 0, %v516_v52  ;;  %v520_v13 = vsel %vm10410_vm7, 0, %v519_v53  ;;  %v993_v16 = vsel %vm10482_vm14, %v696_v5, %v992_v58  ;;  %v473_v32 = vsel %vm10401_vm5, 0, %v472_v15 }
  0x31   : > { %v708_v17 = vshrl.u32 %v9908_v7, 16  ;;  %v711_v19 = vshll.u32 %v9908_v7, 16  ;;  %518 = vst [vmem:[#allocation2 + $0x2c] sm:$0x1] %v517_v10  ;;  %521 = vst [vmem:[#allocation2 + $0x38] sm:$0x1] %v520_v13  ;;  %v705_v25 = vsel %vm10493_vm15, %v697_v6, %v704_v9  ;;  %v352_v43 = vmul.f32 %v10434_v12, %v313_v14 }
  0x32   : > { %v10108_v22 = vld [vmem:[#allocation2 + $0x18] sm:$0xff]   ;;  %994 = vst [vmem:[#allocation2 + $0x24] sm:$0xf] %v993_v16  ;;  %v716_v26 = vshrl.u32 %v9909_v8, 16  ;;  %995 = vst.msk [vmem:[#allocation2 + $0x28] sm:$0xf] %vm447_vm0, %v705_v25  ;;  %v353_v48 = vmul.f32 %v10434_v12, %v314_v20  ;;  %v354_v49 = vmul.f32 %v10434_v12, %v315_v21  ;;  %v355_v56 = vmul.f32 %v10434_v12, %v316_v33 }
  0x33   : > { %v710_v29 = vrot.slane %v708_v17, 7  ;;  %v719_v30 = vshll.u32 %v9909_v8, 16  ;;  %v3873_v31 = vld [vmem:[#allocation2 + $0x18] sm:$0xe]  ;;  %v689_v34 = vrot.slane %v10487_v24, 4  ;;  %2221 = vrot.lane.b32.xlu1 %v10108_v22, %s10285_s12  ;;  %v706_v35 = vrot.slane %v10509_v0, 4 }
  0x34   : > { %v10535_v36 = vrot.slane %v716_v26, 7  ;;  %v3874_v37 = vld [vmem:[#allocation2 + $0x1c] sm:$0xf]  ;;  %474 = vst [vmem:[#allocation2 + $0x3c] sm:$0x1] %v473_v32  ;;  %v9778_v42 = vrot.slane %v3873_v31, 9  ;;  %v356_v3 = vmul.f32 %v10434_v12, %v317_v38  ;;  %v10552_v6 = vadd.f32 %v10443_v18, %v352_v43 }
  0x35   : > { %v713_v39 = vor.u32 %v711_v19, %v710_v29  ;;  %v714_v40 = vrot.slane %v710_v29, 4  ;;  %v2829_v41 = vld [vmem:[#allocation2 + $0xc] sm:$0xe]  ;;  %v10111_v45 = vld [vmem:[#allocation2 + $0x18] sm:$0xff]   ;;  %v3971_v47 = vrot.slane %v3874_v37, 5  ;;  %v10555_v7 = vadd.f32 %v10443_v18, %v353_v48  ;;  %v319_v16 = vld [vmem:[%s10429_s21 + $0x70] sm:$0xff] }
  0x36   : > { %v10109_v44 = vld [vmem:[#allocation2 + $0xc] sm:$0xff]   ;;  %v721_v24 = vor.u32 %v719_v30, %v10535_v36  ;;  %v2831_v52 = vld [vmem:[#allocation2 + $0x14] sm:$0x1]  ;;  %v9714_v53 = vrot.slane %v2829_v41, 9  ;;  %v2832_v13 = vld [vmem:[#allocation2 + $0x18] sm:$0xe]  ;;  %v10562_v14 = vadd.f32 %v10443_v18, %v354_v49  ;;  %v10565_v15 = vadd.f32 %v10443_v18, %v355_v56 }
  0x37   : > { %v2830_v46 = vld [vmem:[#allocation2 + $0x10] sm:$0xf]  ;;  %v1000_v51 = vsel %vm10482_vm14, %v713_v39, %v999_v27  ;;  %v1786_v55 = vld [vmem:[#allocation2 + $0xc] sm:$0xe]  ;;  %2219 = vrot.lane.b32.xlu0 %v10109_v44, %s10285_s12  ;;  %v2930_v59 = vrot.slane %v2831_v52, 5  ;;  %v10559_v10 = vsel %vm10422_vm10, %v9778_v42, %v3971_v47  ;;  %v723_v17 = vrot.slane %v10535_v36, 4 }
  0x38   : > { %v2927_v54 = vrot.slane %v2830_v46, 5  ;;  %v722_v58 = vsel %vm10493_vm15, %v714_v40, %v721_v24  ;;  %1001 = vst [vmem:[#allocation2 + $0x30] sm:$0xf] %v1000_v51  ;;  %v1787_v60 = vld [vmem:[#allocation2 + $0x10] sm:$0xf]  ;;  %v9651_v62 = vrot.slane %v1786_v55, 9  ;;  %v357_v26 = vmul.f32 %v10434_v12, %v318_v57 }
  0x39   : > { %v1788_v61 = vld [vmem:[#allocation2 + $0x14] sm:$0x1]  ;;  %1002 = vst.msk [vmem:[#allocation2 + $0x34] sm:$0xf] %vm447_vm0, %v722_v58  ;;  %v1891_v0 = vrot.slane %v1787_v60, 5  ;;  %v10110_v4 = vld [vmem:[#allocation2 + $0x24] sm:$0xff]   ;;  %v10581_v33 = vadd.f32 %v10443_v18, %v356_v3  ;;  %v10595_v51 = vmul.f32 %v10434_v12, %v319_v16 }
  0x3a   : > { %v2929_v63 = vrot.slane %v2927_v54, 4  ;;  %v1894_v5 = vrot.slane %v1788_v61, 5  ;;  %v989_v9 = vld [vmem:[#allocation2 + $0x20] sm:$0x1]  ;;  %3265 = vrot.lane.b32.xlu1 %v10110_v4, %s10286_s13  ;;  %v10113_v19 = vld [vmem:[#allocation2 + $0x24] sm:$0xff]   ;;  %v2928_v20 = vsel %vm10422_vm10, %v9714_v53, %v2927_v54  ;;  %v3973_v29 = vrot.slane %v3971_v47, 4 }
  0x3b   : > { %v1893_v8 = vrot.slane %v1891_v0, 4  ;;  %3263 = vrot.lane.b32.xlu0 %v10111_v45, %s10286_s13  ;;  %v990_v21 = vsel %vm10401_vm5, %v689_v34, %v989_v9  ;;  %v2833_v22 = vld [vmem:[#allocation2 + $0x1c] sm:$0xf]  ;;  %v996_v25 = vld [vmem:[#allocation2 + $0x2c] sm:$0x1]  ;;  %v1892_v34 = vsel %vm10422_vm10, %v9651_v62, %v1891_v0  ;;  %v9715_v43 = vrot.slane %v2832_v13, 9 }
  0x3c   : > { %v2931_v27 = vsel %vm10422_vm10, %v2929_v63, %v2930_v59  ;;  %991 = vst [vmem:[#allocation2 + $0x20] sm:$0x1] %v990_v21  ;;  %v997_v30 = vsel %vm10401_vm5, %v706_v35, %v996_v25  ;;  %v3876_v31 = vld [vmem:[#allocation2 + $0x24] sm:$0xe]  ;;  %v3877_v32 = vld [vmem:[#allocation2 + $0x28] sm:$0xf]  ;;  %v10592_v49 = vadd.f32 %v10443_v18, %v357_v26 }
  0x3d   : > { %v320_v37 = vld [vmem:[%s10429_s21 + $0x78] sm:$0xff]  ;;  %v1895_v38 = vsel %vm10422_vm10, %v1893_v8, %v1894_v5  ;;  %v2934_v39 = vrot.slane %v2833_v22, 5  ;;  %998 = vst [vmem:[#allocation2 + $0x2c] sm:$0x1] %v997_v30  ;;  %v3978_v40 = vrot.slane %v3877_v32, 5  ;;  %v423_v35 = vmax.f32 %v10552_v6, 0.0 }
  0x3e   : > { %v1792_v41 = vld [vmem:[#allocation2 + $0x24] sm:$0xe]  ;;  %v1793_v42 = vld [vmem:[#allocation2 + $0x28] sm:$0xf]  ;;  %v424_v45 = vmax.f32 %v10555_v7, 0.0  ;;  %v9730_v46 = vcombine.low %v2928_v20, %v2931_v27  ;;  %v9779_v47 = vrot.slane %v3876_v31, 9  ;;  %v9667_v52 = vcombine.low %v1892_v34, %v1895_v38 }
  0x3f   : > { %v1905_v44 = vrot.slane %v1793_v42, 5  ;;  %2223 = vrot.lane.b32.xlu0 %v10113_v19, %s10285_s12  ;;  %v1789_v48 = vld [vmem:[#allocation2 + $0x18] sm:$0xe]  ;;  %v9653_v53 = vrot.slane %v1792_v41, 9  ;;  %v1790_v54 = vld [vmem:[#allocation2 + $0x1c] sm:$0xf]  ;;  %v10598_v57 = vmul.f32 %v10434_v12, %v320_v37  ;;  %v2935_v12 = vsel %vm10422_vm10, %v9715_v43, %v2934_v39 }
  0x40   : > { %v10112_v24 = vld [vmem:[#allocation2 + $0x30] sm:$0xff]   ;;  %v9652_v55 = vrot.slane %v1789_v48, 9  ;;  %v2287_v56 = vld [vmem:[#allocation2 + $0x18] sm:$0xf]  ;;  %v2936_v58 = vrot.slane %v2934_v39, 4  ;;  %v3980_v59 = vrot.slane %v3978_v40, 4  ;;  %v3979_v6 = vsel %vm10422_vm10, %v9779_v47, %v3978_v40 }
  0x41   : > { %2225 = vrot.lane.b32.xlu1 %v10112_v24, %s10285_s12  ;;  %v1907_v60 = vrot.slane %v1905_v44, 4  ;;  %v1898_v61 = vrot.slane %v1790_v54, 5  ;;  %v2288_v62 = vld [vmem:[#allocation2 + $0x1c] sm:$0xf]  ;;  %v2357_v18 = vshrl.u32 %v2287_v56, 16  ;;  %v2360_v63 = vshll.u32 %v2287_v56, 16 }
  0x42   : > { %v2366_v0 = vshll.u32 %v2288_v62, 16  ;;  %v2370_v3 = vshrl.u32 %v2288_v62, 16  ;;  %v10606_v8 = vpack.c.bf16 %v423_v35, %v423_v35  ;;  %v10608_v9 = vpack.c.bf16 %v424_v45, %v424_v45  ;;  %v3331_v43 = vld [vmem:[#allocation2 + $0x24] sm:$0xf] }
  0x43   : > { %3085 = vrot.lane.b32.xlu0 %v9730_v46, %s10287_s17  ;;  %v3875_v4 = vld [vmem:[#allocation2 + $0x20] sm:$0x1]  ;;  %v1906_v21 = vsel %vm10422_vm10, %v9653_v53, %v1905_v44  ;;  %v10614_v22 = vsel %vm10422_vm10, %v9652_v55, %v1898_v61  ;;  %v1900_v27 = vrot.slane %v1898_v61, 4  ;;  %v2359_v34 = vrot.slane %v2357_v18, 4  ;;  %v3332_v44 = vld [vmem:[#allocation2 + $0x28] sm:$0xf] }
  0x44   : > { %v2834_v5 = vld [vmem:[#allocation2 + $0x20] sm:$0x1]  ;;  %v3974_v13 = vrot.slane %v3875_v4, 5  ;;  %v3878_v19 = vld [vmem:[#allocation2 + $0x2c] sm:$0x1]  ;;  %v2362_v38 = vrot.slane %v2360_v63, 5 }
  0x45   : > { %v1791_v7 = vld [vmem:[#allocation2 + $0x20] sm:$0x1]  ;;  %v2937_v16 = vrot.slane %v2834_v5, 5  ;;  %v1794_v20 = vld [vmem:[#allocation2 + $0x2c] sm:$0x1]  ;;  %2044 = vrot.lane.b32.xlu1 %v9667_v52, %s10283_s26  ;;  %v3981_v25 = vrot.slane %v3878_v19, 5 }
  0x46   : > { %v1908_v26 = vrot.slane %v1794_v20, 5  ;;  %v1901_v30 = vrot.slane %v1791_v7, 5  ;;  %v3975_v31 = vsel %vm10422_vm10, %v3973_v29, %v3974_v13  ;;  %v2289_v37 = vld [vmem:[#allocation2 + $0x20] sm:$0x1]  ;;  %v2363_v24 = vor.u32 %v2362_v38, %v2359_v34  ;;  %v3333_v46 = vld [vmem:[#allocation2 + $0x2c] sm:$0x1] }
  0x47   : > { %v2938_v32 = vsel %vm10422_vm10, %v2936_v58, %v2937_v16  ;;  %v9794_v39 = vcombine.low %v10559_v10, %v3975_v31  ;;  %v3982_v41 = vsel %vm10422_vm10, %v3980_v59, %v3981_v25  ;;  %v2368_v47 = vrot.slane %v2366_v0, 5  ;;  %v1238_v58 = vld [vmem:[#allocation2 + $0xc] sm:$0xf]  ;;  %v1239_v18 = vld [vmem:[#allocation2 + $0x10] sm:$0xf] }
  0x48   : > { %v9731_v40 = vcombine.low %v2935_v12, %v2938_v32  ;;  %v1909_v42 = vsel %vm10422_vm10, %v1907_v60, %v1908_v26  ;;  %v9795_v35 = vcombine.low %v3979_v6, %v3982_v41  ;;  %v1902_v29 = vsel %vm10422_vm10, %v1900_v27, %v1901_v30  ;;  %v1240_v6 = vld [vmem:[#allocation2 + $0x14] sm:$0x1]  ;;  %v1242_v31 = vld [vmem:[#allocation2 + $0x1c] sm:$0xf] }
  0x49   : > { %v9669_v45 = vcombine.low %v1906_v21, %v1909_v42  ;;  %4129 = vrot.lane.b32.xlu0 %v9794_v39, %s10288_s18  ;;  %v9668_v10 = vcombine.low %v10614_v22, %v1902_v29  ;;  %v2372_v48 = vrot.slane %v2370_v3, 4  ;;  %v2376_v52 = vshll.u32 %v2289_v37, 16  ;;  %v1241_v22 = vld [vmem:[#allocation2 + $0x18] sm:$0xf] }
  0x4a   : > { %3087 = vrot.lane.b32.xlu1 %v9731_v40, %s10287_s17  ;;  %v2364_v53 = vrot.slane %v2363_v24, 4  ;;  %v3401_v54 = vshrl.u32 %v3331_v43, 16  ;;  %v3404_v55 = vshll.u32 %v3331_v43, 16  ;;  %v3410_v56 = vshll.u32 %v3332_v44, 16  ;;  %v2284_v24 = vld [vmem:[#allocation2 + $0xc] sm:$0xf] }
  0x4b   : > { %v2373_v59 = vor.u32 %v2372_v48, %v2368_v47  ;;  %v2378_v60 = vrot.slane %v2376_v52, 5  ;;  %v3414_v61 = vshrl.u32 %v3332_v44, 16  ;;  %v3420_v62 = vshll.u32 %v3333_v46, 16  ;;  %v2285_v52 = vld [vmem:[#allocation2 + $0x10] sm:$0xf] }
  0x4c   : > { %v2369_v63 = vsel %vm10461_vm13, %v2364_v53, %v2368_v47  ;;  %v3403_v4 = vrot.slane %v3401_v54, 4  ;;  %v3406_v5 = vrot.slane %v3404_v55, 5  ;;  %v3412_v12 = vrot.slane %v3410_v56, 5 }
  0x4d   : > { %4131 = vrot.lane.b32.xlu0 %v9795_v35, %s10288_s18  ;;  %v2374_v0 = vrot.slane %v2373_v59, 4  ;;  %v3416_v3 = vrot.slane %v3414_v61, 4  ;;  %v3422_v7 = vrot.slane %v3420_v62, 5  ;;  %v1311_v13 = vshrl.u32 %v1238_v58, 16  ;;  %v1243_v35 = vld [vmem:[#allocation2 + $0x20] sm:$0x1] }
  0x4e   : > { %2048 = vrot.lane.b32.xlu1 %v9669_v45, %s10283_s26  ;;  %v3407_v16 = vor.u32 %v3406_v5, %v3403_v4  ;;  %v1314_v19 = vshll.u32 %v1238_v58, 16  ;;  %v1320_v20 = vshll.u32 %v1239_v18, 16  ;;  %v1324_v21 = vshrl.u32 %v1239_v18, 16 }
  0x4f   : > { %v2379_v25 = vsel %vm10461_vm13, %v2374_v0, %v2378_v60  ;;  %v3417_v26 = vor.u32 %v3416_v3, %v3412_v12  ;;  %v1313_v27 = vrot.slane %v1311_v13, 4  ;;  %v1330_v30 = vshll.u32 %v1240_v6, 16  ;;  %v1245_v13 = vld [vmem:[#allocation2 + $0x28] sm:$0xf] }
  0x50   : > { %v9699_v32 = vcombine.low %v2369_v63, %v2379_v25  ;;  %v3408_v37 = vrot.slane %v3407_v16, 4  ;;  %v1316_v34 = vrot.slane %v1314_v19, 5  ;;  %v1322_v38 = vrot.slane %v1320_v20, 5  ;;  %v2286_v63 = vld [vmem:[#allocation2 + $0x14] sm:$0x1] }
  0x51   : > { %2046 = vrot.lane.b32.xlu0 %v9668_v10, %s10283_s26  ;;  %v3418_v39 = vrot.slane %v3417_v26, 4  ;;  %v1326_v40 = vrot.slane %v1324_v21, 4  ;;  %v1332_v41 = vrot.slane %v1330_v30, 5  ;;  %v1335_v42 = vshrl.u32 %v1241_v22, 16 }
  0x52   : > { %2766 = vrot.lane.b32.xlu1 %v9699_v32, %s10289_s19  ;;  %v3413_v43 = vsel %vm10461_vm13, %v3408_v37, %v3412_v12  ;;  %v1317_v44 = vor.u32 %v1316_v34, %v1313_v27  ;;  %v1338_v45 = vshll.u32 %v1241_v22, 16  ;;  %v1344_v29 = vshll.u32 %v1242_v31, 16  ;;  %v1244_v12 = vld [vmem:[#allocation2 + $0x24] sm:$0xf]  ;;  %v1246_v32 = vld [vmem:[#allocation2 + $0x2c] sm:$0x1] }
  0x53   : > { %v3423_v46 = vsel %vm10461_vm13, %v3418_v39, %v3422_v7  ;;  %v1327_v47 = vor.u32 %v1326_v40, %v1322_v38  ;;  %v1337_v10 = vrot.slane %v1335_v42, 4  ;;  %v1348_v48 = vshrl.u32 %v1242_v31, 16 }
  0x54   : > { %v9763_v53 = vcombine.low %v3413_v43, %v3423_v46  ;;  %v1318_v54 = vrot.slane %v1317_v44, 4  ;;  %v1340_v55 = vrot.slane %v1338_v45, 5  ;;  %v1346_v56 = vrot.slane %v1344_v29, 5  ;;  %v3329_v43 = vld [vmem:[#allocation2 + $0x1c] sm:$0xf] }
  0x55   : > { %v1328_v58 = vrot.slane %v1327_v47, 4  ;;  %v1350_v59 = vrot.slane %v1348_v48, 4  ;;  %v1354_v60 = vshll.u32 %v1243_v35, 16  ;;  %v2333_v61 = vshrl.u32 %v2284_v24, 16 }
  0x56   : > { %3810 = vrot.lane.b32.xlu1 %v9763_v53, %s10290_s20  ;;  %v1323_v62 = vsel %vm10461_vm13, %v1318_v54, %v1322_v38  ;;  %v1341_v18 = vor.u32 %v1340_v55, %v1337_v10  ;;  %v2336_v4 = vshll.u32 %v2284_v24, 16  ;;  %v2342_v5 = vshll.u32 %v2285_v52, 16  ;;  %v3328_v38 = vld [vmem:[#allocation2 + $0x18] sm:$0xf]  ;;  %v3330_v53 = vld [vmem:[#allocation2 + $0x20] sm:$0x1] }
  0x57   : > { %v1333_v6 = vsel %vm10461_vm13, %v1328_v58, %v1332_v41  ;;  %v1351_v0 = vor.u32 %v1350_v59, %v1346_v56  ;;  %v1356_v3 = vrot.slane %v1354_v60, 5  ;;  %v2335_v7 = vrot.slane %v2333_v61, 4 }
  0x58   : > { %v9635_v16 = vcombine.low %v1323_v62, %v1333_v6  ;;  %v1342_v19 = vrot.slane %v1341_v18, 4  ;;  %v2338_v20 = vrot.slane %v2336_v4, 5  ;;  %v2344_v21 = vrot.slane %v2342_v5, 5  ;;  %v2291_v5 = vld [vmem:[#allocation2 + $0x28] sm:$0xf] }
  0x59   : > { %v1352_v22 = vrot.slane %v1351_v0, 4  ;;  %v2346_v25 = vshrl.u32 %v2285_v52, 16  ;;  %v2352_v26 = vshll.u32 %v2286_v63, 16  ;;  %v1359_v27 = vshrl.u32 %v1244_v12, 16 }
  0x5a   : > { %1720 = vrot.lane.b32.xlu0 %v9635_v16, %s10284_s10  ;;  %v1347_v30 = vsel %vm10461_vm13, %v1342_v19, %v1346_v56  ;;  %v2339_v31 = vor.u32 %v2338_v20, %v2335_v7  ;;  %v1362_v37 = vshll.u32 %v1244_v12, 16  ;;  %v1368_v34 = vshll.u32 %v1245_v13, 16  ;;  %v2290_v56 = vld [vmem:[#allocation2 + $0x24] sm:$0xf] }
  0x5b   : > { %v1357_v39 = vsel %vm10461_vm13, %v1352_v22, %v1356_v3  ;;  %v2348_v40 = vrot.slane %v2346_v25, 4  ;;  %v2354_v41 = vrot.slane %v2352_v26, 5  ;;  %v1361_v42 = vrot.slane %v1359_v27, 4  ;;  %v2292_v3 = vld [vmem:[#allocation2 + $0x2c] sm:$0x1] }
  0x5c   : > { %v9636_v44 = vcombine.low %v1347_v30, %v1357_v39  ;;  %v2340_v35 = vrot.slane %v2339_v31, 4  ;;  %v1364_v45 = vrot.slane %v1362_v37, 5  ;;  %v1370_v29 = vrot.slane %v1368_v34, 5  ;;  %v2293_v22 = vld [vmem:[#allocation2 + $0x30] sm:$0xf] }
  0x5d   : > { %v2349_v24 = vor.u32 %v2348_v40, %v2344_v21  ;;  %v1372_v46 = vshrl.u32 %v1245_v13, 16  ;;  %v1378_v47 = vshll.u32 %v1246_v32, 16  ;;  %v3377_v10 = vshrl.u32 %v3328_v38, 16  ;;  %v1003_v13 = vld [vmem:[#allocation2 + $0x38] sm:$0x1] }
  0x5e   : > { %1722 = vrot.lane.b32.xlu1 %v9636_v44, %s10284_s10  ;;  %v2345_v48 = vsel %vm10461_vm13, %v2340_v35, %v2344_v21  ;;  %v1365_v52 = vor.u32 %v1364_v45, %v1361_v42  ;;  %v3380_v54 = vshll.u32 %v3328_v38, 16  ;;  %v3386_v55 = vshll.u32 %v3329_v43, 16  ;;  %v2294_v31 = vld [vmem:[#allocation2 + $0x34] sm:$0xf] }
  0x5f   : > { %v2350_v58 = vrot.slane %v2349_v24, 4  ;;  %v1374_v59 = vrot.slane %v1372_v46, 4  ;;  %v1380_v60 = vrot.slane %v1378_v47, 5  ;;  %v3379_v61 = vrot.slane %v3377_v10, 4  ;;  %v2836_v24 = vld [vmem:[#allocation2 + $0x28] sm:$0xf] }
  0x60   : > { %v1366_v62 = vrot.slane %v1365_v52, 4  ;;  %v3382_v18 = vrot.slane %v3380_v54, 5  ;;  %v3388_v63 = vrot.slane %v3386_v55, 5  ;;  %v3390_v4 = vshrl.u32 %v3329_v43, 16  ;;  %v2835_v43 = vld [vmem:[#allocation2 + $0x24] sm:$0xe] }
  0x61   : > { %v2355_v12 = vsel %vm10461_vm13, %v2350_v58, %v2354_v41  ;;  %v1375_v6 = vor.u32 %v1374_v59, %v1370_v29  ;;  %v3396_v0 = vshll.u32 %v3330_v53, 16  ;;  %v2381_v7 = vshrl.u32 %v2290_v56, 16  ;;  %v2837_v46 = vld [vmem:[#allocation2 + $0x2c] sm:$0x1]  ;;  %v2838_v53 = vld [vmem:[#allocation2 + $0x30] sm:$0xe] }
  0x62   : > { %v9698_v16 = vcombine.low %v2345_v48, %v2355_v12  ;;  %v1371_v19 = vsel %vm10461_vm13, %v1366_v62, %v1370_v29  ;;  %v3383_v20 = vor.u32 %v3382_v18, %v3379_v61  ;;  %v3392_v21 = vrot.slane %v3390_v4, 4  ;;  %v2839_v54 = vld [vmem:[#allocation2 + $0x34] sm:$0xf] }
  0x63   : > { %v1376_v25 = vrot.slane %v1375_v6, 4  ;;  %v3398_v26 = vrot.slane %v3396_v0, 5  ;;  %v2383_v27 = vrot.slane %v2381_v7, 4  ;;  %v2384_v30 = vshll.u32 %v2290_v56, 16 }
  0x64   : > { %2764 = vrot.lane.b32.xlu0 %v9698_v16, %s10289_s19  ;;  %v3384_v32 = vrot.slane %v3383_v20, 4  ;;  %v3393_v37 = vor.u32 %v3392_v21, %v3388_v63  ;;  %v2390_v34 = vshll.u32 %v2291_v5, 16  ;;  %v2394_v38 = vshrl.u32 %v2291_v5, 16 }
  0x65   : > { %v1381_v39 = vsel %vm10461_vm13, %v1376_v25, %v1380_v60  ;;  %v2386_v40 = vrot.slane %v2384_v30, 5  ;;  %v2400_v41 = vshll.u32 %v2292_v3, 16  ;;  %v1004_v42 = vsel %vm10401_vm5, %v723_v17, %v1003_v13 }
  0x66   : > { %v9637_v44 = vcombine.low %v1371_v19, %v1381_v39  ;;  %v3389_v35 = vsel %vm10461_vm13, %v3384_v32, %v3388_v63  ;;  %v3394_v45 = vrot.slane %v3393_v37, 4  ;;  %v2392_v29 = vrot.slane %v2390_v34, 5  ;;  %1005 = vst [vmem:[#allocation2 + $0x38] sm:$0x1] %v1004_v42  ;;  %v3334_v39 = vld [vmem:[#allocation2 + $0x30] sm:$0xf] }
  0x67   : > { %v2387_v47 = vor.u32 %v2386_v40, %v2383_v27  ;;  %v2396_v10 = vrot.slane %v2394_v38, 4  ;;  %v2402_v48 = vrot.slane %v2400_v41, 5  ;;  %v2405_v52 = vshrl.u32 %v2293_v22, 16  ;;  %v10685_v40 = vld [vmem:[%s13409_s2] ss:$0 sm:$0xff] }
  0x68   : > { %1724 = vrot.lane.b32.xlu1 %v9637_v44, %s10284_s10  ;;  %v3399_v36 = vsel %vm10461_vm13, %v3394_v45, %v3398_v26  ;;  %v2408_v17 = vshll.u32 %v2293_v22, 16  ;;  %v2414_v55 = vshll.u32 %v2294_v31, 16  ;;  %v2418_v56 = vshrl.u32 %v2294_v31, 16  ;;  %v3335_v45 = vld [vmem:[#allocation2 + $0x34] sm:$0xf] }
  0x69   : > { %v9762_v58 = vcombine.low %v3389_v35, %v3399_v36  ;;  %v2388_v59 = vrot.slane %v2387_v47, 4  ;;  %v2397_v60 = vor.u32 %v2396_v10, %v2392_v29  ;;  %v2407_v61 = vrot.slane %v2405_v52, 4  ;;  %v522_v36 = vld [vmem:[#allocation2 + $0x44] sm:$0x1] }
  0x6a   : > { %v2410_v62 = vrot.slane %v2408_v17, 5  ;;  %v2416_v18 = vrot.slane %v2414_v55, 5  ;;  %v2420_v63 = vrot.slane %v2418_v56, 4  ;;  %v9716_v4 = vrot.slane %v2835_v43, 9  ;;  %v10114_v55 = vld [vmem:[#allocation2 + $0x30] sm:$0xff]  }
  0x6b   : > { %3808 = vrot.lane.b32.xlu0 %v9762_v58, %s10290_s20  ;;  %v2393_v5 = vsel %vm10461_vm13, %v2388_v59, %v2392_v29  ;;  %v2398_v12 = vrot.slane %v2397_v60, 4  ;;  %v2941_v6 = vrot.slane %v2836_v24, 5  ;;  %v2944_v0 = vrot.slane %v2837_v46, 5  ;;  %v3879_v59 = vld [vmem:[#allocation2 + $0x30] sm:$0xe] }
  0x6c   : > { %v2411_v3 = vor.u32 %v2410_v62, %v2407_v61  ;;  %v2421_v7 = vor.u32 %v2420_v63, %v2416_v18  ;;  %v9717_v13 = vrot.slane %v2838_v53, 9  ;;  %v2948_v16 = vrot.slane %v2839_v54, 5  ;;  %v1006_v53 = vld [vmem:[#allocation2 + $0x3c] sm:$0xf] }
  0x6d   : > { %v2403_v19 = vsel %vm10461_vm13, %v2398_v12, %v2402_v48  ;;  %v2295_v20 = vld [vmem:[#allocation2 + $0x38] sm:$0x1]  ;;  %v2942_v21 = vsel %vm10422_vm10, %v9716_v4, %v2941_v6  ;;  %v2943_v22 = vrot.slane %v2941_v6, 4  ;;  %v725_v26 = vshrl.u32 %v10606_v8, 16 }
  0x6e   : > { %v2840_v25 = vld [vmem:[#allocation2 + $0x38] sm:$0x1]  ;;  %v9700_v27 = vcombine.low %v2393_v5, %v2403_v19  ;;  %v2412_v30 = vrot.slane %v2411_v3, 4  ;;  %v2422_v31 = vrot.slane %v2421_v7, 4  ;;  %v2424_v32 = vshll.u32 %v2295_v20, 16 }
  0x6f   : > { %v2945_v37 = vsel %vm10422_vm10, %v2943_v22, %v2944_v0  ;;  %v2950_v34 = vrot.slane %v2948_v16, 4  ;;  %v2951_v38 = vrot.slane %v2840_v25, 5  ;;  %v10689_v41 = vadd.f32 %v10685_v40, %v10595_v51  ;;  %v3336_v51 = vld [vmem:[#allocation2 + $0x38] sm:$0x1]  ;;  %v1247_v0 = vld [vmem:[#allocation2 + $0x30] sm:$0xf] }
  0x70   : > { %2768 = vrot.lane.b32.xlu0 %v9700_v27, %s10289_s19  ;;  %v2417_v42 = vsel %vm10461_vm13, %v2412_v30, %v2416_v18  ;;  %v2426_v43 = vrot.slane %v2424_v32, 5  ;;  %v9732_v44 = vcombine.low %v2942_v21, %v2945_v37  ;;  %v727_v35 = vrot.slane %v725_v26, 7  ;;  %v3880_v18 = vld [vmem:[#allocation2 + $0x34] sm:$0xf]  ;;  %v3881_v6 = vld [vmem:[#allocation2 + $0x38] sm:$0x1] }
  0x71   : > { %v2949_v29 = vsel %vm10422_vm10, %v9717_v13, %v2948_v16  ;;  %v728_v24 = vshll.u32 %v10606_v8, 16  ;;  %v733_v46 = vshrl.u32 %v10608_v9, 16  ;;  %v736_v47 = vshll.u32 %v10608_v9, 16  ;;  %v1248_v19 = vld [vmem:[#allocation2 + $0x34] sm:$0xf] }
  0x72   : > { %v2427_v10 = vsel %vm10461_vm13, %v2422_v31, %v2426_v43  ;;  %v2952_v48 = vsel %vm10422_vm10, %v2950_v34, %v2951_v38  ;;  %v731_v52 = vrot.slane %v727_v35, 4  ;;  %v3425_v54 = vshrl.u32 %v3334_v39, 16  ;;  %v1249_v30 = vld [vmem:[#allocation2 + $0x38] sm:$0x1] }
  0x73   : > { %v9701_v17 = vcombine.low %v2417_v42, %v2427_v10  ;;  %v730_v56 = vor.u32 %v728_v24, %v727_v35  ;;  %v10703_v58 = vrot.slane %v733_v46, 7  ;;  %v3428_v8 = vshll.u32 %v3334_v39, 16 }
  0x74   : > { %3089 = vrot.lane.b32.xlu0 %v9732_v44, %s10287_s17  ;;  %v3427_v9 = vrot.slane %v3425_v54, 4  ;;  %v3434_v60 = vshll.u32 %v3335_v45, 16  ;;  %v3438_v61 = vshrl.u32 %v3335_v45, 16  ;;  %v3444_v62 = vshll.u32 %v3336_v51, 16  ;;  %v1795_v45 = vld [vmem:[#allocation2 + $0x30] sm:$0xe] }
  0x75   : > { %2770 = vrot.lane.b32.xlu1 %v9701_v17, %s10289_s19  ;;  %v9733_v63 = vcombine.low %v2949_v29, %v2952_v48  ;;  %v738_v4 = vor.u32 %v736_v47, %v10703_v58  ;;  %v1007_v5 = vsel %vm10482_vm14, %v730_v56, %v1006_v53  ;;  %v3430_v12 = vrot.slane %v3428_v8, 5  ;;  %v1796_v53 = vld [vmem:[#allocation2 + $0x34] sm:$0xf]  ;;  %v321_v54 = vld [vmem:[%s10429_s21 + $0x80] sm:$0xff] }
  0x76   : > { %1008 = vst [vmem:[#allocation2 + $0x3c] sm:$0xf] %v1007_v5  ;;  %v3436_v3 = vrot.slane %v3434_v60, 5  ;;  %v3440_v7 = vrot.slane %v3438_v61, 4  ;;  %v3446_v13 = vrot.slane %v3444_v62, 5  ;;  %v523_v16 = vsel %vm10410_vm7, 0, %v522_v36 }
  0x77   : > { %v739_v20 = vsel %vm10493_vm15, %v731_v52, %v738_v4  ;;  %v3431_v21 = vor.u32 %v3430_v12, %v3427_v9  ;;  %524 = vst [vmem:[#allocation2 + $0x44] sm:$0x1] %v523_v16  ;;  %v9780_v22 = vrot.slane %v3879_v59, 9  ;;  %v3985_v25 = vrot.slane %v3880_v18, 5  ;;  %v322_v62 = vld [vmem:[%s10429_s21 + $0x88] sm:$0xff] }
  0x78   : > { %3267 = vrot.lane.b32.xlu0 %v10114_v55, %s10286_s13  ;;  %1009 = vst.msk [vmem:[#allocation2 + $0x40] sm:$0xf] %vm447_vm0, %v739_v20  ;;  %v3441_v26 = vor.u32 %v3440_v7, %v3436_v3  ;;  %v3988_v27 = vrot.slane %v3881_v6, 5  ;;  %v1383_v31 = vshrl.u32 %v1247_v0, 16  ;;  %v1386_v32 = vshll.u32 %v1247_v0, 16 }
  0x79   : > { %3091 = vrot.lane.b32.xlu1 %v9733_v63, %s10287_s17  ;;  %v740_v37 = vrot.slane %v10703_v58, 4  ;;  %v3432_v34 = vrot.slane %v3431_v21, 4  ;;  %v3987_v38 = vrot.slane %v3985_v25, 4  ;;  %v1392_v39 = vshll.u32 %v1248_v19, 16 }
  0x7a   : > { %v3442_v42 = vrot.slane %v3441_v26, 4  ;;  %v1385_v43 = vrot.slane %v1383_v31, 4  ;;  %v1388_v44 = vrot.slane %v1386_v32, 5  ;;  %v1396_v35 = vshrl.u32 %v1248_v19, 16 }
  0x7b   : > { %v3437_v29 = vsel %vm10461_vm13, %v3432_v34, %v3436_v3  ;;  %v3986_v24 = vsel %vm10422_vm10, %v9780_v22, %v3985_v25  ;;  %v1394_v46 = vrot.slane %v1392_v39, 5  ;;  %v1402_v47 = vshll.u32 %v1249_v30, 16 }
  0x7c   : > { %v3447_v51 = vsel %vm10461_vm13, %v3442_v42, %v3446_v13  ;;  %v3989_v10 = vsel %vm10422_vm10, %v3987_v38, %v3988_v27  ;;  %v1389_v48 = vor.u32 %v1388_v44, %v1385_v43  ;;  %v1398_v52 = vrot.slane %v1396_v35, 4  ;;  %v323_v43 = vld [vmem:[%s10429_s21 + $0x90] sm:$0xff] }
  0x7d   : > { %v9764_v36 = vcombine.low %v3437_v29, %v3447_v51  ;;  %v3337_v17 = vld [vmem:[#allocation2 + $0x3c] sm:$0xf]  ;;  %v1404_v55 = vrot.slane %v1402_v47, 5  ;;  %v9654_v56 = vrot.slane %v1795_v45, 9  ;;  %v10729_v58 = vadd.f32 %v10685_v40, %v10598_v57  ;;  %v10738_v57 = vld [vmem:[%s13408_s1] ss:$0 sm:$0xff] }
  0x7e   : > { %v1010_v8 = vld [vmem:[#allocation2 + $0x44] sm:$0x1]  ;;  %v3449_v59 = vshrl.u32 %v3337_v17, 16  ;;  %v3452_v9 = vshll.u32 %v3337_v17, 16  ;;  %v1390_v60 = vrot.slane %v1389_v48, 4  ;;  %v1399_v61 = vor.u32 %v1398_v52, %v1394_v46  ;;  %v324_v47 = vld [vmem:[%s10429_s21 + $0x98] sm:$0xff] }
  0x7f   : > { %v10115_v18 = vld [vmem:[#allocation2 + $0x3c] sm:$0xff]   ;;  %3812 = vrot.lane.b32.xlu0 %v9764_v36, %s10290_s20  ;;  %v1011_v63 = vsel %vm10401_vm5, %v740_v37, %v1010_v8  ;;  %v9796_v5 = vcombine.low %v3986_v24, %v3989_v10  ;;  %v1912_v12 = vrot.slane %v1796_v53, 5  ;;  %v10741_v6 = vmul.f32 %v10738_v57, %v321_v54  ;;  %v1797_v29 = vld [vmem:[#allocation2 + $0x38] sm:$0x1] }
  0x80   : > { %v3338_v4 = vld [vmem:[#allocation2 + $0x40] sm:$0xf]  ;;  %1012 = vst [vmem:[#allocation2 + $0x44] sm:$0x1] %v1011_v63  ;;  %v3451_v0 = vrot.slane %v3449_v59, 4  ;;  %v3454_v3 = vrot.slane %v3452_v9, 5  ;;  %3269 = vrot.lane.b32.xlu1 %v10115_v18, %s10286_s13  ;;  %v1395_v19 = vsel %vm10461_vm13, %v1390_v60, %v1394_v46  ;;  %v10747_v26 = vmul.f32 %v10738_v57, %v322_v62 }
  0x81   : > { %v3458_v7 = vshll.u32 %v3338_v4, 16  ;;  %v3462_v13 = vshrl.u32 %v3338_v4, 16  ;;  %v3882_v16 = vld [vmem:[#allocation2 + $0x3c] sm:$0xe]  ;;  %v1400_v20 = vrot.slane %v1399_v61, 4  ;;  %v10757_v24 = vsel %vm10422_vm10, %v9654_v56, %v1912_v12 }
  0x82   : > { %v3883_v21 = vld [vmem:[#allocation2 + $0x40] sm:$0xf]  ;;  %v9781_v22 = vrot.slane %v3882_v16, 9  ;;  %v1250_v25 = vld [vmem:[#allocation2 + $0x3c] sm:$0xf]  ;;  %v3455_v27 = vor.u32 %v3454_v3, %v3451_v0  ;;  %v1914_v17 = vrot.slane %v1912_v12, 4  ;;  %v10765_v61 = vmul.f32 %v10738_v57, %v323_v43 }
  0x83   : > { %v3460_v30 = vrot.slane %v3458_v7, 5  ;;  %v3464_v31 = vrot.slane %v3462_v13, 4  ;;  %v3992_v32 = vrot.slane %v3883_v21, 5  ;;  %v1251_v37 = vld [vmem:[#allocation2 + $0x40] sm:$0xf]  ;;  %4133 = vrot.lane.b32.xlu0 %v9796_v5, %s10288_s18  ;;  %v1405_v34 = vsel %vm10461_vm13, %v1400_v20, %v1404_v55 }
  0x84   : > { %v1407_v38 = vshrl.u32 %v1250_v25, 16  ;;  %v1410_v39 = vshll.u32 %v1250_v25, 16  ;;  %v1416_v42 = vshll.u32 %v1251_v37, 16  ;;  %v3456_v44 = vrot.slane %v3455_v27, 4  ;;  %v1798_v46 = vld [vmem:[#allocation2 + $0x3c] sm:$0xe] }
  0x85   : > { %v3465_v35 = vor.u32 %v3464_v31, %v3460_v30  ;;  %v10753_v45 = vcombine.low %v1395_v19, %v1405_v34  ;;  %v3993_v51 = vsel %vm10422_vm10, %v9781_v22, %v3992_v32  ;;  %v3994_v10 = vrot.slane %v3992_v32, 4  ;;  %v1799_v55 = vld [vmem:[#allocation2 + $0x40] sm:$0xf]  ;;  %v475_v31 = vld [vmem:[#allocation2 + $0x48] sm:$0x1] }
  0x86   : > { %v1409_v48 = vrot.slane %v1407_v38, 4  ;;  %v1412_v52 = vrot.slane %v1410_v39, 5  ;;  %v1418_v54 = vrot.slane %v1416_v42, 5  ;;  %v1420_v36 = vshrl.u32 %v1251_v37, 16  ;;  %v2296_v32 = vld [vmem:[#allocation2 + $0x3c] sm:$0xf] }
  0x87   : > { %v3466_v53 = vrot.slane %v3465_v35, 4  ;;  %v3339_v8 = vld [vmem:[#allocation2 + $0x44] sm:$0x1]  ;;  %v3461_v59 = vsel %vm10461_vm13, %v3456_v44, %v3460_v30  ;;  %v10768_v62 = vmul.f32 %v10738_v57, %v324_v47  ;;  %v1915_v12 = vrot.slane %v1797_v29, 5  ;;  %v2297_v29 = vld [vmem:[#allocation2 + $0x40] sm:$0xf] }
  0x88   : > { %v3884_v9 = vld [vmem:[#allocation2 + $0x44] sm:$0x1]  ;;  %v1413_v60 = vor.u32 %v1412_v52, %v1409_v48  ;;  %v3468_v18 = vshll.u32 %v3339_v8, 16  ;;  %v1422_v4 = vrot.slane %v1420_v36, 4  ;;  %v9655_v3 = vrot.slane %v1798_v46, 9  ;;  %v10116_v36 = vld [vmem:[#allocation2 + $0x3c] sm:$0xff]  }
  0x89   : > { %v1252_v56 = vld [vmem:[#allocation2 + $0x44] sm:$0x1]  ;;  %v3995_v63 = vrot.slane %v3884_v9, 5  ;;  %v1919_v7 = vrot.slane %v1799_v55, 5  ;;  %v1916_v27 = vsel %vm10422_vm10, %v1914_v17, %v1915_v12  ;;  %v425_v44 = vmax.f32 %v10562_v14, 0.0 }
  0x8a   : > { %v1426_v5 = vshll.u32 %v1252_v56, 16  ;;  %v1414_v0 = vrot.slane %v1413_v60, 4  ;;  %v3470_v13 = vrot.slane %v3468_v18, 5  ;;  %v1423_v19 = vor.u32 %v1422_v4, %v1418_v54  ;;  %v1800_v21 = vld [vmem:[#allocation2 + $0x44] sm:$0x1] }
  0x8b   : > { %v3996_v16 = vsel %vm10422_vm10, %v3994_v10, %v3995_v63  ;;  %v10778_v30 = vsel %vm10422_vm10, %v9655_v3, %v1919_v7  ;;  %v9670_v38 = vcombine.low %v10757_v24, %v1916_v27  ;;  %v1921_v39 = vrot.slane %v1919_v7, 4  ;;  %v2842_v63 = vld [vmem:[#allocation2 + $0x40] sm:$0xf] }
  0x8c   : > { %v1428_v20 = vrot.slane %v1426_v5, 5  ;;  %v9797_v22 = vcombine.low %v3993_v51, %v3996_v16  ;;  %v1419_v25 = vsel %vm10461_vm13, %v1414_v0, %v1418_v54  ;;  %v3471_v37 = vsel %vm10461_vm13, %v3466_v53, %v3470_v13  ;;  %v525_v53 = vld [vmem:[#allocation2 + $0x50] sm:$0x1]  ;;  %v2843_v16 = vld [vmem:[#allocation2 + $0x44] sm:$0x1] }
  0x8d   : > { %v1424_v34 = vrot.slane %v1423_v19, 4  ;;  %v9765_v42 = vcombine.low %v3461_v59, %v3471_v37  ;;  %v1922_v43 = vrot.slane %v1800_v21, 5  ;;  %v426_v35 = vmax.f32 %v10565_v15, 0.0  ;;  %v2298_v15 = vld [vmem:[#allocation2 + $0x44] sm:$0x1] }
  0x8e   : > { %4135 = vrot.lane.b32.xlu0 %v9797_v22, %s10288_s18  ;;  %v476_v47 = vsel %vm10401_vm5, 0, %v475_v31  ;;  %v2429_v51 = vshrl.u32 %v2296_v32, 16  ;;  %v2432_v10 = vshll.u32 %v2296_v32, 16  ;;  %v9912_v14 = vpack.c.bf16 %v425_v44, %v425_v44  ;;  %v2841_v59 = vld [vmem:[#allocation2 + $0x3c] sm:$0xe]  ;;  %v10131_v27 = vld [vmem:[%s13410_s3] sm:$0xff]  }
  0x8f   : > { %v1429_v46 = vsel %vm10461_vm13, %v1424_v34, %v1428_v20  ;;  %3814 = vrot.lane.b32.xlu1 %v9765_v42, %s10290_s20  ;;  %v10793_v48 = vsel %vm10422_vm10, %v1921_v39, %v1922_v43  ;;  %477 = vst [vmem:[#allocation2 + $0x48] sm:$0x1] %v476_v47  ;;  %v9913_v52 = vpack.c.bf16 %v426_v35, %v426_v35  ;;  %v2438_v8 = vshll.u32 %v2297_v29, 16  ;;  %v478_v34 = vld [vmem:[#allocation2 + $0x54] sm:$0x1] }
  0x90   : > { %v9639_v24 = vcombine.low %v1419_v25, %v1429_v46  ;;  %v9671_v54 = vcombine.low %v10778_v30, %v10793_v48  ;;  %v2431_v17 = vrot.slane %v2429_v51, 4  ;;  %v2434_v55 = vrot.slane %v2432_v10, 5  ;;  %9968 = vmatprep.subr.bf16.mxu0 %v10131_v27  ;;  %10034 = vmatprep.subr.bf16.mxu1 %v10131_v27  ;;  %v481_v10 = vld [vmem:[#allocation2 + $0x60] sm:$0x1] }
  0x91   : > { %v742_v9 = vshrl.u32 %v9912_v14, 16  ;;  %v745_v56 = vshll.u32 %v9912_v14, 16  ;;  %v750_v60 = vshrl.u32 %v9913_v52, 16  ;;  %v753_v18 = vshll.u32 %v9913_v52, 16  ;;  %9969 = vmatpush3.bf16.msra.mxu0 %v10131_v27  ;;  %10037 = vmatpush3.bf16.msra.mxu1 %v10131_v27 }
  0x92   : > { %2050 = vrot.lane.b32.xlu0 %v9670_v38, %s10283_s26  ;;  %v2435_v4 = vor.u32 %v2434_v55, %v2431_v17  ;;  %v2440_v5 = vrot.slane %v2438_v8, 5  ;;  %v2442_v0 = vshrl.u32 %v2297_v29, 16  ;;  %v2448_v12 = vshll.u32 %v2298_v15, 16  ;;  %v528_v38 = vld [vmem:[#allocation2 + $0x5c] sm:$0x1] }
  0x93   : > { %1726 = vrot.lane.b32.xlu1 %v10753_v45, %s10284_s10  ;;  %v744_v3 = vrot.slane %v742_v9, 7  ;;  %v752_v7 = vrot.slane %v750_v60, 7  ;;  %v526_v13 = vsel %vm10410_vm7, 0, %v525_v53  ;;  %v9718_v19 = vrot.slane %v2841_v59, 9  ;;  %v531_v9 = vld [vmem:[#allocation2 + $0x68] sm:$0x1] }
  0x94   : > { %v2436_v20 = vrot.slane %v2435_v4, 4  ;;  %v2444_v21 = vrot.slane %v2442_v0, 4  ;;  %v2450_v22 = vrot.slane %v2448_v12, 5  ;;  %527 = vst [vmem:[#allocation2 + $0x50] sm:$0x1] %v526_v13  ;;  %v2955_v25 = vrot.slane %v2842_v63, 5 }
  0x95   : > { %v747_v31 = vor.u32 %v745_v56, %v744_v3  ;;  %v748_v45 = vrot.slane %v744_v3, 4  ;;  %v755_v32 = vor.u32 %v753_v18, %v752_v7  ;;  %v757_v37 = vrot.slane %v752_v7, 4  ;;  %v10122_v56 = vld [vmem:[#allocation2] sm:$0xff]   ;;  %v10127_v4 = vld [vmem:[#allocation2 + $0xc] sm:$0xff]  }
  0x96   : > { %2227 = vrot.lane.b32.xlu0 %v10116_v36, %s10285_s12  ;;  %v1013_v39 = vld [vmem:[#allocation2 + $0x48] sm:$0xf]  ;;  %v2441_v42 = vsel %vm10461_vm13, %v2436_v20, %v2440_v5  ;;  %v2445_v43 = vor.u32 %v2444_v21, %v2440_v5  ;;  %v10810_v44 = vsel %vm10422_vm10, %v9718_v19, %v2955_v25  ;;  %v2957_v35 = vrot.slane %v2955_v25, 4  ;;  %v10130_v5 = vld [vmem:[#allocation2 + $0x18] sm:$0xff]  }
  0x97   : > { %1728 = vrot.lane.b32.xlu1 %v9639_v24, %s10284_s10  ;;  %v756_v29 = vsel %vm10493_vm15, %v748_v45, %v755_v32  ;;  %v1014_v46 = vsel %vm10482_vm14, %v747_v31, %v1013_v39  ;;  %v2958_v47 = vrot.slane %v2843_v16, 5  ;;  %v427_v51 = vmax.f32 %v10581_v33, 0.0  ;;  %v10132_v13 = vld [vmem:[#allocation2 + $0x24] sm:$0xff]  }
  0x98   : > { %1015 = vst [vmem:[#allocation2 + $0x48] sm:$0xf] %v1014_v46  ;;  %1016 = vst.msk [vmem:[#allocation2 + $0x4c] sm:$0xf] %vm447_vm0, %v756_v29  ;;  %v2446_v14 = vrot.slane %v2445_v43, 4  ;;  %v428_v52 = vmax.f32 %v10592_v49, 0.0  ;;  %v10858_v31 = vadd.f32 %v10685_v40, %v10741_v6  ;;  %v10871_v6 = vadd.f32 %v10685_v40, %v10765_v61 }
  0x99   : > { %v479_v24 = vsel %vm10401_vm5, 0, %v478_v34  ;;  %v529_v15 = vsel %vm10410_vm7, 0, %v528_v38  ;;  %v2959_v53 = vsel %vm10422_vm10, %v2957_v35, %v2958_v47  ;;  %v9914_v33 = vpack.c.bf16 %v427_v51, %v427_v51  ;;  %v10133_v19 = vld [vmem:[%s13410_s3 + $0x8] sm:$0xff]   ;;  %v325_v45 = vld [vmem:[%s10429_s21 + $0xa0] sm:$0xff]  ;;  %v10875_v47 = vpop.permute.xlu1 %2042 }
  0x9a   : > { %480 = vst [vmem:[#allocation2 + $0x54] sm:$0x1] %v479_v24  ;;  %530 = vst [vmem:[#allocation2 + $0x5c] sm:$0x1] %v529_v15  ;;  %v429_v36 = vmax.f32 %v10689_v41, 0.0  ;;  %v430_v17 = vmax.f32 %v10729_v58, 0.0  ;;  %v2451_v49 = vsel %vm10461_vm13, %v2446_v14, %v2450_v22  ;;  %v9734_v55 = vcombine.low %v10810_v44, %v2959_v53  ;;  %9970 = vmatprep.subr.bf16.mxu0 %v10133_v19 }
  0x9b   : > { %v9915_v8 = vpack.c.bf16 %v428_v52, %v428_v52  ;;  %v482_v59 = vsel %vm10401_vm5, 0, %v481_v10  ;;  %2052 = vrot.lane.b32.xlu1 %v9671_v54, %s10283_s26  ;;  %v9702_v60 = vcombine.low %v2441_v42, %v2451_v49  ;;  %v1017_v41 = vld [vmem:[#allocation2 + $0x50] sm:$0x1]  ;;  %v759_v18 = vshrl.u32 %v9914_v33, 16  ;;  %10035 = vmatprep.subr.bf16.mxu1 %v10133_v19 }
  0x9c   : > { %v762_v58 = vshll.u32 %v9914_v33, 16  ;;  %483 = vst [vmem:[#allocation2 + $0x60] sm:$0x1] %v482_v59  ;;  %v10837_v63 = vpack.c.bf16 %v429_v36, %v429_v36  ;;  %v1018_v0 = vsel %vm10401_vm5, %v757_v37, %v1017_v41  ;;  %v10841_v7 = vpack.c.bf16 %v430_v17, %v430_v17  ;;  %9971 = vmatpush3.bf16.msra.mxu0 %v10133_v19  ;;  %v10884_v33 = vpop.permute.xlu0 %1718  ;;  %v326_v36 = vld [vmem:[%s10429_s21 + $0xa8] sm:$0xff] }
  0x9d   : > { %v767_v12 = vshrl.u32 %v9915_v8, 16  ;;  %v770_v3 = vshll.u32 %v9915_v8, 16  ;;  %2772 = vrot.lane.b32.xlu0 %v9702_v60, %s10289_s19  ;;  %1019 = vst [vmem:[#allocation2 + $0x50] sm:$0x1] %v1018_v0  ;;  %v761_v30 = vrot.slane %v759_v18, 7  ;;  %v532_v16 = vsel %vm10410_vm7, 0, %v531_v9  ;;  %10038 = vmatpush3.bf16.msra.mxu1 %v10133_v19 }
  0x9e   : > { %v776_v48 = vshrl.u32 %v10837_v63, 16  ;;  %v779_v54 = vshll.u32 %v10837_v63, 16  ;;  %v784_v21 = vshrl.u32 %v10841_v7, 16  ;;  %v787_v22 = vshll.u32 %v10841_v7, 16  ;;  %533 = vst [vmem:[#allocation2 + $0x68] sm:$0x1] %v532_v16 }
  0x9f   : > { %v10851_v20 = vrot.slane %v767_v12, 7  ;;  %vm13419_vm1 = vcmask 31744   ;;  %v10117_v25 = vld [vmem:[#allocation2 + $0x48] sm:$0xff]   ;;  %v765_v27 = vrot.slane %v761_v30, 4  ;;  %v764_v38 = vor.u32 %v762_v58, %v761_v30 }
  0xa0   : > { %1219 = vst.msk [vmem:[#allocation3] sm:$0xff] %vm13419_vm1, %v10122_v56  ;;  %1220 = vst.msk [vmem:[#allocation3 + $0x8] sm:$0xff] %vm13419_vm1, %v10127_v4  ;;  %v2299_v32 = vld [vmem:[#allocation2 + $0x48] sm:$0xf]  ;;  %v2300_v37 = vld [vmem:[#allocation2 + $0x4c] sm:$0xf]  ;;  %v10867_v42 = vadd.f32 %v10685_v40, %v10747_v26  ;;  %2229 = vrot.lane.b32.xlu1 %v10117_v25, %s10285_s12  ;;  %v10881_v61 = vadd.f32 %v10685_v40, %v10768_v62  ;;  %v10893_v59 = vmul.f32 %v10738_v57, %v325_v45 }
  0xa1   : > { %1221 = vst.msk [vmem:[#allocation3 + $0x10] sm:$0xff] %vm13419_vm1, %v10130_v5  ;;  %1222 = vst.msk [vmem:[#allocation3 + $0x18] sm:$0xff] %vm13419_vm1, %v10132_v13  ;;  %v2844_v34 = vld [vmem:[#allocation2 + $0x48] sm:$0xe]  ;;  %v772_v39 = vor.u32 %v770_v3, %v10851_v20  ;;  %v2453_v43 = vshrl.u32 %v2299_v32, 16  ;;  %v2456_v44 = vshll.u32 %v2299_v32, 16  ;;  %3093 = vrot.lane.b32.xlu0 %v9734_v55, %s10287_s17  ;;  %v10899_v13 = vmul.f32 %v10738_v57, %v326_v36 }
  0xa2   : > { %v2462_v35 = vshll.u32 %v2300_v37, 16  ;;  %v2466_v29 = vshrl.u32 %v2300_v37, 16  ;;  %v2845_v46 = vld [vmem:[#allocation2 + $0x4c] sm:$0xf]  ;;  %v9719_v51 = vrot.slane %v2844_v34, 9  ;;  %v774_v62 = vrot.slane %v10851_v20, 4 }
  0xa3   : > { %v2962_v26 = vrot.slane %v2845_v46, 5  ;;  %v773_v10 = vsel %vm10493_vm15, %v765_v27, %v772_v39  ;;  %v2455_v14 = vrot.slane %v2453_v43, 4  ;;  %v2458_v52 = vrot.slane %v2456_v44, 5  ;;  %v10118_v53 = vld [vmem:[#allocation2 + $0x48] sm:$0xff]   ;;  %v1020_v18 = vld [vmem:[#allocation2 + $0x54] sm:$0xf] }
  0xa4   : > { %v2464_v24 = vrot.slane %v2462_v35, 5  ;;  %v2468_v15 = vrot.slane %v2466_v29, 4  ;;  %1023 = vst.msk [vmem:[#allocation2 + $0x58] sm:$0xf] %vm447_vm0, %v773_v10  ;;  %v2301_v17 = vld [vmem:[#allocation2 + $0x50] sm:$0x1]  ;;  %v1021_v4 = vsel %vm10482_vm14, %v764_v38, %v1020_v18 }
  0xa5   : > { %v2846_v49 = vld [vmem:[#allocation2 + $0x50] sm:$0x1]  ;;  %v10889_v55 = vsel %vm10422_vm10, %v9719_v51, %v2962_v26  ;;  %v2964_v8 = vrot.slane %v2962_v26, 4  ;;  %v2459_v9 = vor.u32 %v2458_v52, %v2455_v14  ;;  %v2472_v60 = vshll.u32 %v2301_v17, 16  ;;  %3271 = vrot.lane.b32.xlu0 %v10118_v53, %s10286_s13  ;;  %v3340_v58 = vld [vmem:[#allocation2 + $0x48] sm:$0xf]  ;;  %v10903_v27 = vpop.permute.xlu1 %2221 }
  0xa6   : > { %v2469_v56 = vor.u32 %v2468_v15, %v2464_v24  ;;  %v2965_v41 = vrot.slane %v2846_v49, 5  ;;  %v3341_v5 = vld [vmem:[#allocation2 + $0x4c] sm:$0xf]  ;;  %v3342_v0 = vld [vmem:[#allocation2 + $0x50] sm:$0x1]  ;;  %v3473_v12 = vshrl.u32 %v3340_v58, 16 }
  0xa7   : > { %v3476_v3 = vshll.u32 %v3340_v58, 16  ;;  %v2460_v30 = vrot.slane %v2459_v9, 4  ;;  %v2474_v19 = vrot.slane %v2472_v60, 5  ;;  %1022 = vst [vmem:[#allocation2 + $0x54] sm:$0xf] %v1021_v4  ;;  %v3482_v34 = vshll.u32 %v3341_v5, 16 }
  0xa8   : > { %v2470_v16 = vrot.slane %v2469_v56, 4  ;;  %v2966_v20 = vsel %vm10422_vm10, %v2964_v8, %v2965_v41  ;;  %v1024_v25 = vld [vmem:[#allocation2 + $0x5c] sm:$0x1]  ;;  %v3475_v32 = vrot.slane %v3473_v12, 4  ;;  %v3885_v38 = vld [vmem:[#allocation2 + $0x48] sm:$0xe] }
  0xa9   : > { %v9735_v45 = vcombine.low %v10889_v55, %v2966_v20  ;;  %v3478_v37 = vrot.slane %v3476_v3, 5  ;;  %v2465_v39 = vsel %vm10461_vm13, %v2460_v30, %v2464_v24  ;;  %v3486_v44 = vshrl.u32 %v3341_v5, 16  ;;  %v3886_v29 = vld [vmem:[#allocation2 + $0x4c] sm:$0xf]  ;;  %v3887_v46 = vld [vmem:[#allocation2 + $0x50] sm:$0x1]  ;;  %v10910_v51 = vpop.permute.xlu0 %2219 }
  0xaa   : > { %v2475_v43 = vsel %vm10461_vm13, %v2470_v16, %v2474_v19  ;;  %v3492_v35 = vshll.u32 %v3342_v0, 16  ;;  %v3484_v14 = vrot.slane %v3482_v34, 5  ;;  %v1025_v52 = vsel %vm10401_vm5, %v774_v62, %v1024_v25  ;;  %v327_v53 = vld [vmem:[%s10429_s21 + $0xb0] sm:$0xff]  ;;  %v1253_v55 = vld [vmem:[#allocation2 + $0x48] sm:$0xf] }
  0xab   : > { %v9703_v26 = vcombine.low %v2465_v39, %v2475_v43  ;;  %v3479_v10 = vor.u32 %v3478_v37, %v3475_v32  ;;  %v3344_v15 = vld [vmem:[#allocation2 + $0x58] sm:$0xf]  ;;  %v3488_v36 = vrot.slane %v3486_v44, 4  ;;  %1026 = vst [vmem:[#allocation2 + $0x5c] sm:$0x1] %v1025_v52  ;;  %v9782_v9 = vrot.slane %v3885_v38, 9 }
  0xac   : > { %v3494_v17 = vrot.slane %v3492_v35, 5  ;;  %v3506_v24 = vshll.u32 %v3344_v15, 16  ;;  %v3510_v49 = vshrl.u32 %v3344_v15, 16  ;;  %v3999_v56 = vrot.slane %v3886_v29, 5  ;;  %v1254_v4 = vld [vmem:[#allocation2 + $0x4c] sm:$0xf]  ;;  %v10918_v5 = vpop.permute.xlu1 %3265 }
  0xad   : > { %2774 = vrot.lane.b32.xlu1 %v9703_v26, %s10289_s19  ;;  %v3480_v8 = vrot.slane %v3479_v10, 4  ;;  %v4002_v60 = vrot.slane %v3887_v46, 5  ;;  %v3489_v41 = vor.u32 %v3488_v36, %v3484_v14  ;;  %v1431_v62 = vshrl.u32 %v1253_v55, 16  ;;  %v10920_v0 = vpop.permute.xlu0 %3263  ;;  %v1255_v34 = vld [vmem:[#allocation2 + $0x50] sm:$0x1] }
  0xae   : > { %v10916_v18 = vrot.slane %v3506_v24, 5  ;;  %v3512_v58 = vrot.slane %v3510_v49, 4  ;;  %v3343_v3 = vld [vmem:[#allocation2 + $0x54] sm:$0xf]  ;;  %v4000_v30 = vsel %vm10422_vm10, %v9782_v9, %v3999_v56  ;;  %v4001_v16 = vrot.slane %v3999_v56, 4 }
  0xaf   : > { %v3485_v12 = vsel %vm10461_vm13, %v3480_v8, %v3484_v14  ;;  %v10927_v19 = vmul.f32 %v10738_v57, %v327_v53  ;;  %v3490_v20 = vrot.slane %v3489_v41, 4  ;;  %v3497_v25 = vshrl.u32 %v3343_v3, 16  ;;  %v10119_v38 = vld [vmem:[#allocation2 + $0x54] sm:$0xff]  }
  0xb0   : > { %v3500_v32 = vshll.u32 %v3343_v3, 16  ;;  %v3513_v37 = vor.u32 %v3512_v58, %v10916_v18  ;;  %v4003_v39 = vsel %vm10422_vm10, %v4001_v16, %v4002_v60  ;;  %v1433_v43 = vrot.slane %v1431_v62, 4  ;;  %v3888_v29 = vld [vmem:[#allocation2 + $0x54] sm:$0xe]  ;;  %v3889_v52 = vld [vmem:[#allocation2 + $0x58] sm:$0xf] }
  0xb1   : > { %3095 = vrot.lane.b32.xlu1 %v9735_v45, %s10287_s17  ;;  %v1434_v44 = vshll.u32 %v1253_v55, 16  ;;  %v1440_v35 = vshll.u32 %v1254_v4, 16  ;;  %v3495_v46 = vsel %vm10461_vm13, %v3490_v20, %v3494_v17  ;;  %v3499_v26 = vrot.slane %v3497_v25, 4  ;;  %v10935_v15 = vpop.permute.xlu0 %2223  ;;  %v1256_v41 = vld [vmem:[#allocation2 + $0x54] sm:$0xf] }
  0xb2   : > { %v3502_v10 = vrot.slane %v3500_v32, 5  ;;  %v3514_v14 = vrot.slane %v3513_v37, 4  ;;  %v9766_v53 = vcombine.low %v3485_v12, %v3495_v46  ;;  %v3345_v36 = vld [vmem:[#allocation2 + $0x5c] sm:$0x1]  ;;  %v9798_v45 = vcombine.low %v4000_v30, %v4003_v39  ;;  %v1257_v16 = vld [vmem:[#allocation2 + $0x58] sm:$0xf] }
  0xb3   : > { %v1436_v24 = vrot.slane %v1434_v44, 5  ;;  %v1442_v49 = vrot.slane %v1440_v35, 5  ;;  %v3890_v8 = vld [vmem:[#allocation2 + $0x5c] sm:$0x1]  ;;  %v3516_v56 = vshll.u32 %v3345_v36, 16  ;;  %v1444_v55 = vshrl.u32 %v1254_v4, 16  ;;  %v10937_v58 = vpop.permute.xlu1 %2225 }
  0xb4   : > { %v3503_v9 = vor.u32 %v3502_v10, %v3499_v26  ;;  %v1450_v60 = vshll.u32 %v1255_v34, 16  ;;  %3816 = vrot.lane.b32.xlu0 %v9766_v53, %s10290_s20  ;;  %v9783_v62 = vrot.slane %v3888_v29, 9  ;;  %v4006_v3 = vrot.slane %v3889_v52, 5  ;;  %v1258_v37 = vld [vmem:[#allocation2 + $0x5c] sm:$0x1] }
  0xb5   : > { %3273 = vrot.lane.b32.xlu1 %v10119_v38, %s10286_s13  ;;  %v1437_v17 = vor.u32 %v1436_v24, %v1433_v43  ;;  %v4009_v12 = vrot.slane %v3890_v8, 5  ;;  %v3518_v20 = vrot.slane %v3516_v56, 5  ;;  %v1446_v25 = vrot.slane %v1444_v55, 4  ;;  %v10941_v39 = vpop.permute.xlu0 %3085  ;;  %v1801_v35 = vld [vmem:[#allocation2 + $0x48] sm:$0xe] }
  0xb6   : > { %v3504_v30 = vrot.slane %v3503_v9, 4  ;;  %v1452_v32 = vrot.slane %v1450_v60, 5  ;;  %v4007_v34 = vsel %vm10422_vm10, %v9783_v62, %v4006_v3  ;;  %v4008_v44 = vrot.slane %v4006_v3, 4  ;;  %v1802_v10 = vld [vmem:[#allocation2 + $0x4c] sm:$0xf] }
  0xb7   : > { %v1438_v4 = vrot.slane %v1437_v17, 4  ;;  %v1455_v38 = vshrl.u32 %v1256_v41, 16  ;;  %v3519_v29 = vsel %vm10461_vm13, %v3514_v14, %v3518_v20  ;;  %v1447_v46 = vor.u32 %v1446_v25, %v1442_v49  ;;  %v1803_v52 = vld [vmem:[#allocation2 + $0x50] sm:$0x1]  ;;  %v10950_v53 = vpop.permute.xlu1 %2044  ;;  %v1805_v56 = vld [vmem:[#allocation2 + $0x58] sm:$0xf] }
  0xb8   : > { %v3509_v43 = vsel %vm10461_vm13, %v3504_v30, %v10916_v18  ;;  %v1458_v26 = vshll.u32 %v1256_v41, 16  ;;  %4137 = vrot.lane.b32.xlu0 %v9798_v45, %s10288_s18  ;;  %v4010_v8 = vsel %vm10422_vm10, %v4008_v44, %v4009_v12  ;;  %v1804_v18 = vld [vmem:[#allocation2 + $0x54] sm:$0xe]  ;;  %v1464_v41 = vshll.u32 %v1257_v16, 16  ;;  %v1806_v12 = vld [vmem:[#allocation2 + $0x5c] sm:$0x1] }
  0xb9   : > { %v9767_v36 = vcombine.low %v3509_v43, %v3519_v29  ;;  %v1443_v24 = vsel %vm10461_vm13, %v1438_v4, %v1442_v49  ;;  %v1457_v9 = vrot.slane %v1455_v38, 4  ;;  %v1448_v55 = vrot.slane %v1447_v46, 4 }
  0xba   : > { %v9799_v14 = vcombine.low %v4007_v34, %v4010_v8  ;;  %v1460_v60 = vrot.slane %v1458_v26, 5  ;;  %v1468_v17 = vshrl.u32 %v1257_v16, 16  ;;  %v1474_v62 = vshll.u32 %v1258_v37, 16 }
  0xbb   : > { %3818 = vrot.lane.b32.xlu1 %v9767_v36, %s10290_s20  ;;  %v9656_v3 = vrot.slane %v1801_v35, 9  ;;  %v1926_v30 = vrot.slane %v1802_v10, 5  ;;  %v1453_v45 = vsel %vm10461_vm13, %v1448_v55, %v1452_v32  ;;  %v1466_v20 = vrot.slane %v1464_v41, 5  ;;  %v10960_v4 = vpop.permute.xlu0 %4129  ;;  %v2302_v36 = vld [vmem:[#allocation2 + $0x54] sm:$0xf] }
  0xbc   : > { %v1461_v49 = vor.u32 %v1460_v60, %v1457_v9  ;;  %v1929_v25 = vrot.slane %v1803_v52, 5  ;;  %v10962_v44 = vpop.permute.xlu1 %3087  ;;  %v9640_v34 = vcombine.low %v1443_v24, %v1453_v45  ;;  %4139 = vrot.lane.b32.xlu0 %v9799_v14, %s10288_s18  ;;  %v1470_v38 = vrot.slane %v1468_v17, 4  ;;  %v10137_v14 = vld [vmem:[#allocation2 + $0x30] sm:$0xff]   ;;  %v2303_v17 = vld [vmem:[#allocation2 + $0x58] sm:$0xf] }
  0xbd   : > { %v1476_v43 = vrot.slane %v1474_v62, 5  ;;  %v1927_v16 = vsel %vm10422_vm10, %v9656_v3, %v1926_v30  ;;  %v1928_v35 = vrot.slane %v1926_v30, 4  ;;  %v9657_v29 = vrot.slane %v1804_v18, 9  ;;  %v1027_v18 = vld [vmem:[#allocation2 + $0x60] sm:$0xf]  ;;  %1223 = vst.msk [vmem:[#allocation3 + $0x20] sm:$0xff] %vm13419_vm1, %v10137_v14 }
  0xbe   : > { %v1462_v37 = vrot.slane %v1461_v49, 4  ;;  %v1933_v32 = vrot.slane %v1805_v56, 5  ;;  %v1471_v46 = vor.u32 %v1470_v38, %v1466_v20  ;;  %v1936_v26 = vrot.slane %v1806_v12, 5  ;;  %v2304_v49 = vld [vmem:[#allocation2 + $0x5c] sm:$0x1] }
  0xbf   : > { %1730 = vrot.lane.b32.xlu1 %v9640_v34, %s10284_s10  ;;  %v778_v10 = vrot.slane %v776_v48, 7  ;;  %v786_v52 = vrot.slane %v784_v21, 7  ;;  %v1930_v8 = vsel %vm10422_vm10, %v1928_v35, %v1929_v25  ;;  %v10980_v55 = vadd.f32 %v10685_v40, %v10893_v59  ;;  %v10984_v62 = vpop.permute.xlu0 %4131  ;;  %v1031_v59 = vld [vmem:[#allocation2 + $0x68] sm:$0x1]  ;;  %v2848_v12 = vld [vmem:[#allocation2 + $0x58] sm:$0xf] }
  0xc0   : > { %v1467_v24 = vsel %vm10461_vm13, %v1462_v37, %v1466_v20  ;;  %v1935_v9 = vrot.slane %v1933_v32, 4  ;;  %v10976_v56 = vpop.permute.xlu1 %2048  ;;  %v1472_v48 = vrot.slane %v1471_v46, 4  ;;  %v9672_v60 = vcombine.low %v1927_v16, %v1930_v8  ;;  %v10120_v20 = vld [vmem:[#allocation2 + $0x54] sm:$0xff]   ;;  %v484_v35 = vld [vmem:[#allocation2 + $0x6c] sm:$0x1] }
  0xc1   : > { %v781_v21 = vor.u32 %v779_v54, %v778_v10  ;;  %v782_v41 = vrot.slane %v778_v10, 4  ;;  %v1934_v3 = vsel %vm10422_vm10, %v9657_v29, %v1933_v32  ;;  %v789_v30 = vor.u32 %v787_v22, %v786_v52  ;;  %v2847_v22 = vld [vmem:[#allocation2 + $0x54] sm:$0xe]  ;;  %v10138_v29 = vld [vmem:[#allocation2 + $0x3c] sm:$0xff]  }
  0xc2   : > { %v791_v45 = vrot.slane %v786_v52, 4  ;;  %v2477_v40 = vshrl.u32 %v2302_v36, 16  ;;  %v1477_v63 = vsel %vm10461_vm13, %v1472_v48, %v1476_v43  ;;  %2054 = vrot.lane.b32.xlu0 %v9672_v60, %s10283_s26  ;;  %v1937_v54 = vsel %vm10422_vm10, %v1935_v9, %v1936_v26  ;;  %v2849_v43 = vld [vmem:[#allocation2 + $0x5c] sm:$0x1]  ;;  %1224 = vst.msk [vmem:[#allocation3 + $0x28] sm:$0xff] %vm13419_vm1, %v10138_v29 }
  0xc3   : > { %v1028_v25 = vsel %vm10482_vm14, %v781_v21, %v1027_v18  ;;  %v2480_v7 = vshll.u32 %v2302_v36, 16  ;;  %v9641_v34 = vcombine.low %v1467_v24, %v1477_v63  ;;  %v790_v38 = vsel %vm10493_vm15, %v782_v41, %v789_v30  ;;  %v534_v18 = vld [vmem:[#allocation2 + $0x74] sm:$0x1]  ;;  %v11008_v21 = vpop.permute.xlu0 %2046  ;;  %v328_v41 = vld [vmem:[%s10429_s21 + $0xb8] sm:$0xff] }
  0xc4   : > { %1029 = vst [vmem:[#allocation2 + $0x60] sm:$0xf] %v1028_v25  ;;  %v2479_v16 = vrot.slane %v2477_v40, 4  ;;  %v2486_v37 = vshll.u32 %v2303_v17, 16  ;;  %1030 = vst.msk [vmem:[#allocation2 + $0x64] sm:$0xf] %vm447_vm0, %v790_v38  ;;  %v1032_v10 = vsel %vm10401_vm5, %v791_v45, %v1031_v59  ;;  %v11003_v52 = vpop.permute.xlu1 %2766  ;;  %v9673_v36 = vcombine.low %v1934_v3, %v1937_v54 }
  0xc5   : > { %v2482_v32 = vrot.slane %v2480_v7, 5  ;;  %v2490_v46 = vshrl.u32 %v2303_v17, 16  ;;  %v2496_v26 = vshll.u32 %v2304_v49, 16  ;;  %1732 = vrot.lane.b32.xlu1 %v9641_v34, %s10284_s10  ;;  %1033 = vst [vmem:[#allocation2 + $0x68] sm:$0x1] %v1032_v10  ;;  %v9720_v8 = vrot.slane %v2847_v22, 9 }
  0xc6   : > { %v2488_v24 = vrot.slane %v2486_v37, 5  ;;  %v2969_v9 = vrot.slane %v2848_v12, 5  ;;  %2231 = vrot.lane.b32.xlu0 %v10120_v20, %s10285_s12  ;;  %v2972_v60 = vrot.slane %v2849_v43, 5  ;;  %vm1766_vm6 = vcmask 64544  }
  0xc7   : > { %v2483_v14 = vor.u32 %v2482_v32, %v2479_v16  ;;  %v2492_v48 = vrot.slane %v2490_v46, 4  ;;  %v2498_v17 = vrot.slane %v2496_v26, 5  ;;  %1767 = vst.msk [vmem:[#allocation3] sm:$0xff] %vm1766_vm6, %v10884_v33  ;;  %v431_v3 = vmax.f32 %v10858_v31, 0.0  ;;  %v11027_v31 = vld [vmem:[%s13409_s2] ss:$0 sm:$0xff] }
  0xc8   : > { %v2971_v30 = vrot.slane %v2969_v9, 4  ;;  %v432_v45 = vmax.f32 %v10867_v42, 0.0  ;;  %v485_v59 = vsel %vm10401_vm5, 0, %v484_v35  ;;  %vm2090_vm8 = vcmask 97344   ;;  %v11044_v22 = vpop.permute.xlu1 %3810 }
  0xc9   : > { %v2484_v49 = vrot.slane %v2483_v14, 4  ;;  %v2493_v40 = vor.u32 %v2492_v48, %v2488_v24  ;;  %2056 = vrot.lane.b32.xlu1 %v9673_v36, %s10283_s26  ;;  %v11020_v63 = vsel %vm10422_vm10, %v9720_v8, %v2969_v9  ;;  %486 = vst [vmem:[#allocation2 + $0x6c] sm:$0x1] %v485_v59  ;;  %2091 = vst.msk [vmem:[#allocation3] sm:$0xff] %vm2090_vm8, %v10875_v47  ;;  %vm13421_vm9 = vcmask 130144  }
  0xca   : > { %v11031_v42 = vadd.f32 %v11027_v31, %v10899_v13  ;;  %v11034_v33 = vmul.f32 %v10738_v57, %v328_v41  ;;  %v2973_v47 = vsel %vm10422_vm10, %v2971_v30, %v2972_v60  ;;  %2268 = vst.msk [vmem:[#allocation3] sm:$0xff] %vm13421_vm9, %v10910_v51  ;;  %v535_v7 = vsel %vm10410_vm7, 0, %v534_v18 }
  0xcb   : > { %v2489_v54 = vsel %vm10461_vm13, %v2484_v49, %v2488_v24  ;;  %v2494_v20 = vrot.slane %v2493_v40, 4  ;;  %v2305_v25 = vld [vmem:[#allocation2 + $0x60] sm:$0xf]  ;;  %v2306_v12 = vld [vmem:[#allocation2 + $0x64] sm:$0xf]  ;;  %v9918_v34 = vpack.c.bf16 %v431_v3, %v431_v3  ;;  %v9919_v38 = vpack.c.bf16 %v432_v45, %v432_v45 }
  0xcc   : > { %v10121_v13 = vld [vmem:[#allocation2 + $0x60] sm:$0xff]   ;;  %v2501_v57 = vshrl.u32 %v2305_v25, 16  ;;  %536 = vst [vmem:[#allocation2 + $0x74] sm:$0x1] %v535_v7  ;;  %v11048_v16 = vadd.f32 %v11027_v31, %v10927_v19  ;;  %v2307_v43 = vld [vmem:[#allocation2 + $0x68] sm:$0x1]  ;;  %v1721_v32 = vpop.permute.xlu0 %1720  ;;  %v9736_v36 = vcombine.low %v11020_v63, %v2973_v47 }
  0xcd   : > { %v2499_v37 = vsel %vm10461_vm13, %v2494_v20, %v2498_v17  ;;  %v2504_v51 = vshll.u32 %v2305_v25, 16  ;;  %v2510_v35 = vshll.u32 %v2306_v12, 16  ;;  %v2514_v29 = vshrl.u32 %v2306_v12, 16  ;;  %2233 = vrot.lane.b32.xlu1 %v10121_v13, %s10285_s12  ;;  %v2850_v24 = vld [vmem:[#allocation2 + $0x60] sm:$0xe]  ;;  %1768 = vst.msk [vmem:[#allocation3 + $0x8] sm:$0xff] %vm1766_vm6, %v1721_v32 }
  0xce   : > { %v9704_v46 = vcombine.low %v2489_v54, %v2499_v37  ;;  %v2503_v26 = vrot.slane %v2501_v57, 4  ;;  %v2520_v10 = vshll.u32 %v2307_v43, 16  ;;  %v2851_v8 = vld [vmem:[#allocation2 + $0x64] sm:$0xf]  ;;  %v2852_v14 = vld [vmem:[#allocation2 + $0x68] sm:$0x1] }
  0xcf   : > { %v2506_v19 = vrot.slane %v2504_v51, 5  ;;  %v2512_v9 = vrot.slane %v2510_v35, 5  ;;  %v2516_v18 = vrot.slane %v2514_v29, 4  ;;  %v9721_v48 = vrot.slane %v2850_v24, 9  ;;  %2092 = vst.msk [vmem:[#allocation3 + $0x8] sm:$0xff] %vm2090_vm8, %v10950_v53  ;;  %v10123_v53 = vld [vmem:[#allocation2 + $0x60] sm:$0xff]  }
  0xd0   : > { %2776 = vrot.lane.b32.xlu0 %v9704_v46, %s10289_s19  ;;  %v2522_v60 = vrot.slane %v2520_v10, 5  ;;  %v2976_v41 = vrot.slane %v2851_v8, 5  ;;  %v2979_v17 = vrot.slane %v2852_v14, 5  ;;  %v793_v30 = vshrl.u32 %v9918_v34, 16  ;;  %2269 = vst.msk [vmem:[#allocation3 + $0x8] sm:$0xff] %vm13421_vm9, %v10903_v27  ;;  %v1723_v59 = vpop.permute.xlu1 %1722 }
  0xd1   : > { %v2507_v3 = vor.u32 %v2506_v19, %v2503_v26  ;;  %v2517_v45 = vor.u32 %v2516_v18, %v2512_v9  ;;  %v796_v49 = vshll.u32 %v9918_v34, 16  ;;  %v801_v40 = vshrl.u32 %v9919_v38, 16  ;;  %v3346_v47 = vld [vmem:[#allocation2 + $0x60] sm:$0xf]  ;;  %1769 = vst.msk [vmem:[#allocation3 + $0x10] sm:$0xff] %vm1766_vm6, %v1723_v59 }
  0xd2   : > { %v11062_v63 = vsel %vm10422_vm10, %v9721_v48, %v2976_v41  ;;  %v2978_v54 = vrot.slane %v2976_v41, 4  ;;  %v795_v20 = vrot.slane %v793_v30, 7  ;;  %v804_v25 = vshll.u32 %v9919_v38, 16  ;;  %v1034_v27 = vld [vmem:[#allocation2 + $0x6c] sm:$0xf]  ;;  %2093 = vst.msk [vmem:[#allocation3 + $0x10] sm:$0xff] %vm2090_vm8, %v11008_v21 }
  0xd3   : > { %v2508_v7 = vrot.slane %v2507_v3, 4  ;;  %v2518_v13 = vrot.slane %v2517_v45, 4  ;;  %v803_v12 = vrot.slane %v801_v40, 7  ;;  %v3521_v57 = vshrl.u32 %v3346_v47, 16  ;;  %v3347_v51 = vld [vmem:[#allocation2 + $0x64] sm:$0xf] }
  0xd4   : > { %3097 = vrot.lane.b32.xlu0 %v9736_v36, %s10287_s17  ;;  %v2980_v34 = vsel %vm10422_vm10, %v2978_v54, %v2979_v17  ;;  %v798_v37 = vor.u32 %v796_v49, %v795_v20  ;;  %v799_v43 = vrot.slane %v795_v20, 4  ;;  %v3348_v38 = vld [vmem:[#allocation2 + $0x68] sm:$0x1]  ;;  %v3524_v35 = vshll.u32 %v3346_v47, 16  ;;  %2270 = vst.msk [vmem:[#allocation3 + $0x10] sm:$0xff] %vm13421_vm9, %v10935_v15 }
  0xd5   : > { %v2513_v29 = vsel %vm10461_vm13, %v2508_v7, %v2512_v9  ;;  %v2523_v32 = vsel %vm10461_vm13, %v2518_v13, %v2522_v60  ;;  %v9737_v21 = vcombine.low %v11062_v63, %v2980_v34  ;;  %v806_v46 = vor.u32 %v804_v25, %v803_v12  ;;  %v1038_v26 = vld [vmem:[#allocation2 + $0x74] sm:$0x1]  ;;  %v3891_v10 = vld [vmem:[#allocation2 + $0x60] sm:$0xe]  ;;  %v3892_v36 = vld [vmem:[#allocation2 + $0x64] sm:$0xf] }
  0xd6   : > { %v9705_v24 = vcombine.low %v2513_v29, %v2523_v32  ;;  %v808_v8 = vrot.slane %v803_v12, 4  ;;  %v1035_v19 = vsel %vm10482_vm14, %v798_v37, %v1034_v27  ;;  %v3523_v18 = vrot.slane %v3521_v57, 4  ;;  %v3893_v14 = vld [vmem:[#allocation2 + $0x68] sm:$0x1]  ;;  %v1259_v41 = vld [vmem:[#allocation2 + $0x60] sm:$0xf]  ;;  %v11086_v40 = vpop.permute.xlu0 %2764 }
  0xd7   : > { %v807_v15 = vsel %vm10493_vm15, %v799_v43, %v806_v46  ;;  %1036 = vst [vmem:[#allocation2 + $0x6c] sm:$0xf] %v1035_v19  ;;  %v3526_v9 = vrot.slane %v3524_v35, 5  ;;  %v3530_v48 = vshll.u32 %v3347_v51, 16  ;;  %v3534_v60 = vshrl.u32 %v3347_v51, 16  ;;  %v329_v43 = vld [vmem:[%s10429_s21 + $0xc0] sm:$0xff] }
  0xd8   : > { %2778 = vrot.lane.b32.xlu1 %v9705_v24, %s10289_s19  ;;  %3275 = vrot.lane.b32.xlu0 %v10123_v53, %s10286_s13  ;;  %1037 = vst.msk [vmem:[#allocation2 + $0x70] sm:$0xf] %vm447_vm0, %v807_v15  ;;  %v3540_v17 = vshll.u32 %v3348_v38, 16  ;;  %v1039_v30 = vsel %vm10401_vm5, %v808_v8, %v1038_v26  ;;  %v9784_v3 = vrot.slane %v3891_v10, 9  ;;  %v4013_v45 = vrot.slane %v3892_v36, 5  ;;  %v330_v51 = vld [vmem:[%s10429_s21 + $0xc8] sm:$0xff] }
  0xd9   : > { %v1260_v49 = vld [vmem:[#allocation2 + $0x64] sm:$0xf]  ;;  %v3527_v59 = vor.u32 %v3526_v9, %v3523_v18  ;;  %v3532_v63 = vrot.slane %v3530_v48, 5  ;;  %v3536_v54 = vrot.slane %v3534_v60, 4  ;;  %1040 = vst [vmem:[#allocation2 + $0x74] sm:$0x1] %v1039_v30  ;;  %v11104_v36 = vadd.f32 %v11027_v31, %v11034_v33 }
  0xda   : > { %v4016_v20 = vrot.slane %v3893_v14, 5  ;;  %v1261_v25 = vld [vmem:[#allocation2 + $0x68] sm:$0x1]  ;;  %v3542_v53 = vrot.slane %v3540_v17, 5  ;;  %v11090_v47 = vsel %vm10422_vm10, %v9784_v3, %v4013_v45  ;;  %v4015_v7 = vrot.slane %v4013_v45, 4  ;;  %v1725_v37 = vpop.permute.xlu1 %1724 }
  0xdb   : > { %v1479_v13 = vshrl.u32 %v1259_v41, 16  ;;  %v3528_v12 = vrot.slane %v3527_v59, 4  ;;  %v3537_v27 = vor.u32 %v3536_v54, %v3532_v63  ;;  %v1482_v57 = vshll.u32 %v1259_v41, 16  ;;  %1770 = vst.msk [vmem:[#allocation3 + $0x18] sm:$0xff] %vm1766_vm6, %v1725_v37  ;;  %v11113_v18 = vld [vmem:[%s13408_s1] ss:$0 sm:$0xff] }
  0xdc   : > { %v1488_v34 = vshll.u32 %v1260_v49, 16  ;;  %3099 = vrot.lane.b32.xlu1 %v9737_v21, %s10287_s17  ;;  %v4017_v38 = vsel %vm10422_vm10, %v4015_v7, %v4016_v20  ;;  %v1492_v29 = vshrl.u32 %v1260_v49, 16  ;;  %v1498_v32 = vshll.u32 %v1261_v25, 16  ;;  %2094 = vst.msk [vmem:[#allocation3 + $0x18] sm:$0xff] %vm2090_vm8, %v10976_v56 }
  0xdd   : > { %v1481_v35 = vrot.slane %v1479_v13, 4  ;;  %v3533_v46 = vsel %vm10461_vm13, %v3528_v12, %v3532_v63  ;;  %v3538_v26 = vrot.slane %v3537_v27, 4  ;;  %v1484_v10 = vrot.slane %v1482_v57, 5  ;;  %2271 = vst.msk [vmem:[#allocation3 + $0x18] sm:$0xff] %vm13421_vm9, %v10937_v58  ;;  %v11108_v19 = vpop.permute.xlu0 %3808 }
  0xde   : > { %v3349_v21 = vld [vmem:[#allocation2 + $0x6c] sm:$0xf]  ;;  %v1490_v24 = vrot.slane %v1488_v34, 5  ;;  %v1494_v8 = vrot.slane %v1492_v29, 4  ;;  %v11116_v14 = vmul.f32 %v11113_v18, %v329_v43  ;;  %v11119_v56 = vmul.f32 %v11113_v18, %v330_v51 }
  0xdf   : > { %v10124_v33 = vld [vmem:[#allocation2 + $0x6c] sm:$0xff]   ;;  %v3543_v15 = vsel %vm10461_vm13, %v3538_v26, %v3542_v53  ;;  %v3545_v48 = vshrl.u32 %v3349_v21, 16  ;;  %v9800_v58 = vcombine.low %v11090_v47, %v4017_v38  ;;  %v1485_v60 = vor.u32 %v1484_v10, %v1481_v35  ;;  %v1807_v10 = vld [vmem:[#allocation2 + $0x60] sm:$0xe] }
  0xe0   : > { %v3350_v9 = vld [vmem:[#allocation2 + $0x70] sm:$0xf]  ;;  %v9768_v41 = vcombine.low %v3533_v46, %v3543_v15  ;;  %v3351_v17 = vld [vmem:[#allocation2 + $0x74] sm:$0x1]  ;;  %v3548_v30 = vshll.u32 %v3349_v21, 16  ;;  %3277 = vrot.lane.b32.xlu1 %v10124_v33, %s10286_s13  ;;  %v1495_v54 = vor.u32 %v1494_v8, %v1490_v24  ;;  %v1500_v13 = vrot.slane %v1498_v32, 5 }
  0xe1   : > { %v3554_v3 = vshll.u32 %v3350_v9, 16  ;;  %v3558_v45 = vshrl.u32 %v3350_v9, 16  ;;  %v3547_v49 = vrot.slane %v3545_v48, 4  ;;  %v3564_v59 = vshll.u32 %v3351_v17, 16  ;;  %v3894_v20 = vld [vmem:[#allocation2 + $0x6c] sm:$0xe] }
  0xe2   : > { %v1486_v63 = vrot.slane %v1485_v60, 4  ;;  %3820 = vrot.lane.b32.xlu0 %v9768_v41, %s10290_s20  ;;  %v3550_v25 = vrot.slane %v3548_v30, 5  ;;  %v3895_v47 = vld [vmem:[#allocation2 + $0x70] sm:$0xf]  ;;  %v1496_v57 = vrot.slane %v1495_v54, 4  ;;  %v9785_v37 = vrot.slane %v3894_v20, 9  ;;  %v11128_v43 = vpop.permute.xlu0 %2768 }
  0xe3   : > { %v3556_v53 = vrot.slane %v3554_v3, 5  ;;  %v3560_v7 = vrot.slane %v3558_v45, 4  ;;  %v3566_v12 = vrot.slane %v3564_v59, 5  ;;  %v3896_v34 = vld [vmem:[#allocation2 + $0x74] sm:$0x1]  ;;  %v4020_v35 = vrot.slane %v3895_v47, 5 }
  0xe4   : > { %v1491_v27 = vsel %vm10461_vm13, %v1486_v63, %v1490_v24  ;;  %v3551_v51 = vor.u32 %v3550_v25, %v3547_v49  ;;  %v4023_v29 = vrot.slane %v3896_v34, 5  ;;  %v1262_v46 = vld [vmem:[#allocation2 + $0x6c] sm:$0xf]  ;;  %v1263_v26 = vld [vmem:[#allocation2 + $0x70] sm:$0xf]  ;;  %v1501_v32 = vsel %vm10461_vm13, %v1496_v57, %v1500_v13 }
  0xe5   : > { %v3561_v38 = vor.u32 %v3560_v7, %v3556_v53  ;;  %v1264_v21 = vld [vmem:[#allocation2 + $0x74] sm:$0x1]  ;;  %v1503_v8 = vshrl.u32 %v1262_v46, 16  ;;  %v1506_v33 = vshll.u32 %v1262_v46, 16  ;;  %v1512_v15 = vshll.u32 %v1263_v26, 16 }
  0xe6   : > { %v1808_v24 = vld [vmem:[#allocation2 + $0x64] sm:$0xf]  ;;  %v3552_v9 = vrot.slane %v3551_v51, 4  ;;  %4141 = vrot.lane.b32.xlu0 %v9800_v58, %s10288_s18  ;;  %v9642_v60 = vcombine.low %v1491_v27, %v1501_v32  ;;  %v4021_v41 = vsel %vm10422_vm10, %v9785_v37, %v4020_v35  ;;  %v1809_v17 = vld [vmem:[#allocation2 + $0x68] sm:$0x1]  ;;  %v4022_v3 = vrot.slane %v4020_v35, 4  ;;  %v11139_v58 = vpop.permute.xlu0 %3089 }
  0xe7   : > { %v3562_v48 = vrot.slane %v3561_v38, 4  ;;  %v1810_v30 = vld [vmem:[#allocation2 + $0x6c] sm:$0xe]  ;;  %v1505_v45 = vrot.slane %v1503_v8, 4  ;;  %v1508_v49 = vrot.slane %v1506_v33, 5  ;;  %v1514_v59 = vrot.slane %v1512_v15, 5  ;;  %v11147_v15 = vpop.permute.xlu1 %2770 }
  0xe8   : > { %v1811_v63 = vld [vmem:[#allocation2 + $0x70] sm:$0xf]  ;;  %v3557_v54 = vsel %vm10461_vm13, %v3552_v9, %v3556_v53  ;;  %v1516_v25 = vshrl.u32 %v1263_v26, 16  ;;  %v1522_v7 = vshll.u32 %v1264_v21, 16  ;;  %v4024_v47 = vsel %vm10422_vm10, %v4022_v3, %v4023_v29  ;;  %v1812_v34 = vld [vmem:[#allocation2 + $0x74] sm:$0x1] }
  0xe9   : > { %v3567_v20 = vsel %vm10461_vm13, %v3562_v48, %v3566_v12  ;;  %v1509_v27 = vor.u32 %v1508_v49, %v1505_v45  ;;  %v9658_v57 = vrot.slane %v1807_v10, 9  ;;  %v9801_v37 = vcombine.low %v4021_v41, %v4024_v47  ;;  %v487_v32 = vld [vmem:[#allocation2 + $0x78] sm:$0x1]  ;;  %v2308_v33 = vld [vmem:[#allocation2 + $0x6c] sm:$0xf] }
  0xea   : > { %v9769_v13 = vcombine.low %v3557_v54, %v3567_v20  ;;  %v1518_v51 = vrot.slane %v1516_v25, 4  ;;  %v1524_v38 = vrot.slane %v1522_v7, 5  ;;  %v1940_v35 = vrot.slane %v1808_v24, 5  ;;  %v11159_v49 = vpop.permute.xlu0 %3267 }
  0xeb   : > { %v1510_v53 = vrot.slane %v1509_v27, 4  ;;  %v1943_v46 = vrot.slane %v1809_v17, 5  ;;  %v9659_v12 = vrot.slane %v1810_v30, 9  ;;  %v1947_v26 = vrot.slane %v1811_v63, 5  ;;  %4143 = vrot.lane.b32.xlu0 %v9801_v37, %s10288_s18  ;;  %v537_v27 = vld [vmem:[#allocation2 + $0x80] sm:$0x1] }
  0xec   : > { %3822 = vrot.lane.b32.xlu1 %v9769_v13, %s10290_s20  ;;  %v1519_v21 = vor.u32 %v1518_v51, %v1514_v59  ;;  %v1941_v29 = vsel %vm10422_vm10, %v9658_v57, %v1940_v35  ;;  %v1942_v8 = vrot.slane %v1940_v35, 4  ;;  %v1950_v10 = vrot.slane %v1812_v34, 5  ;;  %v2310_v13 = vld [vmem:[#allocation2 + $0x74] sm:$0x1]  ;;  %v2853_v35 = vld [vmem:[#allocation2 + $0x6c] sm:$0xe] }
  0xed   : > { %v1515_v24 = vsel %vm10461_vm13, %v1510_v53, %v1514_v59  ;;  %v1948_v9 = vsel %vm10422_vm10, %v9659_v12, %v1947_v26  ;;  %v1949_v48 = vrot.slane %v1947_v26, 4  ;;  %v433_v41 = vmax.f32 %v10871_v6, 0.0  ;;  %v2309_v6 = vld [vmem:[#allocation2 + $0x70] sm:$0xf] }
  0xee   : > { %v1520_v17 = vrot.slane %v1519_v21, 4  ;;  %v1944_v30 = vsel %vm10422_vm10, %v1942_v8, %v1943_v46  ;;  %v434_v3 = vmax.f32 %v10881_v61, 0.0  ;;  %v488_v45 = vsel %vm10401_vm5, 0, %v487_v32  ;;  %v3092_v32 = vpop.permute.xlu1 %3091 }
  0xef   : > { %v9674_v59 = vcombine.low %v1941_v29, %v1944_v30  ;;  %v1951_v63 = vsel %vm10422_vm10, %v1949_v48, %v1950_v10  ;;  %489 = vst [vmem:[#allocation2 + $0x78] sm:$0x1] %v488_v45  ;;  %v9920_v54 = vpack.c.bf16 %v433_v41, %v433_v41  ;;  %v2525_v20 = vshrl.u32 %v2308_v33, 16  ;;  %v2854_v10 = vld [vmem:[#allocation2 + $0x70] sm:$0xf]  ;;  %v10142_v30 = vld [vmem:[#allocation2 + $0x48] sm:$0xff]  }
  0xf0   : > { %1734 = vrot.lane.b32.xlu1 %v9642_v60, %s10284_s10  ;;  %v1525_v25 = vsel %vm10461_vm13, %v1520_v17, %v1524_v38  ;;  %v9675_v7 = vcombine.low %v1948_v9, %v1951_v63  ;;  %v9921_v61 = vpack.c.bf16 %v434_v3, %v434_v3  ;;  %v2528_v47 = vshll.u32 %v2308_v33, 16  ;;  %v10125_v60 = vld [vmem:[#allocation2 + $0x6c] sm:$0xff]   ;;  %v2855_v48 = vld [vmem:[#allocation2 + $0x74] sm:$0x1]  ;;  %1225 = vst.msk [vmem:[#allocation3 + $0x30] sm:$0xff] %vm13419_vm1, %v10142_v30 }
  0xf1   : > { %v9643_v57 = vcombine.low %v1515_v24, %v1525_v25  ;;  %2058 = vrot.lane.b32.xlu0 %v9674_v59, %s10283_s26  ;;  %v810_v34 = vshrl.u32 %v9920_v54, 16  ;;  %v813_v37 = vshll.u32 %v9920_v54, 16  ;;  %v2527_v51 = vrot.slane %v2525_v20, 4  ;;  %v11172_v17 = vpop.permute.xlu0 %3812 }
  0xf2   : > { %v818_v53 = vshrl.u32 %v9921_v61, 16  ;;  %v821_v46 = vshll.u32 %v9921_v61, 16  ;;  %v2530_v12 = vrot.slane %v2528_v47, 5  ;;  %v2534_v26 = vshll.u32 %v2309_v6, 16 }
  0xf3   : > { %v812_v38 = vrot.slane %v810_v34, 7  ;;  %v2538_v21 = vshrl.u32 %v2309_v6, 16  ;;  %v2544_v29 = vshll.u32 %v2310_v13, 16  ;;  %v538_v8 = vsel %vm10410_vm7, 0, %v537_v27 }
  0xf4   : > { %1736 = vrot.lane.b32.xlu1 %v9643_v57, %s10284_s10  ;;  %v11170_v33 = vrot.slane %v818_v53, 7  ;;  %v2531_v24 = vor.u32 %v2530_v12, %v2527_v51  ;;  %v2536_v9 = vrot.slane %v2534_v26, 5  ;;  %539 = vst [vmem:[#allocation2 + $0x80] sm:$0x1] %v538_v8  ;;  %v9722_v41 = vrot.slane %v2853_v35, 9  ;;  %v3270_v35 = vpop.permute.xlu1 %3269  ;;  %v10144_v53 = vld [vmem:[#allocation2 + $0x54] sm:$0xff]  }
  0xf5   : > { %2235 = vrot.lane.b32.xlu0 %v10125_v60, %s10285_s12  ;;  %v815_v3 = vor.u32 %v813_v37, %v812_v38  ;;  %v816_v45 = vrot.slane %v812_v38, 4  ;;  %v2540_v59 = vrot.slane %v2538_v21, 4  ;;  %v2546_v63 = vrot.slane %v2544_v29, 5  ;;  %v540_v51 = vld [vmem:[#allocation2 + $0x8c] sm:$0x1]  ;;  %v4134_v12 = vpop.permute.xlu0 %4133  ;;  %1226 = vst.msk [vmem:[#allocation3 + $0x38] sm:$0xff] %vm13419_vm1, %v10144_v53 }
  0xf6   : > { %v823_v54 = vor.u32 %v821_v46, %v11170_v33  ;;  %v825_v6 = vrot.slane %v11170_v33, 4  ;;  %v1041_v20 = vld [vmem:[#allocation2 + $0x78] sm:$0xf]  ;;  %v2532_v25 = vrot.slane %v2531_v24, 4  ;;  %v2983_v61 = vrot.slane %v2854_v10, 5 }
  0xf7   : > { %v1042_v13 = vsel %vm10482_vm14, %v815_v3, %v1041_v20  ;;  %v2541_v47 = vor.u32 %v2540_v59, %v2536_v9  ;;  %v2986_v27 = vrot.slane %v2855_v48, 5  ;;  %vm2812_vm11 = vcmask 162944   ;;  %v332_v10 = vld [vmem:[%s10429_s21 + $0xd8] sm:$0xff] }
  0xf8   : > { %2060 = vrot.lane.b32.xlu1 %v9675_v7, %s10283_s26  ;;  %v824_v57 = vsel %vm10493_vm15, %v816_v45, %v823_v54  ;;  %1043 = vst [vmem:[#allocation2 + $0x78] sm:$0xf] %v1042_v13  ;;  %v2537_v60 = vsel %vm10461_vm13, %v2532_v25, %v2536_v9  ;;  %v11187_v34 = vsel %vm10422_vm10, %v9722_v41, %v2983_v61  ;;  %v2985_v37 = vrot.slane %v2983_v61, 4  ;;  %v490_v7 = vld [vmem:[#allocation2 + $0x84] sm:$0x1] }
  0xf9   : > { %2814 = vst.msk [vmem:[#allocation3 + $0x8] sm:$0xff] %vm2812_vm11, %v11003_v52  ;;  %2813 = vst.msk [vmem:[#allocation3] sm:$0xff] %vm2812_vm11, %v11086_v40  ;;  %v2542_v46 = vrot.slane %v2541_v47, 4  ;;  %vm3133_vm12 = vcmask 195744   ;;  %vm13420_vm4 = vcmask 228544   ;;  %vm3856_vm3 = vcmask 261344  }
  0xfa   : > { %2815 = vst.msk [vmem:[#allocation3 + $0x10] sm:$0xff] %vm2812_vm11, %v11128_v43  ;;  %2816 = vst.msk [vmem:[#allocation3 + $0x18] sm:$0xff] %vm2812_vm11, %v11147_v15  ;;  %v2987_v52 = vsel %vm10422_vm10, %v2985_v37, %v2986_v27  ;;  %vm4177_vm2 = vcmask 294144   ;;  %v435_v40 = vmax.f32 %v10980_v55, 0.0  ;;  %v436_v43 = vmax.f32 %v11031_v42, 0.0 }
  0xfb   : > { %1044 = vst.msk [vmem:[#allocation2 + $0x7c] sm:$0xf] %vm447_vm0, %v824_v57  ;;  %v11209_v15 = vld [vmem:[%s13410_s3 + $0x10] ss:$0 sps:$4 sm:$0x33]   ;;  %v9738_v42 = vcombine.low %v11187_v34, %v2987_v52  ;;  %vm13422_vm1 = vcmask 1041408   ;;  %v11261_v41 = vadd.f32 %v11027_v31, %v11116_v14  ;;  %v11267_v20 = vadd.f32 %v11027_v31, %v11119_v56 }
  0xfc   : > { %3135 = vst.msk [vmem:[#allocation3 + $0x8] sm:$0xff] %vm3133_vm12, %v10962_v44  ;;  %3134 = vst.msk [vmem:[#allocation3] sm:$0xff] %vm3133_vm12, %v10941_v39  ;;  %v2547_v44 = vsel %vm10461_vm13, %v2542_v46, %v2546_v63  ;;  %v1045_v55 = vld [vmem:[#allocation2 + $0x80] sm:$0x1]  ;;  %v491_v39 = vsel %vm10401_vm5, 0, %v490_v7  ;;  %v11235_v38 = vpack.c.bf16 %v436_v43, %v436_v43  ;;  %10048 = vmatprep.subr.msk.bf16.mxu0 %vm13422_vm1, %v11209_v15  ;;  %10049 = vmatprep.subr.msk.bf16.mxu1 %vm13422_vm1, %v11209_v15 }
  0xfd   : > { %3136 = vst.msk [vmem:[#allocation3 + $0x10] sm:$0xff] %vm3133_vm12, %v11139_v58  ;;  %3137 = vst.msk [vmem:[#allocation3 + $0x18] sm:$0xff] %vm3133_vm12, %v3092_v32  ;;  %v541_v58 = vsel %vm10410_vm7, 0, %v540_v51  ;;  %v9706_v26 = vcombine.low %v2537_v60, %v2547_v44  ;;  %v1046_v32 = vsel %vm10401_vm5, %v825_v6, %v1045_v55  ;;  %v11279_v56 = vmul.f32 %v11113_v18, %v332_v10 }
  0xfe   : > { %3313 = vst.msk [vmem:[#allocation3 + $0x8] sm:$0xff] %vm13420_vm4, %v10918_v5  ;;  %3312 = vst.msk [vmem:[#allocation3] sm:$0xff] %vm13420_vm4, %v10920_v0  ;;  %v11233_v5 = vpack.c.bf16 %v435_v40, %v435_v40  ;;  %v437_v0 = vmax.f32 %v11048_v16, 0.0  ;;  %v838_v21 = vshll.u32 %v11235_v38, 16 }
  0xff   : > { %3314 = vst.msk [vmem:[#allocation3 + $0x10] sm:$0xff] %vm13420_vm4, %v11159_v49  ;;  %3315 = vst.msk [vmem:[#allocation3 + $0x18] sm:$0xff] %vm13420_vm4, %v3270_v35  ;;  %vm4230_vm4 = vcmask 293888   ;;  %2780 = vrot.lane.b32.xlu0 %v9706_v26, %s10289_s19  ;;  %v2311_v29 = vld [vmem:[#allocation2 + $0x78] sm:$0xf] }
 0x100   : > { %3858 = vst.msk [vmem:[#allocation3 + $0x8] sm:$0xff] %vm3856_vm3, %v11044_v22  ;;  %492 = vst [vmem:[#allocation2 + $0x84] sm:$0x1] %v491_v39  ;;  %v438_v22 = vmax.f32 %v11104_v36, 0.0  ;;  %v830_v49 = vshll.u32 %v11233_v5, 16  ;;  %v2549_v9 = vshrl.u32 %v2311_v29, 16  ;;  %v4136_v48 = vpop.permute.xlu0 %4135 }
 0x101   : > { %542 = vst [vmem:[#allocation2 + $0x8c] sm:$0x1] %v541_v58  ;;  %3857 = vst.msk [vmem:[#allocation3] sm:$0xff] %vm3856_vm3, %v11108_v19  ;;  %v827_v19 = vshrl.u32 %v11233_v5, 16  ;;  %v2856_v8 = vld [vmem:[#allocation2 + $0x78] sm:$0xe]  ;;  %v3815_v6 = vpop.permute.xlu1 %3814 }
 0x102   : > { %3859 = vst.msk [vmem:[#allocation3 + $0x10] sm:$0xff] %vm3856_vm3, %v11172_v17  ;;  %1047 = vst [vmem:[#allocation2 + $0x80] sm:$0x1] %v1046_v32  ;;  %v10126_v33 = vld [vmem:[#allocation2 + $0x78] sm:$0xff]   ;;  %v2552_v17 = vshll.u32 %v2311_v29, 16  ;;  %v9723_v59 = vrot.slane %v2856_v8, 9 }
 0x103   : > { %4179 = vst.msk [vmem:[#allocation3 + $0x8] sm:$0xff] %vm4177_vm2, %v10984_v62  ;;  %4178 = vst.msk [vmem:[#allocation3] sm:$0xff] %vm4177_vm2, %v10960_v4  ;;  %v835_v62 = vshrl.u32 %v11235_v38, 16  ;;  %v331_v4 = vld [vmem:[%s10429_s21 + $0xd0] sm:$0xff]  ;;  %v2312_v24 = vld [vmem:[#allocation2 + $0x7c] sm:$0xf]  ;;  %2237 = vrot.lane.b32.xlu1 %v10126_v33, %s10285_s12  ;;  %3101 = vrot.lane.b32.xlu0 %v9738_v42, %s10287_s17 }
 0x104   : > { %4180 = vst.msk [vmem:[#allocation3 + $0x10] sm:$0xff] %vm4177_vm2, %v4134_v12  ;;  %v2558_v30 = vshll.u32 %v2312_v24, 16  ;;  %v2562_v3 = vshrl.u32 %v2312_v24, 16  ;;  %v2857_v45 = vld [vmem:[#allocation2 + $0x7c] sm:$0xf]  ;;  %v2551_v63 = vrot.slane %v2549_v9, 4  ;;  %v11270_v25 = vmul.f32 %v11113_v18, %v331_v4  ;;  %v2051_v31 = vpop.permute.xlu0 %2050 }
 0x105   : > { %v2990_v54 = vrot.slane %v2857_v45, 5  ;;  %v2554_v14 = vrot.slane %v2552_v17, 5  ;;  %v10128_v47 = vld [vmem:[#allocation2 + $0x78] sm:$0xff]   ;;  %v829_v27 = vrot.slane %v827_v19, 7  ;;  %3860 = vst.msk [vmem:[#allocation3 + $0x18] sm:$0xff] %vm3856_vm3, %v3815_v6  ;;  %v837_v7 = vrot.slane %v835_v62, 7  ;;  %v1727_v58 = vpop.permute.xlu1 %1726 }
 0x106   : > { %v2560_v61 = vrot.slane %v2558_v30, 5  ;;  %v2564_v13 = vrot.slane %v2562_v3, 4  ;;  %4181 = vst.msk [vmem:[#allocation3 + $0x18] sm:$0xff] %vm4177_vm2, %v4136_v48  ;;  %v3352_v40 = vld [vmem:[#allocation2 + $0x78] sm:$0xf] }
 0x107   : > { %v11275_v34 = vsel %vm10422_vm10, %v9723_v59, %v2990_v54  ;;  %v2992_v37 = vrot.slane %v2990_v54, 4  ;;  %v2555_v51 = vor.u32 %v2554_v14, %v2551_v63  ;;  %v1048_v52 = vld [vmem:[#allocation2 + $0x84] sm:$0xf]  ;;  %3279 = vrot.lane.b32.xlu0 %v10128_v47, %s10286_s13  ;;  %v832_v43 = vor.u32 %v830_v49, %v829_v27  ;;  %v3353_v42 = vld [vmem:[#allocation2 + $0x7c] sm:$0xf]  ;;  %1771 = vst.msk [vmem:[#allocation3 + $0x20] sm:$0xff] %vm1766_vm6, %v1727_v58 }
 0x108   : > { %v2565_v35 = vor.u32 %v2564_v13, %v2560_v61  ;;  %v833_v12 = vrot.slane %v829_v27, 4  ;;  %v840_v44 = vor.u32 %v838_v21, %v837_v7  ;;  %v842_v55 = vrot.slane %v837_v7, 4  ;;  %v1052_v38 = vld [vmem:[#allocation2 + $0x8c] sm:$0x1]  ;;  %v3897_v29 = vld [vmem:[#allocation2 + $0x78] sm:$0xe]  ;;  %v2228_v10 = vpop.permute.xlu0 %2227 }
 0x109   : > { %v2313_v57 = vld [vmem:[#allocation2 + $0x80] sm:$0x1]  ;;  %v2556_v26 = vrot.slane %v2555_v51, 4  ;;  %v1049_v21 = vsel %vm10482_vm14, %v832_v43, %v1048_v52  ;;  %v3569_v4 = vshrl.u32 %v3352_v40, 16  ;;  %v3898_v8 = vld [vmem:[#allocation2 + $0x7c] sm:$0xf]  ;;  %v1729_v6 = vpop.permute.xlu1 %1728 }
 0x10a   : > { %v2858_v60 = vld [vmem:[#allocation2 + $0x80] sm:$0x1]  ;;  %v2568_v53 = vshll.u32 %v2313_v57, 16  ;;  %v2566_v32 = vrot.slane %v2565_v35, 4  ;;  %v4194_v19 = vld [vmem:[#allocation3] sm:$0xff]  ;;  %v841_v49 = vsel %vm10493_vm15, %v833_v12, %v840_v44  ;;  %2095 = vst.msk [vmem:[#allocation3 + $0x20] sm:$0xff] %vm2090_vm8, %v2051_v31  ;;  %v1053_v13 = vsel %vm10401_vm5, %v842_v55, %v1052_v38 }
 0x10b   : > { %v2993_v46 = vrot.slane %v2858_v60, 5  ;;  %v3354_v39 = vld [vmem:[#allocation2 + $0x80] sm:$0x1]  ;;  %9974 = vmatprep.mubr.msk.bf16.mxu0 %vm4230_vm4, %v4194_v19  ;;  %v2561_v33 = vsel %vm10461_vm13, %v2556_v26, %v2560_v61  ;;  %1050 = vst [vmem:[#allocation2 + $0x84] sm:$0xf] %v1049_v21  ;;  %v3572_v9 = vshll.u32 %v3352_v40, 16 }
 0x10c   : > { %v2570_v5 = vrot.slane %v2568_v53, 5  ;;  %1051 = vst.msk [vmem:[#allocation2 + $0x88] sm:$0xf] %vm447_vm0, %v841_v49  ;;  %v3578_v48 = vshll.u32 %v3353_v42, 16  ;;  %v3899_v17 = vld [vmem:[#allocation2 + $0x80] sm:$0x1] }
 0x10d   : > { %v2994_v18 = vsel %vm10422_vm10, %v2992_v37, %v2993_v46  ;;  %v1265_v30 = vld [vmem:[#allocation2 + $0x78] sm:$0xf]  ;;  %2272 = vst.msk [vmem:[#allocation3 + $0x20] sm:$0xff] %vm13421_vm9, %v2228_v10  ;;  %v3571_v45 = vrot.slane %v3569_v4, 4  ;;  %v3582_v59 = vshrl.u32 %v3353_v42, 16  ;;  %v3588_v63 = vshll.u32 %v3354_v39, 16  ;;  %v2053_v40 = vpop.permute.xlu1 %2052 }
 0x10e   : > { %v9739_v62 = vcombine.low %v11275_v34, %v2994_v18  ;;  %v2571_v24 = vsel %vm10461_vm13, %v2566_v32, %v2570_v5  ;;  %v1266_v54 = vld [vmem:[#allocation2 + $0x7c] sm:$0xf]  ;;  %v3574_v14 = vrot.slane %v3572_v9, 5  ;;  %v3580_v61 = vrot.slane %v3578_v48, 5  ;;  %1772 = vst.msk [vmem:[#allocation3 + $0x28] sm:$0xff] %vm1766_vm6, %v1729_v6 }
 0x10f   : > { %v9707_v3 = vcombine.low %v2561_v33, %v2571_v24  ;;  %v9786_v47 = vrot.slane %v3897_v29, 9  ;;  %v3584_v27 = vrot.slane %v3582_v59, 4  ;;  %v3590_v57 = vrot.slane %v3588_v63, 5  ;;  %1054 = vst [vmem:[#allocation2 + $0x8c] sm:$0x1] %v1053_v13  ;;  %2096 = vst.msk [vmem:[#allocation3 + $0x28] sm:$0xff] %vm2090_vm8, %v2053_v40  ;;  %v2773_v18 = vpop.permute.xlu0 %2772 }
 0x110   : > { %v4027_v60 = vrot.slane %v3898_v8, 5  ;;  %v4030_v34 = vrot.slane %v3899_v17, 5  ;;  %v3575_v37 = vor.u32 %v3574_v14, %v3571_v45  ;;  %v1527_v7 = vshrl.u32 %v1265_v30, 16  ;;  %v1267_v26 = vld [vmem:[#allocation2 + $0x80] sm:$0x1]  ;;  %2817 = vst.msk [vmem:[#allocation3 + $0x20] sm:$0xff] %vm2812_vm11, %v2773_v18 }
 0x111   : > { %2782 = vrot.lane.b32.xlu1 %v9707_v3, %s10289_s19  ;;  %v1530_v31 = vshll.u32 %v1265_v30, 16  ;;  %v1536_v51 = vshll.u32 %v1266_v54, 16  ;;  %v3585_v35 = vor.u32 %v3584_v27, %v3580_v61  ;;  %v1540_v52 = vshrl.u32 %v1266_v54, 16 }
 0x112   : > { %v11304_v53 = vsel %vm10422_vm10, %v9786_v47, %v4027_v60  ;;  %v4029_v46 = vrot.slane %v4027_v60, 4  ;;  %v3576_v43 = vrot.slane %v3575_v37, 4  ;;  %v1529_v12 = vrot.slane %v1527_v7, 4  ;;  %v3355_v19 = vld [vmem:[#allocation2 + $0x84] sm:$0xf]  ;;  %v2230_v63 = vpop.permute.xlu1 %2229 }
 0x113   : > { %v1532_v44 = vrot.slane %v1530_v31, 5  ;;  %v11306_v55 = vrot.slane %v1536_v51, 5  ;;  %v10129_v42 = vld [vmem:[#allocation2 + $0x84] sm:$0xff]   ;;  %v3586_v39 = vrot.slane %v3585_v35, 4  ;;  %v11315_v32 = vpack.c.bf16 %v437_v0, %v437_v0  ;;  %v3094_v54 = vpop.permute.xlu0 %3093  ;;  %2273 = vst.msk [vmem:[#allocation3 + $0x28] sm:$0xff] %vm13421_vm9, %v2230_v63 }
 0x114   : > { %v4031_v58 = vsel %vm10422_vm10, %v4029_v46, %v4030_v34  ;;  %v11320_v5 = vpack.c.bf16 %v438_v22, %v438_v22  ;;  %v3581_v38 = vsel %vm10461_vm13, %v3576_v43, %v3580_v61  ;;  %v1542_v4 = vrot.slane %v1540_v52, 4  ;;  %v3900_v22 = vld [vmem:[#allocation2 + $0x84] sm:$0xe]  ;;  %v3901_v48 = vld [vmem:[#allocation2 + $0x88] sm:$0xf]  ;;  %3138 = vst.msk [vmem:[#allocation3 + $0x20] sm:$0xff] %vm3133_vm12, %v3094_v54 }
 0x115   : > { %3103 = vrot.lane.b32.xlu1 %v9739_v62, %s10287_s17  ;;  %v3356_v62 = vld [vmem:[#allocation2 + $0x88] sm:$0xf]  ;;  %v9802_v49 = vcombine.low %v11304_v53, %v4031_v58  ;;  %v1533_v21 = vor.u32 %v1532_v44, %v1529_v12  ;;  %v3591_v16 = vsel %vm10461_vm13, %v3586_v39, %v3590_v57  ;;  %v3593_v0 = vshrl.u32 %v3355_v19, 16  ;;  %v1268_v47 = vld [vmem:[#allocation2 + $0x84] sm:$0xf] }
 0x116   : > { %v3596_v36 = vshll.u32 %v3355_v19, 16  ;;  %v3602_v29 = vshll.u32 %v3356_v62, 16  ;;  %v9770_v8 = vcombine.low %v3581_v38, %v3591_v16  ;;  %v3357_v10 = vld [vmem:[#allocation2 + $0x8c] sm:$0x1]  ;;  %v3606_v33 = vshrl.u32 %v3356_v62, 16 }
 0x117   : > { %v1534_v24 = vrot.slane %v1533_v21, 4  ;;  %v1543_v9 = vor.u32 %v1542_v4, %v11306_v55  ;;  %v3595_v17 = vrot.slane %v3593_v0, 4  ;;  %v3612_v45 = vshll.u32 %v3357_v10, 16  ;;  %v3902_v59 = vld [vmem:[#allocation2 + $0x8c] sm:$0x1] }
 0x118   : > { %v3598_v30 = vrot.slane %v3596_v36, 5  ;;  %v3604_v3 = vrot.slane %v3602_v29, 5  ;;  %3824 = vrot.lane.b32.xlu0 %v9770_v8, %s10290_s20  ;;  %v3608_v6 = vrot.slane %v3606_v33, 4  ;;  %v1546_v13 = vshll.u32 %v1267_v26, 16  ;;  %v1269_v37 = vld [vmem:[#allocation2 + $0x88] sm:$0xf] }
 0x119   : > { %3281 = vrot.lane.b32.xlu1 %v10129_v42, %s10286_s13  ;;  %v1539_v14 = vsel %vm10461_vm13, %v1534_v24, %v11306_v55  ;;  %v1544_v61 = vrot.slane %v1543_v9, 4  ;;  %v3614_v57 = vrot.slane %v3612_v45, 5  ;;  %v9787_v60 = vrot.slane %v3900_v22, 9  ;;  %v1813_v43 = vld [vmem:[#allocation2 + $0x78] sm:$0xe]  ;;  %v3272_v55 = vpop.permute.xlu0 %3271 }
 0x11a   : > { %v3599_v27 = vor.u32 %v3598_v30, %v3595_v17  ;;  %v4034_v34 = vrot.slane %v3901_v48, 5  ;;  %v3609_v7 = vor.u32 %v3608_v6, %v3604_v3  ;;  %v1548_v31 = vrot.slane %v1546_v13, 5  ;;  %v1814_v12 = vld [vmem:[#allocation2 + $0x7c] sm:$0xf]  ;;  %v1815_v44 = vld [vmem:[#allocation2 + $0x80] sm:$0x1] }
 0x11b   : > { %v4037_v51 = vrot.slane %v3902_v59, 5  ;;  %v1551_v35 = vshrl.u32 %v1268_v47, 16  ;;  %v1554_v40 = vshll.u32 %v1268_v47, 16  ;;  %v1270_v58 = vld [vmem:[#allocation2 + $0x8c] sm:$0x1]  ;;  %v1560_v18 = vshll.u32 %v1269_v37, 16 }
 0x11c   : > { %v3600_v53 = vrot.slane %v3599_v27, 4  ;;  %v4035_v46 = vsel %vm10422_vm10, %v9787_v60, %v4034_v34  ;;  %v4036_v52 = vrot.slane %v4034_v34, 4  ;;  %v3610_v42 = vrot.slane %v3609_v7, 4  ;;  %4145 = vrot.lane.b32.xlu0 %v9802_v49, %s10288_s18  ;;  %v1816_v4 = vld [vmem:[#allocation2 + $0x84] sm:$0xe]  ;;  %v4196_v6 = vld [vmem:[#allocation3 + $0x10] sm:$0xff] }
 0x11d   : > { %v1549_v39 = vsel %vm10461_vm13, %v1544_v61, %v1548_v31  ;;  %v1553_v26 = vrot.slane %v1551_v35, 4  ;;  %vm13442_vm9 = vcmask 228544   ;;  %v1556_v21 = vrot.slane %v1554_v40, 5  ;;  %v1817_v29 = vld [vmem:[#allocation2 + $0x88] sm:$0xf]  ;;  %v4195_v47 = vld [vmem:[#allocation3 + $0x8] sm:$0xff] }
 0x11e   : > { %3316 = vst.msk [vmem:[#allocation3 + $0x20] sm:$0xff] %vm13442_vm9, %v3272_v55  ;;  %v3605_v38 = vsel %vm10461_vm13, %v3600_v53, %v3604_v3  ;;  %v9644_v19 = vcombine.low %v1539_v14, %v1549_v39  ;;  %v4038_v62 = vsel %vm10422_vm10, %v4036_v52, %v4037_v51  ;;  %v3615_v49 = vsel %vm10461_vm13, %v3610_v42, %v3614_v57  ;;  %v1818_v24 = vld [vmem:[#allocation2 + $0x8c] sm:$0x1]  ;;  %v493_v3 = vld [vmem:[#allocation2 + $0x90] sm:$0x1]  ;;  %v10150_v57 = vld [vmem:[#allocation2 + $0x60] sm:$0xff]  }
 0x11f   : > { %v9803_v16 = vcombine.low %v4035_v46, %v4038_v62  ;;  %v1562_v0 = vrot.slane %v1560_v18, 5  ;;  %v1564_v36 = vshrl.u32 %v1269_v37, 16  ;;  %v9771_v22 = vcombine.low %v3605_v38, %v3615_v49  ;;  %v2775_v27 = vpop.permute.xlu1 %2774  ;;  %v2314_v7 = vld [vmem:[#allocation2 + $0x84] sm:$0xf]  ;;  %v11363_v31 = vld [vmem:[%s13409_s2] ss:$0 sm:$0xff] }
 0x120   : > { %v1557_v8 = vor.u32 %v1556_v21, %v1553_v26  ;;  %v1570_v10 = vshll.u32 %v1270_v58, 16  ;;  %v4281_v33 = vsel %vm13422_vm1, %v11209_v15, 0  ;;  %v9660_v48 = vrot.slane %v1813_v43, 9  ;;  %2818 = vst.msk [vmem:[#allocation3 + $0x28] sm:$0xff] %vm2812_vm11, %v2775_v27  ;;  %v2315_v40 = vld [vmem:[#allocation2 + $0x88] sm:$0xf] }
 0x121   : > { %4147 = vrot.lane.b32.xlu0 %v9803_v16, %s10288_s18  ;;  %v1566_v9 = vrot.slane %v1564_v36, 4  ;;  %9973 = vmatpush3.bf16.msra.mxu0 %v4281_v33  ;;  %v1954_v17 = vrot.slane %v1814_v12, 5  ;;  %v1957_v30 = vrot.slane %v1815_v44, 5  ;;  %v9661_v63 = vrot.slane %v1816_v4, 9  ;;  %v10151_v43 = vld [vmem:[#allocation2 + $0x6c] sm:$0xff]   ;;  %v10135_v21 = vld [vmem:[#allocation2 + $0x84] sm:$0xff]  }
 0x122   : > { %3826 = vrot.lane.b32.xlu1 %v9771_v22, %s10290_s20  ;;  %v1558_v45 = vrot.slane %v1557_v8, 4  ;;  %v1572_v59 = vrot.slane %v1570_v10, 5  ;;  %v1961_v54 = vrot.slane %v1817_v29, 5  ;;  %10039 = vmatpush3.bf16.msra.mxu1 %v4281_v33  ;;  %v1964_v13 = vrot.slane %v1818_v24, 5  ;;  %v2316_v42 = vld [vmem:[#allocation2 + $0x8c] sm:$0x1] }
 0x123   : > { %v1567_v14 = vor.u32 %v1566_v9, %v1562_v0  ;;  %v1955_v15 = vsel %vm10422_vm10, %v9660_v48, %v1954_v17  ;;  %v1956_v61 = vrot.slane %v1954_v17, 4  ;;  %v494_v37 = vsel %vm10401_vm5, 0, %v493_v3  ;;  %v543_v39 = vld [vmem:[#allocation2 + $0x98] sm:$0x1]  ;;  %v2859_v38 = vld [vmem:[#allocation2 + $0x84] sm:$0xe] }
 0x124   : > { %v1563_v60 = vsel %vm10461_vm13, %v1558_v45, %v1562_v0  ;;  %v1963_v34 = vrot.slane %v1961_v54, 4  ;;  %9975 = vmatmul.mubr.msk.bf16.vlgmr.msra.gmra.mrb[0].mxu0 %vm4230_vm4, %v4195_v47  ;;  %v11367_v51 = vadd.f32 %v11363_v31, %v11270_v25  ;;  %495 = vst [vmem:[#allocation2 + $0x90] sm:$0x1] %v494_v37  ;;  %v844_v46 = vshrl.u32 %v11315_v32, 16  ;;  %v2860_v16 = vld [vmem:[#allocation2 + $0x88] sm:$0xf] }
 0x125   : > { %v1568_v35 = vrot.slane %v1567_v14, 4  ;;  %v1958_v53 = vsel %vm10422_vm10, %v1956_v61, %v1957_v30  ;;  %v847_v52 = vshll.u32 %v11315_v32, 16  ;;  %9978 = vmatprep.mubr.msk.bf16.mxu0 %vm4230_vm4, %v4196_v6  ;;  %vm13443_vm9 = vcmask 31744   ;;  %v2861_v8 = vld [vmem:[#allocation2 + $0x8c] sm:$0x1]  ;;  %v4197_v10 = vld [vmem:[#allocation3 + $0x18] sm:$0xff] }
 0x126   : > { %1227 = vst.msk [vmem:[#allocation3 + $0x40] sm:$0xff] %vm13443_vm9, %v10150_v57  ;;  %1738 = vrot.lane.b32.xlu1 %v9644_v19, %s10284_s10  ;;  %v9676_v12 = vcombine.low %v1955_v15, %v1958_v53  ;;  %v1962_v25 = vsel %vm10422_vm10, %v9661_v63, %v1961_v54  ;;  %v852_v44 = vshrl.u32 %v11320_v5, 16  ;;  %v855_v55 = vshll.u32 %v11320_v5, 16  ;;  %v3096_v19 = vpop.permute.xlu1 %3095  ;;  %1228 = vst.msk [vmem:[#allocation3 + $0x48] sm:$0xff] %vm13443_vm9, %v10151_v43  ;;  %v3817_v54 = vpop.permute.xlu0 %3816  ;;  %v546_v47 = vld [vmem:[#allocation2 + $0xa4] sm:$0x1] }
 0x127   : > { %v1573_v32 = vsel %vm10461_vm13, %v1568_v35, %v1572_v59  ;;  %v1965_v58 = vsel %vm10422_vm10, %v1963_v34, %v1964_v13  ;;  %v846_v26 = vrot.slane %v844_v46, 7  ;;  %v2573_v18 = vshrl.u32 %v2314_v7, 16  ;;  %3139 = vst.msk [vmem:[#allocation3 + $0x28] sm:$0xff] %vm3133_vm12, %v3096_v19  ;;  %v496_v59 = vld [vmem:[#allocation2 + $0x9c] sm:$0x1] }
 0x128   : > { %v9645_v62 = vcombine.low %v1563_v60, %v1573_v32  ;;  %2062 = vrot.lane.b32.xlu0 %v9676_v12, %s10283_s26  ;;  %v11386_v4 = vrot.slane %v852_v44, 7  ;;  %v2576_v5 = vshll.u32 %v2314_v7, 16  ;;  %v2582_v49 = vshll.u32 %v2315_v40, 16  ;;  %3861 = vst.msk [vmem:[#allocation3 + $0x20] sm:$0xff] %vm3856_vm3, %v3817_v54  ;;  %v499_v44 = vld [vmem:[#allocation2 + $0xa8] sm:$0x1] }
 0x129   : > { %v849_v0 = vor.u32 %v847_v52, %v846_v26  ;;  %v850_v36 = vrot.slane %v846_v26, 4  ;;  %v2575_v29 = vrot.slane %v2573_v18, 4  ;;  %v2586_v22 = vshrl.u32 %v2315_v40, 16  ;;  %v10153_v18 = vld [vmem:[#allocation2 + $0x78] sm:$0xff]  }
 0x12a   : > { %1740 = vrot.lane.b32.xlu1 %v9645_v62, %s10284_s10  ;;  %v9677_v33 = vcombine.low %v1962_v25, %v1965_v58  ;;  %v857_v24 = vor.u32 %v855_v55, %v11386_v4  ;;  %v2578_v9 = vrot.slane %v2576_v5, 5  ;;  %v2584_v48 = vrot.slane %v2582_v49, 5  ;;  %v3274_v63 = vpop.permute.xlu1 %3273  ;;  %v549_v55 = vld [vmem:[#allocation2 + $0xb0] sm:$0x1]  ;;  %v333_v5 = vld [vmem:[%s10429_s21 + $0xe0] sm:$0xff]  ;;  %v334_v49 = vld [vmem:[%s10429_s21 + $0xe8] sm:$0xff] }
 0x12b   : > { %v2588_v17 = vrot.slane %v2586_v22, 4  ;;  %v2592_v30 = vshll.u32 %v2316_v42, 16  ;;  %v544_v3 = vsel %vm10410_vm7, 0, %v543_v39  ;;  %v9724_v45 = vrot.slane %v2859_v38, 9  ;;  %v1055_v14 = vld [vmem:[#allocation2 + $0x90] sm:$0xf] }
 0x12c   : > { %2239 = vrot.lane.b32.xlu0 %v10135_v21, %s10285_s12  ;;  %v858_v6 = vsel %vm10493_vm15, %v850_v36, %v857_v24  ;;  %v2579_v15 = vor.u32 %v2578_v9, %v2575_v29  ;;  %545 = vst [vmem:[#allocation2 + $0x98] sm:$0x1] %v544_v3  ;;  %v2997_v61 = vrot.slane %v2860_v16, 5  ;;  %v3000_v13 = vrot.slane %v2861_v8, 5  ;;  %9979 = vmatmul.mubr.msk.bf16.gmra.mrb[4].mxu0 %vm4230_vm4, %v4197_v10  ;;  %v10154_v38 = vld [vmem:[#allocation2 + $0x84] sm:$0xff]  }
 0x12d   : > { %vm13444_vm9 = vcmask 228544   ;;  %v1056_v27 = vsel %vm10482_vm14, %v849_v0, %v1055_v14  ;;  %1058 = vst.msk [vmem:[#allocation2 + $0x94] sm:$0xf] %vm447_vm0, %v858_v6  ;;  %v2589_v57 = vor.u32 %v2588_v17, %v2584_v48  ;;  %v2594_v60 = vrot.slane %v2592_v30, 5 }
 0x12e   : > { %3317 = vst.msk [vmem:[#allocation3 + $0x28] sm:$0xff] %vm13444_vm9, %v3274_v63  ;;  %v439_v34 = vmax.f32 %v11261_v41, 0.0  ;;  %2064 = vrot.lane.b32.xlu1 %v9677_v33, %s10283_s26  ;;  %1057 = vst [vmem:[#allocation2 + $0x90] sm:$0xf] %v1056_v27  ;;  %v2580_v37 = vrot.slane %v2579_v15, 4  ;;  %v2999_v7 = vrot.slane %v2997_v61, 4  ;;  %v11407_v53 = vadd.f32 %v11363_v31, %v11279_v56  ;;  %v4138_v41 = vpop.permute.xlu0 %4137  ;;  %v3819_v26 = vpop.permute.xlu1 %3818 }
 0x12f   : > { %v440_v35 = vmax.f32 %v11267_v20, 0.0  ;;  %v2590_v46 = vrot.slane %v2589_v57, 4  ;;  %v497_v52 = vsel %vm10401_vm5, 0, %v496_v59  ;;  %v547_v43 = vsel %vm10410_vm7, 0, %v546_v47  ;;  %4182 = vst.msk [vmem:[#allocation3 + $0x20] sm:$0xff] %vm4177_vm2, %v4138_v41 }
 0x130   : > { %v9926_v40 = vpack.c.bf16 %v439_v34, %v439_v34  ;;  %v859_v12 = vrot.slane %v11386_v4, 4  ;;  %v2585_v25 = vsel %vm10461_vm13, %v2580_v37, %v2584_v48  ;;  %v2998_v20 = vsel %vm10422_vm10, %v9724_v45, %v2997_v61  ;;  %498 = vst [vmem:[#allocation2 + $0x9c] sm:$0x1] %v497_v52  ;;  %548 = vst [vmem:[#allocation2 + $0xa4] sm:$0x1] %v547_v43 }
 0x131   : > { %v11418_v56 = vpack.c.bf16 %v440_v35, %v440_v35  ;;  %v2595_v42 = vsel %vm10461_vm13, %v2590_v46, %v2594_v60  ;;  %v3001_v39 = vsel %vm10422_vm10, %v2999_v7, %v3000_v13  ;;  %v441_v4 = vmax.f32 %v11367_v51, 0.0  ;;  %3862 = vst.msk [vmem:[#allocation3 + $0x28] sm:$0xff] %vm3856_vm3, %v3819_v26  ;;  %v11450_v45 = vld [vmem:[%s13408_s1] ss:$0 sm:$0xff] }
 0x132   : > { %v861_v32 = vshrl.u32 %v9926_v40, 16  ;;  %v864_v58 = vshll.u32 %v9926_v40, 16  ;;  %v9708_v19 = vcombine.low %v2585_v25, %v2595_v42  ;;  %v442_v36 = vmax.f32 %v11407_v53, 0.0  ;;  %v4140_v8 = vpop.permute.xlu0 %4139  ;;  %v1731_v63 = vpop.permute.xlu1 %1730 }
 0x133   : > { %v869_v62 = vshrl.u32 %v11418_v56, 16  ;;  %v872_v21 = vshll.u32 %v11418_v56, 16  ;;  %v1059_v16 = vld [vmem:[#allocation2 + $0x98] sm:$0x1]  ;;  %v500_v29 = vsel %vm10401_vm5, 0, %v499_v44  ;;  %v550_v22 = vsel %vm10410_vm7, 0, %v549_v55 }
 0x134   : > { %v11431_v0 = vrot.slane %v861_v32, 7  ;;  %vm13445_vm9 = vcmask 31744   ;;  %2784 = vrot.lane.b32.xlu0 %v9708_v19, %s10289_s19  ;;  %v1060_v10 = vsel %vm10401_vm5, %v859_v12, %v1059_v16  ;;  %v2318_v33 = vld [vmem:[#allocation2 + $0x94] sm:$0xf]  ;;  %v9740_v24 = vcombine.low %v2998_v20, %v3001_v39  ;;  %501 = vst [vmem:[#allocation2 + $0xa8] sm:$0x1] %v500_v29 }
 0x135   : > { %1229 = vst.msk [vmem:[#allocation3 + $0x50] sm:$0xff] %vm13445_vm9, %v10153_v18  ;;  %vm13446_vm1 = vmmov %vm13445_vm9  ;;  %v11443_v9 = vld [vmem:[#allocation2 + $0x94] sm:$0xf]  ;;  %v2317_v17 = vld [vmem:[#allocation2 + $0x90] sm:$0xf]  ;;  %v2606_v30 = vshll.u32 %v2318_v33, 16  ;;  %v372_v59 = vmul.f32 %v11450_v45, %v333_v5  ;;  %v373_v27 = vmul.f32 %v11450_v45, %v334_v49  ;;  %v11473_v16 = vpack.c.bf16 %v441_v4, %v441_v4 }
 0x136   : > { %1230 = vst.msk [vmem:[#allocation3 + $0x58] sm:$0xff] %vm13446_vm1, %v10154_v38  ;;  %551 = vst [vmem:[#allocation2 + $0xb0] sm:$0x1] %v550_v22  ;;  %v10136_v48 = vld [vmem:[#allocation2 + $0x90] sm:$0xff]   ;;  %v866_v3 = vor.u32 %v864_v58, %v11431_v0  ;;  %v2597_v54 = vshrl.u32 %v2317_v17, 16  ;;  %v2600_v6 = vshll.u32 %v2317_v17, 16  ;;  %v2055_v12 = vpop.permute.xlu0 %2054 }
 0x137   : > { %4183 = vst.msk [vmem:[#allocation3 + $0x28] sm:$0xff] %vm4177_vm2, %v4140_v8  ;;  %1061 = vst [vmem:[#allocation2 + $0x98] sm:$0x1] %v1060_v10  ;;  %v2610_v14 = vshrl.u32 %v2318_v33, 16  ;;  %v2862_v15 = vld [vmem:[#allocation2 + $0x90] sm:$0xe]  ;;  %2241 = vrot.lane.b32.xlu1 %v10136_v48, %s10285_s12  ;;  %v11462_v41 = vadd.f32 %v11363_v31, %v372_v59 }
 0x138   : > { %v3004_v61 = vrot.slane %v11443_v9, 5  ;;  %1773 = vst.msk [vmem:[#allocation3 + $0x30] sm:$0xff] %vm1766_vm6, %v1731_v63  ;;  %v11456_v13 = vrot.slane %v2606_v30, 5  ;;  %v9725_v47 = vrot.slane %v2862_v15, 9  ;;  %v2599_v57 = vrot.slane %v2597_v54, 4  ;;  %3105 = vrot.lane.b32.xlu0 %v9740_v24, %s10287_s17  ;;  %v10139_v7 = vld [vmem:[#allocation2 + $0x90] sm:$0xff]  }
 0x139   : > { %v2602_v60 = vrot.slane %v2600_v6, 5  ;;  %v2612_v34 = vrot.slane %v2610_v14, 4  ;;  %v4198_v35 = vld [vmem:[#allocation3 + $0x20] sm:$0xff]  ;;  %v867_v46 = vrot.slane %v11431_v0, 4  ;;  %v871_v52 = vrot.slane %v869_v62, 7  ;;  %2097 = vst.msk [vmem:[#allocation3 + $0x30] sm:$0xff] %vm2090_vm8, %v2055_v12 }
 0x13a   : > { %v3006_v37 = vrot.slane %v3004_v61, 4  ;;  %v1062_v40 = vld [vmem:[#allocation2 + $0x9c] sm:$0xf]  ;;  %v3358_v43 = vld [vmem:[#allocation2 + $0x90] sm:$0xf]  ;;  %9982 = vmatprep.mubr.msk.bf16.mxu0 %vm4230_vm4, %v4198_v35  ;;  %v11476_v0 = vadd.f32 %v11363_v31, %v373_v27  ;;  %v2232_v24 = vpop.permute.xlu0 %2231  ;;  %v11484_v51 = vsel %vm10422_vm10, %v9725_v47, %v3004_v61  ;;  %vm13447_vm1 = vcmask 130144  }
 0x13b   : > { %v2603_v25 = vor.u32 %v2602_v60, %v2599_v57  ;;  %v2613_v20 = vor.u32 %v2612_v34, %v11456_v13  ;;  %v1063_v56 = vsel %vm10482_vm14, %v866_v3, %v1062_v40  ;;  %v3359_v44 = vld [vmem:[#allocation2 + $0x94] sm:$0xf]  ;;  %v3617_v55 = vshrl.u32 %v3358_v43, 16  ;;  %v1066_v42 = vld [vmem:[#allocation2 + $0xa4] sm:$0x1]  ;;  %2274 = vst.msk [vmem:[#allocation3 + $0x30] sm:$0xff] %vm13447_vm1, %v2232_v24  ;;  %vm13448_vm9 = vmmov %vm13447_vm1 }
 0x13c   : > { %v874_v39 = vor.u32 %v872_v21, %v871_v52  ;;  %v876_v32 = vrot.slane %v871_v52, 4  ;;  %1064 = vst [vmem:[#allocation2 + $0x9c] sm:$0xf] %v1063_v56  ;;  %v3620_v58 = vshll.u32 %v3358_v43, 16  ;;  %v3626_v26 = vshll.u32 %v3359_v44, 16  ;;  %3283 = vrot.lane.b32.xlu0 %v10139_v7, %s10286_s13  ;;  %v1733_v21 = vpop.permute.xlu1 %1732 }
 0x13d   : > { %v3903_v18 = vld [vmem:[#allocation2 + $0x90] sm:$0xe]  ;;  %v2604_v62 = vrot.slane %v2603_v25, 4  ;;  %v2614_v5 = vrot.slane %v2613_v20, 4  ;;  %v3619_v33 = vrot.slane %v3617_v55, 4  ;;  %1774 = vst.msk [vmem:[#allocation3 + $0x38] sm:$0xff] %vm1766_vm6, %v1733_v21 }
 0x13e   : > { %v4199_v38 = vld [vmem:[#allocation3 + $0x28] sm:$0xff]  ;;  %v2319_v19 = vld [vmem:[#allocation2 + $0x98] sm:$0x1]  ;;  %v875_v8 = vsel %vm10493_vm15, %v867_v46, %v874_v39  ;;  %v3622_v4 = vrot.slane %v3620_v58, 5  ;;  %v3628_v9 = vrot.slane %v3626_v26, 5  ;;  %v3630_v48 = vshrl.u32 %v3359_v44, 16 }
 0x13f   : > { %v2864_v49 = vld [vmem:[#allocation2 + $0x98] sm:$0x1]  ;;  %9983 = vmatmul.mubr.msk.bf16.gmra.mrb[8].mxu0 %vm4230_vm4, %v4199_v38  ;;  %v2616_v29 = vshll.u32 %v2319_v19, 16  ;;  %1065 = vst.msk [vmem:[#allocation2 + $0xa0] sm:$0xf] %vm447_vm0, %v875_v8  ;;  %v2609_v30 = vsel %vm10461_vm13, %v2604_v62, %v11456_v13  ;;  %v1067_v63 = vsel %vm10401_vm5, %v876_v32, %v1066_v42  ;;  %v9788_v47 = vrot.slane %v3903_v18, 9 }
 0x140   : > { %v3007_v22 = vrot.slane %v2864_v49, 5  ;;  %v3360_v10 = vld [vmem:[#allocation2 + $0x98] sm:$0x1]  ;;  %v3904_v17 = vld [vmem:[#allocation2 + $0x94] sm:$0xf]  ;;  %v3623_v15 = vor.u32 %v3622_v4, %v3619_v33  ;;  %v3632_v61 = vrot.slane %v3630_v48, 4  ;;  %v2057_v27 = vpop.permute.xlu1 %2056  ;;  %v11509_v62 = vpack.c.bf16 %v442_v36, %v442_v36 }
 0x141   : > { %v2618_v3 = vrot.slane %v2616_v29, 5  ;;  %v3636_v59 = vshll.u32 %v3360_v10, 16  ;;  %v3905_v54 = vld [vmem:[#allocation2 + $0x98] sm:$0x1]  ;;  %v1271_v6 = vld [vmem:[#allocation2 + $0x90] sm:$0xf] }
 0x142   : > { %v3008_v14 = vsel %vm10422_vm10, %v3006_v37, %v3007_v22  ;;  %1068 = vst [vmem:[#allocation2 + $0xa4] sm:$0x1] %v1067_v63  ;;  %v4041_v13 = vrot.slane %v3904_v17, 5  ;;  %v4044_v34 = vrot.slane %v3905_v54, 5  ;;  %2098 = vst.msk [vmem:[#allocation3 + $0x38] sm:$0xff] %vm2090_vm8, %v2057_v27  ;;  %v3624_v35 = vrot.slane %v3623_v15, 4  ;;  %v2777_v8 = vpop.permute.xlu0 %2776 }
 0x143   : > { %v2619_v57 = vsel %vm10461_vm13, %v2614_v5, %v2618_v3  ;;  %v3638_v60 = vrot.slane %v3636_v59, 5  ;;  %v3633_v46 = vor.u32 %v3632_v61, %v3628_v9  ;;  %v3361_v52 = vld [vmem:[#allocation2 + $0x9c] sm:$0xf]  ;;  %v1575_v40 = vshrl.u32 %v1271_v6, 16  ;;  %v1272_v20 = vld [vmem:[#allocation2 + $0x94] sm:$0xf] }
 0x144   : > { %v9709_v7 = vcombine.low %v2609_v30, %v2619_v57  ;;  %v9741_v37 = vcombine.low %v11484_v51, %v3008_v14  ;;  %v3641_v43 = vshrl.u32 %v3361_v52, 16  ;;  %v3644_v12 = vshll.u32 %v3361_v52, 16  ;;  %v1273_v42 = vld [vmem:[#allocation2 + $0x98] sm:$0x1]  ;;  %v2234_v32 = vpop.permute.xlu1 %2233  ;;  %v10155_v58 = vld [vmem:[#allocation2 + $0x90] sm:$0xff]   ;;  %2819 = vst.msk [vmem:[#allocation3 + $0x30] sm:$0xff] %vm2812_vm11, %v2777_v8 }
 0x145   : > { %v4043_v25 = vrot.slane %v4041_v13, 4  ;;  %v3629_v56 = vsel %vm10461_vm13, %v3624_v35, %v3628_v9  ;;  %v3634_v44 = vrot.slane %v3633_v46, 4  ;;  %v4042_v55 = vsel %vm10422_vm10, %v9788_v47, %v4041_v13  ;;  %2275 = vst.msk [vmem:[#allocation3 + $0x38] sm:$0xff] %vm13448_vm9, %v2234_v32  ;;  %v3906_v22 = vld [vmem:[#allocation2 + $0x9c] sm:$0xe] }
 0x146   : > { %2786 = vrot.lane.b32.xlu1 %v9709_v7, %s10289_s19  ;;  %v1578_v39 = vshll.u32 %v1271_v6, 16  ;;  %v3362_v26 = vld [vmem:[#allocation2 + $0xa0] sm:$0xf]  ;;  %v3643_v18 = vrot.slane %v3641_v43, 4  ;;  %v1577_v19 = vrot.slane %v1575_v40, 4  ;;  %v3646_v49 = vrot.slane %v3644_v12, 5 }
 0x147   : > { %v4045_v38 = vsel %vm10422_vm10, %v4043_v25, %v4044_v34  ;;  %v3639_v5 = vsel %vm10461_vm13, %v3634_v44, %v3638_v60  ;;  %v3650_v21 = vshll.u32 %v3362_v26, 16  ;;  %v3654_v29 = vshrl.u32 %v3362_v26, 16  ;;  %v10140_v10 = vld [vmem:[#allocation2 + $0x9c] sm:$0xff]   ;;  %v3098_v60 = vpop.permute.xlu0 %3097  ;;  %v1820_v26 = vld [vmem:[#allocation2 + $0x94] sm:$0xf] }
 0x148   : > { %vm13449_vm1 = vcmask 31744   ;;  %v9772_v33 = vcombine.low %v3629_v56, %v3639_v5  ;;  %v9804_v51 = vcombine.low %v4042_v55, %v4045_v38  ;;  %v1580_v53 = vrot.slane %v1578_v39, 5  ;;  %v1274_v36 = vld [vmem:[#allocation2 + $0x9c] sm:$0xf]  ;;  %v3907_v3 = vld [vmem:[#allocation2 + $0xa0] sm:$0xf] }
 0x149   : > { %1231 = vst.msk [vmem:[#allocation3 + $0x60] sm:$0xff] %vm13449_vm1, %v10155_v58  ;;  %v3363_v24 = vld [vmem:[#allocation2 + $0xa4] sm:$0x1]  ;;  %v1584_v4 = vshll.u32 %v1272_v20, 16  ;;  %v3647_v9 = vor.u32 %v3646_v49, %v3643_v18  ;;  %v3652_v48 = vrot.slane %v3650_v21, 5  ;;  %v3656_v17 = vrot.slane %v3654_v29, 4  ;;  %vm13450_vm9 = vmmov %vm13449_vm1 }
 0x14a   : > { %3107 = vrot.lane.b32.xlu1 %v9741_v37, %s10287_s17  ;;  %v3660_v30 = vshll.u32 %v3363_v24, 16  ;;  %v10156_v59 = vld [vmem:[#allocation2 + $0x9c] sm:$0xff]   ;;  %3828 = vrot.lane.b32.xlu0 %v9772_v33, %s10290_s20  ;;  %v1581_v63 = vor.u32 %v1580_v53, %v1577_v19  ;;  %v1588_v6 = vshrl.u32 %v1272_v20, 16  ;;  %v1594_v14 = vshll.u32 %v1273_v42, 16  ;;  %v3908_v15 = vld [vmem:[#allocation2 + $0xa4] sm:$0x1]  ;;  %v2779_v18 = vpop.permute.xlu1 %2778 }
 0x14b   : > { %v1586_v54 = vrot.slane %v1584_v4, 5  ;;  %v3648_v61 = vrot.slane %v3647_v9, 4  ;;  %v3657_v47 = vor.u32 %v3656_v17, %v3652_v48  ;;  %v9789_v57 = vrot.slane %v3906_v22, 9  ;;  %1232 = vst.msk [vmem:[#allocation3 + $0x68] sm:$0xff] %vm13450_vm9, %v10156_v59  ;;  %v1275_v46 = vld [vmem:[#allocation2 + $0xa0] sm:$0xf]  ;;  %v3276_v38 = vpop.permute.xlu0 %3275 }
 0x14c   : > { %v3662_v27 = vrot.slane %v3660_v30, 5  ;;  %v1582_v13 = vrot.slane %v1581_v63, 4  ;;  %v1590_v34 = vrot.slane %v1588_v6, 4  ;;  %v1596_v7 = vrot.slane %v1594_v14, 5  ;;  %3140 = vst.msk [vmem:[#allocation3 + $0x30] sm:$0xff] %vm3133_vm12, %v3098_v60 }
 0x14d   : > { %v4048_v35 = vrot.slane %v3907_v3, 5  ;;  %v3653_v52 = vsel %vm10461_vm13, %v3648_v61, %v3652_v48  ;;  %v3658_v40 = vrot.slane %v3657_v47, 4  ;;  %v4051_v37 = vrot.slane %v3908_v15, 5  ;;  %v1276_v44 = vld [vmem:[#allocation2 + $0xa4] sm:$0x1]  ;;  %2820 = vst.msk [vmem:[#allocation3 + $0x38] sm:$0xff] %vm2812_vm11, %v2779_v18 }
 0x14e   : > { %3285 = vrot.lane.b32.xlu1 %v10140_v10, %s10286_s13  ;;  %v1599_v43 = vshrl.u32 %v1274_v36, 16  ;;  %4149 = vrot.lane.b32.xlu0 %v9804_v51, %s10288_s18  ;;  %v1587_v12 = vsel %vm10461_vm13, %v1582_v13, %v1586_v54  ;;  %v1591_v25 = vor.u32 %v1590_v34, %v1586_v54  ;;  %v1819_v55 = vld [vmem:[#allocation2 + $0x90] sm:$0xe]  ;;  %v1602_v32 = vshll.u32 %v1274_v36, 16  ;;  %v1821_v29 = vld [vmem:[#allocation2 + $0x98] sm:$0x1]  ;;  %v3100_v3 = vpop.permute.xlu1 %3099 }
 0x14f   : > { %v4049_v20 = vsel %vm10422_vm10, %v9789_v57, %v4048_v35  ;;  %v4050_v56 = vrot.slane %v4048_v35, 4  ;;  %v3663_v42 = vsel %vm10461_vm13, %v3658_v40, %v3662_v27  ;;  %v1608_v58 = vshll.u32 %v1275_v46, 16  ;;  %v1822_v30 = vld [vmem:[#allocation2 + $0x9c] sm:$0xe]  ;;  %v1823_v14 = vld [vmem:[#allocation2 + $0xa0] sm:$0xf] }
 0x150   : > { %v1601_v39 = vrot.slane %v1599_v43, 4  ;;  %v9773_v19 = vcombine.low %v3653_v52, %v3663_v42  ;;  %v1592_v5 = vrot.slane %v1591_v25, 4  ;;  %v1612_v21 = vshrl.u32 %v1275_v46, 16  ;;  %3141 = vst.msk [vmem:[#allocation3 + $0x38] sm:$0xff] %vm3133_vm12, %v3100_v3  ;;  %v1069_v57 = vld [vmem:[#allocation2 + $0xa8] sm:$0xf] }
 0x151   : > { %v4052_v49 = vsel %vm10422_vm10, %v4050_v56, %v4051_v37  ;;  %vm13451_vm1 = vcmask 228544   ;;  %v1604_v8 = vrot.slane %v1602_v32, 5  ;;  %v1610_v10 = vrot.slane %v1608_v58, 5  ;;  %v1824_v60 = vld [vmem:[#allocation2 + $0xa4] sm:$0x1] }
 0x152   : > { %3318 = vst.msk [vmem:[#allocation3 + $0x30] sm:$0xff] %vm13451_vm1, %v3276_v38  ;;  %v9805_v22 = vcombine.low %v4049_v20, %v4052_v49  ;;  %v1618_v33 = vshll.u32 %v1276_v44, 16  ;;  %3830 = vrot.lane.b32.xlu1 %v9773_v19, %s10290_s20  ;;  %v1597_v24 = vsel %vm10461_vm13, %v1592_v5, %v1596_v7  ;;  %v1614_v51 = vrot.slane %v1612_v21, 4  ;;  %v502_v46 = vld [vmem:[#allocation2 + $0xb4] sm:$0x1]  ;;  %v3278_v44 = vpop.permute.xlu1 %3277  ;;  %vm13452_vm9 = vmmov %vm13451_vm1 }
 0x153   : > { %v9662_v53 = vrot.slane %v1819_v55, 9  ;;  %v1968_v4 = vrot.slane %v1820_v26, 5  ;;  %v9646_v36 = vcombine.low %v1587_v12, %v1597_v24  ;;  %v1605_v9 = vor.u32 %v1604_v8, %v1601_v39  ;;  %v552_v52 = vld [vmem:[#allocation2 + $0xbc] sm:$0x1]  ;;  %v1073_v20 = vld [vmem:[#allocation2 + $0xb0] sm:$0x1] }
 0x154   : > { %4151 = vrot.lane.b32.xlu0 %v9805_v22, %s10288_s18  ;;  %v1620_v48 = vrot.slane %v1618_v33, 5  ;;  %v1971_v17 = vrot.slane %v1821_v29, 5  ;;  %v1615_v59 = vor.u32 %v1614_v51, %v1610_v10  ;;  %v878_v6 = vshrl.u32 %v11473_v16, 16  ;;  %v2320_v58 = vld [vmem:[#allocation2 + $0x9c] sm:$0xf]  ;;  %3319 = vst.msk [vmem:[#allocation3 + $0x38] sm:$0xff] %vm13452_vm9, %v3278_v44  ;;  %v3821_v26 = vpop.permute.xlu0 %3820 }
 0x155   : > { %v1969_v63 = vsel %vm10422_vm10, %v9662_v53, %v1968_v4  ;;  %v1970_v54 = vrot.slane %v1968_v4, 4  ;;  %v1606_v15 = vrot.slane %v1605_v9, 4  ;;  %v881_v61 = vshll.u32 %v11473_v16, 16  ;;  %v2321_v49 = vld [vmem:[#allocation2 + $0xa0] sm:$0xf]  ;;  %3863 = vst.msk [vmem:[#allocation3 + $0x30] sm:$0xff] %vm3856_vm3, %v3821_v26 }
 0x156   : > { %v886_v47 = vshrl.u32 %v11509_v62, 16  ;;  %v889_v27 = vshll.u32 %v11509_v62, 16  ;;  %1742 = vrot.lane.b32.xlu1 %v9646_v36, %s10284_s10  ;;  %v1616_v13 = vrot.slane %v1615_v59, 4  ;;  %v880_v7 = vrot.slane %v878_v6, 7  ;;  %v11573_v3 = vld [vmem:[#allocation2 + $0xa4] sm:$0x1] }
 0x157   : > { %v1972_v34 = vsel %vm10422_vm10, %v1970_v54, %v1971_v17  ;;  %v9663_v35 = vrot.slane %v1822_v30, 9  ;;  %v1611_v40 = vsel %vm10461_vm13, %v1606_v15, %v1610_v10  ;;  %v1975_v43 = vrot.slane %v1823_v14, 5  ;;  %v335_v6 = vld [vmem:[%s10429_s21 + $0xf0] sm:$0xff]  ;;  %v336_v14 = vld [vmem:[%s10429_s21 + $0xf8] sm:$0xff] }
 0x158   : > { %v9678_v16 = vcombine.low %v1969_v63, %v1972_v34  ;;  %v888_v37 = vrot.slane %v886_v47, 7  ;;  %v1621_v62 = vsel %vm10461_vm13, %v1616_v13, %v1620_v48  ;;  %v883_v12 = vor.u32 %v881_v61, %v880_v7  ;;  %v4142_v36 = vpop.permute.xlu0 %4141 }
 0x159   : > { %v884_v25 = vrot.slane %v880_v7, 4  ;;  %v1978_v56 = vrot.slane %v1824_v60, 5  ;;  %v9647_v55 = vcombine.low %v1611_v40, %v1621_v62  ;;  %v1976_v32 = vsel %vm10422_vm10, %v9663_v35, %v1975_v43  ;;  %4184 = vst.msk [vmem:[#allocation3 + $0x30] sm:$0xff] %vm4177_vm2, %v4142_v36  ;;  %v11586_v62 = vld [vmem:[#allocation2 + $0xa0] sm:$0xf] }
 0x15a   : > { %2066 = vrot.lane.b32.xlu0 %v9678_v16, %s10283_s26  ;;  %v891_v42 = vor.u32 %v889_v27, %v888_v37  ;;  %v893_v39 = vrot.slane %v888_v37, 4  ;;  %v1070_v18 = vsel %vm10482_vm14, %v883_v12, %v1069_v57  ;;  %v1977_v38 = vrot.slane %v1975_v43, 4  ;;  %v11584_v43 = vld [vmem:[#allocation2 + $0x9c] sm:$0xe] }
 0x15b   : > { %v443_v19 = vmax.f32 %v11462_v41, 0.0  ;;  %v444_v5 = vmax.f32 %v11476_v0, 0.0  ;;  %1744 = vrot.lane.b32.xlu1 %v9647_v55, %s10284_s10  ;;  %1071 = vst [vmem:[#allocation2 + $0xa8] sm:$0xf] %v1070_v18  ;;  %v503_v22 = vsel %vm10401_vm5, 0, %v502_v46  ;;  %v553_v41 = vsel %vm10410_vm7, 0, %v552_v52 }
 0x15c   : > { %v892_v21 = vsel %vm10493_vm15, %v884_v25, %v891_v42  ;;  %v1074_v29 = vsel %vm10401_vm5, %v893_v39, %v1073_v20  ;;  %v1979_v0 = vsel %vm10422_vm10, %v1977_v38, %v1978_v56  ;;  %504 = vst [vmem:[#allocation2 + $0xb4] sm:$0x1] %v503_v22  ;;  %554 = vst [vmem:[#allocation2 + $0xbc] sm:$0x1] %v553_v41  ;;  %v2621_v33 = vshrl.u32 %v2320_v58, 16 }
 0x15d   : > { %1072 = vst.msk [vmem:[#allocation2 + $0xac] sm:$0xf] %vm447_vm0, %v892_v21  ;;  %1075 = vst [vmem:[#allocation2 + $0xb0] sm:$0x1] %v1074_v29  ;;  %v9930_v8 = vpack.c.bf16 %v443_v19, %v443_v19  ;;  %v9931_v10 = vpack.c.bf16 %v444_v5, %v444_v5  ;;  %v9679_v24 = vcombine.low %v1976_v32, %v1979_v0  ;;  %v2624_v51 = vshll.u32 %v2320_v58, 16  ;;  %v4144_v20 = vpop.permute.xlu0 %4143 }
 0x15e   : > { %v2630_v53 = vshll.u32 %v2321_v49, 16  ;;  %v2634_v4 = vshrl.u32 %v2321_v49, 16  ;;  %v2623_v54 = vrot.slane %v2621_v33, 4  ;;  %v2640_v27 = vshll.u32 %v11573_v3, 16  ;;  %v3823_v46 = vpop.permute.xlu1 %3822  ;;  %v11601_v22 = vld [vmem:[#allocation2 + $0xa4] sm:$0x1] }
 0x15f   : > { %v895_v9 = vshrl.u32 %v9930_v8, 16  ;;  %v898_v48 = vshll.u32 %v9930_v8, 16  ;;  %v903_v17 = vshrl.u32 %v9931_v10, 16  ;;  %v906_v30 = vshll.u32 %v9931_v10, 16  ;;  %2068 = vrot.lane.b32.xlu0 %v9679_v24, %s10283_s26  ;;  %3864 = vst.msk [vmem:[#allocation3 + $0x38] sm:$0xff] %vm3856_vm3, %v3823_v46 }
 0x160   : > { %v2626_v15 = vrot.slane %v2624_v51, 5  ;;  %v11579_v61 = vrot.slane %v2630_v53, 5  ;;  %v11581_v47 = vrot.slane %v2634_v4, 4  ;;  %v374_v12 = vmul.f32 %v11450_v45, %v335_v6  ;;  %4185 = vst.msk [vmem:[#allocation3 + $0x38] sm:$0xff] %vm4177_vm2, %v4144_v20  ;;  %v4200_v24 = vld [vmem:[#allocation3 + $0x30] sm:$0xff]  ;;  %v10141_v20 = vld [vmem:[#allocation2 + $0x9c] sm:$0xff]  }
 0x161   : > { %v897_v59 = vrot.slane %v895_v9, 7  ;;  %v905_v63 = vrot.slane %v903_v17, 7  ;;  %v375_v25 = vmul.f32 %v11450_v45, %v336_v14  ;;  %v9726_v4 = vrot.slane %v11584_v43, 9  ;;  %9986 = vmatprep.mubr.msk.bf16.mxu0 %vm4230_vm4, %v4200_v24 }
 0x162   : > { %v1277_v57 = vld [vmem:[#allocation2 + $0xa8] sm:$0xf]  ;;  %v2627_v38 = vor.u32 %v2626_v15, %v2623_v54  ;;  %v2637_v29 = vor.u32 %v11581_v47, %v11579_v61  ;;  %v1735_v41 = vpop.permute.xlu1 %1734  ;;  %v3011_v36 = vrot.slane %v11586_v62, 5  ;;  %v11617_v15 = vrot.slane %v2640_v27, 5 }
 0x163   : > { %v900_v60 = vor.u32 %v898_v48, %v897_v59  ;;  %v901_v13 = vrot.slane %v897_v59, 4  ;;  %v908_v34 = vor.u32 %v906_v30, %v905_v63  ;;  %v910_v7 = vrot.slane %v905_v63, 4  ;;  %v1825_v35 = vld [vmem:[#allocation2 + $0xa8] sm:$0xe]  ;;  %v1076_v39 = vld [vmem:[#allocation2 + $0xb4] sm:$0xf]  ;;  %v2059_v9 = vpop.permute.xlu0 %2058 }
 0x164   : > { %v1278_v52 = vld [vmem:[#allocation2 + $0xac] sm:$0xf]  ;;  %v1279_v40 = vld [vmem:[#allocation2 + $0xb0] sm:$0x1]  ;;  %v1623_v16 = vshrl.u32 %v1277_v57, 16  ;;  %v1626_v37 = vshll.u32 %v1277_v57, 16 }
 0x165   : > { %v1632_v56 = vshll.u32 %v1278_v52, 16  ;;  %v1636_v44 = vshrl.u32 %v1278_v52, 16  ;;  %v1642_v55 = vshll.u32 %v1279_v40, 16  ;;  %v909_v42 = vsel %vm10493_vm15, %v901_v13, %v908_v34  ;;  %v1080_v45 = vld [vmem:[#allocation2 + $0xbc] sm:$0x1]  ;;  %1775 = vst.msk [vmem:[#allocation3 + $0x40] sm:$0xff] %vm1766_vm6, %v1735_v41 }
 0x166   : > { %v1625_v32 = vrot.slane %v1623_v16, 4  ;;  %v1628_v58 = vrot.slane %v1626_v37, 5  ;;  %v1077_v26 = vsel %vm10482_vm14, %v900_v60, %v1076_v39  ;;  %1079 = vst.msk [vmem:[#allocation2 + $0xb8] sm:$0xf] %vm447_vm0, %v909_v42  ;;  %v1826_v18 = vld [vmem:[#allocation2 + $0xac] sm:$0xf]  ;;  %v1081_v49 = vsel %vm10401_vm5, %v910_v7, %v1080_v45  ;;  %v1737_v47 = vpop.permute.xlu1 %1736 }
 0x167   : > { %v1634_v19 = vrot.slane %v1632_v56, 5  ;;  %v1638_v5 = vrot.slane %v1636_v44, 4  ;;  %1078 = vst [vmem:[#allocation2 + $0xb4] sm:$0xf] %v1077_v26  ;;  %v1827_v21 = vld [vmem:[#allocation2 + $0xb0] sm:$0x1]  ;;  %v11630_v52 = vadd.f32 %v11363_v31, %v374_v12  ;;  %v11633_v40 = vadd.f32 %v11363_v31, %v375_v25  ;;  %v2236_v16 = vpop.permute.xlu0 %2235 }
 0x168   : > { %v1629_v0 = vor.u32 %v1628_v58, %v1625_v32  ;;  %1082 = vst [vmem:[#allocation2 + $0xbc] sm:$0x1] %v1081_v49  ;;  %v9664_v8 = vrot.slane %v1825_v35, 9  ;;  %v1982_v10 = vrot.slane %v1826_v18, 5  ;;  %v1985_v33 = vrot.slane %v1827_v21, 5  ;;  %v10157_v48 = vld [vmem:[#allocation2 + $0xa8] sm:$0xff]  }
 0x169   : > { %v1639_v51 = vor.u32 %v1638_v5, %v1634_v19  ;;  %v1644_v53 = vrot.slane %v1642_v55, 5  ;;  %v11607_v3 = vrot.slane %v2627_v38, 4  ;;  %v2323_v59 = vld [vmem:[#allocation2 + $0xa8] sm:$0xf]  ;;  %v3014_v63 = vrot.slane %v11601_v22, 5  ;;  %2099 = vst.msk [vmem:[#allocation3 + $0x40] sm:$0xff] %vm2090_vm8, %v2059_v9 }
 0x16a   : > { %v1630_v17 = vrot.slane %v1629_v0, 4  ;;  %v1984_v30 = vrot.slane %v1982_v10, 4  ;;  %v11613_v6 = vsel %vm10422_vm10, %v9664_v8, %v1982_v10  ;;  %v11615_v14 = vrot.slane %v2637_v29, 4  ;;  %1776 = vst.msk [vmem:[#allocation3 + $0x48] sm:$0xff] %vm1766_vm6, %v1737_v47  ;;  %v4201_v7 = vld [vmem:[#allocation3 + $0x38] sm:$0xff]  ;;  %v2061_v18 = vpop.permute.xlu1 %2060 }
 0x16b   : > { %v1640_v54 = vrot.slane %v1639_v51, 4  ;;  %vm13453_vm1 = vcmask 31744   ;;  %v2645_v13 = vshrl.u32 %v2323_v59, 16  ;;  %v2648_v34 = vshll.u32 %v2323_v59, 16  ;;  %9987 = vmatmul.mubr.msk.bf16.gmra.mrb[12].mxu0 %vm4230_vm4, %v4201_v7  ;;  %v2324_v32 = vld [vmem:[#allocation2 + $0xac] sm:$0xf] }
 0x16c   : > { %1233 = vst.msk [vmem:[#allocation3 + $0x70] sm:$0xff] %vm13453_vm1, %v10157_v48  ;;  %v1635_v57 = vsel %vm10461_vm13, %v1630_v17, %v1634_v19  ;;  %v11624_v60 = vsel %vm10422_vm10, %v1984_v30, %v1985_v33  ;;  %v2633_v42 = vsel %vm10461_vm13, %v11607_v3, %v11579_v61  ;;  %vm13454_vm9 = vcmask 130144   ;;  %v2325_v0 = vld [vmem:[#allocation2 + $0xb0] sm:$0x1]  ;;  %v505_v7 = vld [vmem:[#allocation2 + $0xc0] sm:$0x1] }
 0x16d   : > { %v1645_v35 = vsel %vm10461_vm13, %v1640_v54, %v1644_v53  ;;  %v1281_v27 = vld [vmem:[#allocation2 + $0xb8] sm:$0xf]  ;;  %2276 = vst.msk [vmem:[#allocation3 + $0x40] sm:$0xff] %vm13454_vm9, %v2236_v16  ;;  %v9680_v58 = vcombine.low %v11613_v6, %v11624_v60  ;;  %v2643_v26 = vsel %vm10461_vm13, %v11615_v14, %v11617_v15  ;;  %v2647_v33 = vrot.slane %v2645_v13, 4 }
 0x16e   : > { %v1829_v46 = vld [vmem:[#allocation2 + $0xb8] sm:$0xf]  ;;  %v9648_v37 = vcombine.low %v1635_v57, %v1645_v35  ;;  %v1280_v56 = vld [vmem:[#allocation2 + $0xb4] sm:$0xf]  ;;  %v1656_v44 = vshll.u32 %v1281_v27, 16  ;;  %v1660_v55 = vshrl.u32 %v1281_v27, 16  ;;  %v9710_v60 = vcombine.low %v2633_v42, %v2643_v26 }
 0x16f   : > { %v1828_v39 = vld [vmem:[#allocation2 + $0xb4] sm:$0xe]  ;;  %v1282_v12 = vld [vmem:[#allocation2 + $0xbc] sm:$0x1]  ;;  %v1647_v31 = vshrl.u32 %v1280_v56, 16  ;;  %v1650_v25 = vshll.u32 %v1280_v56, 16 }
 0x170   : > { %v1830_v45 = vld [vmem:[#allocation2 + $0xbc] sm:$0x1]  ;;  %1746 = vrot.lane.b32.xlu1 %v9648_v37, %s10284_s10  ;;  %v1658_v61 = vrot.slane %v1656_v44, 5  ;;  %v1662_v38 = vrot.slane %v1660_v55, 4  ;;  %v1666_v19 = vshll.u32 %v1282_v12, 16  ;;  %v9665_v5 = vrot.slane %v1828_v39, 9 }
 0x171   : > { %2100 = vst.msk [vmem:[#allocation3 + $0x48] sm:$0xff] %vm2090_vm8, %v2061_v18  ;;  %v1649_v49 = vrot.slane %v1647_v31, 4  ;;  %v1652_v21 = vrot.slane %v1650_v25, 5  ;;  %v1989_v29 = vrot.slane %v1829_v46, 5  ;;  %v1992_v41 = vrot.slane %v1830_v45, 5  ;;  %v10158_v51 = vld [vmem:[#allocation2 + $0xb4] sm:$0xff]   ;;  %v2781_v27 = vpop.permute.xlu0 %2780 }
 0x172   : > { %v1663_v8 = vor.u32 %v1662_v38, %v1658_v61  ;;  %v1668_v10 = vrot.slane %v1666_v19, 5  ;;  %v2650_v24 = vrot.slane %v2648_v34, 5  ;;  %v2654_v17 = vshll.u32 %v2324_v32, 16  ;;  %1234 = vst.msk [vmem:[#allocation3 + $0x78] sm:$0xff] %vm13453_vm1, %v10158_v51  ;;  %v2326_v35 = vld [vmem:[#allocation2 + $0xb4] sm:$0xf] }
 0x173   : > { %v1653_v53 = vor.u32 %v1652_v21, %v1649_v49  ;;  %v11651_v9 = vsel %vm10422_vm10, %v9665_v5, %v1989_v29  ;;  %v1991_v48 = vrot.slane %v1989_v29, 4  ;;  %v2658_v59 = vshrl.u32 %v2324_v32, 16  ;;  %v2327_v56 = vld [vmem:[#allocation2 + $0xb8] sm:$0xf]  ;;  %2821 = vst.msk [vmem:[#allocation3 + $0x40] sm:$0xff] %vm2812_vm11, %v2781_v27  ;;  %v10143_v39 = vld [vmem:[#allocation2 + $0xa8] sm:$0xff]  }
 0x174   : > { %2243 = vrot.lane.b32.xlu1 %v10141_v20, %s10285_s12  ;;  %v1664_v30 = vrot.slane %v1663_v8, 4  ;;  %v2651_v3 = vor.u32 %v2650_v24, %v2647_v33  ;;  %v2664_v54 = vshll.u32 %v2325_v0, 16  ;;  %v11659_v15 = vrot.slane %v2654_v17, 5  ;;  %v2328_v18 = vld [vmem:[#allocation2 + $0xbc] sm:$0x1] }
 0x175   : > { %v1654_v6 = vrot.slane %v1653_v53, 4  ;;  %v11657_v14 = vsel %vm10422_vm10, %v1991_v48, %v1992_v41  ;;  %v3013_v47 = vrot.slane %v3011_v36, 4  ;;  %v2660_v13 = vrot.slane %v2658_v59, 4  ;;  %v2238_v22 = vpop.permute.xlu1 %2237  ;;  %v2869_v21 = vld [vmem:[#allocation2 + $0xac] sm:$0xf] }
 0x176   : > { %v1669_v57 = vsel %vm10461_vm13, %v1664_v30, %v1668_v10  ;;  %v11671_v34 = vsel %vm10422_vm10, %v9726_v4, %v3011_v36  ;;  %v9681_v16 = vcombine.low %v11651_v9, %v11657_v14  ;;  %v2652_v37 = vrot.slane %v2651_v3, 4  ;;  %2277 = vst.msk [vmem:[#allocation3 + $0x48] sm:$0xff] %vm13454_vm9, %v2238_v22  ;;  %v2868_v10 = vld [vmem:[#allocation2 + $0xa8] sm:$0xe]  ;;  %v555_v33 = vld [vmem:[#allocation2 + $0xc8] sm:$0x1] }
 0x177   : > { %v1659_v46 = vsel %vm10461_vm13, %v1654_v6, %v1658_v61  ;;  %v445_v20 = vmax.f32 %v11630_v52, 0.0  ;;  %v2661_v62 = vor.u32 %v2660_v13, %v11659_v15  ;;  %v2666_v4 = vrot.slane %v2664_v54, 5  ;;  %v10145_v61 = vld [vmem:[#allocation2 + $0xb4] sm:$0xff]   ;;  %v2870_v17 = vld [vmem:[#allocation2 + $0xb0] sm:$0x1] }
 0x178   : > { %v9649_v43 = vcombine.low %v1659_v46, %v1669_v57  ;;  %2070 = vrot.lane.b32.xlu1 %v9680_v58, %s10283_s26  ;;  %v11685_v36 = vsel %vm10422_vm10, %v3013_v47, %v3014_v63  ;;  %v446_v44 = vmax.f32 %v11633_v40, 0.0  ;;  %v506_v52 = vsel %vm10401_vm5, 0, %v505_v7  ;;  %v3102_v58 = vpop.permute.xlu0 %3101  ;;  %v2871_v30 = vld [vmem:[#allocation2 + $0xb4] sm:$0xe]  ;;  %v2872_v47 = vld [vmem:[#allocation2 + $0xb8] sm:$0xf] }
 0x179   : > { %v9932_v55 = vpack.c.bf16 %v445_v20, %v445_v20  ;;  %v2669_v42 = vshrl.u32 %v2326_v35, 16  ;;  %v2662_v32 = vrot.slane %v2661_v62, 4  ;;  %507 = vst [vmem:[#allocation2 + $0xc0] sm:$0x1] %v506_v52  ;;  %v2672_v12 = vshll.u32 %v2326_v35, 16  ;;  %3142 = vst.msk [vmem:[#allocation3 + $0x40] sm:$0xff] %vm3133_vm12, %v3102_v58 }
 0x17a   : > { %1748 = vrot.lane.b32.xlu0 %v9649_v43, %s10284_s10  ;;  %v2678_v31 = vshll.u32 %v2327_v56, 16  ;;  %v2682_v25 = vshrl.u32 %v2327_v56, 16  ;;  %v9933_v26 = vpack.c.bf16 %v446_v44, %v446_v44  ;;  %v2657_v38 = vsel %vm10461_vm13, %v2652_v37, %v11659_v15  ;;  %v2873_v57 = vld [vmem:[#allocation2 + $0xbc] sm:$0x1]  ;;  %v3365_v27 = vld [vmem:[#allocation2 + $0xac] sm:$0xf] }
 0x17b   : > { %v912_v63 = vshrl.u32 %v9932_v55, 16  ;;  %v915_v45 = vshll.u32 %v9932_v55, 16  ;;  %v2671_v40 = vrot.slane %v2669_v42, 4  ;;  %v2674_v19 = vrot.slane %v2672_v12, 5  ;;  %v3366_v46 = vld [vmem:[#allocation2 + $0xb0] sm:$0x1] }
 0x17c   : > { %2788 = vrot.lane.b32.xlu1 %v9710_v60, %s10289_s19  ;;  %v2680_v5 = vrot.slane %v2678_v31, 5  ;;  %v2684_v49 = vrot.slane %v2682_v25, 4  ;;  %v2667_v29 = vsel %vm10461_vm13, %v2662_v32, %v2666_v4  ;;  %v920_v0 = vshrl.u32 %v9933_v26, 16  ;;  %v3280_v3 = vpop.permute.xlu0 %3279  ;;  %v3364_v60 = vld [vmem:[#allocation2 + $0xa8] sm:$0xf] }
 0x17d   : > { %v914_v41 = vrot.slane %v912_v63, 7  ;;  %v923_v8 = vshll.u32 %v9933_v26, 16  ;;  %v9742_v24 = vcombine.low %v11671_v34, %v11685_v36  ;;  %v2675_v51 = vor.u32 %v2674_v19, %v2671_v40  ;;  %v3367_v28 = vld [vmem:[#allocation2 + $0xb4] sm:$0xf]  ;;  %v10147_v19 = vld [vmem:[#allocation2 + $0xa8] sm:$0xff]  }
 0x17e   : > { %2245 = vrot.lane.b32.xlu0 %v10143_v39, %s10285_s12  ;;  %v2685_v53 = vor.u32 %v2684_v49, %v2680_v5  ;;  %v2688_v48 = vshll.u32 %v2328_v18, 16  ;;  %v11702_v6 = vrot.slane %v920_v0, 7  ;;  %v3018_v15 = vrot.slane %v2869_v21, 5 }
 0x17f   : > { %v917_v59 = vor.u32 %v915_v45, %v914_v41  ;;  %v918_v54 = vrot.slane %v914_v41, 4  ;;  %vm13455_vm1 = vcmask 228544   ;;  %v9711_v13 = vcombine.low %v2657_v38, %v2667_v29  ;;  %v3368_v45 = vld [vmem:[#allocation2 + $0xb8] sm:$0xf] }
 0x180   : > { %3320 = vst.msk [vmem:[#allocation3 + $0x40] sm:$0xff] %vm13455_vm1, %v3280_v3  ;;  %2247 = vrot.lane.b32.xlu1 %v10145_v61, %s10285_s12  ;;  %v2676_v34 = vrot.slane %v2675_v51, 4  ;;  %v2686_v7 = vrot.slane %v2685_v53, 4  ;;  %v2690_v35 = vrot.slane %v2688_v48, 5  ;;  %v925_v37 = vor.u32 %v923_v8, %v11702_v6  ;;  %v1083_v20 = vld [vmem:[#allocation2 + $0xc0] sm:$0xf] }
 0x181   : > { %v9727_v56 = vrot.slane %v2868_v10, 9  ;;  %v3020_v43 = vrot.slane %v3018_v15, 4  ;;  %v3021_v62 = vrot.slane %v2870_v17, 5  ;;  %v1084_v4 = vsel %vm10482_vm14, %v917_v59, %v1083_v20 }
 0x182   : > { %2072 = vrot.lane.b32.xlu0 %v9681_v16, %s10283_s26  ;;  %v2681_v36 = vsel %vm10461_vm13, %v2676_v34, %v2680_v5  ;;  %v2691_v44 = vsel %vm10461_vm13, %v2686_v7, %v2690_v35  ;;  %v556_v52 = vsel %vm10410_vm7, 0, %v555_v33  ;;  %v926_v55 = vsel %vm10493_vm15, %v918_v54, %v925_v37  ;;  %1085 = vst [vmem:[#allocation2 + $0xc0] sm:$0xf] %v1084_v4 }
 0x183   : > { %v927_v42 = vrot.slane %v11702_v6, 4  ;;  %557 = vst [vmem:[#allocation2 + $0xc8] sm:$0x1] %v556_v52  ;;  %v9728_v9 = vrot.slane %v2871_v30, 9  ;;  %1086 = vst.msk [vmem:[#allocation2 + $0xc4] sm:$0xf] %vm447_vm0, %v926_v55  ;;  %v9712_v23 = vcombine.low %v2681_v36, %v2691_v44  ;;  %v2783_v32 = vpop.permute.xlu1 %2782  ;;  %v3019_v22 = vsel %vm10422_vm10, %v9727_v56, %v3018_v15 }
 0x184   : > { %3109 = vrot.lane.b32.xlu1 %v9742_v24, %s10287_s17  ;;  %v3025_v14 = vrot.slane %v2872_v47, 5  ;;  %v3028_v16 = vrot.slane %v2873_v57, 5  ;;  %v3665_v39 = vshrl.u32 %v3364_v60, 16  ;;  %v3668_v12 = vshll.u32 %v3364_v60, 16  ;;  %2822 = vst.msk [vmem:[#allocation3 + $0x48] sm:$0xff] %vm2812_vm11, %v2783_v32  ;;  %vm13456_vm0 = vmmov %vm13455_vm1 }
 0x185   : > { %v3674_v2 = vshll.u32 %v3365_v27, 16  ;;  %v3678_v31 = vshrl.u32 %v3365_v27, 16  ;;  %v3684_v25 = vshll.u32 %v3366_v46, 16  ;;  %v3022_v58 = vsel %vm10422_vm10, %v3020_v43, %v3021_v62  ;;  %vm13463_vm1 = vmmov %vm13456_vm0 }
 0x186   : > { %2790 = vrot.lane.b32.xlu0 %v9711_v13, %s10289_s19  ;;  %v3027_v26 = vrot.slane %v3025_v14, 4  ;;  %v3667_v63 = vrot.slane %v3665_v39, 4  ;;  %v3026_v18 = vsel %vm10422_vm10, %v9728_v9, %v3025_v14  ;;  %v3670_v40 = vrot.slane %v3668_v12, 5  ;;  %v3911_v12 = vld [vmem:[#allocation2 + $0xb0] sm:$0x1] }
 0x187   : > { %v3676_v61 = vrot.slane %v3674_v2, 5  ;;  %v3680_v38 = vrot.slane %v3678_v31, 4  ;;  %v3686_v49 = vrot.slane %v3684_v25, 5  ;;  %v3689_v21 = vshrl.u32 %v3367_v28, 16  ;;  %v3104_v41 = vpop.permute.xlu1 %3103 }
 0x188   : > { %2792 = vrot.lane.b32.xlu1 %v9712_v23, %s10289_s19  ;;  %v3029_v5 = vsel %vm10422_vm10, %v3027_v26, %v3028_v16  ;;  %v3692_v29 = vshll.u32 %v3367_v28, 16  ;;  %v3671_v0 = vor.u32 %v3670_v40, %v3667_v63  ;;  %v3698_v10 = vshll.u32 %v3368_v45, 16  ;;  %3143 = vst.msk [vmem:[#allocation3 + $0x48] sm:$0xff] %vm3133_vm12, %v3104_v41  ;;  %v3909_v23 = vld [vmem:[#allocation2 + $0xa8] sm:$0xe] }
 0x189   : > { %v3681_v8 = vor.u32 %v3680_v38, %v3676_v61  ;;  %v3702_v33 = vshrl.u32 %v3368_v45, 16  ;;  %v2329_v51 = vld [vmem:[#allocation2 + $0xc0] sm:$0xf]  ;;  %v9743_v48 = vcombine.low %v3019_v22, %v3022_v58  ;;  %v9744_v59 = vcombine.low %v3026_v18, %v3029_v5  ;;  %v3910_v16 = vld [vmem:[#allocation2 + $0xac] sm:$0xf] }
 0x18a   : > { %v1087_v24 = vld [vmem:[#allocation2 + $0xc8] sm:$0x1]  ;;  %v10146_v53 = vld [vmem:[#allocation2 + $0xc0] sm:$0xff]   ;;  %v2693_v3 = vshrl.u32 %v2329_v51, 16  ;;  %v2696_v54 = vshll.u32 %v2329_v51, 16  ;;  %v3672_v47 = vrot.slane %v3671_v0, 4  ;;  %v3825_v27 = vpop.permute.xlu0 %3824 }
 0x18b   : > { %v1088_v17 = vsel %vm10401_vm5, %v927_v42, %v1087_v24  ;;  %v2330_v30 = vld [vmem:[#allocation2 + $0xc4] sm:$0xf]  ;;  %v2874_v57 = vld [vmem:[#allocation2 + $0xc0] sm:$0xe]  ;;  %v3282_v60 = vpop.permute.xlu1 %3281  ;;  %2249 = vrot.lane.b32.xlu0 %v10146_v53, %s10285_s12  ;;  %v3682_v34 = vrot.slane %v3681_v8, 4  ;;  %v3691_v1 = vrot.slane %v3689_v21, 4  ;;  %vm13457_vm5 = vmmov %vm13454_vm9 }
 0x18c   : > { %3287 = vrot.lane.b32.xlu1 %v10147_v19, %s10286_s13  ;;  %1089 = vst [vmem:[#allocation2 + $0xc8] sm:$0x1] %v1088_v17  ;;  %v2702_v6 = vshll.u32 %v2330_v30, 16  ;;  %v2706_v15 = vshrl.u32 %v2330_v30, 16  ;;  %v2695_v13 = vrot.slane %v2693_v3, 4  ;;  %v9729_v35 = vrot.slane %v2874_v57, 9  ;;  %vm13458_vm14 = vmmov %vm13457_vm5 }
 0x18d   : > { %v2875_v7 = vld [vmem:[#allocation2 + $0xc4] sm:$0xf]  ;;  %3321 = vst.msk [vmem:[#allocation3 + $0x48] sm:$0xff] %vm13456_vm0, %v3282_v60  ;;  %v2698_v46 = vrot.slane %v2696_v54, 5  ;;  %v3677_v56 = vsel %vm10461_vm13, %v3672_v47, %v3676_v61  ;;  %v3687_v43 = vsel %vm10461_vm13, %v3682_v34, %v3686_v49  ;;  %v3694_v4 = vrot.slane %v3692_v29, 5  ;;  %s10298_s12 = smov [#allocation6]  }
 0x18e   : > { %v2704_v37 = vrot.slane %v2702_v6, 5  ;;  %v2708_v20 = vrot.slane %v2706_v15, 4  ;;  %3865 = vst.msk [vmem:[#allocation3 + $0x40] sm:$0xff] %vm3856_vm3, %v3825_v27  ;;  %v3032_v62 = vrot.slane %v2875_v7, 5  ;;  %v11746_v36 = vrot.slane %v3698_v10, 5  ;;  %v4146_v39 = vpop.permute.xlu0 %4145  ;;  %v10149_v40 = vld [vmem:[#allocation2 + $0xc0] sm:$0xff]  }
 0x18f   : > { %v2699_v44 = vor.u32 %v2698_v46, %v2695_v13  ;;  %v9774_v55 = vcombine.low %v3677_v56, %v3687_v43  ;;  %v3369_v42 = vld [vmem:[#allocation2 + $0xbc] sm:$0x1]  ;;  %v3704_v9 = vrot.slane %v3702_v33, 4  ;;  %3111 = vrot.lane.b32.xlu0 %v9743_v48, %s10287_s17  ;;  %v3695_v14 = vor.u32 %v3694_v4, %v3691_v1  ;;  %v3370_v2 = vld [vmem:[#allocation2 + $0xc0] sm:$0xf]  ;;  %4186 = vst.msk [vmem:[#allocation3 + $0x40] sm:$0xff] %vm4177_vm2, %v4146_v39 }
 0x190   : > { %v2709_v52 = vor.u32 %v2708_v20, %v2704_v37  ;;  %3113 = vrot.lane.b32.xlu1 %v9744_v59, %s10287_s17  ;;  %v3708_v22 = vshll.u32 %v3369_v42, 16  ;;  %v9790_v58 = vrot.slane %v3909_v23, 9  ;;  %v11755_v45 = vsel %vm10422_vm10, %v9729_v35, %v3032_v62  ;;  %v3371_v5 = vld [vmem:[#allocation2 + $0xc4] sm:$0xf]  ;;  %v3373_v54 = vld [vmem:[#allocation2 + $0xcc] sm:$0xf] }
 0x191   : > { %v2700_v32 = vrot.slane %v2699_v44, 4  ;;  %v3705_v28 = vor.u32 %v3704_v9, %v11746_v36  ;;  %v3034_v18 = vrot.slane %v3032_v62, 4  ;;  %v11757_v61 = vrot.slane %v3695_v14, 4  ;;  %v3374_v60 = vld [vmem:[#allocation2 + $0xd0] sm:$0xf]  ;;  %v10148_v46 = vld [vmem:[#allocation2 + $0xb4] sm:$0xff]  }
 0x192   : > { %v2710_v26 = vrot.slane %v2709_v52, 4  ;;  %v4055_v38 = vrot.slane %v3910_v16, 5  ;;  %v4058_v19 = vrot.slane %v3911_v12, 5  ;;  %v3713_v49 = vshrl.u32 %v3370_v2, 16  ;;  %v11780_v43 = vld [vmem:[#allocation2 + $0xb8] sm:$0xf] }
 0x193   : > { %v2331_v31 = vld [vmem:[#allocation2 + $0xc8] sm:$0x1]  ;;  %v4148_v21 = vpop.permute.xlu0 %4147  ;;  %v2705_v29 = vsel %vm10461_vm13, %v2700_v32, %v2704_v37  ;;  %v3716_v10 = vshll.u32 %v3370_v2, 16  ;;  %v3706_v24 = vrot.slane %v3705_v28, 4  ;;  %v3710_v51 = vrot.slane %v3708_v22, 5 }
 0x194   : > { %v2876_v25 = vld [vmem:[#allocation2 + $0xc8] sm:$0x1]  ;;  %v2712_v63 = vshll.u32 %v2331_v31, 16  ;;  %3832 = vrot.lane.b32.xlu1 %v9774_v55, %s10290_s20  ;;  %v3827_v33 = vpop.permute.xlu1 %3826  ;;  %v4056_v53 = vsel %vm10422_vm10, %v9790_v58, %v4055_v38  ;;  %v4057_v48 = vrot.slane %v4055_v38, 4  ;;  %v3715_v30 = vrot.slane %v3713_v49, 4 }
 0x195   : > { %v3035_v0 = vrot.slane %v2876_v25, 5  ;;  %v3372_v8 = vld [vmem:[#allocation2 + $0xc8] sm:$0x1]  ;;  %3866 = vst.msk [vmem:[#allocation3 + $0x48] sm:$0xff] %vm3856_vm3, %v3827_v33  ;;  %v3718_v3 = vrot.slane %v3716_v10, 5  ;;  %v3722_v59 = vshll.u32 %v3371_v5, 16  ;;  %v3701_v37 = vsel %vm10461_vm13, %v11757_v61, %v11746_v36 }
 0x196   : > { %v2714_v41 = vrot.slane %v2712_v63, 5  ;;  %4187 = vst.msk [vmem:[#allocation3 + $0x48] sm:$0xff] %vm4177_vm2, %v4148_v21  ;;  %v4059_v15 = vsel %vm10422_vm10, %v4057_v48, %v4058_v19  ;;  %v3726_v47 = vshrl.u32 %v3371_v5, 16  ;;  %v3732_v57 = vshll.u32 %v3372_v8, 16  ;;  %v4202_v13 = vld [vmem:[#allocation3 + $0x40] sm:$0xff] }
 0x197   : > { %v3036_v34 = vsel %vm10422_vm10, %v3034_v18, %v3035_v0  ;;  %v9806_v7 = vcombine.low %v4056_v53, %v4059_v15  ;;  %v3719_v35 = vor.u32 %v3718_v3, %v3715_v30  ;;  %v3724_v1 = vrot.slane %v3722_v59, 5  ;;  %9990 = vmatprep.mubr.msk.bf16.mxu0 %vm4230_vm4, %v4202_v13  ;;  %v3375_v4 = vld [vmem:[#allocation2 + $0xd4] sm:$0x1]  ;;  %v3912_v16 = vld [vmem:[#allocation2 + $0xb4] sm:$0xe] }
 0x198   : > { %v2715_v17 = vsel %vm10461_vm13, %v2710_v26, %v2714_v41  ;;  %3291 = vrot.lane.b32.xlu1 %v10149_v40, %s10286_s13  ;;  %v1739_v27 = vpop.permute.xlu1 %1738  ;;  %v3711_v20 = vsel %vm10461_vm13, %v3706_v24, %v3710_v51  ;;  %v3728_v56 = vrot.slane %v3726_v47, 4  ;;  %v3737_v44 = vshrl.u32 %v3373_v54, 16  ;;  %v3914_v22 = vld [vmem:[#allocation2 + $0xbc] sm:$0x1]  ;;  %v3918_v40 = vld [vmem:[#allocation2 + $0xcc] sm:$0xe] }
 0x199   : > { %v9713_v6 = vcombine.low %v2705_v29, %v2715_v17  ;;  %1777 = vst.msk [vmem:[#allocation3 + $0x50] sm:$0xff] %vm1766_vm6, %v1739_v27  ;;  %v3720_v62 = vrot.slane %v3719_v35, 4  ;;  %v3740_v52 = vshll.u32 %v3373_v54, 16  ;;  %v3746_v55 = vshll.u32 %v3374_v60, 16  ;;  %v3919_v61 = vld [vmem:[#allocation2 + $0xd0] sm:$0xf] }
 0x19a   : > { %v2063_v42 = vpop.permute.xlu0 %2062  ;;  %v9745_v9 = vcombine.low %v11755_v45, %v3036_v34  ;;  %v3729_v23 = vor.u32 %v3728_v56, %v3724_v1  ;;  %v3734_v36 = vrot.slane %v3732_v57, 5  ;;  %v3750_v14 = vshrl.u32 %v3374_v60, 16  ;;  %v3920_v38 = vld [vmem:[#allocation2 + $0xd4] sm:$0x1]  ;;  %v3916_v41 = vld [vmem:[#allocation2 + $0xc4] sm:$0xf] }
 0x19b   : > { %2794 = vrot.lane.b32.xlu0 %v9713_v6, %s10289_s19  ;;  %2101 = vst.msk [vmem:[#allocation3 + $0x50] sm:$0xff] %vm2090_vm8, %v2063_v42  ;;  %v4062_v39 = vrot.slane %v11780_v43, 5  ;;  %v3739_v32 = vrot.slane %v3737_v44, 4  ;;  %v3742_v12 = vrot.slane %v3740_v52, 5  ;;  %v3748_v2 = vrot.slane %v3746_v55, 5  ;;  %v10152_v60 = vld [vmem:[#allocation2 + $0xcc] sm:$0xff]  }
 0x19c   : > { %4153 = vrot.lane.b32.xlu1 %v9806_v7, %s10288_s18  ;;  %v1741_v31 = vpop.permute.xlu1 %1740  ;;  %v3725_v25 = vsel %vm10461_vm13, %v3720_v62, %v3724_v1  ;;  %v3730_v28 = vrot.slane %v3729_v23, 4  ;;  %v3752_v58 = vrot.slane %v3750_v14, 4  ;;  %v3756_v26 = vshll.u32 %v3375_v4, 16  ;;  %v3915_v54 = vld [vmem:[#allocation2 + $0xc0] sm:$0xe] }
 0x19d   : > { %1778 = vst.msk [vmem:[#allocation3 + $0x58] sm:$0xff] %vm1766_vm6, %v1741_v31  ;;  %v4203_v63 = vld [vmem:[#allocation3 + $0x48] sm:$0xff]  ;;  %v9775_v45 = vcombine.low %v3701_v37, %v3711_v20  ;;  %v3743_v18 = vor.u32 %v3742_v12, %v3739_v32  ;;  %v9791_v49 = vrot.slane %v3912_v16, 9  ;;  %v4064_v8 = vrot.slane %v4062_v39, 4  ;;  %v3917_v6 = vld [vmem:[#allocation2 + $0xc8] sm:$0x1] }
 0x19e   : > { %v2240_v19 = vpop.permute.xlu0 %2239  ;;  %9991 = vmatmul.mubr.msk.bf16.gmra.mrb[16].mxu0 %vm4230_vm4, %v4203_v63  ;;  %v3735_v5 = vsel %vm10461_vm13, %v3730_v28, %v3734_v36  ;;  %v3753_v21 = vor.u32 %v3752_v58, %v3748_v2  ;;  %v3758_v29 = vrot.slane %v3756_v26, 5  ;;  %v4065_v10 = vrot.slane %v3914_v22, 5  ;;  %v4584_v55 = vld [vmem:[#allocation4 + $0x10] sm:$0x1]  ;;  %v4587_v23 = vld [vmem:[#allocation4 + $0x20] sm:$0x1] }
 0x19f   : > { %3289 = vrot.lane.b32.xlu0 %v10148_v46, %s10286_s13  ;;  %2278 = vst.msk [vmem:[#allocation3 + $0x50] sm:$0xff] %vm13457_vm5, %v2240_v19  ;;  %v9776_v0 = vcombine.low %v3725_v25, %v3735_v5  ;;  %v3744_v33 = vrot.slane %v3743_v18, 4  ;;  %v9793_v53 = vrot.slane %v3918_v40, 9  ;;  %v4076_v48 = vrot.slane %v3919_v61, 5  ;;  %v4611_v12 = vld [vmem:[#allocation4 + $0xa0] sm:$0x1] }
 0x1a0   : > { %v2065_v24 = vpop.permute.xlu1 %2064  ;;  %v3754_v51 = vrot.slane %v3753_v21, 4  ;;  %v4079_v17 = vrot.slane %v3920_v38, 5  ;;  %v4069_v3 = vrot.slane %v3916_v41, 5  ;;  %v4063_v13 = vsel %vm10422_vm10, %v9791_v49, %v4062_v39  ;;  %v4590_v63 = vld [vmem:[#allocation4 + $0x30] sm:$0x1] }
 0x1a1   : > { %2102 = vst.msk [vmem:[#allocation3 + $0x58] sm:$0xff] %vm2090_vm8, %v2065_v24  ;;  %3836 = vrot.lane.b32.xlu1 %v9776_v0, %s10290_s20  ;;  %v3749_v30 = vsel %vm10461_vm13, %v3744_v33, %v3748_v2  ;;  %v4077_v15 = vsel %vm10422_vm10, %v9793_v53, %v4076_v48  ;;  %v4078_v47 = vrot.slane %v4076_v48, 4  ;;  %v4066_v34 = vsel %vm10422_vm10, %v4064_v8, %v4065_v10  ;;  %v4581_v38 = vld [vmem:[#allocation4] sm:$0x1]  ;;  %v4574_v49 = vld [vmem:[#allocation4 + $0x4] sm:$0x1] }
 0x1a2   : > { %v3759_v59 = vsel %vm10461_vm13, %v3754_v51, %v3758_v29  ;;  %v9792_v35 = vrot.slane %v3915_v54, 9  ;;  %v4071_v1 = vrot.slane %v4069_v3, 4  ;;  %v4072_v27 = vrot.slane %v3917_v6, 5  ;;  %v4614_v29 = vld [vmem:[#allocation4 + $0xb0] sm:$0x1] }
 0x1a3   : > { %3115 = vrot.lane.b32.xlu0 %v9745_v9, %s10287_s17  ;;  %v9777_v57 = vcombine.low %v3749_v30, %v3759_v59  ;;  %v4080_v7 = vsel %vm10422_vm10, %v4078_v47, %v4079_v17  ;;  %vm4572_vm7 = vcmask 57344   ;;  %v9807_v20 = vcombine.low %v4063_v13, %v4066_v34  ;;  %v4608_v9 = vld [vmem:[#allocation4 + $0x90] sm:$0x1]  ;;  %v4593_v59 = vld [vmem:[#allocation4 + $0x40] sm:$0x1]  ;;  %s10295_s17 = smov 64  }
 0x1a4   : > { %v9809_v46 = vcombine.low %v4077_v15, %v4080_v7  ;;  %v4070_v43 = vsel %vm10422_vm10, %v9792_v35, %v4069_v3  ;;  %v4073_v62 = vsel %vm10422_vm10, %v4071_v1, %v4072_v27  ;;  %vm13459_vm15 = vsmask.f32 256  ;;  %vm13462_vm10 = vmmov %vm13456_vm0  ;;  %v11872_v15 = vld [vmem:[%s13411_s4] ss:$0 sm:$0xff] }
 0x1a5   : > { %3838 = vrot.lane.b32.xlu1 %v9777_v57, %s10290_s20  ;;  %vm11821_vm9 = vmand %vm4572_vm7, %vm13459_vm15  ;;  %v9808_v52 = vcombine.low %v4070_v43, %v4073_v62  ;;  %v10291_v13 = vmov 1966171168   ;;  %v4655_v7 = vlaneseq  ;;  %v11878_v27 = vld [vmem:[%s13412_s5] ss:$0 sm:$0xff]  ;;  %vm6399_vm15 = vcmask 1042434  }
 0x1a6   : > { %v2785_v37 = vpop.permute.xlu0 %2784  ;;  %v4585_v11 = vsel %vm11821_vm9, 0, %v4584_v55  ;;  %v4609_v36 = vsel %vm11821_vm9, 0, %v4608_v9  ;;  %v4588_v14 = vsel %vm11821_vm9, 0, %v4587_v23  ;;  %v4612_v2 = vsel %vm11821_vm9, 0, %v4611_v12  ;;  %vm13464_vm0 = vmmov %vm13457_vm5 }
 0x1a7   : > { %3834 = vrot.lane.b32.xlu0 %v9775_v45, %s10290_s20  ;;  %2823 = vst.msk [vmem:[#allocation3 + $0x50] sm:$0xff] %vm2812_vm11, %v2785_v37  ;;  %4586 = vst [vmem:[#allocation4 + $0x10] sm:$0x1] %v4585_v11  ;;  %v4591_v45 = vsel %vm11821_vm9, 0, %v4590_v63  ;;  %v4582_v19 = vsel %vm11821_vm9, 0, %v4581_v38  ;;  %v4575_v21 = vsel %vm11821_vm9, 0, %v4574_v49  ;;  %v4653_v34 = vunpack.c.l.s4 %v10291_v13 }
 0x1a8   : > { %4610 = vst [vmem:[#allocation4 + $0x90] sm:$0x1] %v4609_v36  ;;  %4589 = vst [vmem:[#allocation4 + $0x20] sm:$0x1] %v4588_v14  ;;  %v4615_v0 = vsel %vm11821_vm9, 0, %v4614_v29  ;;  %v4594_v6 = vsel %vm11821_vm9, 0, %v4593_v59 }
 0x1a9   : > { %v2242_v56 = vpop.permute.xlu1 %2241  ;;  %4159 = vrot.lane.b32.xlu1 %v9809_v46, %s10288_s18  ;;  %4613 = vst [vmem:[#allocation4 + $0xa0] sm:$0x1] %v4612_v2  ;;  %4592 = vst [vmem:[#allocation4 + $0x30] sm:$0x1] %v4591_v45  ;;  %v4654_v9 = vunpack.c.0.s8 %v4653_v34  ;;  %v11885_v23 = vshrl.u32 %v4655_v7, 7 }
 0x1aa   : > { %2279 = vst.msk [vmem:[#allocation3 + $0x58] sm:$0xff] %vm13458_vm14, %v2242_v56  ;;  %v3106_v4 = vpop.permute.xlu0 %3105  ;;  %4583 = vst [vmem:[#allocation4] sm:$0x1] %v4582_v19  ;;  %v10292_v56 = vmov 1935823168   ;;  %vm6396_vm14 = vcmask 1041409  }
 0x1ab   : > { %3293 = vrot.lane.b32.xlu0 %v10152_v60, %s10286_s13  ;;  %3144 = vst.msk [vmem:[#allocation3 + $0x50] sm:$0xff] %vm3133_vm12, %v3106_v4  ;;  %4576 = vst [vmem:[#allocation4 + $0x4] sm:$0x1] %v4575_v21  ;;  %v5436_v43 = vunpack.c.l.s4 %v10292_v56 }
 0x1ac   : > { %4616 = vst [vmem:[#allocation4 + $0xb0] sm:$0x1] %v4615_v0  ;;  %vm13465_vm5 = vmmov %vm13464_vm0 }
 0x1ad   : > { %vm13466_vm7 = vmmov %vm13464_vm0  ;;  %4595 = vst [vmem:[#allocation4 + $0x40] sm:$0x1] %v4594_v6  ;;  %v5437_v12 = vunpack.c.0.s8 %v5436_v43 }
 0x1ae   : > { %v3284_v42 = vpop.permute.xlu0 %3283 }
 0x1af   : > { %4155 = vrot.lane.b32.xlu0 %v9807_v20, %s10288_s18  ;;  %3322 = vst.msk [vmem:[#allocation3 + $0x50] sm:$0xff] %vm13462_vm10, %v3284_v42  ;;  %v11901_v19 = vsub.s32 %v5437_v12, %v11885_v23  ;;  %vm6402_vm10 = vcmask 1043459  }
 0x1b1   : > { %v7979_v53 = vld [vmem:[#allocation4] sm:$0xf] }
 0x1b2   : > { %v7996_v17 = vshrl.u32 %v7979_v53, 16  ;;  %v7999_v30 = vshll.u32 %v7979_v53, 16  ;;  %v7980_v35 = vld [vmem:[#allocation4 + $0x4] sm:$0x1] }
 0x1b3   : > { %4157 = vrot.lane.b32.xlu0 %v9808_v52, %s10288_s18  ;;  %v8005_v55 = vshll.u32 %v7980_v35, 16 }
 0x1b4   : > { %v7998_v47 = vrot.slane %v7996_v17, 4  ;;  %v8001_v57 = vrot.slane %v7999_v30, 5 }
 0x1b6   : > { %v8002_v52 = vor.u32 %v8001_v57, %v7998_v47 }
 0x1b8   : > { %v2787_v16 = vpop.permute.xlu1 %2786 }
 0x1b9   : > { %2824 = vst.msk [vmem:[#allocation3 + $0x58] sm:$0xff] %vm2812_vm11, %v2787_v16 }
 0x1bc   : > { %v3108_v39 = vpop.permute.xlu1 %3107  ;;  %v3829_v32 = vpop.permute.xlu0 %3828 }
 0x1bd   : > { %3145 = vst.msk [vmem:[#allocation3 + $0x58] sm:$0xff] %vm3133_vm12, %v3108_v39 }
 0x1be   : > { %3867 = vst.msk [vmem:[#allocation3 + $0x50] sm:$0xff] %vm3856_vm3, %v3829_v32 }
 0x1c0   : > { %v3286_v31 = vpop.permute.xlu1 %3285  ;;  %v4150_v25 = vpop.permute.xlu0 %4149 }
 0x1c1   : > { %3323 = vst.msk [vmem:[#allocation3 + $0x58] sm:$0xff] %vm13463_vm1, %v3286_v31 }
 0x1c2   : > { %4188 = vst.msk [vmem:[#allocation3 + $0x50] sm:$0xff] %vm4177_vm2, %v4150_v25  ;;  %v11892_v25 = vrot.slane %v8002_v52, 4 }
 0x1c4   : > { %v3831_v28 = vpop.permute.xlu1 %3830 }
 0x1c5   : > { %3868 = vst.msk [vmem:[#allocation3 + $0x58] sm:$0xff] %vm3856_vm3, %v3831_v28  ;;  %v11894_v28 = vrot.slane %v8005_v55, 5 }
 0x1c6   : > { %v4152_v22 = vpop.permute.xlu0 %4151 }
 0x1c7   : > { %4189 = vst.msk [vmem:[#allocation3 + $0x58] sm:$0xff] %vm4177_vm2, %v4152_v22 }
 0x1c8   : > { %v1743_v58 = vpop.permute.xlu1 %1742 }
 0x1c9   : > { %v4204_v26 = vld [vmem:[#allocation3 + $0x50] sm:$0xff]  ;;  %1779 = vst.msk [vmem:[#allocation3 + $0x60] sm:$0xff] %vm1766_vm6, %v1743_v58 }
 0x1ca   : > { %9994 = vmatprep.mubr.msk.bf16.mxu0 %vm4230_vm4, %v4204_v26  ;;  %v11898_v26 = vsub.s32 %v4654_v9, %v11885_v23 }
 0x1cc   : > { %v2067_v18 = vpop.permute.xlu0 %2066 }
 0x1cd   : > { %2103 = vst.msk [vmem:[#allocation3 + $0x60] sm:$0xff] %vm2090_vm8, %v2067_v18  ;;  %v1745_v40 = vpop.permute.xlu1 %1744 }
 0x1ce   : > { %v4205_v61 = vld [vmem:[#allocation3 + $0x58] sm:$0xff]  ;;  %1780 = vst.msk [vmem:[#allocation3 + $0x68] sm:$0xff] %vm1766_vm6, %v1745_v40 }
 0x1cf   : > { %9995 = vmatmul.mubr.msk.bf16.gmra.mrb[20].mxu0 %vm4230_vm4, %v4205_v61 }
 0x1d1   : > { %v2069_v5 = vpop.permute.xlu0 %2068 }
 0x1d2   : > { %2104 = vst.msk [vmem:[#allocation3 + $0x68] sm:$0xff] %vm2090_vm8, %v2069_v5 }
 0x1e2   : > { %v1747_v41 = vpop.permute.xlu1 %1746 }
 0x1e3   : > { %1781 = vst.msk [vmem:[#allocation3 + $0x70] sm:$0xff] %vm1766_vm6, %v1747_v41 }
 0x1e6   : > { %v2244_v8 = vpop.permute.xlu1 %2243 }
 0x1e7   : > { %2280 = vst.msk [vmem:[#allocation3 + $0x60] sm:$0xff] %vm13464_vm0, %v2244_v8 }
 0x1ea   : > { %v2071_v10 = vpop.permute.xlu1 %2070 }
 0x1eb   : > { %2105 = vst.msk [vmem:[#allocation3 + $0x70] sm:$0xff] %vm2090_vm8, %v2071_v10  ;;  %v8008_v10 = vsel %vm10461_vm13, %v11892_v25, %v11894_v28 }
 0x1ec   : > { %v1749_v33 = vpop.permute.xlu0 %1748 }
 0x1ed   : > { %1782 = vst.msk [vmem:[#allocation3 + $0x78] sm:$0xff] %vm1766_vm6, %v1749_v33  ;;  %vm13467_vm6 = vmmov %vm13463_vm1  ;;  %vm6405_vm1 = vcmask 1044484  }
 0x1ee   : > { %v2789_v24 = vpop.permute.xlu1 %2788 }
 0x1ef   : > { %2825 = vst.msk [vmem:[#allocation3 + $0x60] sm:$0xff] %vm2812_vm11, %v2789_v24 }
 0x1f0   : > { %v2246_v51 = vpop.permute.xlu0 %2245 }
 0x1f1   : > { %2281 = vst.msk [vmem:[#allocation3 + $0x68] sm:$0xff] %vm13465_vm5, %v2246_v51  ;;  %vm13469_vm5 = vmmov %vm13467_vm6 }
 0x1f2   : > { %v2248_v48 = vpop.permute.xlu1 %2247 }
 0x1f3   : > { %2282 = vst.msk [vmem:[#allocation3 + $0x70] sm:$0xff] %vm13466_vm7, %v2248_v48  ;;  %vm6411_vm7 = vcmask 1046534  }
 0x1f4   : > { %v2073_v3 = vpop.permute.xlu0 %2072 }
 0x1f5   : > { %2106 = vst.msk [vmem:[#allocation3 + $0x78] sm:$0xff] %vm2090_vm8, %v2073_v3  ;;  %vm13468_vm8 = vmmov %vm13464_vm0  ;;  %vm6408_vm0 = vcmask 1045509  }
 0x1f6   : > { %v3110_v54 = vpop.permute.xlu1 %3109 }
 0x1f7   : > { %3146 = vst.msk [vmem:[#allocation3 + $0x60] sm:$0xff] %vm3133_vm12, %v3110_v54  ;;  %v9976_v1 = vpop.f32.mrb[0].mxu0 }
 0x1f8   : > { %v2791_v60 = vpop.permute.xlu0 %2790  ;;  %v4453_v37 = vmul.f32 %v9976_v1, %v11872_v15  ;;  %v4317_v20 = vpop.f32.mrb[1].mxu0 }
 0x1f9   : > { %2826 = vst.msk [vmem:[#allocation3 + $0x68] sm:$0xff] %vm2812_vm11, %v2791_v60  ;;  %v4451_v62 = vmul.f32 %v11872_v15, %v4317_v20  ;;  %v9977_v4 = vpop.f32.mrb[2].mxu0 }
 0x1fa   : > { %v2793_v46 = vpop.permute.xlu1 %2792  ;;  %v4492_v42 = vadd.f32 %v11878_v27, %v4453_v37  ;;  %v4454_v11 = vmul.f32 %v9977_v4, %v11872_v15  ;;  %v4320_v36 = vpop.f32.mrb[3].mxu0 }
 0x1fb   : > { %2827 = vst.msk [vmem:[#allocation3 + $0x70] sm:$0xff] %vm2812_vm11, %v2793_v46  ;;  %v4490_v14 = vadd.f32 %v11878_v27, %v4451_v62  ;;  %v4452_v16 = vmul.f32 %v11872_v15, %v4320_v36 }
 0x1fc   : > { %v4493_v32 = vadd.f32 %v11878_v27, %v4454_v11  ;;  %v4524_v22 = vmax.f32 %v4492_v42, 0.0 }
 0x1fd   : > { %v2250_v2 = vpop.permute.xlu0 %2249  ;;  %v4491_v31 = vadd.f32 %v11878_v27, %v4452_v16  ;;  %v4522_v63 = vmax.f32 %v4490_v14, 0.0 }
 0x1fe   : > { %v3288_v39 = vpop.permute.xlu1 %3287  ;;  %2283 = vst.msk [vmem:[#allocation3 + $0x78] sm:$0xff] %vm13468_vm8, %v2250_v2  ;;  %v4525_v58 = vmax.f32 %v4493_v32, 0.0  ;;  %vm13471_vm8 = vsmask.f32 7938 }
 0x1ff   : > { %3324 = vst.msk [vmem:[#allocation3 + $0x60] sm:$0xff] %vm13467_vm6, %v3288_v39  ;;  %v4523_v45 = vmax.f32 %v4491_v31, 0.0  ;;  %v9980_v18 = vpop.f32.mrb[4].mxu0  ;;  %vm6414_vm6 = vcmask 1047559  }
 0x200   : > { %v4555_v61 = vpack.c.bf16 %v4525_v58, %v4524_v22  ;;  %v9832_v38 = vpack.c.bf16 %v4525_v58, %v4525_v58  ;;  %v4457_v5 = vmul.f32 %v9980_v18, %v11872_v15  ;;  %v4333_v49 = vpop.f32.mrb[5].mxu0 }
 0x201   : > { %v3112_v21 = vpop.permute.xlu0 %3111  ;;  %v4554_v29 = vpack.c.bf16 %v4523_v45, %v4522_v63  ;;  %v9831_v41 = vpack.c.bf16 %v4523_v45, %v4523_v45  ;;  %v4455_v0 = vmul.f32 %v11872_v15, %v4333_v49  ;;  %v9981_v8 = vpop.f32.mrb[6].mxu0 }
 0x202   : > { %v3114_v40 = vpop.permute.xlu1 %3113  ;;  %3147 = vst.msk [vmem:[#allocation3 + $0x68] sm:$0xff] %vm3133_vm12, %v3112_v21  ;;  %v4707_v33 = vrot.slane %v4555_v61, %v11898_v26  ;;  %v4714_v24 = vrot.slane %v9832_v38, %v11898_v26  ;;  %v11914_v51 = vadd.f32 %v11878_v27, %v4457_v5  ;;  %v11917_v53 = vmul.f32 %v9981_v8, %v11872_v15  ;;  %v4336_v48 = vpop.f32.mrb[7].mxu0 }
 0x203   : > { %3148 = vst.msk [vmem:[#allocation3 + $0x70] sm:$0xff] %vm3133_vm12, %v3114_v40  ;;  %v4658_v17 = vrot.slane %v4554_v29, %v11898_v26  ;;  %v4665_v30 = vrot.slane %v9831_v41, %v11898_v26  ;;  %v11922_v3 = vadd.f32 %v11878_v27, %v4455_v0  ;;  %v11925_v59 = vmul.f32 %v11872_v15, %v4336_v48 }
 0x204   : > { %v4715_v6 = vcombine.high %v4707_v33, %v4707_v33  ;;  %v4716_v47 = vcombine.high %v4714_v24, %v4714_v24  ;;  %v4723_v57 = vrot.slane %v4707_v33, %v11898_v26  ;;  %v4730_v60 = vrot.slane %v4714_v24, %v11898_v26 }
 0x205   : > { %v4666_v13 = vcombine.high %v4658_v17, %v4658_v17  ;;  %v4667_v34 = vcombine.high %v4665_v30, %v4665_v30  ;;  %v11931_v7 = vrot.slane %v4658_v17, %v11898_v26  ;;  %v11934_v35 = vrot.slane %v4665_v30, %v11898_v26 }
 0x206   : > { %v3833_v54 = vpop.permute.xlu1 %3832  ;;  %v4737_v1 = vrot.slane %v4715_v6, %v11898_v26  ;;  %v4744_v46 = vrot.slane %v4716_v47, %v11898_v26  ;;  %v4745_v37 = vcombine.high %v4723_v57, %v4723_v57  ;;  %v4746_v20 = vcombine.high %v4730_v60, %v4730_v60 }
 0x207   : > { %3869 = vst.msk [vmem:[#allocation3 + $0x60] sm:$0xff] %vm3856_vm3, %v3833_v54  ;;  %v6676_v56 = vrot.slane %v4723_v57, %v11901_v19  ;;  %v6732_v43 = vrot.slane %v4730_v60, %v11901_v19  ;;  %v11941_v62 = vrot.slane %v4666_v13, %v11898_v26  ;;  %v11944_v4 = vrot.slane %v4667_v34, %v11898_v26 }
 0x208   : > { %v4747_v55 = vcombine.high %v4737_v1, %v4737_v1  ;;  %v4748_v42 = vcombine.high %v4744_v46, %v4744_v46  ;;  %v6690_v11 = vrot.slane %v4737_v1, %v11901_v19  ;;  %v6704_v9 = vrot.slane %v4745_v37, %v11901_v19 }
 0x209   : > { %v6683_v36 = vrot.slane %v6676_v56, %v11901_v19  ;;  %v6739_v14 = vrot.slane %v6732_v43, %v11901_v19  ;;  %v6746_v16 = vrot.slane %v4744_v46, %v11901_v19  ;;  %v6760_v39 = vrot.slane %v4746_v20, %v11901_v19  ;;  %v7851_v56 = vld [vmem:[#allocation4 + $0x14] sm:$0x1] }
 0x20a   : > { %v3292_v52 = vpop.permute.xlu1 %3291  ;;  %v6697_v32 = vrot.slane %v6690_v11, %v11901_v19  ;;  %v6711_v12 = vrot.slane %v6704_v9, %v11901_v19  ;;  %v6718_v2 = vrot.slane %v4747_v55, %v11901_v19  ;;  %v6774_v31 = vrot.slane %v4748_v42, %v11901_v19 }
 0x20b   : > { %3326 = vst.msk [vmem:[#allocation3 + $0x70] sm:$0xff] %vm13469_vm5, %v3292_v52  ;;  %v6753_v58 = vrot.slane %v6746_v16, %v11901_v19  ;;  %v6767_v63 = vrot.slane %v6760_v39, %v11901_v19  ;;  %v7566_v45 = vunpack.c.l.b16 %v6683_v36  ;;  %v7570_v18 = vunpack.c.l.b16 %v6739_v14 }
 0x20c   : > { %v6725_v61 = vrot.slane %v6718_v2, %v11901_v19  ;;  %v6781_v38 = vrot.slane %v6774_v31, %v11901_v19  ;;  %v7567_v5 = vunpack.c.l.b16 %v6697_v32  ;;  %v7568_v49 = vunpack.c.l.b16 %v6711_v12 }
 0x20d   : > { %v2795_v22 = vpop.permute.xlu0 %2794  ;;  %v7571_v21 = vunpack.c.l.b16 %v6753_v58  ;;  %v7572_v29 = vunpack.c.l.b16 %v6767_v63  ;;  %v7636_v41 = vrot.slane %v7570_v18, 4  ;;  %v4696_v0 = vcombine.high %v11931_v7, %v11931_v7 }
 0x20e   : > { %2828 = vst.msk [vmem:[#allocation3 + $0x78] sm:$0xff] %vm2812_vm11, %v2795_v22  ;;  %v4154_v40 = vpop.permute.xlu1 %4153  ;;  %v7569_v8 = vunpack.c.l.b16 %v6725_v61  ;;  %v7573_v33 = vunpack.c.l.b16 %v6781_v38  ;;  %v7630_v24 = vrot.slane %v7567_v5, 7  ;;  %v7632_v48 = vrot.slane %v7568_v49, 6  ;;  %vm13470_vm11 = vmmov %vm13469_vm5  ;;  %v7848_v61 = vld [vmem:[#allocation4 + $0x10] sm:$0xf] }
 0x20f   : > { %4190 = vst.msk [vmem:[#allocation3 + $0x60] sm:$0xff] %vm4177_vm2, %v4154_v40  ;;  %v7638_v30 = vrot.slane %v7571_v21, 3  ;;  %v7640_v54 = vrot.slane %v7572_v29, 2  ;;  %v4697_v6 = vcombine.high %v11934_v35, %v11934_v35  ;;  %v4698_v47 = vcombine.high %v11941_v62, %v11941_v62 }
 0x210   : > { %v7631_v60 = vsel %vm6396_vm14, %v7630_v24, %v7566_v45  ;;  %v7634_v13 = vrot.slane %v7569_v8, 5  ;;  %v7642_v34 = vrot.slane %v7573_v33, 1  ;;  %v7767_v1 = vsel %vm6399_vm15, %v7630_v24, %v7566_v45 }
 0x211   : > { %v3290_v17 = vpop.permute.xlu0 %3289  ;;  %v7633_v37 = vsel %vm6399_vm15, %v7632_v48, %v7631_v60  ;;  %v7768_v20 = vsel %vm6402_vm10, %v7632_v48, %v7767_v1  ;;  %v4699_v43 = vcombine.high %v11944_v4, %v11944_v4  ;;  %v5441_v52 = vrot.slane %v11931_v7, %v11901_v19 }
 0x212   : > { %v11969_v57 = vpop.f32.mrb[8].mxu0  ;;  %3325 = vst.msk [vmem:[#allocation3 + $0x68] sm:$0xff] %vm13470_vm11, %v3290_v17  ;;  %v7635_v42 = vsel %vm6402_vm10, %v7634_v13, %v7633_v37  ;;  %v7769_v11 = vsel %vm6405_vm1, %v7634_v13, %v7768_v20  ;;  %v7816_v9 = vpack.c.b16 %v7642_v34, %v7642_v34  ;;  %v5455_v36 = vrot.slane %v11941_v62, %v11901_v19 }
 0x213   : > { %v11974_v46 = vpop.f32.mrb[9].mxu0  ;;  %v7637_v39 = vsel %vm6405_vm1, %v7636_v41, %v7635_v42  ;;  %v7770_v32 = vsel %vm6408_vm0, %v7636_v41, %v7769_v11  ;;  %v5448_v12 = vrot.slane %v5441_v52, %v11901_v19  ;;  %v5469_v7 = vrot.slane %v4696_v0, %v11901_v19  ;;  %v3837_v2 = vpop.permute.xlu1 %3836 }
 0x214   : > { %v11982_v55 = vpop.f32.mrb[10].mxu0  ;;  %v7639_v22 = vsel %vm6408_vm0, %v7638_v30, %v7637_v39  ;;  %v7771_v58 = vsel %vm6411_vm7, %v7638_v30, %v7770_v32  ;;  %v7852_v62 = vsel %vm11821_vm9, %v7816_v9, %v7851_v56  ;;  %v5462_v63 = vrot.slane %v5455_v36, %v11901_v19  ;;  %3871 = vst.msk [vmem:[#allocation3 + $0x70] sm:$0xff] %vm3856_vm3, %v3837_v2 }
 0x215   : > { %v11988_v14 = vpop.f32.mrb[11].mxu0  ;;  %v3116_v16 = vpop.permute.xlu0 %3115  ;;  %vm13472_vm5 = vcmask 60416   ;;  %v7641_v18 = vsel %vm6411_vm7, %v7640_v54, %v7639_v22  ;;  %v7772_v40 = vsel %vm6414_vm6, %v7640_v54, %v7771_v58  ;;  %7853 = vst [vmem:[#allocation4 + $0x14] sm:$0x1] %v7852_v62  ;;  %v5476_v38 = vrot.slane %v5469_v7, %v11901_v19  ;;  %v6625_v58 = vld [vmem:[#allocation4 + $0x94] sm:$0x1] }
 0x216   : > { %3149 = vst.msk [vmem:[#allocation3 + $0x78] sm:$0xff] %vm3133_vm12, %v3116_v16  ;;  %v4206_v31 = vld [vmem:[#allocation3 + $0x60] sm:$0xff]  ;;  %vm12002_vm11 = vmand %vm13472_vm5, %vm13471_vm8  ;;  %v5483_v5 = vrot.slane %v4698_v47, %v11901_v19  ;;  %v7643_v49 = vsel %vm6414_vm6, %v7642_v34, %v7641_v18  ;;  %v7815_v21 = vpack.c.b16 %v7772_v40, %v7772_v40  ;;  %v5497_v29 = vrot.slane %v11934_v35, %v11901_v19 }
 0x217   : > { %9998 = vmatprep.mubr.msk.bf16.mxu0 %vm4230_vm4, %v4206_v31  ;;  %v5511_v41 = vrot.slane %v11944_v4, %v11901_v19  ;;  %v7742_v8 = vpack.c.b16 %v7643_v49, %v7643_v49  ;;  %v5525_v24 = vrot.slane %v4697_v6, %v11901_v19  ;;  %v5539_v48 = vrot.slane %v4699_v43, %v11901_v19  ;;  %v3839_v17 = vpop.permute.xlu1 %3838  ;;  %vm13475_vm12 = vmmov %vm13472_vm5 }
 0x218   : > { %v5490_v33 = vrot.slane %v5483_v5, %v11901_v19  ;;  %v7849_v30 = vsel %vm12002_vm11, %v7815_v21, %v7848_v61  ;;  %v5504_v54 = vrot.slane %v5497_v29, %v11901_v19  ;;  %v6331_v47 = vunpack.c.l.b16 %v5448_v12 }
 0x219   : > { %v3835_v0 = vpop.permute.xlu0 %3834  ;;  %v5518_v35 = vrot.slane %v5511_v41, %v11901_v19  ;;  %7759 = vst.msk [vmem:[#allocation4 + $0x18] sm:$0xf] %vm13475_vm12, %v7742_v8  ;;  %7850 = vst [vmem:[#allocation4 + $0x10] sm:$0xf] %v7849_v30  ;;  %v5532_v4 = vrot.slane %v5525_v24, %v11901_v19  ;;  %v5546_v6 = vrot.slane %v5539_v48, %v11901_v19  ;;  %v6332_v60 = vunpack.c.l.b16 %v5462_v63  ;;  %v6622_v24 = vld [vmem:[#allocation4 + $0x90] sm:$0xf] }
 0x21a   : > { %3870 = vst.msk [vmem:[#allocation3 + $0x68] sm:$0xff] %vm3856_vm3, %v3835_v0  ;;  %v6333_v13 = vunpack.c.l.b16 %v5476_v38  ;;  %v6334_v34 = vunpack.c.l.b16 %v5490_v33  ;;  %v6335_v1 = vunpack.c.l.b16 %v5504_v54  ;;  %v4528_v20 = vmax.f32 %v11914_v51, 0.0 }
 0x21b   : > { %v6336_v37 = vunpack.c.l.b16 %v5518_v35  ;;  %v6337_v43 = vunpack.c.l.b16 %v5532_v4  ;;  %v6338_v52 = vunpack.c.l.b16 %v5546_v6  ;;  %v6395_v42 = vrot.slane %v6332_v60, 7  ;;  %v4160_v9 = vpop.permute.xlu1 %4159 }
 0x21c   : > { %v6398_v11 = vrot.slane %v6333_v13, 6  ;;  %vm13476_vm8 = vcmask 228544   ;;  %v6401_v36 = vrot.slane %v6334_v34, 5  ;;  %v6404_v16 = vrot.slane %v6335_v1, 4 }
 0x21d   : > { %v3294_v56 = vpop.permute.xlu0 %3293  ;;  %v6407_v39 = vrot.slane %v6336_v37, 3  ;;  %v4526_v32 = vmax.f32 %v11922_v3, 0.0  ;;  %v6397_v12 = vsel %vm6396_vm14, %v6395_v42, %v6331_v47  ;;  %v6410_v7 = vrot.slane %v6337_v43, 2 }
 0x21e   : > { %3327 = vst.msk [vmem:[#allocation3 + $0x78] sm:$0xff] %vm13476_vm8, %v3294_v56  ;;  %v6413_v2 = vrot.slane %v6338_v52, 1  ;;  %v6539_v51 = vsel %vm6399_vm15, %v6395_v42, %v6331_v47  ;;  %v6400_v31 = vsel %vm6399_vm15, %v6398_v11, %v6397_v12  ;;  %v4497_v62 = vadd.f32 %v11878_v27, %v11917_v53 }
 0x21f   : > { %3872 = vst.msk [vmem:[#allocation3 + $0x78] sm:$0xff] %vm3856_vm3, %v3839_v17  ;;  %v6540_v22 = vsel %vm6402_vm10, %v6398_v11, %v6539_v51  ;;  %v4495_v3 = vadd.f32 %v11878_v27, %v11925_v59  ;;  %v6403_v18 = vsel %vm6402_vm10, %v6401_v36, %v6400_v31  ;;  %v4461_v38 = vmul.f32 %v11969_v57, %v11872_v15  ;;  %vm13477_vm3 = vmmov %vm13472_vm5 }
 0x220   : > { %4193 = vst.msk [vmem:[#allocation3 + $0x78] sm:$0xff] %vm4177_vm2, %v4160_v9  ;;  %v6541_v40 = vsel %vm6405_vm1, %v6401_v36, %v6540_v22  ;;  %v6588_v61 = vpack.c.b16 %v6413_v2, %v6413_v2  ;;  %v6406_v5 = vsel %vm6405_vm1, %v6404_v16, %v6403_v18  ;;  %v4529_v21 = vmax.f32 %v4497_v62, 0.0  ;;  %v10159_v29 = vld [vmem:[#allocation4 + $0x8] ss:$16 sps:$4 sm:$0xff]  }
 0x221   : > { %v4156_v63 = vpop.permute.xlu0 %4155  ;;  %v6542_v49 = vsel %vm6408_vm0, %v6404_v16, %v6541_v40  ;;  %v4527_v53 = vmax.f32 %v4495_v3, 0.0  ;;  %v6409_v59 = vsel %vm6408_vm0, %v6407_v39, %v6406_v5  ;;  %v12053_v8 = vadd.f32 %v11878_v27, %v4461_v38  ;;  %7962 = vrot.lane.b32.xlu0 %v10159_v29, %s10283_s26 }
 0x222   : > { %4191 = vst.msk [vmem:[#allocation3 + $0x68] sm:$0xff] %vm4177_vm2, %v4156_v63  ;;  %v6543_v41 = vsel %vm6411_vm7, %v6407_v39, %v6542_v49  ;;  %v6626_v0 = vsel %vm11821_vm9, %v6588_v61, %v6625_v58  ;;  %v6412_v57 = vsel %vm6411_vm7, %v6410_v7, %v6409_v59  ;;  %v4557_v48 = vpack.c.bf16 %v4529_v21, %v4528_v20 }
 0x223   : > { %v6544_v33 = vsel %vm6414_vm6, %v6410_v7, %v6543_v41  ;;  %6627 = vst [vmem:[#allocation4 + $0x94] sm:$0x1] %v6626_v0  ;;  %v9834_v17 = vpack.c.bf16 %v4529_v21, %v4529_v21  ;;  %v6415_v54 = vsel %vm6414_vm6, %v6413_v2, %v6412_v57  ;;  %v4556_v47 = vpack.c.bf16 %v4527_v53, %v4526_v32 }
 0x224   : > { %v6587_v35 = vpack.c.b16 %v6544_v33, %v6544_v33  ;;  %v9833_v4 = vpack.c.bf16 %v4527_v53, %v4527_v53  ;;  %v6514_v6 = vpack.c.b16 %v6415_v54, %v6415_v54  ;;  %v4805_v60 = vrot.slane %v4557_v48, %v11898_v26 }
 0x225   : > { %v4158_v30 = vpop.permute.xlu0 %4157  ;;  %v4812_v13 = vrot.slane %v9834_v17, %v11898_v26  ;;  %v4532_v34 = vmax.f32 %v12053_v8, 0.0  ;;  %v4756_v37 = vrot.slane %v4556_v47, %v11898_v26  ;;  %v12069_v56 = vmul.f32 %v11872_v15, %v11974_v46 }
 0x226   : > { %4192 = vst.msk [vmem:[#allocation3 + $0x70] sm:$0xff] %vm4177_vm2, %v4158_v30  ;;  %v6623_v1 = vsel %vm12002_vm11, %v6587_v35, %v6622_v24  ;;  %v4763_v20 = vrot.slane %v9833_v4, %v11898_v26  ;;  %v4813_v43 = vcombine.high %v4805_v60, %v4805_v60  ;;  %v4821_v42 = vrot.slane %v4805_v60, %v11898_v26  ;;  %vm13478_vm2 = vmmov %vm13477_vm3 }
 0x227   : > { %6531 = vst.msk [vmem:[#allocation4 + $0x98] sm:$0xf] %vm13477_vm3, %v6514_v6  ;;  %6624 = vst [vmem:[#allocation4 + $0x90] sm:$0xf] %v6623_v1  ;;  %v4814_v52 = vcombine.high %v4812_v13, %v4812_v13  ;;  %v4828_v11 = vrot.slane %v4812_v13, %v11898_v26  ;;  %v4764_v36 = vcombine.high %v4756_v37, %v4756_v37  ;;  %v4209_v62 = vld [vmem:[#allocation3 + $0x78] sm:$0xff]  ;;  %vm13482_vm8 = vcmask 1041408  }
 0x228   : > { %v4765_v16 = vcombine.high %v4763_v20, %v4763_v20  ;;  %v12075_v39 = vrot.slane %v4756_v37, %v11898_v26  ;;  %v12078_v32 = vrot.slane %v4763_v20, %v11898_v26  ;;  %v4835_v46 = vrot.slane %v4813_v43, %v11898_v26  ;;  %vm13480_vm5 = vmmov %vm13478_vm2 }
 0x229   : > { %v4207_v9 = vld [vmem:[#allocation3 + $0x68] sm:$0xff]  ;;  %v4842_v12 = vrot.slane %v4814_v52, %v11898_v26  ;;  %v4843_v7 = vcombine.high %v4821_v42, %v4821_v42  ;;  %v4844_v2 = vcombine.high %v4828_v11, %v4828_v11  ;;  %v6788_v51 = vrot.slane %v4821_v42, %v11901_v19  ;;  %vm13481_vm12 = vmmov %vm13478_vm2 }
 0x22a   : > { %9999 = vmatmul.mubr.msk.bf16.gmra.mrb[24].mxu0 %vm4230_vm4, %v4207_v9  ;;  %v6844_v31 = vrot.slane %v4828_v11, %v11901_v19  ;;  %v12086_v22 = vrot.slane %v4764_v36, %v11898_v26  ;;  %v12089_v58 = vrot.slane %v4765_v16, %v11898_v26  ;;  %v4845_v3 = vcombine.high %v4835_v46, %v4835_v46  ;;  %vm13483_vm3 = vmmov %vm13478_vm2 }
 0x22b   : > { %v4846_v63 = vcombine.high %v4842_v12, %v4842_v12  ;;  %v6802_v18 = vrot.slane %v4835_v46, %v11901_v19  ;;  %v6816_v40 = vrot.slane %v4843_v7, %v11901_v19  ;;  %v6795_v38 = vrot.slane %v6788_v51, %v11901_v19  ;;  %v7857_v7 = vld [vmem:[#allocation4 + $0x24] sm:$0x1] }
 0x22c   : > { %v6851_v5 = vrot.slane %v6844_v31, %v11901_v19  ;;  %v6858_v49 = vrot.slane %v4842_v12, %v11901_v19  ;;  %v6872_v21 = vrot.slane %v4844_v2, %v11901_v19  ;;  %v6830_v59 = vrot.slane %v4845_v3, %v11901_v19 }
 0x22d   : > { %v4208_v61 = vld [vmem:[#allocation3 + $0x70] sm:$0xff]  ;;  %v6809_v53 = vrot.slane %v6802_v18, %v11901_v19  ;;  %v6823_v29 = vrot.slane %v6816_v40, %v11901_v19  ;;  %v6886_v41 = vrot.slane %v4846_v63, %v11901_v19  ;;  %v7574_v33 = vunpack.c.l.b16 %v6795_v38 }
 0x22e   : > { %10002 = vmatprep.mubr.msk.bf16.mxu1 %vm4230_vm4, %v4208_v61  ;;  %v6865_v0 = vrot.slane %v6858_v49, %v11901_v19  ;;  %v6879_v57 = vrot.slane %v6872_v21, %v11901_v19  ;;  %v7578_v24 = vunpack.c.l.b16 %v6851_v5  ;;  %v6837_v48 = vrot.slane %v6830_v59, %v11901_v19 }
 0x22f   : > { %10003 = vmatmul.mubr.msk.bf16.vlgmr.msra.gmra.mrb[0].mxu1 %vm4230_vm4, %v4209_v62  ;;  %v6893_v17 = vrot.slane %v6886_v41, %v11901_v19  ;;  %v7575_v30 = vunpack.c.l.b16 %v6809_v53  ;;  %v7576_v54 = vunpack.c.l.b16 %v6823_v29  ;;  %v4794_v6 = vcombine.high %v12075_v39, %v12075_v39  ;;  %v7854_v29 = vld [vmem:[#allocation4 + $0x20] sm:$0xf]  ;;  %vm13479_vm4 = vmmov %vm13478_vm2 }
 0x230   : > { %v7579_v35 = vunpack.c.l.b16 %v6865_v0  ;;  %v7580_v47 = vunpack.c.l.b16 %v6879_v57  ;;  %v7650_v4 = vrot.slane %v7578_v24, 4  ;;  %v7577_v60 = vunpack.c.l.b16 %v6837_v48 }
 0x231   : > { %v7581_v13 = vunpack.c.l.b16 %v6893_v17  ;;  %v7644_v1 = vrot.slane %v7575_v30, 7  ;;  %v7646_v37 = vrot.slane %v7576_v54, 6  ;;  %v4795_v52 = vcombine.high %v12078_v32, %v12078_v32 }
 0x232   : > { %v7652_v20 = vrot.slane %v7579_v35, 3  ;;  %v7654_v43 = vrot.slane %v7580_v47, 2  ;;  %v4796_v42 = vcombine.high %v12086_v22, %v12086_v22  ;;  %v7648_v9 = vrot.slane %v7577_v60, 5 }
 0x233   : > { %v7645_v11 = vsel %vm6396_vm14, %v7644_v1, %v7574_v33  ;;  %v7656_v36 = vrot.slane %v7581_v13, 1  ;;  %v7773_v16 = vsel %vm6399_vm15, %v7644_v1, %v7574_v33  ;;  %v4797_v2 = vcombine.high %v12089_v58, %v12089_v58 }
 0x234   : > { %v7647_v46 = vsel %vm6399_vm15, %v7646_v37, %v7645_v11  ;;  %v7774_v12 = vsel %vm6402_vm10, %v7646_v37, %v7773_v16  ;;  %v5553_v51 = vrot.slane %v12075_v39, %v11901_v19  ;;  %v5567_v63 = vrot.slane %v12086_v22, %v11901_v19 }
 0x235   : > { %v7649_v31 = vsel %vm6402_vm10, %v7648_v9, %v7647_v46  ;;  %v7775_v62 = vsel %vm6405_vm1, %v7648_v9, %v7774_v12  ;;  %v7818_v3 = vpack.c.b16 %v7656_v36, %v7656_v36  ;;  %v5581_v38 = vrot.slane %v4794_v6, %v11901_v19 }
 0x236   : > { %v7651_v18 = vsel %vm6405_vm1, %v7650_v4, %v7649_v31  ;;  %v7776_v40 = vsel %vm6408_vm0, %v7650_v4, %v7775_v62  ;;  %v5560_v61 = vrot.slane %v5553_v51, %v11901_v19  ;;  %v5574_v21 = vrot.slane %v5567_v63, %v11901_v19 }
 0x237   : > { %v7653_v5 = vsel %vm6408_vm0, %v7652_v20, %v7651_v18  ;;  %v7777_v39 = vsel %vm6411_vm7, %v7652_v20, %v7776_v40  ;;  %v7858_v49 = vsel %vm11821_vm9, %v7818_v3, %v7857_v7  ;;  %v5588_v59 = vrot.slane %v5581_v38, %v11901_v19  ;;  %v7981_v7 = vld [vmem:[#allocation4 + $0x10] sm:$0xf]  ;;  %v6631_v18 = vld [vmem:[#allocation4 + $0xa4] sm:$0x1] }
 0x238   : > { %v7655_v53 = vsel %vm6411_vm7, %v7654_v43, %v7653_v5  ;;  %v7778_v22 = vsel %vm6414_vm6, %v7654_v43, %v7777_v39  ;;  %7859 = vst [vmem:[#allocation4 + $0x24] sm:$0x1] %v7858_v49  ;;  %v5595_v41 = vrot.slane %v4796_v42, %v11901_v19  ;;  %v5609_v33 = vrot.slane %v12078_v32, %v11901_v19 }
 0x239   : > { %v7657_v0 = vsel %vm6414_vm6, %v7656_v36, %v7655_v53  ;;  %v7817_v57 = vpack.c.b16 %v7778_v22, %v7778_v22  ;;  %v5623_v24 = vrot.slane %v12089_v58, %v11901_v19  ;;  %v5637_v30 = vrot.slane %v4795_v52, %v11901_v19 }
 0x23a   : > { %v7743_v48 = vpack.c.b16 %v7657_v0, %v7657_v0  ;;  %v5602_v17 = vrot.slane %v5595_v41, %v11901_v19  ;;  %v5651_v54 = vrot.slane %v4797_v2, %v11901_v19  ;;  %v5616_v47 = vrot.slane %v5609_v33, %v11901_v19 }
 0x23b   : > { %v7855_v35 = vsel %vm12002_vm11, %v7817_v57, %v7854_v29  ;;  %v5630_v4 = vrot.slane %v5623_v24, %v11901_v19  ;;  %v6339_v6 = vunpack.c.l.b16 %v5560_v61  ;;  %v5644_v32 = vrot.slane %v5637_v30, %v11901_v19  ;;  %v6628_v57 = vld [vmem:[#allocation4 + $0xa0] sm:$0xf] }
 0x23c   : > { %7760 = vst.msk [vmem:[#allocation4 + $0x28] sm:$0xf] %vm13478_vm2, %v7743_v48  ;;  %7856 = vst [vmem:[#allocation4 + $0x20] sm:$0xf] %v7855_v35  ;;  %v5658_v58 = vrot.slane %v5651_v54, %v11901_v19  ;;  %v6340_v60 = vunpack.c.l.b16 %v5574_v21  ;;  %v6341_v13 = vunpack.c.l.b16 %v5588_v59  ;;  %v6342_v1 = vunpack.c.l.b16 %v5602_v17  ;;  %v7982_v21 = vld [vmem:[#allocation4 + $0x14] sm:$0x1] }
 0x23d   : > { %v6343_v37 = vunpack.c.l.b16 %v5616_v47  ;;  %v6344_v20 = vunpack.c.l.b16 %v5630_v4  ;;  %v4498_v43 = vadd.f32 %v11878_v27, %v12069_v56  ;;  %v6345_v52 = vunpack.c.l.b16 %v5644_v32  ;;  %v12187_v32 = vld [vmem:[#allocation4 + $0x10] sm:$0xf] }
 0x23e   : > { %v6346_v42 = vunpack.c.l.b16 %v5658_v58  ;;  %v6416_v11 = vrot.slane %v6340_v60, 7  ;;  %v6418_v9 = vrot.slane %v6341_v13, 6  ;;  %v6420_v36 = vrot.slane %v6342_v1, 5  ;;  %v12157_v3 = vpop.f32.mrb[12].mxu0 }
 0x23f   : > { %v6422_v16 = vrot.slane %v6343_v37, 4  ;;  %v6424_v46 = vrot.slane %v6344_v20, 3  ;;  %v4530_v12 = vmax.f32 %v4498_v43, 0.0  ;;  %v6426_v51 = vrot.slane %v6345_v52, 2  ;;  %v12165_v38 = vpop.f32.mrb[13].mxu0 }
 0x240   : > { %v6417_v2 = vsel %vm6396_vm14, %v6416_v11, %v6339_v6  ;;  %v6428_v31 = vrot.slane %v6346_v42, 1  ;;  %v6545_v62 = vsel %vm6399_vm15, %v6416_v11, %v6339_v6  ;;  %v4462_v40 = vmul.f32 %v11982_v55, %v11872_v15  ;;  %v12169_v22 = vpop.f32.mrb[14].mxu0  ;;  %v12191_v20 = vld [vmem:[#allocation4 + $0x14] sm:$0x1] }
 0x241   : > { %v6419_v63 = vsel %vm6399_vm15, %v6418_v9, %v6417_v2  ;;  %v6546_v56 = vsel %vm6402_vm10, %v6418_v9, %v6545_v62  ;;  %v4460_v61 = vmul.f32 %v11872_v15, %v11988_v14  ;;  %v8010_v53 = vshrl.u32 %v7981_v7, 16  ;;  %v12181_v48 = vpop.f32.mrb[15].mxu0 }
 0x242   : > { %v6421_v5 = vsel %vm6402_vm10, %v6420_v36, %v6419_v63  ;;  %v6547_v39 = vsel %vm6405_vm1, %v6420_v36, %v6546_v56  ;;  %v6590_v49 = vpack.c.b16 %v6428_v31, %v6428_v31  ;;  %v4501_v55 = vadd.f32 %v11878_v27, %v4462_v40 }
 0x243   : > { %v6423_v29 = vsel %vm6405_vm1, %v6422_v16, %v6421_v5  ;;  %v6548_v59 = vsel %vm6408_vm0, %v6422_v16, %v6547_v39  ;;  %v4499_v41 = vadd.f32 %v11878_v27, %v4460_v61  ;;  %v10160_v15 = vld [vmem:[#allocation4 + $0x10] ss:$16 sps:$4 sm:$0xff]   ;;  %v12179_v24 = vrot.slane %v8010_v53, 4  ;;  %v10161_v37 = vld [vmem:[#allocation4 + $0x18] ss:$16 sps:$4 sm:$0xff]  }
 0x244   : > { %v6425_v14 = vsel %vm6408_vm0, %v6424_v46, %v6423_v29  ;;  %v6549_v0 = vsel %vm6411_vm7, %v6424_v46, %v6548_v59  ;;  %v6632_v33 = vsel %vm11821_vm9, %v6590_v49, %v6631_v18  ;;  %v4533_v54 = vmax.f32 %v4501_v55, 0.0  ;;  %8411 = vrot.lane.b32.xlu0 %v10160_v15, %s10293_s24 }
 0x245   : > { %v6427_v17 = vsel %vm6411_vm7, %v6426_v51, %v6425_v14  ;;  %v6550_v30 = vsel %vm6414_vm6, %v6426_v51, %v6549_v0  ;;  %6633 = vst [vmem:[#allocation4 + $0xa4] sm:$0x1] %v6632_v33  ;;  %v4531_v27 = vmax.f32 %v4499_v41, 0.0  ;;  %v8013_v4 = vshll.u32 %v7981_v7, 16 }
 0x246   : > { %v6429_v35 = vsel %vm6414_vm6, %v6428_v31, %v6427_v17  ;;  %v6589_v47 = vpack.c.b16 %v6550_v30, %v6550_v30  ;;  %v8019_v6 = vshll.u32 %v7982_v21, 16  ;;  %v4559_v60 = vpack.c.bf16 %v4533_v54, %v4532_v34 }
 0x247   : > { %v6515_v58 = vpack.c.b16 %v6429_v35, %v6429_v35  ;;  %v9836_v13 = vpack.c.bf16 %v4533_v54, %v4533_v54  ;;  %v4558_v1 = vpack.c.bf16 %v4531_v27, %v4530_v12  ;;  %v9835_v52 = vpack.c.bf16 %v4531_v27, %v4531_v27 }
 0x248   : > { %v6629_v43 = vsel %vm12002_vm11, %v6589_v47, %v6628_v57  ;;  %v12195_v42 = vrot.slane %v8013_v4, 5  ;;  %v12197_v11 = vrot.slane %v8019_v6, 5  ;;  %v4903_v9 = vrot.slane %v4559_v60, %v11898_v26  ;;  %8456 = vrot.lane.b32.xlu0 %v10161_v37, %s10294_s25 }
 0x249   : > { %6532 = vst.msk [vmem:[#allocation4 + $0xa8] sm:$0xf] %vm13479_vm4, %v6515_v58  ;;  %6630 = vst [vmem:[#allocation4 + $0xa0] sm:$0xf] %v6629_v43  ;;  %v4910_v8 = vrot.slane %v9836_v13, %v11898_v26  ;;  %v4854_v34 = vrot.slane %v4558_v1, %v11898_v26  ;;  %v8490_v36 = vshrl.u32 %v12187_v32, 16  ;;  %v4861_v16 = vrot.slane %v9835_v52, %v11898_v26 }
 0x24a   : > { %v8016_v46 = vor.u32 %v12195_v42, %v12179_v24  ;;  %v8493_v12 = vshll.u32 %v12187_v32, 16  ;;  %v8499_v7 = vshll.u32 %v12191_v20, 16  ;;  %v4911_v2 = vcombine.high %v4903_v9, %v4903_v9  ;;  %vm13484_vm4 = vmmov %vm13478_vm2 }
 0x24b   : > { %v4912_v51 = vcombine.high %v4910_v8, %v4910_v8  ;;  %v4919_v31 = vrot.slane %v4903_v9, %v11898_v26  ;;  %v4926_v62 = vrot.slane %v4910_v8, %v11898_v26  ;;  %v4862_v63 = vcombine.high %v4854_v34, %v4854_v34 }
 0x24c   : > { %v4863_v56 = vcombine.high %v4861_v16, %v4861_v16  ;;  %v4870_v18 = vrot.slane %v4854_v34, %v11898_v26  ;;  %v12214_v40 = vrot.slane %v4861_v16, %v11898_v26  ;;  %v4933_v61 = vrot.slane %v4911_v2, %v11898_v26 }
 0x24d   : > { %v4940_v5 = vrot.slane %v4912_v51, %v11898_v26  ;;  %v4941_v39 = vcombine.high %v4919_v31, %v4919_v31  ;;  %v4942_v49 = vcombine.high %v4926_v62, %v4926_v62  ;;  %v6900_v21 = vrot.slane %v4919_v31, %v11901_v19 }
 0x24e   : > { %v6956_v53 = vrot.slane %v4926_v62, %v11901_v19  ;;  %v4884_v29 = vrot.slane %v4862_v63, %v11898_v26  ;;  %v12222_v59 = vrot.slane %v4863_v56, %v11898_v26  ;;  %v4943_v55 = vcombine.high %v4933_v61, %v4933_v61 }
 0x24f   : > { %v4944_v41 = vcombine.high %v4940_v5, %v4940_v5  ;;  %v6914_v15 = vrot.slane %v4933_v61, %v11901_v19  ;;  %v6928_v14 = vrot.slane %v4941_v39, %v11901_v19  ;;  %v6907_v0 = vrot.slane %v6900_v21, %v11901_v19 }
 0x250   : > { %v6963_v57 = vrot.slane %v6956_v53, %v11901_v19  ;;  %v6970_v33 = vrot.slane %v4940_v5, %v11901_v19  ;;  %v6984_v17 = vrot.slane %v4942_v49, %v11901_v19  ;;  %v6942_v27 = vrot.slane %v4943_v55, %v11901_v19  ;;  %v7863_v55 = vld [vmem:[#allocation4 + $0x34] sm:$0x1] }
 0x251   : > { %v6921_v30 = vrot.slane %v6914_v15, %v11901_v19  ;;  %v6935_v54 = vrot.slane %v6928_v14, %v11901_v19  ;;  %v6998_v35 = vrot.slane %v4944_v41, %v11901_v19  ;;  %v7582_v6 = vunpack.c.l.b16 %v6907_v0 }
 0x252   : > { %v6977_v47 = vrot.slane %v6970_v33, %v11901_v19  ;;  %v6991_v4 = vrot.slane %v6984_v17, %v11901_v19  ;;  %v7586_v58 = vunpack.c.l.b16 %v6963_v57  ;;  %v6949_v60 = vrot.slane %v6942_v27, %v11901_v19 }
 0x253   : > { %v7005_v13 = vrot.slane %v6998_v35, %v11901_v19  ;;  %v7583_v1 = vunpack.c.l.b16 %v6921_v30  ;;  %v7584_v37 = vunpack.c.l.b16 %v6935_v54  ;;  %v4892_v8 = vcombine.high %v4870_v18, %v4870_v18 }
 0x254   : > { %v7587_v43 = vunpack.c.l.b16 %v6977_v47  ;;  %v7588_v52 = vunpack.c.l.b16 %v6991_v4  ;;  %v7664_v9 = vrot.slane %v7586_v58, 4  ;;  %v7585_v34 = vunpack.c.l.b16 %v6949_v60  ;;  %v7860_v58 = vld [vmem:[#allocation4 + $0x30] sm:$0xf] }
 0x255   : > { %v7589_v16 = vunpack.c.l.b16 %v7005_v13  ;;  %v7658_v2 = vrot.slane %v7583_v1, 7  ;;  %v7660_v51 = vrot.slane %v7584_v37, 6  ;;  %v4893_v63 = vcombine.high %v12214_v40, %v12214_v40 }
 0x256   : > { %v7666_v31 = vrot.slane %v7587_v43, 3  ;;  %v7668_v62 = vrot.slane %v7588_v52, 2  ;;  %v4894_v56 = vcombine.high %v4884_v29, %v4884_v29  ;;  %v7662_v5 = vrot.slane %v7585_v34, 5 }
 0x257   : > { %v7659_v61 = vsel %vm6396_vm14, %v7658_v2, %v7582_v6  ;;  %v7670_v39 = vrot.slane %v7589_v16, 1  ;;  %v7779_v49 = vsel %vm6399_vm15, %v7658_v2, %v7582_v6  ;;  %v4895_v41 = vcombine.high %v12222_v59, %v12222_v59 }
 0x258   : > { %v7661_v21 = vsel %vm6399_vm15, %v7660_v51, %v7659_v61  ;;  %v7780_v53 = vsel %vm6402_vm10, %v7660_v51, %v7779_v49  ;;  %v5665_v15 = vrot.slane %v4870_v18, %v11901_v19  ;;  %v5679_v33 = vrot.slane %v4884_v29, %v11901_v19 }
 0x259   : > { %v7663_v14 = vsel %vm6402_vm10, %v7662_v5, %v7661_v21  ;;  %v7781_v0 = vsel %vm6405_vm1, %v7662_v5, %v7780_v53  ;;  %v7820_v57 = vpack.c.b16 %v7670_v39, %v7670_v39  ;;  %v5693_v27 = vrot.slane %v4892_v8, %v11901_v19 }
 0x25a   : > { %v7665_v17 = vsel %vm6405_vm1, %v7664_v9, %v7663_v14  ;;  %v7782_v30 = vsel %vm6408_vm0, %v7664_v9, %v7781_v0  ;;  %v5672_v54 = vrot.slane %v5665_v15, %v11901_v19  ;;  %v5686_v4 = vrot.slane %v5679_v33, %v11901_v19 }
 0x25b   : > { %v7667_v35 = vsel %vm6408_vm0, %v7666_v31, %v7665_v17  ;;  %v7783_v47 = vsel %vm6411_vm7, %v7666_v31, %v7782_v30  ;;  %v7864_v18 = vsel %vm11821_vm9, %v7820_v57, %v7863_v55  ;;  %v5700_v60 = vrot.slane %v5693_v27, %v11901_v19  ;;  %v8475_v27 = vld [vmem:[#allocation4 + $0x20] sm:$0xf] }
 0x25c   : > { %v7669_v6 = vsel %vm6411_vm7, %v7668_v62, %v7667_v35  ;;  %v7784_v29 = vsel %vm6414_vm6, %v7668_v62, %v7783_v47  ;;  %7865 = vst [vmem:[#allocation4 + $0x34] sm:$0x1] %v7864_v18  ;;  %v5707_v13 = vrot.slane %v4894_v56, %v11901_v19  ;;  %v5721_v43 = vrot.slane %v12214_v40, %v11901_v19 }
 0x25d   : > { %v7671_v1 = vsel %vm6414_vm6, %v7670_v39, %v7669_v6  ;;  %v7819_v37 = vpack.c.b16 %v7784_v29, %v7784_v29  ;;  %v5735_v52 = vrot.slane %v12222_v59, %v11901_v19  ;;  %v5749_v34 = vrot.slane %v4893_v63, %v11901_v19  ;;  %v8476_v6 = vld [vmem:[#allocation4 + $0x24] sm:$0x1] }
 0x25e   : > { %v7744_v9 = vpack.c.b16 %v7671_v1, %v7671_v1  ;;  %v5714_v8 = vrot.slane %v5707_v13, %v11901_v19  ;;  %v5763_v16 = vrot.slane %v4895_v41, %v11901_v19  ;;  %v5728_v51 = vrot.slane %v5721_v43, %v11901_v19  ;;  %v6634_v1 = vld [vmem:[#allocation4 + $0xb0] sm:$0xf] }
 0x25f   : > { %v7861_v2 = vsel %vm12002_vm11, %v7819_v37, %v7860_v58  ;;  %v5742_v31 = vrot.slane %v5735_v52, %v11901_v19  ;;  %v6347_v62 = vunpack.c.l.b16 %v5672_v54  ;;  %v5756_v40 = vrot.slane %v5749_v34, %v11901_v19  ;;  %v10162_v52 = vld [vmem:[#allocation4 + $0x90] ss:$16 sps:$4 sm:$0xff]  }
 0x260   : > { %7761 = vst.msk [vmem:[#allocation4 + $0x38] sm:$0xf] %vm13480_vm5, %v7744_v9  ;;  %7862 = vst [vmem:[#allocation4 + $0x30] sm:$0xf] %v7861_v2  ;;  %v5770_v59 = vrot.slane %v5763_v16, %v11901_v19  ;;  %v6348_v56 = vunpack.c.l.b16 %v5686_v4  ;;  %v6349_v61 = vunpack.c.l.b16 %v5700_v60  ;;  %v6350_v63 = vunpack.c.l.b16 %v5714_v8 }
 0x261   : > { %v6351_v5 = vunpack.c.l.b16 %v5728_v51  ;;  %v6352_v39 = vunpack.c.l.b16 %v5742_v31  ;;  %v8017_v49 = vrot.slane %v8016_v46, 4  ;;  %v6353_v21 = vunpack.c.l.b16 %v5756_v40  ;;  %v6637_v46 = vld [vmem:[#allocation4 + $0xb4] sm:$0x1]  ;;  %v12316_v31 = vld [vmem:[%s13411_s4] ss:$0 sm:$0xff]  ;;  %vm13485_vm5 = vmmov %vm13478_vm2 }
 0x262   : > { %v6354_v53 = vunpack.c.l.b16 %v5770_v59  ;;  %v6430_v55 = vrot.slane %v6348_v56, 7  ;;  %v6432_v41 = vrot.slane %v6349_v61, 6  ;;  %v6434_v15 = vrot.slane %v6350_v63, 5  ;;  %v4617_v59 = vld [vmem:[#allocation4 + $0xc0] sm:$0x1] }
 0x263   : > { %v6436_v14 = vrot.slane %v6351_v5, 4  ;;  %v6438_v0 = vrot.slane %v6352_v39, 3  ;;  %v8022_v57 = vsel %vm10461_vm13, %v8017_v49, %v12197_v11  ;;  %v6440_v17 = vrot.slane %v6353_v21, 2  ;;  %v8226_v56 = vld [vmem:[#allocation4 + $0x90] sm:$0xf] }
 0x264   : > { %v6431_v33 = vsel %vm6396_vm14, %v6430_v55, %v6347_v62  ;;  %v6442_v30 = vrot.slane %v6354_v53, 1  ;;  %v6551_v54 = vsel %vm6399_vm15, %v6430_v55, %v6347_v62  ;;  %v9855_v35 = vcombine.low %v8008_v10, %v8022_v57  ;;  %v10163_v49 = vld [vmem:[#allocation4 + $0x98] ss:$16 sps:$4 sm:$0xff]  }
 0x265   : > { %v6433_v24 = vsel %vm6399_vm15, %v6432_v41, %v6431_v33  ;;  %v6552_v42 = vsel %vm6402_vm10, %v6432_v41, %v6551_v54  ;;  %v8492_v11 = vrot.slane %v8490_v36, 4  ;;  %v8495_v29 = vrot.slane %v8493_v12, 5  ;;  %v8227_v41 = vld [vmem:[#allocation4 + $0x94] sm:$0x1] }
 0x266   : > { %v6435_v47 = vsel %vm6402_vm10, %v6434_v15, %v6433_v24  ;;  %v6553_v18 = vsel %vm6405_vm1, %v6434_v15, %v6552_v42  ;;  %v6592_v4 = vpack.c.b16 %v6442_v30, %v6442_v30  ;;  %8119 = vrot.lane.b32.xlu0 %v9855_v35, %s10289_s19  ;;  %v8501_v25 = vrot.slane %v8499_v7, 5 }
 0x267   : > { %v6437_v58 = vsel %vm6405_vm1, %v6436_v14, %v6435_v47  ;;  %v6554_v60 = vsel %vm6408_vm0, %v6436_v14, %v6553_v18  ;;  %v8504_v28 = vshrl.u32 %v8475_v27, 16  ;;  %v10164_v10 = vld [vmem:[#allocation4 + $0x28] ss:$16 sps:$4 sm:$0xff]   ;;  %v8496_v12 = vor.u32 %v8495_v29, %v8492_v11  ;;  %v8228_v14 = vld [vmem:[#allocation4 + $0xa0] sm:$0xf] }
 0x268   : > { %v6439_v36 = vsel %vm6408_vm0, %v6438_v0, %v6437_v58  ;;  %v6555_v13 = vsel %vm6411_vm7, %v6438_v0, %v6554_v60  ;;  %v6638_v32 = vsel %vm11821_vm9, %v6592_v4, %v6637_v46  ;;  %v8507_v20 = vshll.u32 %v8475_v27, 16  ;;  %7964 = vrot.lane.b32.xlu1 %v10164_v10, %s10283_s26  ;;  %v12345_v29 = vld [vmem:[#allocation4 + $0xa4] sm:$0x1] }
 0x269   : > { %v6441_v37 = vsel %vm6411_vm7, %v6440_v17, %v6439_v36  ;;  %v6556_v43 = vsel %vm6414_vm6, %v6440_v17, %v6555_v13  ;;  %6639 = vst [vmem:[#allocation4 + $0xb4] sm:$0x1] %v6638_v32  ;;  %v8506_v9 = vrot.slane %v8504_v28, 4  ;;  %v8497_v34 = vrot.slane %v8496_v12, 4 }
 0x26a   : > { %v6443_v7 = vsel %vm6414_vm6, %v6442_v30, %v6441_v37  ;;  %v6591_v8 = vpack.c.b16 %v6556_v43, %v6556_v43  ;;  %v8513_v16 = vshll.u32 %v8476_v6, 16  ;;  %8164 = vrot.lane.b32.xlu0 %v10162_v52, %s10286_s13  ;;  %v8509_v51 = vrot.slane %v8507_v20, 5 }
 0x26b   : > { %v6516_v2 = vpack.c.b16 %v6443_v7, %v6443_v7  ;;  %v4465_v62 = vmul.f32 %v12316_v31, %v12157_v3  ;;  %v4463_v40 = vmul.f32 %v12316_v31, %v12165_v38  ;;  %v8502_v63 = vsel %vm10461_vm13, %v8497_v34, %v8501_v25  ;;  %v12332_v38 = vld [vmem:[%s13412_s5] ss:$0 sm:$0xff] }
 0x26c   : > { %v6635_v61 = vsel %vm12002_vm11, %v6591_v8, %v6634_v1  ;;  %v8515_v5 = vrot.slane %v8513_v16, 5  ;;  %v4466_v39 = vmul.f32 %v12316_v31, %v12169_v22  ;;  %v8510_v3 = vor.u32 %v8509_v51, %v8506_v9 }
 0x26d   : > { %6533 = vst.msk [vmem:[#allocation4 + $0xb8] sm:$0xf] %vm13481_vm12, %v6516_v2  ;;  %6636 = vst [vmem:[#allocation4 + $0xb0] sm:$0xf] %v6635_v61  ;;  %v4504_v21 = vadd.f32 %v12332_v38, %v4465_v62  ;;  %v4502_v53 = vadd.f32 %v12332_v38, %v4463_v40  ;;  %v4464_v55 = vmul.f32 %v12316_v31, %v12181_v48  ;;  %v4618_v15 = vsel %vm11821_vm9, 0, %v4617_v59 }
 0x26e   : > { %v4505_v22 = vadd.f32 %v12332_v38, %v4466_v39  ;;  %v8243_v0 = vshrl.u32 %v8226_v56, 16  ;;  %v8246_v57 = vshll.u32 %v8226_v56, 16  ;;  %8209 = vrot.lane.b32.xlu0 %v10163_v49, %s10288_s18  ;;  %v8511_v33 = vrot.slane %v8510_v3, 4  ;;  %4619 = vst [vmem:[#allocation4 + $0xc0] sm:$0x1] %v4618_v15 }
 0x26f   : > { %v4536_v17 = vmax.f32 %v4504_v21, 0.0  ;;  %v4534_v30 = vmax.f32 %v4502_v53, 0.0  ;;  %v4503_v54 = vadd.f32 %v12332_v38, %v4464_v55  ;;  %v8252_v42 = vshll.u32 %v8227_v41, 16  ;;  %v9059_v61 = vld [vmem:[%s13414_s7] sm:$0x3] }
 0x270   : > { %v4537_v27 = vmax.f32 %v4505_v22, 0.0  ;;  %v8245_v24 = vrot.slane %v8243_v0, 4  ;;  %v8248_v48 = vrot.slane %v8246_v57, 5  ;;  %v8516_v46 = vsel %vm10461_vm13, %v8511_v33, %v8515_v5  ;;  %10050 = vmatprep.subr.msk.bf16.mxu1 %vm13482_vm8, %v9059_v61 }
 0x271   : > { %v4535_v35 = vmax.f32 %v4503_v54, 0.0  ;;  %v8257_v11 = vshrl.u32 %v8228_v14, 16  ;;  %v8260_v47 = vshll.u32 %v8228_v14, 16  ;;  %v9879_v18 = vcombine.low %v8502_v63, %v8516_v46  ;;  %v9992_v60 = vpop.f32.mrb[16].mxu0 }
 0x272   : > { %v4561_v4 = vpack.c.bf16 %v4537_v27, %v4536_v17  ;;  %v9838_v6 = vpack.c.bf16 %v4537_v27, %v4537_v27  ;;  %v8249_v58 = vor.u32 %v8248_v48, %v8245_v24  ;;  %v12347_v10 = vrot.slane %v8252_v42, 5  ;;  %v12351_v13 = vpop.f32.mrb[17].mxu0 }
 0x273   : > { %v4560_v25 = vpack.c.bf16 %v4535_v35, %v4534_v30  ;;  %v9837_v28 = vpack.c.bf16 %v4535_v35, %v4535_v35  ;;  %v12349_v36 = vrot.slane %v8257_v11, 4  ;;  %8613 = vrot.lane.b32.xlu0 %v9879_v18, %s10295_s17  ;;  %v12358_v37 = vrot.slane %v8260_v47, 5  ;;  %v12360_v43 = vpop.f32.mrb[18].mxu0 }
 0x274   : > { %v5001_v1 = vrot.slane %v4561_v4, %v11898_v26  ;;  %v5008_v32 = vrot.slane %v9838_v6, %v11898_v26  ;;  %v12356_v12 = vrot.slane %v8249_v58, 4  ;;  %v8266_v20 = vshll.u32 %v12345_v29, 16  ;;  %v12368_v8 = vpop.f32.mrb[19].mxu0 }
 0x275   : > { %v4952_v52 = vrot.slane %v4560_v25, %v11898_v26  ;;  %v4959_v9 = vrot.slane %v9837_v28, %v11898_v26  ;;  %v12366_v7 = vmul.f32 %v12316_v31, %v9992_v60  ;;  %v4467_v29 = vmul.f32 %v12316_v31, %v12351_v13 }
 0x276   : > { %v5009_v34 = vcombine.high %v5001_v1, %v5001_v1  ;;  %v5010_v16 = vcombine.high %v5008_v32, %v5008_v32  ;;  %v5017_v2 = vrot.slane %v5001_v1, %v11898_v26  ;;  %v5024_v51 = vrot.slane %v5008_v32, %v11898_v26 }
 0x277   : > { %v4960_v62 = vcombine.high %v4952_v52, %v4952_v52  ;;  %v4961_v40 = vcombine.high %v4959_v9, %v4959_v9  ;;  %v4968_v59 = vrot.slane %v4952_v52, %v11898_v26  ;;  %v12374_v56 = vrot.slane %v4959_v9, %v11898_v26 }
 0x278   : > { %v5031_v63 = vrot.slane %v5009_v34, %v11898_v26  ;;  %v5038_v5 = vrot.slane %v5010_v16, %v11898_v26  ;;  %v5039_v39 = vcombine.high %v5017_v2, %v5017_v2  ;;  %v5040_v49 = vcombine.high %v5024_v51, %v5024_v51 }
 0x279   : > { %v7012_v3 = vrot.slane %v5017_v2, %v11901_v19  ;;  %v7068_v21 = vrot.slane %v5024_v51, %v11901_v19  ;;  %v4982_v53 = vrot.slane %v4960_v62, %v11898_v26  ;;  %v12386_v55 = vrot.slane %v4961_v40, %v11898_v26 }
 0x27a   : > { %v5041_v41 = vcombine.high %v5031_v63, %v5031_v63  ;;  %v5042_v22 = vcombine.high %v5038_v5, %v5038_v5  ;;  %v7026_v15 = vrot.slane %v5031_v63, %v11901_v19  ;;  %v7040_v14 = vrot.slane %v5039_v39, %v11901_v19  ;;  %v7869_v39 = vld [vmem:[#allocation4 + $0x44] sm:$0x1] }
 0x27b   : > { %v7019_v0 = vrot.slane %v7012_v3, %v11901_v19  ;;  %v7075_v57 = vrot.slane %v7068_v21, %v11901_v19  ;;  %v7082_v33 = vrot.slane %v5038_v5, %v11901_v19  ;;  %v7096_v17 = vrot.slane %v5040_v49, %v11901_v19 }
 0x27c   : > { %v7033_v30 = vrot.slane %v7026_v15, %v11901_v19  ;;  %v7047_v54 = vrot.slane %v7040_v14, %v11901_v19  ;;  %v7054_v27 = vrot.slane %v5041_v41, %v11901_v19  ;;  %v7110_v24 = vrot.slane %v5042_v22, %v11901_v19 }
 0x27d   : > { %v7089_v48 = vrot.slane %v7082_v33, %v11901_v19  ;;  %v7103_v42 = vrot.slane %v7096_v17, %v11901_v19  ;;  %v7590_v46 = vunpack.c.l.b16 %v7019_v0  ;;  %v7594_v35 = vunpack.c.l.b16 %v7075_v57 }
 0x27e   : > { %v7061_v11 = vrot.slane %v7054_v27, %v11901_v19  ;;  %v7117_v47 = vrot.slane %v7110_v24, %v11901_v19  ;;  %v7591_v18 = vunpack.c.l.b16 %v7033_v30  ;;  %v7592_v4 = vunpack.c.l.b16 %v7047_v54  ;;  %v7866_v24 = vld [vmem:[#allocation4 + $0x40] sm:$0xf] }
 0x27f   : > { %v7595_v6 = vunpack.c.l.b16 %v7089_v48  ;;  %v7596_v58 = vunpack.c.l.b16 %v7103_v42  ;;  %v7678_v60 = vrot.slane %v7594_v35, 4  ;;  %v4990_v25 = vcombine.high %v4968_v59, %v4968_v59 }
 0x280   : > { %v7593_v28 = vunpack.c.l.b16 %v7061_v11  ;;  %v7597_v1 = vunpack.c.l.b16 %v7117_v47  ;;  %v7672_v32 = vrot.slane %v7591_v18, 7  ;;  %v7674_v52 = vrot.slane %v7592_v4, 6 }
 0x281   : > { %v7680_v9 = vrot.slane %v7595_v6, 3  ;;  %v7682_v34 = vrot.slane %v7596_v58, 2  ;;  %v4991_v16 = vcombine.high %v12374_v56, %v12374_v56  ;;  %v4992_v2 = vcombine.high %v4982_v53, %v4982_v53 }
 0x282   : > { %v7673_v51 = vsel %vm6396_vm14, %v7672_v32, %v7590_v46  ;;  %v7676_v62 = vrot.slane %v7593_v28, 5  ;;  %v7684_v40 = vrot.slane %v7597_v1, 1  ;;  %v7785_v61 = vsel %vm6399_vm15, %v7672_v32, %v7590_v46 }
 0x283   : > { %v7675_v63 = vsel %vm6399_vm15, %v7674_v52, %v7673_v51  ;;  %v7786_v5 = vsel %vm6402_vm10, %v7674_v52, %v7785_v61  ;;  %v4993_v49 = vcombine.high %v12386_v55, %v12386_v55  ;;  %v5777_v3 = vrot.slane %v4968_v59, %v11901_v19 }
 0x284   : > { %v7677_v21 = vsel %vm6402_vm10, %v7676_v62, %v7675_v63  ;;  %v7787_v41 = vsel %vm6405_vm1, %v7676_v62, %v7786_v5  ;;  %v7822_v22 = vpack.c.b16 %v7684_v40, %v7684_v40  ;;  %v5791_v15 = vrot.slane %v4982_v53, %v11901_v19 }
 0x285   : > { %v7679_v14 = vsel %vm6405_vm1, %v7678_v60, %v7677_v21  ;;  %v7788_v0 = vsel %vm6408_vm0, %v7678_v60, %v7787_v41  ;;  %v5784_v57 = vrot.slane %v5777_v3, %v11901_v19  ;;  %v5805_v33 = vrot.slane %v4990_v25, %v11901_v19 }
 0x286   : > { %v7681_v17 = vsel %vm6408_vm0, %v7680_v9, %v7679_v14  ;;  %v7789_v30 = vsel %vm6411_vm7, %v7680_v9, %v7788_v0  ;;  %v7870_v59 = vsel %vm11821_vm9, %v7822_v22, %v7869_v39  ;;  %v5798_v54 = vrot.slane %v5791_v15, %v11901_v19 }
 0x287   : > { %v7683_v27 = vsel %vm6411_vm7, %v7682_v34, %v7681_v17  ;;  %v7790_v53 = vsel %vm6414_vm6, %v7682_v34, %v7789_v30  ;;  %7871 = vst [vmem:[#allocation4 + $0x44] sm:$0x1] %v7870_v59  ;;  %v5812_v48 = vrot.slane %v5805_v33, %v11901_v19  ;;  %v5819_v42 = vrot.slane %v4992_v2, %v11901_v19  ;;  %v4596_v17 = vld [vmem:[#allocation4 + $0x50] sm:$0x1] }
 0x288   : > { %v7685_v46 = vsel %vm6414_vm6, %v7684_v40, %v7683_v27  ;;  %v7821_v35 = vpack.c.b16 %v7790_v53, %v7790_v53  ;;  %v5833_v11 = vrot.slane %v12374_v56, %v11901_v19  ;;  %v5847_v47 = vrot.slane %v12386_v55, %v11901_v19 }
 0x289   : > { %v7745_v18 = vpack.c.b16 %v7685_v46, %v7685_v46  ;;  %v5826_v4 = vrot.slane %v5819_v42, %v11901_v19  ;;  %v5861_v6 = vrot.slane %v4991_v16, %v11901_v19  ;;  %v5875_v58 = vrot.slane %v4993_v49, %v11901_v19  ;;  %v7983_v42 = vld [vmem:[#allocation4 + $0x20] sm:$0xf] }
 0x28a   : > { %v7867_v60 = vsel %vm12002_vm11, %v7821_v35, %v7866_v24  ;;  %v5840_v25 = vrot.slane %v5833_v11, %v11901_v19  ;;  %v5854_v28 = vrot.slane %v5847_v47, %v11901_v19  ;;  %v6355_v1 = vunpack.c.l.b16 %v5784_v57  ;;  %v6640_v11 = vld [vmem:[#allocation4 + $0xc0] sm:$0xf] }
 0x28b   : > { %7762 = vst.msk [vmem:[#allocation4 + $0x48] sm:$0xf] %vm13483_vm3, %v7745_v18  ;;  %7868 = vst [vmem:[#allocation4 + $0x40] sm:$0xf] %v7867_v60  ;;  %v5868_v56 = vrot.slane %v5861_v6, %v11901_v19  ;;  %v5882_v55 = vrot.slane %v5875_v58, %v11901_v19  ;;  %v6356_v32 = vunpack.c.l.b16 %v5798_v54  ;;  %v6357_v52 = vunpack.c.l.b16 %v5812_v48  ;;  %v4620_v48 = vld [vmem:[#allocation4 + $0xd0] sm:$0x1] }
 0x28c   : > { %v6358_v9 = vunpack.c.l.b16 %v5826_v4  ;;  %v6359_v34 = vunpack.c.l.b16 %v5840_v25  ;;  %v6360_v16 = vunpack.c.l.b16 %v5854_v28  ;;  %v8255_v2 = vsel %vm10461_vm13, %v12356_v12, %v12347_v10  ;;  %v6643_v12 = vld [vmem:[#allocation4 + $0xc4] sm:$0x1]  ;;  %v7985_v25 = vld [vmem:[#allocation4 + $0x30] sm:$0xf]  ;;  %vm13486_vm3 = vmmov %vm13478_vm2 }
 0x28d   : > { %v6361_v51 = vunpack.c.l.b16 %v5868_v56  ;;  %v6362_v62 = vunpack.c.l.b16 %v5882_v55  ;;  %v6444_v40 = vrot.slane %v6356_v32, 7  ;;  %v6446_v61 = vrot.slane %v6357_v52, 6  ;;  %v7984_v60 = vld [vmem:[#allocation4 + $0x24] sm:$0x1]  ;;  %v7986_v52 = vld [vmem:[#allocation4 + $0x34] sm:$0x1] }
 0x28e   : > { %v6448_v63 = vrot.slane %v6358_v9, 5  ;;  %v6450_v5 = vrot.slane %v6359_v34, 4  ;;  %v6452_v39 = vrot.slane %v6360_v16, 3  ;;  %v8263_v49 = vor.u32 %v12358_v37, %v12349_v36 }
 0x28f   : > { %v6445_v3 = vsel %vm6396_vm14, %v6444_v40, %v6355_v1  ;;  %v6454_v21 = vrot.slane %v6361_v51, 2  ;;  %v6456_v41 = vrot.slane %v6362_v62, 1  ;;  %v6557_v22 = vsel %vm6399_vm15, %v6444_v40, %v6355_v1 }
 0x290   : > { %v6447_v15 = vsel %vm6399_vm15, %v6446_v61, %v6445_v3  ;;  %v6558_v10 = vsel %vm6402_vm10, %v6446_v61, %v6557_v22  ;;  %v8264_v14 = vrot.slane %v8263_v49, 4  ;;  %v8268_v0 = vrot.slane %v8266_v20, 5 }
 0x291   : > { %v6449_v57 = vsel %vm6402_vm10, %v6448_v63, %v6447_v15  ;;  %v6559_v33 = vsel %vm6405_vm1, %v6448_v63, %v6558_v10  ;;  %v6594_v36 = vpack.c.b16 %v6456_v41, %v6456_v41  ;;  %v4508_v37 = vadd.f32 %v12332_v38, %v12366_v7 }
 0x292   : > { %v6451_v30 = vsel %vm6405_vm1, %v6450_v5, %v6449_v57  ;;  %v6560_v59 = vsel %vm6408_vm0, %v6450_v5, %v6559_v33  ;;  %v8269_v54 = vsel %vm10461_vm13, %v8264_v14, %v8268_v0  ;;  %v10165_v20 = vld [vmem:[#allocation4 + $0x30] ss:$16 sps:$4 sm:$0xff]   ;;  %v4506_v13 = vadd.f32 %v12332_v38, %v4467_v29  ;;  %v10166_v32 = vld [vmem:[#allocation4 + $0x38] ss:$16 sps:$4 sm:$0xff]  }
 0x293   : > { %v6453_v27 = vsel %vm6408_vm0, %v6452_v39, %v6451_v30  ;;  %v6561_v53 = vsel %vm6411_vm7, %v6452_v39, %v6560_v59  ;;  %v6644_v24 = vsel %vm11821_vm9, %v6594_v36, %v6643_v12  ;;  %v9867_v7 = vcombine.low %v8255_v2, %v8269_v54  ;;  %8413 = vrot.lane.b32.xlu1 %v10165_v20, %s10293_s24  ;;  %v12488_v39 = vld [vmem:[#allocation4 + $0x30] sm:$0xf] }
 0x294   : > { %v6455_v46 = vsel %vm6411_vm7, %v6454_v21, %v6453_v27  ;;  %v6562_v35 = vsel %vm6414_vm6, %v6454_v21, %v6561_v53  ;;  %6645 = vst [vmem:[#allocation4 + $0xc4] sm:$0x1] %v6644_v24  ;;  %v4540_v47 = vmax.f32 %v4508_v37, 0.0  ;;  %v4470_v6 = vmul.f32 %v12316_v31, %v12360_v43 }
 0x295   : > { %v6457_v18 = vsel %vm6414_vm6, %v6456_v41, %v6455_v46  ;;  %v6593_v4 = vpack.c.b16 %v6562_v35, %v6562_v35  ;;  %8366 = vrot.lane.b32.xlu0 %v9867_v7, %s10296_s23  ;;  %v4597_v58 = vsel %vm11821_vm9, 0, %v4596_v17  ;;  %v4538_v1 = vmax.f32 %v4506_v13, 0.0 }
 0x296   : > { %v6517_v28 = vpack.c.b16 %v6457_v18, %v6457_v18  ;;  %4598 = vst [vmem:[#allocation4 + $0x50] sm:$0x1] %v4597_v58  ;;  %v4468_v56 = vmul.f32 %v12316_v31, %v12368_v8  ;;  %v4621_v55 = vsel %vm11821_vm9, 0, %v4620_v48  ;;  %v4509_v43 = vadd.f32 %v12332_v38, %v4470_v6 }
 0x297   : > { %v6641_v9 = vsel %vm12002_vm11, %v6593_v4, %v6640_v11  ;;  %4622 = vst [vmem:[#allocation4 + $0xd0] sm:$0x1] %v4621_v55  ;;  %v8024_v34 = vshrl.u32 %v7983_v42, 16  ;;  %v8027_v16 = vshll.u32 %v7983_v42, 16  ;;  %8458 = vrot.lane.b32.xlu1 %v10166_v32, %s10294_s25  ;;  %v8033_v8 = vshll.u32 %v7984_v60, 16 }
 0x298   : > { %6534 = vst.msk [vmem:[#allocation4 + $0xc8] sm:$0xf] %vm13478_vm2, %v6517_v28  ;;  %6642 = vst [vmem:[#allocation4 + $0xc0] sm:$0xf] %v6641_v9  ;;  %v4507_v2 = vadd.f32 %v12332_v38, %v4468_v56  ;;  %v8038_v51 = vshrl.u32 %v7985_v25, 16  ;;  %v8041_v62 = vshll.u32 %v7985_v25, 16 }
 0x299   : > { %v4541_v40 = vmax.f32 %v4509_v43, 0.0  ;;  %v8026_v61 = vrot.slane %v8024_v34, 4  ;;  %v8029_v63 = vrot.slane %v8027_v16, 5  ;;  %v8047_v5 = vshll.u32 %v7986_v52, 16 }
 0x29a   : > { %v4539_v49 = vmax.f32 %v4507_v2, 0.0  ;;  %v12490_v3 = vrot.slane %v8033_v8, 5  ;;  %v8040_v21 = vrot.slane %v8038_v51, 4  ;;  %v8043_v41 = vrot.slane %v8041_v62, 5 }
 0x29b   : > { %v4563_v22 = vpack.c.bf16 %v4541_v40, %v4540_v47  ;;  %v9840_v15 = vpack.c.bf16 %v4541_v40, %v4541_v40  ;;  %v8030_v10 = vor.u32 %v8029_v63, %v8026_v61  ;;  %v12492_v12 = vrot.slane %v8047_v5, 5 }
 0x29c   : > { %v4562_v14 = vpack.c.bf16 %v4539_v49, %v4538_v1  ;;  %v9839_v0 = vpack.c.bf16 %v4539_v49, %v4539_v49  ;;  %v8044_v57 = vor.u32 %v8043_v41, %v8040_v21  ;;  %v8518_v33 = vshrl.u32 %v12488_v39, 16 }
 0x29d   : > { %v5099_v36 = vrot.slane %v4563_v22, %v11898_v26  ;;  %v5106_v37 = vrot.slane %v9840_v15, %v11898_v26  ;;  %v12497_v17 = vrot.slane %v8030_v10, 4  ;;  %v8521_v30 = vshll.u32 %v12488_v39, 16 }
 0x29e   : > { %v5050_v59 = vrot.slane %v4562_v14, %v11898_v26  ;;  %v5057_v54 = vrot.slane %v9839_v0, %v11898_v26  ;;  %v12502_v29 = vrot.slane %v8044_v57, 4  ;;  %v12504_v20 = vrot.slane %v8518_v33, 4 }
 0x29f   : > { %v5107_v27 = vcombine.high %v5099_v36, %v5099_v36  ;;  %v5108_v53 = vcombine.high %v5106_v37, %v5106_v37  ;;  %v5115_v24 = vrot.slane %v5099_v36, %v11898_v26  ;;  %v5122_v7 = vrot.slane %v5106_v37, %v11898_v26 }
 0x2a0   : > { %v5058_v48 = vcombine.high %v5050_v59, %v5050_v59  ;;  %v5059_v42 = vcombine.high %v5057_v54, %v5057_v54  ;;  %v12509_v46 = vrot.slane %v5050_v59, %v11898_v26  ;;  %v12512_v35 = vrot.slane %v5057_v54, %v11898_v26 }
 0x2a1   : > { %v5129_v11 = vrot.slane %v5107_v27, %v11898_v26  ;;  %v5136_v47 = vrot.slane %v5108_v53, %v11898_v26  ;;  %v5137_v13 = vcombine.high %v5115_v24, %v5115_v24  ;;  %v5138_v18 = vcombine.high %v5122_v7, %v5122_v7 }
 0x2a2   : > { %v12516_v4 = vpop.f32.mrb[20].mxu0  ;;  %v7124_v6 = vrot.slane %v5115_v24, %v11901_v19  ;;  %v7180_v58 = vrot.slane %v5122_v7, %v11901_v19  ;;  %v12521_v60 = vrot.slane %v5058_v48, %v11898_v26  ;;  %v12524_v25 = vrot.slane %v5059_v42, %v11898_v26 }
 0x2a3   : > { %v12526_v28 = vpop.f32.mrb[21].mxu0  ;;  %v5139_v1 = vcombine.high %v5129_v11, %v5129_v11  ;;  %v5140_v56 = vcombine.high %v5136_v47, %v5136_v47  ;;  %v7138_v55 = vrot.slane %v5129_v11, %v11901_v19  ;;  %v7152_v32 = vrot.slane %v5137_v13, %v11901_v19 }
 0x2a4   : > { %v12530_v52 = vpop.f32.mrb[22].mxu0  ;;  %v7131_v9 = vrot.slane %v7124_v6, %v11901_v19  ;;  %v7187_v43 = vrot.slane %v7180_v58, %v11901_v19  ;;  %v7194_v34 = vrot.slane %v5136_v47, %v11901_v19  ;;  %v7208_v16 = vrot.slane %v5138_v18, %v11901_v19  ;;  %v7875_v18 = vld [vmem:[#allocation4 + $0x54] sm:$0x1] }
 0x2a5   : > { %v12536_v2 = vpop.f32.mrb[23].mxu0  ;;  %v7145_v8 = vrot.slane %v7138_v55, %v11901_v19  ;;  %v7159_v51 = vrot.slane %v7152_v32, %v11901_v19  ;;  %v7166_v62 = vrot.slane %v5139_v1, %v11901_v19  ;;  %v7222_v40 = vrot.slane %v5140_v56, %v11901_v19 }
 0x2a6   : > { %v7201_v61 = vrot.slane %v7194_v34, %v11901_v19  ;;  %v7215_v63 = vrot.slane %v7208_v16, %v11901_v19  ;;  %v7598_v5 = vunpack.c.l.b16 %v7131_v9  ;;  %v7602_v49 = vunpack.c.l.b16 %v7187_v43 }
 0x2a7   : > { %v7173_v21 = vrot.slane %v7166_v62, %v11901_v19  ;;  %v7229_v41 = vrot.slane %v7222_v40, %v11901_v19  ;;  %v7599_v22 = vunpack.c.l.b16 %v7145_v8  ;;  %v7600_v15 = vunpack.c.l.b16 %v7159_v51 }
 0x2a8   : > { %v7603_v10 = vunpack.c.l.b16 %v7201_v61  ;;  %v7604_v14 = vunpack.c.l.b16 %v7215_v63  ;;  %v7692_v0 = vrot.slane %v7602_v49, 4  ;;  %v5088_v57 = vcombine.high %v12509_v46, %v12509_v46  ;;  %v7872_v61 = vld [vmem:[#allocation4 + $0x50] sm:$0xf] }
 0x2a9   : > { %v7601_v33 = vunpack.c.l.b16 %v7173_v21  ;;  %v7605_v36 = vunpack.c.l.b16 %v7229_v41  ;;  %v7686_v37 = vrot.slane %v7599_v22, 7  ;;  %v7688_v59 = vrot.slane %v7600_v15, 6 }
 0x2aa   : > { %v7694_v54 = vrot.slane %v7603_v10, 3  ;;  %v7696_v27 = vrot.slane %v7604_v14, 2  ;;  %v5089_v53 = vcombine.high %v12512_v35, %v12512_v35  ;;  %v5090_v24 = vcombine.high %v12521_v60, %v12521_v60 }
 0x2ab   : > { %v7687_v7 = vsel %vm6396_vm14, %v7686_v37, %v7598_v5  ;;  %v7690_v48 = vrot.slane %v7601_v33, 5  ;;  %v7698_v42 = vrot.slane %v7605_v36, 1  ;;  %v7791_v11 = vsel %vm6399_vm15, %v7686_v37, %v7598_v5 }
 0x2ac   : > { %v7689_v47 = vsel %vm6399_vm15, %v7688_v59, %v7687_v7  ;;  %v7792_v13 = vsel %vm6402_vm10, %v7688_v59, %v7791_v11  ;;  %v5091_v6 = vcombine.high %v12524_v25, %v12524_v25  ;;  %v5889_v58 = vrot.slane %v12509_v46, %v11901_v19 }
 0x2ad   : > { %v7691_v1 = vsel %vm6402_vm10, %v7690_v48, %v7689_v47  ;;  %v7793_v56 = vsel %vm6405_vm1, %v7690_v48, %v7792_v13  ;;  %v7824_v55 = vpack.c.b16 %v7698_v42, %v7698_v42  ;;  %v5903_v32 = vrot.slane %v12521_v60, %v11901_v19 }
 0x2ae   : > { %v7693_v9 = vsel %vm6405_vm1, %v7692_v0, %v7691_v1  ;;  %v7794_v43 = vsel %vm6408_vm0, %v7692_v0, %v7793_v56  ;;  %v5896_v34 = vrot.slane %v5889_v58, %v11901_v19  ;;  %v5917_v16 = vrot.slane %v5088_v57, %v11901_v19  ;;  %v8478_v1 = vld [vmem:[#allocation4 + $0x34] sm:$0x1] }
 0x2af   : > { %v7695_v8 = vsel %vm6408_vm0, %v7694_v54, %v7693_v9  ;;  %v7795_v46 = vsel %vm6411_vm7, %v7694_v54, %v7794_v43  ;;  %v7876_v51 = vsel %vm11821_vm9, %v7824_v55, %v7875_v18  ;;  %v5910_v62 = vrot.slane %v5903_v32, %v11901_v19 }
 0x2b0   : > { %v7697_v40 = vsel %vm6411_vm7, %v7696_v27, %v7695_v8  ;;  %v7796_v60 = vsel %vm6414_vm6, %v7696_v27, %v7795_v46  ;;  %7877 = vst [vmem:[#allocation4 + $0x54] sm:$0x1] %v7876_v51  ;;  %v5924_v63 = vrot.slane %v5917_v16, %v11901_v19  ;;  %v5931_v5 = vrot.slane %v5090_v24, %v11901_v19  ;;  %v8480_v51 = vld [vmem:[#allocation4 + $0x44] sm:$0x1] }
 0x2b1   : > { %v7699_v49 = vsel %vm6414_vm6, %v7698_v42, %v7697_v40  ;;  %v7823_v21 = vpack.c.b16 %v7796_v60, %v7796_v60  ;;  %v5945_v41 = vrot.slane %v12512_v35, %v11901_v19  ;;  %v5959_v22 = vrot.slane %v12524_v25, %v11901_v19 }
 0x2b2   : > { %v7746_v15 = vpack.c.b16 %v7699_v49, %v7699_v49  ;;  %v5938_v10 = vrot.slane %v5931_v5, %v11901_v19  ;;  %v5973_v14 = vrot.slane %v5089_v53, %v11901_v19  ;;  %v5987_v0 = vrot.slane %v5091_v6, %v11901_v19 }
 0x2b3   : > { %v7873_v57 = vsel %vm12002_vm11, %v7823_v21, %v7872_v61  ;;  %v5952_v33 = vrot.slane %v5945_v41, %v11901_v19  ;;  %v5966_v36 = vrot.slane %v5959_v22, %v11901_v19  ;;  %v6363_v37 = vunpack.c.l.b16 %v5896_v34  ;;  %v6649_v34 = vld [vmem:[#allocation4 + $0xd4] sm:$0x1]  ;;  %v6646_v61 = vld [vmem:[#allocation4 + $0xd0] sm:$0xf] }
 0x2b4   : > { %7763 = vst.msk [vmem:[#allocation4 + $0x58] sm:$0xf] %vm13484_vm4, %v7746_v15  ;;  %7874 = vst [vmem:[#allocation4 + $0x50] sm:$0xf] %v7873_v57  ;;  %v5980_v35 = vrot.slane %v5973_v14, %v11901_v19  ;;  %v5994_v25 = vrot.slane %v5987_v0, %v11901_v19  ;;  %v6364_v59 = vunpack.c.l.b16 %v5910_v62  ;;  %v6365_v54 = vunpack.c.l.b16 %v5924_v63  ;;  %v10167_v14 = vld [vmem:[#allocation4 + $0xb0] ss:$16 sps:$4 sm:$0xff]  }
 0x2b5   : > { %v6366_v27 = vunpack.c.l.b16 %v5938_v10  ;;  %v6367_v53 = vunpack.c.l.b16 %v5952_v33  ;;  %v6368_v24 = vunpack.c.l.b16 %v5966_v36  ;;  %v8036_v7 = vsel %vm10461_vm13, %v12497_v17, %v12490_v3  ;;  %v8479_v3 = vld [vmem:[#allocation4 + $0x40] sm:$0xf] }
 0x2b6   : > { %v6369_v48 = vunpack.c.l.b16 %v5980_v35  ;;  %v6370_v42 = vunpack.c.l.b16 %v5994_v25  ;;  %v6458_v11 = vrot.slane %v6364_v59, 7  ;;  %v6460_v47 = vrot.slane %v6365_v54, 6  ;;  %v4599_v36 = vld [vmem:[#allocation4 + $0x60] sm:$0x1] }
 0x2b7   : > { %v6462_v13 = vrot.slane %v6366_v27, 5  ;;  %v6464_v18 = vrot.slane %v6367_v53, 4  ;;  %v6466_v6 = vrot.slane %v6368_v24, 3  ;;  %v8050_v58 = vsel %vm10461_vm13, %v12502_v29, %v12492_v12  ;;  %v4623_v54 = vld [vmem:[#allocation4 + $0xe0] sm:$0x1] }
 0x2b8   : > { %v6459_v56 = vsel %vm6396_vm14, %v6458_v11, %v6363_v37  ;;  %v6468_v55 = vrot.slane %v6369_v48, 2  ;;  %v6470_v32 = vrot.slane %v6370_v42, 1  ;;  %v6563_v9 = vsel %vm6399_vm15, %v6458_v11, %v6363_v37  ;;  %v10169_v27 = vld [vmem:[#allocation4] ss:$16 sps:$4 sm:$0xff]   ;;  %v10168_v11 = vld [vmem:[#allocation4 + $0xb8] ss:$16 sps:$4 sm:$0xff]  }
 0x2b9   : > { %v6461_v17 = vsel %vm6399_vm15, %v6460_v47, %v6459_v56  ;;  %v6564_v43 = vsel %vm6402_vm10, %v6460_v47, %v6563_v9  ;;  %v9856_v16 = vcombine.low %v8036_v7, %v8050_v58  ;;  %v8523_v8 = vrot.slane %v8521_v30, 5  ;;  %v10175_v53 = vld [vmem:[#allocation4 + $0x20] ss:$16 sps:$4 sm:$0xff]   ;;  %v8231_v56 = vld [vmem:[#allocation4 + $0xb4] sm:$0x1] }
 0x2ba   : > { %v6463_v46 = vsel %vm6402_vm10, %v6462_v13, %v6461_v17  ;;  %v6565_v12 = vsel %vm6405_vm1, %v6462_v13, %v6564_v43  ;;  %v6596_v29 = vpack.c.b16 %v6470_v32, %v6470_v32  ;;  %v8527_v62 = vshll.u32 %v8478_v1, 16 }
 0x2bb   : > { %v6465_v40 = vsel %vm6405_vm1, %v6464_v18, %v6463_v46  ;;  %v6566_v60 = vsel %vm6408_vm0, %v6464_v18, %v6565_v12  ;;  %8121 = vrot.lane.b32.xlu1 %v9856_v16, %s10289_s19  ;;  %v8524_v63 = vor.u32 %v8523_v8, %v12504_v20  ;;  %v8532_v5 = vshrl.u32 %v8479_v3, 16  ;;  %v7963_v18 = vpop.permute.xlu0 %7962 }
 0x2bc   : > { %v6467_v39 = vsel %vm6408_vm0, %v6466_v6, %v6465_v40  ;;  %v6567_v30 = vsel %vm6411_vm7, %v6466_v6, %v6566_v60  ;;  %v6650_v49 = vsel %vm11821_vm9, %v6596_v29, %v6649_v34  ;;  %v12616_v21 = vrot.slane %v8527_v62, 5  ;;  %v8230_v6 = vld [vmem:[#allocation4 + $0xb0] sm:$0xf] }
 0x2bd   : > { %v6469_v41 = vsel %vm6411_vm7, %v6468_v55, %v6467_v39  ;;  %v6568_v22 = vsel %vm6414_vm6, %v6468_v55, %v6567_v30  ;;  %6651 = vst [vmem:[#allocation4 + $0xd4] sm:$0x1] %v6650_v49  ;;  %v8525_v15 = vrot.slane %v8524_v63, 4  ;;  %v8534_v10 = vrot.slane %v8532_v5, 4  ;;  %v8232_v55 = vld [vmem:[#allocation4 + $0xc0] sm:$0xf] }
 0x2be   : > { %v6471_v20 = vsel %vm6414_vm6, %v6470_v32, %v6469_v41  ;;  %v6595_v0 = vpack.c.b16 %v6568_v22, %v6568_v22  ;;  %v8535_v57 = vshll.u32 %v8479_v3, 16  ;;  %v8541_v33 = vshll.u32 %v8480_v51, 16 }
 0x2bf   : > { %v6518_v37 = vpack.c.b16 %v6471_v20, %v6471_v20  ;;  %v8530_v35 = vsel %vm10461_vm13, %v8525_v15, %v12616_v21  ;;  %8166 = vrot.lane.b32.xlu1 %v10167_v14, %s10286_s13  ;;  %v4473_v25 = vmul.f32 %v12316_v31, %v12516_v4  ;;  %v4471_v59 = vmul.f32 %v12316_v31, %v12526_v28 }
 0x2c0   : > { %v6647_v24 = vsel %vm12002_vm11, %v6595_v0, %v6646_v61  ;;  %v8537_v7 = vrot.slane %v8535_v57, 5  ;;  %v8543_v48 = vrot.slane %v8541_v33, 5  ;;  %v4474_v42 = vmul.f32 %v12316_v31, %v12530_v52 }
 0x2c1   : > { %6535 = vst.msk [vmem:[#allocation4 + $0xd8] sm:$0xf] %vm13485_vm5, %v6518_v37  ;;  %6648 = vst [vmem:[#allocation4 + $0xd0] sm:$0xf] %v6647_v24  ;;  %v4512_v4 = vadd.f32 %v12332_v38, %v4473_v25  ;;  %v4510_v47 = vadd.f32 %v12332_v38, %v4471_v59  ;;  %v4600_v28 = vsel %vm11821_vm9, 0, %v4599_v36  ;;  %v4472_v13 = vmul.f32 %v12316_v31, %v12536_v2 }
 0x2c2   : > { %v8538_v58 = vor.u32 %v8537_v7, %v8534_v10  ;;  %v4513_v1 = vadd.f32 %v12332_v38, %v4474_v42  ;;  %4601 = vst [vmem:[#allocation4 + $0x60] sm:$0x1] %v4600_v28  ;;  %v4624_v52 = vsel %vm11821_vm9, 0, %v4623_v54  ;;  %vm13427_vm12 = vcmask 64512   ;;  %v10170_v31 = vld [vmem:[#allocation4 + $0x48] ss:$16 sps:$4 sm:$0xff]  }
 0x2c3   : > { %8211 = vrot.lane.b32.xlu1 %v10168_v11, %s10288_s18  ;;  %v4544_v32 = vmax.f32 %v4512_v4, 0.0  ;;  %v4542_v9 = vmax.f32 %v4510_v47, 0.0  ;;  %v4511_v3 = vadd.f32 %v12332_v38, %v4472_v13  ;;  %4625 = vst [vmem:[#allocation4 + $0xe0] sm:$0x1] %v4624_v52  ;;  %7929 = vst.msk [vmem:[#allocation5] sm:$0xff] %vm13427_vm12, %v10169_v27  ;;  %vm13423_vm8 = vcmask 130112   ;;  %v12686_v47 = vpop.permute.xlu0 %8411 }
 0x2c4   : > { %7930 = vst.msk [vmem:[#allocation5 + $0x8] sm:$0xff] %vm13427_vm12, %v10175_v53  ;;  %v8539_v2 = vrot.slane %v8538_v58, 4  ;;  %v4545_v17 = vmax.f32 %v4513_v1, 0.0  ;;  %v8271_v43 = vshrl.u32 %v8230_v6, 16  ;;  %v8274_v34 = vshll.u32 %v8230_v6, 16 }
 0x2c5   : > { %7975 = vst.msk [vmem:[#allocation5] sm:$0xff] %vm13423_vm8, %v7963_v18  ;;  %v4543_v16 = vmax.f32 %v4511_v3, 0.0  ;;  %v8280_v8 = vshll.u32 %v8231_v56, 16  ;;  %v8285_v46 = vshrl.u32 %v8232_v55, 16  ;;  %v8288_v12 = vshll.u32 %v8232_v55, 16 }
 0x2c6   : > { %v8544_v38 = vsel %vm10461_vm13, %v8539_v2, %v8543_v48  ;;  %v4565_v29 = vpack.c.bf16 %v4545_v17, %v4544_v32  ;;  %v9842_v51 = vpack.c.bf16 %v4545_v17, %v4545_v17  ;;  %v12650_v62 = vrot.slane %v8271_v43, 4 }
 0x2c7   : > { %v9880_v40 = vcombine.low %v8530_v35, %v8544_v38  ;;  %v4564_v60 = vpack.c.bf16 %v4543_v16, %v4542_v9  ;;  %v9841_v61 = vpack.c.bf16 %v4543_v16, %v4543_v16  ;;  %7966 = vrot.lane.b32.xlu1 %v10170_v31, %s10283_s26  ;;  %v12653_v63 = vrot.slane %v8274_v34, 5 }
 0x2c8   : > { %v5197_v5 = vrot.slane %v4565_v29, %v11898_v26  ;;  %v5204_v39 = vrot.slane %v9842_v51, %v11898_v26  ;;  %v12657_v30 = vrot.slane %v8280_v8, 5  ;;  %v12659_v49 = vrot.slane %v8285_v46, 4 }
 0x2c9   : > { %8615 = vrot.lane.b32.xlu0 %v9880_v40, %s10295_s17  ;;  %v5148_v21 = vrot.slane %v4564_v60, %v11898_v26  ;;  %v5155_v41 = vrot.slane %v9841_v61, %v11898_v26  ;;  %v8277_v22 = vor.u32 %v12653_v63, %v12650_v62  ;;  %v12666_v15 = vrot.slane %v8288_v12, 5  ;;  %v12700_v40 = vpop.permute.xlu0 %8456 }
 0x2ca   : > { %v5205_v10 = vcombine.high %v5197_v5, %v5197_v5  ;;  %v5206_v14 = vcombine.high %v5204_v39, %v5204_v39  ;;  %v5213_v20 = vrot.slane %v5197_v5, %v11898_v26  ;;  %v5220_v0 = vrot.slane %v5204_v39, %v11898_v26 }
 0x2cb   : > { %v5156_v57 = vcombine.high %v5148_v21, %v5148_v21  ;;  %v5157_v33 = vcombine.high %v5155_v41, %v5155_v41  ;;  %v5164_v36 = vrot.slane %v5148_v21, %v11898_v26  ;;  %v12672_v37 = vrot.slane %v5155_v41, %v11898_v26 }
 0x2cc   : > { %v5227_v35 = vrot.slane %v5205_v10, %v11898_v26  ;;  %v5234_v25 = vrot.slane %v5206_v14, %v11898_v26  ;;  %v5235_v59 = vcombine.high %v5213_v20, %v5213_v20  ;;  %v5236_v54 = vcombine.high %v5220_v0, %v5220_v0 }
 0x2cd   : > { %v7236_v27 = vrot.slane %v5213_v20, %v11901_v19  ;;  %v7292_v53 = vrot.slane %v5220_v0, %v11901_v19  ;;  %v12679_v24 = vrot.slane %v5156_v57, %v11898_v26  ;;  %v12682_v7 = vrot.slane %v5157_v33, %v11898_v26  ;;  %v7881_v57 = vld [vmem:[#allocation4 + $0x64] sm:$0x1] }
 0x2ce   : > { %v5237_v48 = vcombine.high %v5227_v35, %v5227_v35  ;;  %v5238_v42 = vcombine.high %v5234_v25, %v5234_v25  ;;  %v7250_v11 = vrot.slane %v5227_v35, %v11901_v19  ;;  %v7264_v4 = vrot.slane %v5235_v59, %v11901_v19 }
 0x2cf   : > { %v7243_v28 = vrot.slane %v7236_v27, %v11901_v19  ;;  %v7299_v13 = vrot.slane %v7292_v53, %v11901_v19  ;;  %v7306_v18 = vrot.slane %v5234_v25, %v11901_v19  ;;  %v7320_v6 = vrot.slane %v5236_v54, %v11901_v19 }
 0x2d0   : > { %v7257_v58 = vrot.slane %v7250_v11, %v11901_v19  ;;  %v7271_v1 = vrot.slane %v7264_v4, %v11901_v19  ;;  %v7278_v52 = vrot.slane %v5237_v48, %v11901_v19  ;;  %v7334_v56 = vrot.slane %v5238_v42, %v11901_v19 }
 0x2d1   : > { %v7313_v55 = vrot.slane %v7306_v18, %v11901_v19  ;;  %v7327_v32 = vrot.slane %v7320_v6, %v11901_v19  ;;  %v7606_v9 = vunpack.c.l.b16 %v7243_v28  ;;  %v7610_v3 = vunpack.c.l.b16 %v7299_v13 }
 0x2d2   : > { %v7285_v31 = vrot.slane %v7278_v52, %v11901_v19  ;;  %v7341_v2 = vrot.slane %v7334_v56, %v11901_v19  ;;  %v7607_v17 = vunpack.c.l.b16 %v7257_v58  ;;  %v7608_v43 = vunpack.c.l.b16 %v7271_v1  ;;  %v7878_v58 = vld [vmem:[#allocation4 + $0x60] sm:$0xf] }
 0x2d3   : > { %v7611_v34 = vunpack.c.l.b16 %v7313_v55  ;;  %v7612_v16 = vunpack.c.l.b16 %v7327_v32  ;;  %v7706_v8 = vrot.slane %v7610_v3, 4  ;;  %v5186_v46 = vcombine.high %v5164_v36, %v5164_v36 }
 0x2d4   : > { %v7609_v12 = vunpack.c.l.b16 %v7285_v31  ;;  %v7613_v38 = vunpack.c.l.b16 %v7341_v2  ;;  %v7700_v29 = vrot.slane %v7607_v17, 7  ;;  %v7702_v51 = vrot.slane %v7608_v43, 6 }
 0x2d5   : > { %v7708_v60 = vrot.slane %v7611_v34, 3  ;;  %v7710_v61 = vrot.slane %v7612_v16, 2  ;;  %v5187_v5 = vcombine.high %v12672_v37, %v12672_v37  ;;  %v5188_v39 = vcombine.high %v12679_v24, %v12679_v24 }
 0x2d6   : > { %v7701_v21 = vsel %vm6396_vm14, %v7700_v29, %v7606_v9  ;;  %v7704_v41 = vrot.slane %v7609_v12, 5  ;;  %v7712_v10 = vrot.slane %v7613_v38, 1  ;;  %v7797_v14 = vsel %vm6399_vm15, %v7700_v29, %v7606_v9 }
 0x2d7   : > { %v7703_v20 = vsel %vm6399_vm15, %v7702_v51, %v7701_v21  ;;  %v7798_v0 = vsel %vm6402_vm10, %v7702_v51, %v7797_v14  ;;  %v5189_v33 = vcombine.high %v12682_v7, %v12682_v7  ;;  %v6001_v35 = vrot.slane %v5164_v36, %v11901_v19  ;;  %v8233_v14 = vld [vmem:[#allocation4 + $0xc4] sm:$0x1] }
 0x2d8   : > { %v7705_v25 = vsel %vm6402_vm10, %v7704_v41, %v7703_v20  ;;  %v7799_v59 = vsel %vm6405_vm1, %v7704_v41, %v7798_v0  ;;  %v7826_v54 = vpack.c.b16 %v7712_v10, %v7712_v10  ;;  %v6015_v27 = vrot.slane %v12679_v24, %v11901_v19  ;;  %v8120_v18 = vpop.permute.xlu0 %8119 }
 0x2d9   : > { %v7707_v53 = vsel %vm6405_vm1, %v7706_v8, %v7705_v25  ;;  %v7800_v48 = vsel %vm6408_vm0, %v7706_v8, %v7799_v59  ;;  %v6008_v42 = vrot.slane %v6001_v35, %v11901_v19  ;;  %v6029_v11 = vrot.slane %v5186_v46, %v11901_v19 }
 0x2da   : > { %v7709_v4 = vsel %vm6408_vm0, %v7708_v60, %v7707_v53  ;;  %v7801_v36 = vsel %vm6411_vm7, %v7708_v60, %v7800_v48  ;;  %v7882_v28 = vsel %vm11821_vm9, %v7826_v54, %v7881_v57  ;;  %v6022_v13 = vrot.slane %v6015_v27, %v11901_v19  ;;  %v7965_v56 = vpop.permute.xlu1 %7964  ;;  %v6655_v54 = vld [vmem:[#allocation4 + $0xe4] sm:$0x1] }
 0x2db   : > { %v7711_v24 = vsel %vm6411_vm7, %v7710_v61, %v7709_v4  ;;  %v7802_v6 = vsel %vm6414_vm6, %v7710_v61, %v7801_v36  ;;  %7883 = vst [vmem:[#allocation4 + $0x64] sm:$0x1] %v7882_v28  ;;  %v6036_v1 = vrot.slane %v6029_v11, %v11901_v19  ;;  %v6043_v52 = vrot.slane %v5188_v39, %v11901_v19  ;;  %v7987_v11 = vld [vmem:[#allocation4 + $0x40] sm:$0xf]  ;;  %v7988_v4 = vld [vmem:[#allocation4 + $0x44] sm:$0x1] }
 0x2dc   : > { %v7713_v55 = vsel %vm6414_vm6, %v7712_v10, %v7711_v24  ;;  %v7825_v32 = vpack.c.b16 %v7802_v6, %v7802_v6  ;;  %v6057_v9 = vrot.slane %v12672_v37, %v11901_v19  ;;  %v6071_v3 = vrot.slane %v12682_v7, %v11901_v19  ;;  %7976 = vst.msk [vmem:[#allocation5 + $0x8] sm:$0xff] %vm13423_vm8, %v7965_v56  ;;  %v7989_v56 = vld [vmem:[#allocation4 + $0x50] sm:$0xf] }
 0x2dd   : > { %v7747_v31 = vpack.c.b16 %v7713_v55, %v7713_v55  ;;  %v6050_v2 = vrot.slane %v6043_v52, %v11901_v19  ;;  %v6085_v17 = vrot.slane %v5187_v5, %v11901_v19  ;;  %v6099_v43 = vrot.slane %v5189_v33, %v11901_v19  ;;  %v8165_v5 = vpop.permute.xlu0 %8164  ;;  %v4578_v55 = vld [vmem:[#allocation4 + $0xc] sm:$0x1] }
 0x2de   : > { %v7879_v34 = vsel %vm12002_vm11, %v7825_v32, %v7878_v58  ;;  %v6064_v16 = vrot.slane %v6057_v9, %v11901_v19  ;;  %v6078_v8 = vrot.slane %v6071_v3, %v11901_v19  ;;  %v6371_v37 = vunpack.c.l.b16 %v6008_v42  ;;  %v6652_v3 = vld [vmem:[#allocation4 + $0xe0] sm:$0xf] }
 0x2df   : > { %7764 = vst.msk [vmem:[#allocation4 + $0x68] sm:$0xf] %vm13486_vm3, %v7747_v31  ;;  %7880 = vst [vmem:[#allocation4 + $0x60] sm:$0xf] %v7879_v34  ;;  %v6092_v7 = vrot.slane %v6085_v17, %v11901_v19  ;;  %v6106_v46 = vrot.slane %v6099_v43, %v11901_v19  ;;  %v6372_v12 = vunpack.c.l.b16 %v6022_v13  ;;  %v6373_v38 = vunpack.c.l.b16 %v6036_v1  ;;  %v4632_v34 = vld [vmem:[#allocation4 + $0x110] sm:$0x1] }
 0x2e0   : > { %v6374_v29 = vunpack.c.l.b16 %v6050_v2  ;;  %v6375_v51 = vunpack.c.l.b16 %v6064_v16  ;;  %v6376_v60 = vunpack.c.l.b16 %v6078_v8  ;;  %v8278_v61 = vrot.slane %v8277_v22, 4 }
 0x2e1   : > { %v6377_v39 = vunpack.c.l.b16 %v6092_v7  ;;  %v6378_v21 = vunpack.c.l.b16 %v6106_v46  ;;  %v6472_v41 = vrot.slane %v6372_v12, 7  ;;  %v6474_v10 = vrot.slane %v6373_v38, 6  ;;  %v8210_v58 = vpop.permute.xlu0 %8209 }
 0x2e2   : > { %v6476_v20 = vrot.slane %v6374_v29, 5  ;;  %v6478_v0 = vrot.slane %v6375_v51, 4  ;;  %v6480_v57 = vrot.slane %v6376_v60, 3  ;;  %v8283_v33 = vsel %vm10461_vm13, %v8278_v61, %v12657_v30 }
 0x2e3   : > { %v6473_v35 = vsel %vm6396_vm14, %v6472_v41, %v6371_v37  ;;  %v6482_v25 = vrot.slane %v6377_v39, 2  ;;  %v6484_v59 = vrot.slane %v6378_v21, 1  ;;  %v6569_v62 = vsel %vm6399_vm15, %v6472_v41, %v6371_v37  ;;  %v10196_v41 = vld [vmem:[%s13414_s7] sm:$0x3] }
 0x2e4   : > { %v6475_v63 = vsel %vm6399_vm15, %v6474_v10, %v6473_v35  ;;  %v6570_v22 = vsel %vm6402_vm10, %v6474_v10, %v6569_v62  ;;  %v8291_v27 = vor.u32 %v12666_v15, %v12659_v49  ;;  %v8294_v53 = vshll.u32 %v8233_v14, 16  ;;  %v7990_v49 = vld [vmem:[#allocation4 + $0x54] sm:$0x1] }
 0x2e5   : > { %v6477_v48 = vsel %vm6402_vm10, %v6476_v20, %v6475_v63  ;;  %v6571_v42 = vsel %vm6405_vm1, %v6476_v20, %v6570_v22  ;;  %v6598_v30 = vpack.c.b16 %v6484_v59, %v6484_v59  ;;  %vm8131_vm2 = vcmask 195712   ;;  %v10198_v63 = vld [vmem:[%s10429_s21 + $0x8] sm:$0xff] }
 0x2e6   : > { %v6479_v36 = vsel %vm6405_vm1, %v6478_v0, %v6477_v48  ;;  %v6572_v28 = vsel %vm6408_vm0, %v6478_v0, %v6571_v42  ;;  %v8292_v13 = vrot.slane %v8291_v27, 4  ;;  %v8296_v24 = vrot.slane %v8294_v53, 5  ;;  %8132 = vst.msk [vmem:[#allocation5] sm:$0xff] %vm8131_vm2, %v8120_v18  ;;  %v10171_v6 = vld [vmem:[#allocation4 + $0x50] ss:$16 sps:$4 sm:$0xff]  }
 0x2e7   : > { %v6481_v15 = vsel %vm6408_vm0, %v6480_v57, %v6479_v36  ;;  %v6573_v1 = vsel %vm6411_vm7, %v6480_v57, %v6572_v28  ;;  %v6656_v52 = vsel %vm11821_vm9, %v6598_v30, %v6655_v54  ;;  %vm13425_vm4 = vcmask 261312   ;;  %8415 = vrot.lane.b32.xlu0 %v10171_v6, %s10293_s24  ;;  %v10172_v8 = vld [vmem:[#allocation4 + $0x58] ss:$16 sps:$4 sm:$0xff]   ;;  %v4602_v53 = vld [vmem:[#allocation4 + $0x70] sm:$0x1] }
 0x2e8   : > { %v6483_v32 = vsel %vm6411_vm7, %v6482_v25, %v6481_v15  ;;  %v6574_v9 = vsel %vm6414_vm6, %v6482_v25, %v6573_v1  ;;  %6657 = vst [vmem:[#allocation4 + $0xe4] sm:$0x1] %v6656_v52  ;;  %v8297_v18 = vsel %vm10461_vm13, %v8292_v13, %v8296_v24  ;;  %8177 = vst.msk [vmem:[#allocation5] sm:$0xff] %vm13425_vm4, %v8165_v5  ;;  %vm13424_vm5 = vcmask 326912   ;;  %v10199_v54 = vld [vmem:[%s10429_s21 + $0x20] sm:$0xff]  ;;  %v10200_v30 = vld [vmem:[%s10429_s21 + $0x28] sm:$0xff] }
 0x2e9   : > { %v6485_v31 = vsel %vm6414_vm6, %v6484_v59, %v6483_v32  ;;  %v6597_v2 = vpack.c.b16 %v6574_v9, %v6574_v9  ;;  %v9868_v17 = vcombine.low %v8283_v33, %v8297_v18  ;;  %8222 = vst.msk [vmem:[#allocation5] sm:$0xff] %vm13424_vm5, %v8210_v58  ;;  %v8052_v43 = vshrl.u32 %v7987_v11, 16  ;;  %v10197_v33 = vld [vmem:[%s10429_s21] sm:$0xff]  ;;  %v4626_v48 = vld [vmem:[#allocation4 + $0xf0] sm:$0x1] }
 0x2ea   : > { %v6519_v16 = vpack.c.b16 %v6485_v31, %v6485_v31  ;;  %v8055_v37 = vshll.u32 %v7987_v11, 16  ;;  %v8061_v7 = vshll.u32 %v7988_v4, 16  ;;  %v8066_v46 = vshrl.u32 %v7989_v56, 16  ;;  %v12793_v4 = vld [vmem:[%s10429_s21 + $0x40] sm:$0xff]  ;;  %v12798_v28 = vld [vmem:[%s10429_s21 + $0x48] sm:$0xff] }
 0x2eb   : > { %v6653_v12 = vsel %vm12002_vm11, %v6597_v2, %v6652_v3  ;;  %8368 = vrot.lane.b32.xlu1 %v9868_v17, %s10296_s23  ;;  %v8054_v38 = vrot.slane %v8052_v43, 4  ;;  %v8069_v29 = vshll.u32 %v7989_v56, 16  ;;  %v8075_v51 = vshll.u32 %v7990_v49, 16  ;;  %8460 = vrot.lane.b32.xlu0 %v10172_v8, %s10294_s25  ;;  %v4605_v24 = vld [vmem:[#allocation4 + $0x80] sm:$0x1]  ;;  %v12805_v15 = vld [vmem:[%s10429_s21 + $0x60] sm:$0xff] }
 0x2ec   : > { %6536 = vst.msk [vmem:[#allocation4 + $0xe8] sm:$0xf] %vm13486_vm3, %v6519_v16  ;;  %6654 = vst [vmem:[#allocation4 + $0xe0] sm:$0xf] %v6653_v12  ;;  %v8057_v60 = vrot.slane %v8055_v37, 5  ;;  %v8068_v61 = vrot.slane %v8066_v46, 4  ;;  %v8659_v35 = vcombine.high %v10197_v33, %v10197_v33  ;;  %v8676_v22 = vcombine.high %v10198_v63, %v10198_v63 }
 0x2ed   : > { %v4579_v5 = vsel %vm11821_vm9, 0, %v4578_v55  ;;  %v8071_v39 = vrot.slane %v8069_v29, 5  ;;  %v4633_v21 = vsel %vm11821_vm9, 0, %v4632_v34  ;;  %vm13487_vm3 = vcmask 1041408   ;;  %v4629_v6 = vld [vmem:[#allocation4 + $0x100] sm:$0x1] }
 0x2ee   : > { %4580 = vst [vmem:[#allocation4 + $0xc] sm:$0x1] %v4579_v5  ;;  %v9317_v10 = vsel %vm13487_vm3, %v10196_v41, 0  ;;  %v8058_v14 = vor.u32 %v8057_v60, %v8054_v38  ;;  %v8063_v20 = vrot.slane %v8061_v7, 5  ;;  %4634 = vst [vmem:[#allocation4 + $0x110] sm:$0x1] %v4633_v21  ;;  %v8693_v27 = vcombine.high %v10199_v54, %v10199_v54 }
 0x2ef   : > { %10007 = vmatpush3.bf16.msra.mxu1 %v9317_v10  ;;  %v8072_v0 = vor.u32 %v8071_v39, %v8068_v61  ;;  %v8077_v57 = vrot.slane %v8075_v51, 5  ;;  %v10297_v59 = vmov 1983009808   ;;  %v8710_v11 = vcombine.high %v10200_v30, %v10200_v30  ;;  %v12810_v52 = vld [vmem:[%s10429_s21 + $0x68] sm:$0xff]  ;;  %v12823_v18 = vld [vmem:[%s10429_s21 + $0x80] sm:$0xff] }
 0x2f0   : > { %v8059_v25 = vrot.slane %v8058_v14, 4  ;;  %v8661_v62 = vunpack.c.l.s4 %v10297_v59  ;;  %v8727_v36 = vcombine.high %v12793_v4, %v12793_v4  ;;  %v8744_v13 = vcombine.high %v12798_v28, %v12798_v28  ;;  %v12814_v55 = vld [vmem:[#allocation4 + $0xd0] sm:$0xf]  ;;  %v12840_v37 = vld [vmem:[%s10429_s21 + $0xa0] sm:$0xff] }
 0x2f1   : > { %v8073_v42 = vrot.slane %v8072_v0, 4  ;;  %v8761_v1 = vcombine.high %v12805_v15, %v12805_v15  ;;  %v8778_v56 = vcombine.high %v12810_v52, %v12810_v52  ;;  %v4603_v9 = vsel %vm11821_vm9, 0, %v4602_v53  ;;  %v12835_v16 = vld [vmem:[%s10429_s21 + $0x88] sm:$0xff] }
 0x2f2   : > { %v8064_v58 = vsel %vm10461_vm13, %v8059_v25, %v8063_v20  ;;  %v8662_v49 = vunpack.c.0.s8 %v8661_v62  ;;  %v4627_v3 = vsel %vm11821_vm9, 0, %v4626_v48  ;;  %v8795_v31 = vcombine.high %v12823_v18, %v12823_v18  ;;  %4604 = vst [vmem:[#allocation4 + $0x70] sm:$0x1] %v4603_v9  ;;  %v12845_v7 = vld [vmem:[%s10429_s21 + $0xa8] sm:$0xff] }
 0x2f3   : > { %v8078_v32 = vsel %vm10461_vm13, %v8073_v42, %v8077_v57  ;;  %4628 = vst [vmem:[#allocation4 + $0xf0] sm:$0x1] %v4627_v3  ;;  %v4606_v43 = vsel %vm11821_vm9, 0, %v4605_v24  ;;  %v4630_v34 = vsel %vm11821_vm9, 0, %v4629_v6  ;;  %v8812_v8 = vcombine.high %v12835_v16, %v12835_v16  ;;  %v10173_v0 = vld [vmem:[#allocation4 + $0xd0] ss:$16 sps:$4 sm:$0xff]  }
 0x2f4   : > { %v9857_v2 = vcombine.low %v8064_v58, %v8078_v32  ;;  %v12828_v17 = vsub.s32 %v8662_v49, %v11885_v23  ;;  %4607 = vst [vmem:[#allocation4 + $0x80] sm:$0x1] %v4606_v43  ;;  %4631 = vst [vmem:[#allocation4 + $0x100] sm:$0x1] %v4630_v34  ;;  %v8829_v23 = vcombine.high %v12840_v37, %v12840_v37  ;;  %v8299_v12 = vshrl.u32 %v12814_v55, 16 }
 0x2f5   : > { %v8846_v46 = vcombine.high %v12845_v7, %v12845_v7  ;;  %v10174_v58 = vld [vmem:[#allocation4 + $0xd8] ss:$16 sps:$4 sm:$0xff]   ;;  %vm8378_vm3 = vcmask 392512   ;;  %vm8423_vm8 = vcmask 458112   ;;  %vm8468_vm5 = vcmask 523712  }
 0x2f6   : > { %8123 = vrot.lane.b32.xlu0 %v9857_v2, %s10289_s19  ;;  %v8666_v38 = vrot.slane %v10197_v33, %v12828_v17  ;;  %v8673_v29 = vrot.slane %v8659_v35, %v12828_v17  ;;  %v8683_v51 = vrot.slane %v10198_v63, %v12828_v17  ;;  %v8690_v60 = vrot.slane %v8676_v22, %v12828_v17 }
 0x2f7   : > { %v8700_v61 = vrot.slane %v10199_v54, %v12828_v17  ;;  %v8707_v5 = vrot.slane %v8693_v27, %v12828_v17  ;;  %v8717_v39 = vrot.slane %v10200_v30, %v12828_v17  ;;  %v8724_v21 = vrot.slane %v8710_v11, %v12828_v17 }
 0x2f8   : > { %v8674_v41 = vcombine.high %v8666_v38, %v8666_v38  ;;  %v8675_v10 = vcombine.high %v8673_v29, %v8673_v29  ;;  %v8691_v14 = vcombine.high %v8683_v51, %v8683_v51  ;;  %v8692_v20 = vcombine.high %v8690_v60, %v8690_v60 }
 0x2f9   : > { %v8708_v57 = vcombine.high %v8700_v61, %v8700_v61  ;;  %v8709_v33 = vcombine.high %v8707_v5, %v8707_v5  ;;  %v8725_v35 = vcombine.high %v8717_v39, %v8717_v39  ;;  %v8726_v25 = vcombine.high %v8724_v21, %v8724_v21 }
 0x2fa   : > { %v8995_v59 = vpack.c.bf16 %v8666_v38, %v8666_v38  ;;  %v8996_v62 = vpack.c.bf16 %v8674_v41, %v8674_v41  ;;  %v8997_v63 = vpack.c.bf16 %v8673_v29, %v8673_v29  ;;  %v8998_v22 = vpack.c.bf16 %v8675_v10, %v8675_v10  ;;  %8168 = vrot.lane.b32.xlu0 %v10173_v0, %s10286_s13  ;;  %v8614_v0 = vpop.permute.xlu0 %8613 }
 0x2fb   : > { %v8999_v54 = vpack.c.bf16 %v8683_v51, %v8683_v51  ;;  %v9000_v27 = vpack.c.bf16 %v8691_v14, %v8691_v14  ;;  %v9001_v53 = vpack.c.bf16 %v8690_v60, %v8690_v60  ;;  %v9002_v48 = vpack.c.bf16 %v8692_v20, %v8692_v20 }
 0x2fc   : > { %v9003_v42 = vpack.c.bf16 %v8700_v61, %v8700_v61  ;;  %v9004_v30 = vpack.c.bf16 %v8708_v57, %v8708_v57  ;;  %v9005_v11 = vpack.c.bf16 %v8707_v5, %v8707_v5  ;;  %v9006_v24 = vpack.c.bf16 %v8709_v33, %v8709_v33 }
 0x2fd   : > { %v10000_v6 = vpop.f32.mrb[24].mxu0  ;;  %v9007_v49 = vpack.c.bf16 %v8717_v39, %v8717_v39  ;;  %v9008_v32 = vpack.c.bf16 %v8725_v35, %v8725_v35  ;;  %v9009_v9 = vpack.c.bf16 %v8724_v21, %v8724_v21  ;;  %v9010_v3 = vpack.c.bf16 %v8726_v25, %v8726_v25 }
 0x2fe   : > { %v4413_v2 = vpop.f32.mrb[25].mxu0  ;;  %v9124_v43 = vunpack.c.l.b16 %v8995_v59  ;;  %v9125_v34 = vunpack.c.l.b16 %v8996_v62  ;;  %v9126_v38 = vunpack.c.l.b16 %v8997_v63  ;;  %v9127_v29 = vunpack.c.l.b16 %v8998_v22  ;;  %8213 = vrot.lane.b32.xlu0 %v10174_v58, %s10288_s18 }
 0x2ff   : > { %v12860_v51 = vpop.f32.mrb[26].mxu0  ;;  %v9128_v60 = vunpack.c.l.b16 %v8999_v54  ;;  %v9129_v61 = vunpack.c.l.b16 %v9000_v27  ;;  %v9130_v5 = vunpack.c.l.b16 %v9001_v53  ;;  %v9131_v41 = vunpack.c.l.b16 %v9002_v48 }
 0x300   : > { %v12863_v10 = vpop.f32.mrb[27].mxu0  ;;  %vm13426_vm4 = vcmask 589312   ;;  %v9132_v39 = vunpack.c.l.b16 %v9003_v42  ;;  %v9133_v21 = vunpack.c.l.b16 %v9004_v30  ;;  %v9134_v14 = vunpack.c.l.b16 %v9005_v11 }
 0x301   : > { %v9135_v20 = vunpack.c.l.b16 %v9006_v24  ;;  %v9136_v57 = vunpack.c.l.b16 %v9007_v49  ;;  %v9137_v33 = vunpack.c.l.b16 %v9008_v32  ;;  %v9138_v35 = vunpack.c.l.b16 %v9009_v9 }
 0x302   : > { %v9139_v25 = vunpack.c.l.b16 %v9010_v3  ;;  %v12865_v59 = vpop.f32.mrb[0].mxu1  ;;  %v9188_v62 = vrot.slane %v9125_v34, 7  ;;  %v9190_v63 = vrot.slane %v9126_v38, 6  ;;  %v9192_v22 = vrot.slane %v9127_v29, 5 }
 0x303   : > { %v9194_v54 = vrot.slane %v9128_v60, 4  ;;  %v12867_v27 = vpop.f32.mrb[1].mxu1  ;;  %v9196_v53 = vrot.slane %v9129_v61, 3  ;;  %v9198_v48 = vrot.slane %v9130_v5, 2  ;;  %v9200_v58 = vrot.slane %v9131_v41, 1 }
 0x304   : > { %v9202_v42 = vrot.slane %v9133_v21, 7  ;;  %v12869_v30 = vpop.f32.mrb[2].mxu1  ;;  %v9189_v11 = vsel %vm6396_vm14, %v9188_v62, %v9124_v43  ;;  %v9204_v24 = vrot.slane %v9134_v14, 6  ;;  %v9206_v49 = vrot.slane %v9135_v20, 5  ;;  %v12881_v43 = vld [vmem:[%s13411_s4] ss:$0 sm:$0xff] }
 0x305   : > { %v9208_v32 = vrot.slane %v9136_v57, 4  ;;  %v12872_v9 = vpop.f32.mrb[3].mxu1  ;;  %v9191_v3 = vsel %vm6399_vm15, %v9190_v63, %v9189_v11  ;;  %v9210_v38 = vrot.slane %v9137_v33, 3  ;;  %v9212_v29 = vrot.slane %v9138_v35, 2 }
 0x306   : > { %v9203_v34 = vsel %vm6396_vm14, %v9202_v42, %v9132_v39  ;;  %v9193_v60 = vsel %vm6402_vm10, %v9192_v22, %v9191_v3  ;;  %v9214_v5 = vrot.slane %v9139_v25, 1  ;;  %v4477_v41 = vmul.f32 %v12881_v43, %v10000_v6  ;;  %v12895_v6 = vld [vmem:[%s13412_s5] ss:$0 sm:$0xff] }
 0x307   : > { %v9205_v61 = vsel %vm6399_vm15, %v9204_v24, %v9203_v34  ;;  %v8367_v21 = vpop.permute.xlu0 %8366  ;;  %v9195_v14 = vsel %vm6405_vm1, %v9194_v54, %v9193_v60  ;;  %v4475_v39 = vmul.f32 %v12881_v43, %v4413_v2  ;;  %v8734_v57 = vrot.slane %v12793_v4, %v12828_v17 }
 0x308   : > { %v9207_v20 = vsel %vm6402_vm10, %v9206_v49, %v9205_v61  ;;  %8379 = vst.msk [vmem:[#allocation5] sm:$0xff] %vm8378_vm3, %v8367_v21  ;;  %v9197_v33 = vsel %vm6408_vm0, %v9196_v53, %v9195_v14  ;;  %v12898_v25 = vadd.f32 %v12895_v6, %v4477_v41  ;;  %v8741_v2 = vrot.slane %v8727_v36, %v12828_v17  ;;  %v10183_v41 = vld [vmem:[#allocation4 + $0x40] ss:$16 sps:$4 sm:$0xff]  }
 0x309   : > { %v9209_v35 = vsel %vm6405_vm1, %v9208_v32, %v9207_v20  ;;  %8424 = vst.msk [vmem:[#allocation5] sm:$0xff] %vm8423_vm8, %v12686_v47  ;;  %v9199_v62 = vsel %vm6411_vm7, %v9198_v48, %v9197_v33  ;;  %v12909_v22 = vadd.f32 %v12895_v6, %v4475_v39  ;;  %v8742_v54 = vcombine.high %v8734_v57, %v8734_v57 }
 0x30a   : > { %v9211_v63 = vsel %vm6408_vm0, %v9210_v38, %v9209_v35  ;;  %8469 = vst.msk [vmem:[#allocation5] sm:$0xff] %vm8468_vm5, %v12700_v40  ;;  %v9201_v53 = vsel %vm6414_vm6, %v9200_v58, %v9199_v62  ;;  %v4548_v4 = vmax.f32 %v12898_v25, 0.0  ;;  %v8743_v36 = vcombine.high %v8741_v2, %v8741_v2 }
 0x30b   : > { %v9213_v42 = vsel %vm6411_vm7, %v9212_v29, %v9211_v63  ;;  %8626 = vst.msk [vmem:[#allocation5] sm:$0xff] %vm13426_vm4, %v8614_v0  ;;  %v4546_v48 = vmax.f32 %v12909_v22, 0.0  ;;  %v8751_v11 = vrot.slane %v12798_v28, %v12828_v17  ;;  %v8758_v40 = vrot.slane %v8744_v13, %v12828_v17 }
 0x30c   : > { %v9215_v47 = vsel %vm6414_vm6, %v9214_v5, %v9213_v42  ;;  %v8768_v24 = vrot.slane %v12805_v15, %v12828_v17  ;;  %v8775_v0 = vrot.slane %v8761_v1, %v12828_v17  ;;  %v8785_v49 = vrot.slane %v12810_v52, %v12828_v17  ;;  %7931 = vst.msk [vmem:[#allocation5 + $0x10] sm:$0xff] %vm13427_vm12, %v10183_v41 }
 0x30d   : > { %v9300_v58 = vpack.c.b16 %v9215_v47, %v9201_v53  ;;  %v8759_v32 = vcombine.high %v8751_v11, %v8751_v11  ;;  %v8760_v3 = vcombine.high %v8758_v40, %v8758_v40  ;;  %v8792_v28 = vrot.slane %v8778_v56, %v12828_v17 }
 0x30e   : > { %v9011_v13 = vpack.c.bf16 %v8734_v57, %v8734_v57  ;;  %vm13488_vm4 = vcmask 31744   ;;  %v8776_v34 = vcombine.high %v8768_v24, %v8768_v24  ;;  %v8777_v38 = vcombine.high %v8775_v0, %v8775_v0 }
 0x30f   : > { %10008 = vmatprep.mubr.msk.bf16.mxu1 %vm13488_vm4, %v9300_v58  ;;  %v8793_v29 = vcombine.high %v8785_v49, %v8785_v49  ;;  %v9012_v60 = vpack.c.bf16 %v8742_v54, %v8742_v54  ;;  %v8794_v61 = vcombine.high %v8792_v28, %v8792_v28  ;;  %v9013_v15 = vpack.c.bf16 %v8741_v2, %v8741_v2 }
 0x310   : > { %v9014_v1 = vpack.c.bf16 %v8743_v36, %v8743_v36  ;;  %v9015_v5 = vpack.c.bf16 %v8751_v11, %v8751_v11  ;;  %v9016_v21 = vpack.c.bf16 %v8759_v32, %v8759_v32  ;;  %v9017_v14 = vpack.c.bf16 %v8758_v40, %v8758_v40 }
 0x311   : > { %v9018_v20 = vpack.c.bf16 %v8760_v3, %v8760_v3  ;;  %v9019_v39 = vpack.c.bf16 %v8768_v24, %v8768_v24  ;;  %v9020_v33 = vpack.c.bf16 %v8776_v34, %v8776_v34  ;;  %v9021_v35 = vpack.c.bf16 %v8775_v0, %v8775_v0 }
 0x312   : > { %v9022_v52 = vpack.c.bf16 %v8777_v38, %v8777_v38  ;;  %v9023_v56 = vpack.c.bf16 %v8785_v49, %v8785_v49  ;;  %v9024_v57 = vpack.c.bf16 %v8793_v29, %v8793_v29  ;;  %v9025_v62 = vpack.c.bf16 %v8792_v28, %v8792_v28 }
 0x313   : > { %v9026_v63 = vpack.c.bf16 %v8794_v61, %v8794_v61  ;;  %v9140_v53 = vunpack.c.l.b16 %v9011_v13  ;;  %v9141_v54 = vunpack.c.l.b16 %v9012_v60  ;;  %v9142_v42 = vunpack.c.l.b16 %v9013_v15 }
 0x314   : > { %v9143_v2 = vunpack.c.l.b16 %v9014_v1  ;;  %v9144_v36 = vunpack.c.l.b16 %v9015_v5  ;;  %v9145_v47 = vunpack.c.l.b16 %v9016_v21  ;;  %v9146_v11 = vunpack.c.l.b16 %v9017_v14 }
 0x315   : > { %v9147_v58 = vunpack.c.l.b16 %v9018_v20  ;;  %v9148_v40 = vunpack.c.l.b16 %v9019_v39  ;;  %v9149_v32 = vunpack.c.l.b16 %v9020_v33  ;;  %v9150_v24 = vunpack.c.l.b16 %v9021_v35 }
 0x316   : > { %v9151_v3 = vunpack.c.l.b16 %v9022_v52  ;;  %v9152_v0 = vunpack.c.l.b16 %v9023_v56  ;;  %v9153_v34 = vunpack.c.l.b16 %v9024_v57  ;;  %v9154_v49 = vunpack.c.l.b16 %v9025_v62 }
 0x317   : > { %v9155_v38 = vunpack.c.l.b16 %v9026_v63  ;;  %v9216_v41 = vrot.slane %v9141_v54, 7  ;;  %v9218_v29 = vrot.slane %v9142_v42, 6  ;;  %v9220_v28 = vrot.slane %v9143_v2, 5 }
 0x318   : > { %v9222_v61 = vrot.slane %v9144_v36, 4  ;;  %v9224_v13 = vrot.slane %v9145_v47, 3  ;;  %v9226_v15 = vrot.slane %v9146_v11, 2  ;;  %v9228_v1 = vrot.slane %v9147_v58, 1 }
 0x319   : > { %v9217_v60 = vsel %vm6396_vm14, %v9216_v41, %v9140_v53  ;;  %v9230_v5 = vrot.slane %v9149_v32, 7  ;;  %v9232_v14 = vrot.slane %v9150_v24, 6  ;;  %v9234_v20 = vrot.slane %v9151_v3, 5 }
 0x31a   : > { %v9219_v21 = vsel %vm6399_vm15, %v9218_v29, %v9217_v60  ;;  %v9236_v39 = vrot.slane %v9152_v0, 4  ;;  %v9238_v52 = vrot.slane %v9153_v34, 3  ;;  %v9240_v56 = vrot.slane %v9154_v49, 2 }
 0x31b   : > { %v9221_v33 = vsel %vm6402_vm10, %v9220_v28, %v9219_v21  ;;  %v9231_v35 = vsel %vm6396_vm14, %v9230_v5, %v9148_v40  ;;  %v9242_v63 = vrot.slane %v9155_v38, 1  ;;  %v4478_v53 = vmul.f32 %v12881_v43, %v12860_v51 }
 0x31c   : > { %v9223_v57 = vsel %vm6405_vm1, %v9222_v61, %v9221_v33  ;;  %v9233_v62 = vsel %vm6399_vm15, %v9232_v14, %v9231_v35  ;;  %v4476_v2 = vmul.f32 %v12881_v43, %v12863_v10  ;;  %v4481_v36 = vmul.f32 %v12881_v43, %v12865_v59  ;;  %v10181_v59 = vld [vmem:[%s13413_s6] sm:$0xff]  }
 0x31d   : > { %v9225_v54 = vsel %vm6408_vm0, %v9224_v13, %v9223_v57  ;;  %v9235_v42 = vsel %vm6402_vm10, %v9234_v20, %v9233_v62  ;;  %v4517_v58 = vadd.f32 %v12895_v6, %v4478_v53  ;;  %v4479_v40 = vmul.f32 %v12881_v43, %v12867_v27  ;;  %10016 = vmatprep.subr.bf16.mxu1 %v10181_v59 }
 0x31e   : > { %v9227_v47 = vsel %vm6411_vm7, %v9226_v15, %v9225_v54  ;;  %v9237_v11 = vsel %vm6405_vm1, %v9236_v39, %v9235_v42  ;;  %v4515_v24 = vadd.f32 %v12895_v6, %v4476_v2  ;;  %v12962_v10 = vadd.f32 %v12895_v6, %v4481_v36  ;;  %v12980_v15 = vpop.permute.xlu1 %8413 }
 0x31f   : > { %v9229_v51 = vsel %vm6414_vm6, %v9228_v1, %v9227_v47  ;;  %v9239_v32 = vsel %vm6408_vm0, %v9238_v52, %v9237_v11  ;;  %v4549_v0 = vmax.f32 %v4517_v58, 0.0  ;;  %v12969_v34 = vadd.f32 %v12895_v6, %v4479_v40  ;;  %v10184_v58 = vld [vmem:[%s13413_s6 + $0x10] sm:$0xff]  }
 0x320   : > { %v9241_v3 = vsel %vm6411_vm7, %v9240_v56, %v9239_v32  ;;  %v4482_v27 = vmul.f32 %v12881_v43, %v12869_v30  ;;  %v4547_v38 = vmax.f32 %v4515_v24, 0.0  ;;  %v4552_v41 = vmax.f32 %v12962_v10, 0.0 }
 0x321   : > { %v9243_v49 = vsel %vm6414_vm6, %v9242_v63, %v9241_v3  ;;  %v4480_v29 = vmul.f32 %v12881_v43, %v12872_v9  ;;  %v4567_v61 = vpack.c.bf16 %v4549_v0, %v4548_v4  ;;  %v9844_v13 = vpack.c.bf16 %v4549_v0, %v4549_v0  ;;  %v10182_v9 = vld [vmem:[%s13413_s6 + $0x8] sm:$0xff]  }
 0x322   : > { %v9301_v28 = vpack.c.b16 %v9243_v49, %v9229_v51  ;;  %v4550_v60 = vmax.f32 %v12969_v34, 0.0  ;;  %v4566_v30 = vpack.c.bf16 %v4547_v38, %v4546_v48  ;;  %v9843_v1 = vpack.c.bf16 %v4547_v38, %v4547_v38  ;;  %v13018_v42 = vpop.permute.xlu1 %8458 }
 0x323   : > { %v4521_v5 = vadd.f32 %v12895_v6, %v4482_v27  ;;  %v4519_v21 = vadd.f32 %v12895_v6, %v4480_v29  ;;  %v5295_v43 = vrot.slane %v4567_v61, %v11898_v26  ;;  %v5302_v25 = vrot.slane %v9844_v13, %v11898_v26 }
 0x324   : > { %10009 = vmatmul.mubr.msk.bf16.vlgmr.msra.gmra.mrb[4].mxu1 %vm13488_vm4, %v9301_v28  ;;  %v12994_v4 = vrot.slane %v12823_v18, %v12828_v17  ;;  %v13000_v22 = vrot.slane %v8795_v31, %v12828_v17  ;;  %v5246_v6 = vrot.slane %v4566_v30, %v11898_v26  ;;  %v5253_v48 = vrot.slane %v9843_v1, %v11898_v26 }
 0x325   : > { %v13004_v14 = vmax.f32 %v4521_v5, 0.0  ;;  %v13006_v20 = vmax.f32 %v4519_v21, 0.0  ;;  %10017 = vmatpush3.bf16.msra.mxu1 %v10181_v59  ;;  %v5303_v39 = vcombine.high %v5295_v43, %v5295_v43  ;;  %v5304_v33 = vcombine.high %v5302_v25, %v5302_v25  ;;  %v10185_v59 = vld [vmem:[%s13413_s6 + $0x18] sm:$0xff]  }
 0x326   : > { %v5311_v35 = vrot.slane %v5295_v43, %v11898_v26  ;;  %v5318_v52 = vrot.slane %v5302_v25, %v11898_v26  ;;  %10018 = vmatprep.subr.bf16.mxu1 %v10182_v9  ;;  %v5254_v56 = vcombine.high %v5246_v6, %v5246_v6  ;;  %v5255_v18 = vcombine.high %v5253_v48, %v5253_v48 }
 0x327   : > { %v13011_v31 = vrot.slane %v5246_v6, %v11898_v26  ;;  %v13014_v57 = vrot.slane %v5253_v48, %v11898_v26  ;;  %v5325_v62 = vrot.slane %v5303_v39, %v11898_v26  ;;  %v5332_v63 = vrot.slane %v5304_v33, %v11898_v26 }
 0x328   : > { %v5333_v53 = vcombine.high %v5311_v35, %v5311_v35  ;;  %v5334_v54 = vcombine.high %v5318_v52, %v5318_v52  ;;  %v7348_v2 = vrot.slane %v5311_v35, %v11901_v19  ;;  %v7404_v36 = vrot.slane %v5318_v52, %v11901_v19 }
 0x329   : > { %v13023_v47 = vrot.slane %v5254_v56, %v11898_v26  ;;  %v13026_v11 = vrot.slane %v5255_v18, %v11898_v26  ;;  %10019 = vmatpush3.bf16.msra.mxu1 %v10182_v9  ;;  %v5335_v40 = vcombine.high %v5325_v62, %v5325_v62  ;;  %v5336_v51 = vcombine.high %v5332_v63, %v5332_v63 }
 0x32a   : > { %v7362_v32 = vrot.slane %v5325_v62, %v11901_v19  ;;  %v7376_v24 = vrot.slane %v5333_v53, %v11901_v19  ;;  %v7355_v3 = vrot.slane %v7348_v2, %v11901_v19  ;;  %v7411_v0 = vrot.slane %v7404_v36, %v11901_v19  ;;  %10020 = vmatprep.subr.bf16.mxu1 %v10184_v58 }
 0x32b   : > { %v7418_v27 = vrot.slane %v5332_v63, %v11901_v19  ;;  %v7432_v49 = vrot.slane %v5334_v54, %v11901_v19  ;;  %v7390_v28 = vrot.slane %v5335_v40, %v11901_v19  ;;  %v7446_v61 = vrot.slane %v5336_v51, %v11901_v19 }
 0x32c   : > { %v7369_v38 = vrot.slane %v7362_v32, %v11901_v19  ;;  %v7383_v29 = vrot.slane %v7376_v24, %v11901_v19  ;;  %v7614_v1 = vunpack.c.l.b16 %v7355_v3  ;;  %v7618_v5 = vunpack.c.l.b16 %v7411_v0  ;;  %v7887_v0 = vld [vmem:[#allocation4 + $0x74] sm:$0x1] }
 0x32d   : > { %v7425_v13 = vrot.slane %v7418_v27, %v11901_v19  ;;  %v7439_v30 = vrot.slane %v7432_v49, %v11901_v19  ;;  %10021 = vmatpush3.bf16.msra.mxu1 %v10184_v58  ;;  %v7397_v21 = vrot.slane %v7390_v28, %v11901_v19  ;;  %v7453_v9 = vrot.slane %v7446_v61, %v11901_v19  ;;  %v8122_v6 = vpop.permute.xlu1 %8121 }
 0x32e   : > { %v7615_v43 = vunpack.c.l.b16 %v7369_v38  ;;  %v7616_v25 = vunpack.c.l.b16 %v7383_v29  ;;  %10022 = vmatprep.subr.bf16.mxu1 %v10185_v59  ;;  %v7720_v33 = vrot.slane %v7618_v5, 4  ;;  %v5284_v35 = vcombine.high %v13011_v31, %v13011_v31  ;;  %8133 = vst.msk [vmem:[#allocation5 + $0x8] sm:$0xff] %vm8131_vm2, %v8122_v6  ;;  %v7884_v6 = vld [vmem:[#allocation4 + $0x70] sm:$0xf] }
 0x32f   : > { %v7619_v48 = vunpack.c.l.b16 %v7425_v13  ;;  %v7620_v39 = vunpack.c.l.b16 %v7439_v30  ;;  %v7617_v52 = vunpack.c.l.b16 %v7397_v21  ;;  %v7621_v56 = vunpack.c.l.b16 %v7453_v9 }
 0x330   : > { %v7714_v18 = vrot.slane %v7615_v43, 7  ;;  %v7716_v62 = vrot.slane %v7616_v25, 6  ;;  %v5285_v54 = vcombine.high %v13014_v57, %v13014_v57  ;;  %v5286_v2 = vcombine.high %v13023_v47, %v13023_v47 }
 0x331   : > { %v7722_v63 = vrot.slane %v7619_v48, 3  ;;  %v7724_v53 = vrot.slane %v7620_v39, 2  ;;  %10023 = vmatpush3.bf16.msra.mxu1 %v10185_v59  ;;  %v7718_v58 = vrot.slane %v7617_v52, 5  ;;  %v7726_v40 = vrot.slane %v7621_v56, 1  ;;  %v8167_v32 = vpop.permute.xlu1 %8166 }
 0x332   : > { %v7715_v36 = vsel %vm6396_vm14, %v7714_v18, %v7614_v1  ;;  %v7803_v51 = vsel %vm6399_vm15, %v7714_v18, %v7614_v1  ;;  %v5287_v27 = vcombine.high %v13026_v11, %v13026_v11  ;;  %v6113_v49 = vrot.slane %v13011_v31, %v11901_v19 }
 0x333   : > { %v7717_v24 = vsel %vm6399_vm15, %v7716_v62, %v7715_v36  ;;  %v7804_v3 = vsel %vm6402_vm10, %v7716_v62, %v7803_v51  ;;  %vm13489_vm4 = vcmask 261312   ;;  %v7828_v29 = vpack.c.b16 %v7726_v40, %v7726_v40 }
 0x334   : > { %8178 = vst.msk [vmem:[#allocation5 + $0x8] sm:$0xff] %vm13489_vm4, %v8167_v32  ;;  %v7719_v59 = vsel %vm6402_vm10, %v7718_v58, %v7717_v24  ;;  %v7805_v38 = vsel %vm6405_vm1, %v7718_v58, %v7804_v3  ;;  %v6127_v28 = vrot.slane %v13023_v47, %v11901_v19  ;;  %v6120_v30 = vrot.slane %v6113_v49, %v11901_v19 }
 0x335   : > { %v7721_v61 = vsel %vm6405_vm1, %v7720_v33, %v7719_v59  ;;  %v7806_v13 = vsel %vm6408_vm0, %v7720_v33, %v7805_v38  ;;  %v6141_v1 = vrot.slane %v5284_v35, %v11901_v19  ;;  %v7888_v21 = vsel %vm11821_vm9, %v7828_v29, %v7887_v0  ;;  %v8212_v43 = vpop.permute.xlu1 %8211 }
 0x336   : > { %v7723_v31 = vsel %vm6408_vm0, %v7722_v63, %v7721_v61  ;;  %v7807_v5 = vsel %vm6411_vm7, %v7722_v63, %v7806_v13  ;;  %v6134_v9 = vrot.slane %v6127_v28, %v11901_v19  ;;  %7889 = vst [vmem:[#allocation4 + $0x74] sm:$0x1] %v7888_v21  ;;  %v6155_v39 = vrot.slane %v5286_v2, %v11901_v19 }
 0x337   : > { %v7725_v47 = vsel %vm6411_vm7, %v7724_v53, %v7723_v31  ;;  %v7808_v25 = vsel %vm6414_vm6, %v7724_v53, %v7807_v5  ;;  %v6148_v48 = vrot.slane %v6141_v1, %v11901_v19  ;;  %vm13490_vm4 = vcmask 326912  }
 0x338   : > { %8223 = vst.msk [vmem:[#allocation5 + $0x8] sm:$0xff] %vm13490_vm4, %v8212_v43  ;;  %v7727_v33 = vsel %vm6414_vm6, %v7726_v40, %v7725_v47  ;;  %v7827_v35 = vpack.c.b16 %v7808_v25, %v7808_v25  ;;  %v6169_v52 = vrot.slane %v13014_v57, %v11901_v19  ;;  %v6183_v56 = vrot.slane %v13026_v11, %v11901_v19 }
 0x339   : > { %v7748_v18 = vpack.c.b16 %v7727_v33, %v7727_v33  ;;  %v6162_v62 = vrot.slane %v6155_v39, %v11901_v19  ;;  %v6197_v63 = vrot.slane %v5285_v54, %v11901_v19  ;;  %v6211_v53 = vrot.slane %v5287_v27, %v11901_v19  ;;  %v7967_v51 = vpop.permute.xlu1 %7966 }
 0x33a   : > { %v7885_v2 = vsel %vm12002_vm11, %v7827_v35, %v7884_v6  ;;  %v6176_v36 = vrot.slane %v6169_v52, %v11901_v19  ;;  %v6190_v58 = vrot.slane %v6183_v56, %v11901_v19  ;;  %v6379_v40 = vunpack.c.l.b16 %v6120_v30 }
 0x33b   : > { %vm13491_vm4 = vcmask 60416   ;;  %7886 = vst [vmem:[#allocation4 + $0x70] sm:$0xf] %v7885_v2  ;;  %v6204_v57 = vrot.slane %v6197_v63, %v11901_v19  ;;  %v6218_v11 = vrot.slane %v6211_v53, %v11901_v19  ;;  %v6380_v32 = vunpack.c.l.b16 %v6134_v9  ;;  %v6661_v9 = vld [vmem:[#allocation4 + $0xf4] sm:$0x1] }
 0x33c   : > { %7765 = vst.msk [vmem:[#allocation4 + $0x78] sm:$0xf] %vm13491_vm4, %v7748_v18  ;;  %v6381_v54 = vunpack.c.l.b16 %v6148_v48  ;;  %vm13492_vm12 = vcmask 130112   ;;  %v6382_v24 = vunpack.c.l.b16 %v6162_v62  ;;  %v6383_v3 = vunpack.c.l.b16 %v6176_v36  ;;  %v6658_v2 = vld [vmem:[#allocation4 + $0xf0] sm:$0xf] }
 0x33d   : > { %7977 = vst.msk [vmem:[#allocation5 + $0x10] sm:$0xff] %vm13492_vm12, %v7967_v51  ;;  %v6384_v0 = vunpack.c.l.b16 %v6190_v58  ;;  %v4569_v27 = vpack.c.bf16 %v13004_v14, %v4552_v41  ;;  %v6385_v49 = vunpack.c.l.b16 %v6204_v57  ;;  %v6386_v59 = vunpack.c.l.b16 %v6218_v11  ;;  %vm13493_vm12 = vmmov %vm13491_vm4 }
 0x33e   : > { %v6486_v38 = vrot.slane %v6380_v32, 7  ;;  %v6488_v29 = vrot.slane %v6381_v54, 6  ;;  %v6490_v28 = vrot.slane %v6382_v24, 5  ;;  %v6492_v61 = vrot.slane %v6383_v3, 4 }
 0x33f   : > { %v6494_v13 = vrot.slane %v6384_v0, 3  ;;  %v9846_v30 = vpack.c.bf16 %v13004_v14, %v13004_v14  ;;  %v6496_v31 = vrot.slane %v6385_v49, 2  ;;  %v6498_v5 = vrot.slane %v6386_v59, 1 }
 0x340   : > { %v6487_v1 = vsel %vm6396_vm14, %v6486_v38, %v6379_v40  ;;  %v6575_v21 = vsel %vm6399_vm15, %v6486_v38, %v6379_v40  ;;  %v5393_v43 = vrot.slane %v4569_v27, %v11898_v26  ;;  %v4568_v48 = vpack.c.bf16 %v13006_v20, %v4550_v60 }
 0x341   : > { %v6489_v10 = vsel %vm6399_vm15, %v6488_v29, %v6487_v1  ;;  %v6576_v41 = vsel %vm6402_vm10, %v6488_v29, %v6575_v21  ;;  %v5400_v47 = vrot.slane %v9846_v30, %v11898_v26  ;;  %v6600_v14 = vpack.c.b16 %v6498_v5, %v6498_v5 }
 0x342   : > { %v6491_v25 = vsel %vm6402_vm10, %v6490_v28, %v6489_v10  ;;  %v6577_v6 = vsel %vm6405_vm1, %v6490_v28, %v6576_v41  ;;  %v5401_v35 = vcombine.high %v5393_v43, %v5393_v43  ;;  %v5409_v53 = vrot.slane %v5393_v43, %v11898_v26 }
 0x343   : > { %v6493_v39 = vsel %vm6405_vm1, %v6492_v61, %v6491_v25  ;;  %v6578_v33 = vsel %vm6408_vm0, %v6492_v61, %v6577_v6  ;;  %v5402_v52 = vcombine.high %v5400_v47, %v5400_v47  ;;  %v10176_v56 = vld [vmem:[#allocation4 + $0x68] ss:$16 sps:$4 sm:$0xff]   ;;  %v6662_v63 = vsel %vm11821_vm9, %v6600_v14, %v6661_v9 }
 0x344   : > { %v6495_v18 = vsel %vm6408_vm0, %v6494_v13, %v6493_v39  ;;  %v6579_v62 = vsel %vm6411_vm7, %v6494_v13, %v6578_v33  ;;  %6663 = vst [vmem:[#allocation4 + $0xf4] sm:$0x1] %v6662_v63  ;;  %v5416_v36 = vrot.slane %v5400_v47, %v11898_v26  ;;  %v5423_v58 = vrot.slane %v5401_v35, %v11898_v26 }
 0x345   : > { %v6497_v34 = vsel %vm6411_vm7, %v6496_v31, %v6495_v18  ;;  %v6580_v60 = vsel %vm6414_vm6, %v6496_v31, %v6579_v62  ;;  %7968 = vrot.lane.b32.xlu1 %v10176_v56, %s10283_s26  ;;  %v5430_v57 = vrot.slane %v5402_v52, %v11898_v26  ;;  %v5431_v11 = vcombine.high %v5409_v53, %v5409_v53 }
 0x346   : > { %v6499_v40 = vsel %vm6414_vm6, %v6498_v5, %v6497_v34  ;;  %v6599_v51 = vpack.c.b16 %v6580_v60, %v6580_v60  ;;  %v5432_v54 = vcombine.high %v5416_v36, %v5416_v36  ;;  %v5433_v24 = vcombine.high %v5423_v58, %v5423_v58 }
 0x347   : > { %v6520_v32 = vpack.c.b16 %v6499_v40, %v6499_v40  ;;  %v7460_v3 = vrot.slane %v5409_v53, %v11901_v19  ;;  %v5434_v27 = vcombine.high %v5430_v57, %v5430_v57  ;;  %v7474_v49 = vrot.slane %v5423_v58, %v11901_v19 }
 0x348   : > { %v6659_v0 = vsel %vm12002_vm11, %v6599_v51, %v6658_v2  ;;  %v7488_v59 = vrot.slane %v5431_v11, %v11901_v19  ;;  %v7502_v29 = vrot.slane %v5433_v24, %v11901_v19  ;;  %v7516_v28 = vrot.slane %v5416_v36, %v11901_v19 }
 0x349   : > { %6537 = vst.msk [vmem:[#allocation4 + $0xf8] sm:$0xf] %vm13493_vm12, %v6520_v32  ;;  %6660 = vst [vmem:[#allocation4 + $0xf0] sm:$0xf] %v6659_v0  ;;  %v7467_v38 = vrot.slane %v7460_v3, %v11901_v19  ;;  %v7530_v61 = vrot.slane %v5430_v57, %v11901_v19  ;;  %v7481_v13 = vrot.slane %v7474_v49, %v11901_v19  ;;  %vm13494_vm12 = vcmask 589312  }
 0x34a   : > { %v7495_v30 = vrot.slane %v7488_v59, %v11901_v19  ;;  %v7544_v1 = vrot.slane %v5432_v54, %v11901_v19  ;;  %v7558_v31 = vrot.slane %v5434_v27, %v11901_v19  ;;  %v7509_v5 = vrot.slane %v7502_v29, %v11901_v19 }
 0x34b   : > { %v7523_v21 = vrot.slane %v7516_v28, %v11901_v19  ;;  %v7537_v10 = vrot.slane %v7530_v61, %v11901_v19  ;;  %v7622_v41 = vunpack.c.l.b16 %v7467_v38  ;;  %v7623_v47 = vunpack.c.l.b16 %v7481_v13 }
 0x34c   : > { %v7551_v9 = vrot.slane %v7544_v1, %v11901_v19  ;;  %v7565_v43 = vrot.slane %v7558_v31, %v11901_v19  ;;  %v7624_v25 = vunpack.c.l.b16 %v7495_v30  ;;  %v7625_v6 = vunpack.c.l.b16 %v7509_v5  ;;  %v7890_v30 = vld [vmem:[#allocation4 + $0x80] sm:$0xf] }
 0x34d   : > { %v7626_v14 = vunpack.c.l.b16 %v7523_v21  ;;  %v7627_v39 = vunpack.c.l.b16 %v7537_v10  ;;  %v9845_v33 = vpack.c.bf16 %v13006_v20, %v13006_v20  ;;  %v7728_v56 = vrot.slane %v7623_v47, 7  ;;  %v7893_v20 = vld [vmem:[#allocation4 + $0x84] sm:$0x1] }
 0x34e   : > { %v7628_v35 = vunpack.c.l.b16 %v7551_v9  ;;  %v7629_v52 = vunpack.c.l.b16 %v7565_v43  ;;  %v7730_v18 = vrot.slane %v7624_v25, 6  ;;  %v7732_v62 = vrot.slane %v7625_v6, 5 }
 0x34f   : > { %v7734_v63 = vrot.slane %v7626_v14, 4  ;;  %v7736_v53 = vrot.slane %v7627_v39, 3  ;;  %v5344_v34 = vrot.slane %v4568_v48, %v11898_v26  ;;  %v7729_v60 = vsel %vm6396_vm14, %v7728_v56, %v7622_v41 }
 0x350   : > { %v7738_v2 = vrot.slane %v7628_v35, 2  ;;  %v7740_v36 = vrot.slane %v7629_v52, 1  ;;  %v7809_v58 = vsel %vm6399_vm15, %v7728_v56, %v7622_v41  ;;  %v7731_v40 = vsel %vm6399_vm15, %v7730_v18, %v7729_v60 }
 0x351   : > { %v7810_v51 = vsel %vm6402_vm10, %v7730_v18, %v7809_v58  ;;  %v5351_v57 = vrot.slane %v9845_v33, %v11898_v26  ;;  %v5352_v11 = vcombine.high %v5344_v34, %v5344_v34  ;;  %v7733_v32 = vsel %vm6402_vm10, %v7732_v62, %v7731_v40 }
 0x352   : > { %v7811_v54 = vsel %vm6405_vm1, %v7732_v62, %v7810_v51  ;;  %v7830_v24 = vpack.c.b16 %v7740_v36, %v7740_v36  ;;  %v5360_v48 = vrot.slane %v5344_v34, %v11898_v26  ;;  %v7735_v3 = vsel %vm6405_vm1, %v7734_v63, %v7733_v32  ;;  %v8616_v34 = vpop.permute.xlu0 %8615 }
 0x353   : > { %v7812_v0 = vsel %vm6408_vm0, %v7734_v63, %v7811_v54  ;;  %v5353_v27 = vcombine.high %v5351_v57, %v5351_v57  ;;  %v5367_v49 = vrot.slane %v5351_v57, %v11898_v26  ;;  %v7737_v59 = vsel %vm6408_vm0, %v7736_v53, %v7735_v3 }
 0x354   : > { %v7813_v38 = vsel %vm6411_vm7, %v7736_v53, %v7812_v0  ;;  %v7894_v29 = vsel %vm11821_vm9, %v7830_v24, %v7893_v20  ;;  %v5374_v28 = vrot.slane %v5352_v11, %v11898_v26  ;;  %v7739_v61 = vsel %vm6411_vm7, %v7738_v2, %v7737_v59 }
 0x355   : > { %v7814_v13 = vsel %vm6414_vm6, %v7738_v2, %v7813_v38  ;;  %7895 = vst [vmem:[#allocation4 + $0x84] sm:$0x1] %v7894_v29  ;;  %v5381_v1 = vrot.slane %v5353_v27, %v11898_v26  ;;  %v5382_v31 = vcombine.high %v5360_v48, %v5360_v48  ;;  %v7741_v5 = vsel %vm6414_vm6, %v7740_v36, %v7739_v61 }
 0x356   : > { %v7829_v21 = vpack.c.b16 %v7814_v13, %v7814_v13  ;;  %v5383_v10 = vcombine.high %v5367_v49, %v5367_v49  ;;  %v5384_v41 = vcombine.high %v5374_v28, %v5374_v28  ;;  %v7749_v9 = vpack.c.b16 %v7741_v5, %v7741_v5 }
 0x357   : > { %v5385_v43 = vcombine.high %v5381_v1, %v5381_v1  ;;  %v6225_v47 = vrot.slane %v5360_v48, %v11901_v19  ;;  %v6239_v25 = vrot.slane %v5374_v28, %v11901_v19  ;;  %v6253_v14 = vrot.slane %v5382_v31, %v11901_v19 }
 0x358   : > { %v7891_v6 = vsel %vm12002_vm11, %v7829_v21, %v7890_v30  ;;  %v6267_v39 = vrot.slane %v5384_v41, %v11901_v19  ;;  %v6281_v26 = vrot.slane %v5367_v49, %v11901_v19  ;;  %7766 = vst.msk [vmem:[#allocation4 + $0x88] sm:$0xf] %vm13491_vm4, %v7749_v9  ;;  %v6295_v52 = vrot.slane %v5381_v1, %v11901_v19 }
 0x359   : > { %7892 = vst [vmem:[#allocation4 + $0x80] sm:$0xf] %v7891_v6  ;;  %v6232_v33 = vrot.slane %v6225_v47, %v11901_v19  ;;  %v6246_v35 = vrot.slane %v6239_v25, %v11901_v19  ;;  %v6309_v56 = vrot.slane %v5383_v10, %v11901_v19  ;;  %v6260_v18 = vrot.slane %v6253_v14, %v11901_v19  ;;  %v13193_v49 = vpop.permute.xlu0 %8415  ;;  %v6667_v10 = vld [vmem:[#allocation4 + $0x104] sm:$0x1] }
 0x35a   : > { %v6274_v62 = vrot.slane %v6267_v39, %v11901_v19  ;;  %v6288_v63 = vrot.slane %v6281_v26, %v11901_v19  ;;  %v6323_v53 = vrot.slane %v5385_v43, %v11901_v19  ;;  %v6302_v60 = vrot.slane %v6295_v52, %v11901_v19 }
 0x35b   : > { %v6316_v2 = vrot.slane %v6309_v56, %v11901_v19  ;;  %v6387_v36 = vunpack.c.l.b16 %v6232_v33  ;;  %v6388_v58 = vunpack.c.l.b16 %v6246_v35  ;;  %v6389_v51 = vunpack.c.l.b16 %v6260_v18  ;;  %v6664_v33 = vld [vmem:[#allocation4 + $0x100] sm:$0xf] }
 0x35c   : > { %v6330_v40 = vrot.slane %v6323_v53, %v11901_v19  ;;  %v6390_v20 = vunpack.c.l.b16 %v6274_v62  ;;  %v6391_v57 = vunpack.c.l.b16 %v6288_v63  ;;  %v6392_v11 = vunpack.c.l.b16 %v6302_v60  ;;  %v10217_v53 = vld.sshfl [vmem:[%s10429_s21 + $0xa8] sm:$0xff pattern:$0x76325410] }
 0x35d   : > { %v6393_v32 = vunpack.c.l.b16 %v6316_v2  ;;  %v6500_v54 = vrot.slane %v6388_v58, 7  ;;  %v13191_v24 = vcombine.high %v12994_v4, %v12994_v4  ;;  %v6502_v3 = vrot.slane %v6389_v51, 6  ;;  %v8369_v28 = vpop.permute.xlu1 %8368  ;;  %v13232_v56 = vpop.permute.xlu0 %8460 }
 0x35e   : > { %v6394_v48 = vunpack.c.l.b16 %v6330_v40  ;;  %v6504_v0 = vrot.slane %v6390_v20, 5  ;;  %v6506_v27 = vrot.slane %v6391_v57, 4  ;;  %v6508_v38 = vrot.slane %v6392_v11, 3  ;;  %8380 = vst.msk [vmem:[#allocation5 + $0x8] sm:$0xff] %vm8378_vm3, %v8369_v28  ;;  %v10187_v11 = vld [vmem:[#allocation4 + $0x60] ss:$16 sps:$4 sm:$0xff]  }
 0x35f   : > { %v6501_v59 = vsel %vm6396_vm14, %v6500_v54, %v6387_v36  ;;  %v6510_v19 = vrot.slane %v6393_v32, 2  ;;  %v6581_v29 = vsel %vm6399_vm15, %v6500_v54, %v6387_v36  ;;  %v13201_v1 = vcombine.high %v13000_v22, %v13000_v22  ;;  %8425 = vst.msk [vmem:[#allocation5 + $0x8] sm:$0xff] %vm8423_vm8, %v12980_v15  ;;  %v10178_v52 = vld [vmem:[#allocation4 + $0x78] ss:$16 sps:$4 sm:$0xff]  }
 0x360   : > { %v6503_v61 = vsel %vm6399_vm15, %v6502_v3, %v6501_v59  ;;  %v6512_v13 = vrot.slane %v6394_v48, 1  ;;  %v6582_v30 = vsel %vm6402_vm10, %v6502_v3, %v6581_v29  ;;  %v10177_v31 = vld [vmem:[#allocation4 + $0x70] ss:$16 sps:$4 sm:$0xff]   ;;  %v8819_v41 = vrot.slane %v12835_v16, %v12828_v17  ;;  %8470 = vst.msk [vmem:[#allocation5 + $0x8] sm:$0xff] %vm8468_vm5, %v13018_v42 }
 0x361   : > { %v6505_v5 = vsel %vm6402_vm10, %v6504_v0, %v6503_v61  ;;  %v6583_v21 = vsel %vm6405_vm1, %v6504_v0, %v6582_v30  ;;  %v8826_v9 = vrot.slane %v8812_v8, %v12828_v17  ;;  %v8836_v6 = vrot.slane %v12840_v37, %v12828_v17  ;;  %8417 = vrot.lane.b32.xlu1 %v10177_v31, %s10293_s24 }
 0x362   : > { %v6507_v43 = vsel %vm6405_vm1, %v6506_v27, %v6505_v5  ;;  %v6584_v47 = vsel %vm6408_vm0, %v6506_v27, %v6583_v21  ;;  %v6602_v25 = vpack.c.b16 %v6512_v13, %v6512_v13  ;;  %v8827_v8 = vcombine.high %v8819_v41, %v8819_v41  ;;  %8627 = vst.msk [vmem:[#allocation5 + $0x8] sm:$0xff] %vm13494_vm12, %v8616_v34 }
 0x363   : > { %v6509_v14 = vsel %vm6408_vm0, %v6508_v38, %v6507_v43  ;;  %v6585_v16 = vsel %vm6411_vm7, %v6508_v38, %v6584_v47  ;;  %v8828_v15 = vcombine.high %v8826_v9, %v8826_v9  ;;  %v8843_v42 = vrot.slane %v8829_v23, %v12828_v17 }
 0x364   : > { %v6511_v39 = vsel %vm6411_vm7, %v6510_v19, %v6509_v14  ;;  %v6586_v26 = vsel %vm6414_vm6, %v6510_v19, %v6585_v16  ;;  %v6668_v35 = vsel %vm11821_vm9, %v6602_v25, %v6667_v10  ;;  %v8844_v63 = vcombine.high %v8836_v6, %v8836_v6  ;;  %vm13495_vm9 = vmmov %vm13491_vm4 }
 0x365   : > { %v6513_v18 = vsel %vm6414_vm6, %v6512_v13, %v6511_v39  ;;  %v6601_v62 = vpack.c.b16 %v6586_v26, %v6586_v26  ;;  %6669 = vst [vmem:[#allocation4 + $0x104] sm:$0x1] %v6668_v35  ;;  %v8845_v60 = vcombine.high %v8843_v42, %v8843_v42  ;;  %v8860_v44 = vrot.slane %v8846_v46, %v12828_v17 }
 0x366   : > { %v6521_v34 = vpack.c.b16 %v6513_v18, %v6513_v18  ;;  %v9027_v37 = vpack.c.bf16 %v12994_v4, %v12994_v4  ;;  %8462 = vrot.lane.b32.xlu1 %v10178_v52, %s10294_s25  ;;  %v8861_v2 = vcombine.high %v10217_v53, %v10217_v53  ;;  %v9028_v36 = vpack.c.bf16 %v13191_v24, %v13191_v24  ;;  %s9934_s25 = sshll.u32 %s10366_s9, 10 }
 0x367   : > { %v6665_v23 = vsel %vm12002_vm11, %v6601_v62, %v6664_v33  ;;  %v9029_v58 = vpack.c.bf16 %v13000_v22, %v13000_v22  ;;  %v8862_v7 = vcombine.high %v8860_v44, %v8860_v44  ;;  %v9030_v46 = vpack.c.bf16 %v13201_v1, %v13201_v1  ;;  %s13358_s22 = scalar_lea.hbm %s13415_s8, %s9934_s25 }
 0x368   : > { %6538 = vst.msk [vmem:[#allocation4 + $0x108] sm:$0xf] %vm13495_vm9, %v6521_v34  ;;  %6666 = vst [vmem:[#allocation4 + $0x100] sm:$0xf] %v6665_v23  ;;  %v9031_v4 = vpack.c.bf16 %v8819_v41, %v8819_v41  ;;  %v9032_v40 = vpack.c.bf16 %v8827_v8, %v8827_v8  ;;  %v9033_v51 = vpack.c.bf16 %v8826_v9, %v8826_v9  ;;  %v8124_v3 = vpop.permute.xlu0 %8123  ;;  %v9156_v27 = vunpack.c.l.b16 %v9027_v37 }
 0x369   : > { %v9034_v20 = vpack.c.bf16 %v8828_v15, %v8828_v15  ;;  %v9035_v45 = vpack.c.bf16 %v8836_v6, %v8836_v6  ;;  %v9036_v57 = vpack.c.bf16 %v8844_v63, %v8844_v63  ;;  %v9037_v32 = vpack.c.bf16 %v8843_v42, %v8843_v42  ;;  %8134 = vst.msk [vmem:[#allocation5 + $0x10] sm:$0xff] %vm8131_vm2, %v8124_v3  ;;  %v8235_v42 = vld [vmem:[#allocation4 + $0xd4] sm:$0x1] }
 0x36a   : > { %v9038_v54 = vpack.c.bf16 %v8845_v60, %v8845_v60  ;;  %v9039_v24 = vpack.c.bf16 %v10217_v53, %v10217_v53  ;;  %v9040_v48 = vpack.c.bf16 %v8861_v2, %v8861_v2  ;;  %v9041_v22 = vpack.c.bf16 %v8860_v44, %v8860_v44  ;;  %v8236_v53 = vld [vmem:[#allocation4 + $0xe0] sm:$0xf] }
 0x36b   : > { %v9042_v0 = vpack.c.bf16 %v8862_v7, %v8862_v7  ;;  %v9157_v59 = vunpack.c.l.b16 %v9028_v36  ;;  %vm13496_vm11 = vcmask 64512   ;;  %v9158_v38 = vunpack.c.l.b16 %v9029_v58 }
 0x36c   : > { %7932 = vst.msk [vmem:[#allocation5 + $0x18] sm:$0xff] %vm13496_vm11, %v10187_v11  ;;  %v9159_v19 = vunpack.c.l.b16 %v9030_v46  ;;  %v9160_v29 = vunpack.c.l.b16 %v9031_v4  ;;  %v9161_v28 = vunpack.c.l.b16 %v9032_v40  ;;  %v9162_v61 = vunpack.c.l.b16 %v9033_v51  ;;  %v8169_v41 = vpop.permute.xlu0 %8168  ;;  %v10212_v46 = vld [vmem:[#allocation4 + $0xd0] sm:$0xf] }
 0x36d   : > { %v9163_v13 = vunpack.c.l.b16 %v9034_v20  ;;  %v9164_v30 = vunpack.c.l.b16 %v9035_v45  ;;  %v9165_v1 = vunpack.c.l.b16 %v9036_v57  ;;  %v9166_v31 = vunpack.c.l.b16 %v9037_v32  ;;  %v8237_v20 = vld [vmem:[#allocation4 + $0xe4] sm:$0x1] }
 0x36e   : > { %v9167_v5 = vunpack.c.l.b16 %v9038_v54  ;;  %v9168_v21 = vunpack.c.l.b16 %v9039_v24  ;;  %v9169_v10 = vunpack.c.l.b16 %v9040_v48  ;;  %v9170_v9 = vunpack.c.l.b16 %v9041_v22 }
 0x36f   : > { %v9171_v43 = vunpack.c.l.b16 %v9042_v0  ;;  %v9244_v47 = vrot.slane %v9157_v59, 7  ;;  %v9246_v25 = vrot.slane %v9158_v38, 6  ;;  %v10179_v6 = vld [vmem:[#allocation4 + $0xf0] ss:$16 sps:$4 sm:$0xff]   ;;  %vm13497_vm4 = vcmask 261312  }
 0x370   : > { %8179 = vst.msk [vmem:[#allocation5 + $0x10] sm:$0xff] %vm13497_vm4, %v8169_v41  ;;  %v9248_v14 = vrot.slane %v9159_v19, 5  ;;  %v9250_v16 = vrot.slane %v9160_v29, 4  ;;  %v9252_v8 = vrot.slane %v9161_v28, 3  ;;  %v9254_v15 = vrot.slane %v9162_v61, 2  ;;  %8170 = vrot.lane.b32.xlu1 %v10179_v6, %s10286_s13  ;;  %v8214_v34 = vpop.permute.xlu0 %8213  ;;  %v10213_v19 = vld [vmem:[%s10429_s21 + $0xc0] sm:$0xff] }
 0x371   : > { %v9245_v39 = vsel %vm6396_vm14, %v9244_v47, %v9156_v27  ;;  %v9256_v26 = vrot.slane %v9163_v13, 1  ;;  %v9258_v33 = vrot.slane %v9165_v1, 7  ;;  %v9260_v35 = vrot.slane %v9166_v31, 6  ;;  %v10180_v2 = vld [vmem:[#allocation4 + $0xf8] ss:$16 sps:$4 sm:$0xff]   ;;  %v10214_v61 = vld [vmem:[%s10429_s21 + $0xc8] sm:$0xff] }
 0x372   : > { %v9247_v52 = vsel %vm6399_vm15, %v9246_v25, %v9245_v39  ;;  %v9262_v18 = vrot.slane %v9167_v5, 5  ;;  %v9264_v62 = vrot.slane %v9168_v21, 4  ;;  %v9266_v63 = vrot.slane %v9169_v10, 3  ;;  %v10215_v25 = vld [vmem:[%s10429_s21 + $0xe0] sm:$0xff]  ;;  %v10216_v39 = vld [vmem:[%s10429_s21 + $0xe8] sm:$0xff]  ;;  %s10222_s21 = sshll.u32 %s10298_s12, 4  ;;  %s10223_s21 = int_to_ptr.vmem [resolvable:$false] %s10222_s21 }
 0x373   : > { %v9249_v60 = vsel %vm6402_vm10, %v9248_v14, %v9247_v52  ;;  %v9259_v44 = vsel %vm6396_vm14, %v9258_v33, %v9164_v30  ;;  %v9268_v37 = vrot.slane %v9170_v9, 2  ;;  %v9270_v23 = vrot.slane %v9171_v43, 1  ;;  %s10224_s13 = scalar_lea.vmem %s10223_s21, 2048 }
 0x374   : > { %vm13498_vm12 = vcmask 326912   ;;  %v9251_v36 = vsel %vm6405_vm1, %v9250_v16, %v9249_v60  ;;  %v9261_v58 = vsel %vm6399_vm15, %v9260_v35, %v9259_v44  ;;  %v8301_v7 = vrot.slane %v8299_v12, 4  ;;  %8215 = vrot.lane.b32.xlu1 %v10180_v2, %s10288_s18  ;;  %s296_s18 = sand.u32 1, %s10272_s28  }
 0x375   : > { %8224 = vst.msk [vmem:[#allocation5 + $0x10] sm:$0xff] %vm13498_vm12, %v8214_v34  ;;  %v8302_v4 = vshll.u32 %v10212_v46, 16  ;;  %v9253_v40 = vsel %vm6408_vm0, %v9252_v8, %v9251_v36  ;;  %v9263_v51 = vsel %vm6402_vm10, %v9262_v18, %v9261_v58  ;;  %v8308_v45 = vshll.u32 %v8235_v42, 16  ;;  %s13365_s9 = scalar_lea.sflag [#allocation7], %s296_s18 }
 0x376   : > { %v8313_v57 = vshrl.u32 %v8236_v53, 16  ;;  %v9255_v11 = vsel %vm6411_vm7, %v9254_v15, %v9253_v40  ;;  %v9265_v32 = vsel %vm6405_vm1, %v9264_v62, %v9263_v51  ;;  %v8316_v55 = vshll.u32 %v8236_v53, 16 }
 0x377   : > { %v8304_v54 = vrot.slane %v8302_v4, 5  ;;  %v9257_v12 = vsel %vm6414_vm6, %v9256_v26, %v9255_v11  ;;  %v9267_v24 = vsel %vm6408_vm0, %v9266_v63, %v9265_v32  ;;  %v8310_v48 = vrot.slane %v8308_v45, 5 }
 0x378   : > { %v8315_v3 = vrot.slane %v8313_v57, 4  ;;  %v9269_v22 = vsel %vm6411_vm7, %v9268_v37, %v9267_v24  ;;  %v8318_v27 = vrot.slane %v8316_v55, 5  ;;  %v8322_v59 = vshll.u32 %v8237_v20, 16 }
 0x379   : > { %v8305_v0 = vor.u32 %v8304_v54, %v8301_v7  ;;  %v9271_v38 = vsel %vm6414_vm6, %v9270_v23, %v9269_v22  ;;  %v8863_v29 = vcombine.high %v10213_v19, %v10213_v19  ;;  %v8870_v28 = vrot.slane %v10213_v19, %v12828_v17 }
 0x37a   : > { %v8880_v13 = vcombine.high %v10214_v61, %v10214_v61  ;;  %v9302_v30 = vpack.c.b16 %v9271_v38, %v9257_v12  ;;  %v8319_v31 = vor.u32 %v8318_v27, %v8315_v3  ;;  %v8324_v5 = vrot.slane %v8322_v59, 5 }
 0x37b   : > { %v8306_v1 = vrot.slane %v8305_v0, 4  ;;  %v8877_v21 = vrot.slane %v8863_v29, %v12828_v17  ;;  %v8878_v10 = vcombine.high %v8870_v28, %v8870_v28  ;;  %v8887_v41 = vrot.slane %v10214_v61, %v12828_v17 }
 0x37c   : > { %v8894_v9 = vrot.slane %v8880_v13, %v12828_v17  ;;  %vm13499_vm9 = vcmask 31744   ;;  %v8320_v47 = vrot.slane %v8319_v31, 4  ;;  %v8897_v6 = vcombine.high %v10215_v25, %v10215_v25 }
 0x37d   : > { %10012 = vmatprep.mubr.msk.bf16.mxu1 %vm13499_vm9, %v9302_v30  ;;  %v8311_v43 = vsel %vm10461_vm13, %v8306_v1, %v8310_v48  ;;  %v8904_v14 = vrot.slane %v10215_v25, %v12828_v17  ;;  %v8879_v16 = vcombine.high %v8877_v21, %v8877_v21  ;;  %v8895_v8 = vcombine.high %v8887_v41, %v8887_v41 }
 0x37e   : > { %v8896_v15 = vcombine.high %v8894_v9, %v8894_v9  ;;  %v8914_v26 = vcombine.high %v10216_v39, %v10216_v39  ;;  %v8325_v33 = vsel %vm10461_vm13, %v8320_v47, %v8324_v5  ;;  %v8911_v35 = vrot.slane %v8897_v6, %v12828_v17 }
 0x37f   : > { %v8912_v42 = vcombine.high %v8904_v14, %v8904_v14  ;;  %v8921_v52 = vrot.slane %v10216_v39, %v12828_v17  ;;  %v9869_v18 = vcombine.low %v8311_v43, %v8325_v33  ;;  %v9043_v63 = vpack.c.bf16 %v8870_v28, %v8870_v28 }
 0x380   : > { %v8928_v62 = vrot.slane %v8914_v26, %v12828_v17  ;;  %v8913_v53 = vcombine.high %v8911_v35, %v8911_v35  ;;  %v9044_v60 = vpack.c.bf16 %v8878_v10, %v8878_v10  ;;  %v9045_v44 = vpack.c.bf16 %v8877_v21, %v8877_v21 }
 0x381   : > { %v8929_v34 = vcombine.high %v8921_v52, %v8921_v52  ;;  %8370 = vrot.lane.b32.xlu0 %v9869_v18, %s10296_s23  ;;  %v9046_v23 = vpack.c.bf16 %v8879_v16, %v8879_v16  ;;  %v9047_v2 = vpack.c.bf16 %v8887_v41, %v8887_v41  ;;  %v9048_v36 = vpack.c.bf16 %v8895_v8, %v8895_v8 }
 0x382   : > { %v8930_v37 = vcombine.high %v8928_v62, %v8928_v62  ;;  %v9049_v58 = vpack.c.bf16 %v8894_v9, %v8894_v9  ;;  %v9050_v7 = vpack.c.bf16 %v8896_v15, %v8896_v15  ;;  %v9052_v46 = vpack.c.bf16 %v8912_v42, %v8912_v42  ;;  %v8481_v9 = vld [vmem:[#allocation4 + $0x50] sm:$0xf] }
 0x383   : > { %v9053_v4 = vpack.c.bf16 %v8911_v35, %v8911_v35  ;;  %v9051_v40 = vpack.c.bf16 %v8904_v14, %v8904_v14  ;;  %v9054_v51 = vpack.c.bf16 %v8913_v53, %v8913_v53  ;;  %v9055_v20 = vpack.c.bf16 %v8921_v52, %v8921_v52  ;;  %v8483_v14 = vld [vmem:[#allocation4 + $0x60] sm:$0xf]  ;;  %v8482_v35 = vld [vmem:[#allocation4 + $0x54] sm:$0x1]  ;;  %v8484_v53 = vld [vmem:[#allocation4 + $0x64] sm:$0x1] }
 0x384   : > { %v9056_v45 = vpack.c.bf16 %v8929_v34, %v8929_v34  ;;  %v9057_v17 = vpack.c.bf16 %v8928_v62, %v8928_v62  ;;  %v9058_v57 = vpack.c.bf16 %v8930_v37, %v8930_v37  ;;  %v9173_v11 = vunpack.c.l.b16 %v9044_v60 }
 0x385   : > { %v9174_v32 = vunpack.c.l.b16 %v9045_v44  ;;  %v9172_v54 = vunpack.c.l.b16 %v9043_v63  ;;  %v9175_v55 = vunpack.c.l.b16 %v9046_v23  ;;  %v9176_v12 = vunpack.c.l.b16 %v9047_v2  ;;  %v7991_v2 = vld [vmem:[#allocation4 + $0x60] sm:$0xf] }
 0x386   : > { %v9177_v24 = vunpack.c.l.b16 %v9048_v36  ;;  %v9178_v48 = vunpack.c.l.b16 %v9049_v58  ;;  %v9179_v3 = vunpack.c.l.b16 %v9050_v7  ;;  %v9181_v22 = vunpack.c.l.b16 %v9052_v46 }
 0x387   : > { %v9182_v0 = vunpack.c.l.b16 %v9053_v4  ;;  %v9180_v27 = vunpack.c.l.b16 %v9051_v40  ;;  %v9183_v59 = vunpack.c.l.b16 %v9054_v51  ;;  %v9184_v38 = vunpack.c.l.b16 %v9055_v20  ;;  %v7992_v4 = vld [vmem:[#allocation4 + $0x64] sm:$0x1] }
 0x388   : > { %v9185_v19 = vunpack.c.l.b16 %v9056_v45  ;;  %v9186_v29 = vunpack.c.l.b16 %v9057_v17  ;;  %v9272_v28 = vrot.slane %v9173_v11, 7  ;;  %v9274_v61 = vrot.slane %v9174_v32, 6  ;;  %v7993_v17 = vld [vmem:[#allocation4 + $0x70] sm:$0xf]  ;;  %v7994_v11 = vld [vmem:[#allocation4 + $0x74] sm:$0x1] }
 0x389   : > { %v9276_v13 = vrot.slane %v9175_v55, 5  ;;  %v9187_v30 = vunpack.c.l.b16 %v9058_v57  ;;  %v9278_v1 = vrot.slane %v9176_v12, 4  ;;  %v9280_v31 = vrot.slane %v9177_v24, 3  ;;  %v8630_v12 = vld [vmem:[#allocation5] sm:$0xff] }
 0x38a   : > { %v9273_v5 = vsel %vm6396_vm14, %v9272_v28, %v9172_v54  ;;  %v9286_v21 = vrot.slane %v9181_v22, 7  ;;  %v9288_v10 = vrot.slane %v9182_v0, 6  ;;  %v9290_v41 = vrot.slane %v9183_v59, 5  ;;  %v8238_v22 = vld [vmem:[#allocation4 + $0xf0] sm:$0xf] }
 0x38b   : > { %v9275_v43 = vsel %vm6399_vm15, %v9274_v61, %v9273_v5  ;;  %v9282_v47 = vrot.slane %v9178_v48, 2  ;;  %v9284_v25 = vrot.slane %v9179_v3, 1  ;;  %v9292_v6 = vrot.slane %v9184_v38, 4 }
 0x38c   : > { %v9277_v16 = vsel %vm6402_vm10, %v9276_v13, %v9275_v43  ;;  %v9287_v8 = vsel %vm6396_vm14, %v9286_v21, %v9180_v27  ;;  %v9294_v15 = vrot.slane %v9185_v19, 3  ;;  %v9296_v39 = vrot.slane %v9186_v29, 2  ;;  %v8240_v13 = vld [vmem:[#allocation4 + $0x100] sm:$0xf]  ;;  %v8485_v21 = vld [vmem:[#allocation4 + $0x70] sm:$0xf] }
 0x38d   : > { %v9279_v26 = vsel %vm6405_vm1, %v9278_v1, %v9277_v16  ;;  %v9289_v33 = vsel %vm6399_vm15, %v9288_v10, %v9287_v8  ;;  %v8546_v42 = vshrl.u32 %v8481_v9, 16  ;;  %v8549_v52 = vshll.u32 %v8481_v9, 16  ;;  %vm13500_vm15 = vmmov %vm13499_vm9 }
 0x38e   : > { %v9281_v18 = vsel %vm6408_vm0, %v9280_v31, %v9279_v26  ;;  %v9291_v62 = vsel %vm6402_vm10, %v9290_v41, %v9289_v33  ;;  %v9298_v63 = vrot.slane %v9187_v30, 1  ;;  %v8560_v34 = vshrl.u32 %v8483_v14, 16 }
 0x38f   : > { %v9283_v60 = vsel %vm6411_vm7, %v9282_v47, %v9281_v18  ;;  %v9293_v44 = vsel %vm6405_vm1, %v9292_v6, %v9291_v62  ;;  %v8548_v37 = vrot.slane %v8546_v42, 4  ;;  %v8551_v23 = vrot.slane %v8549_v52, 5  ;;  %v8239_v47 = vld [vmem:[#allocation4 + $0xf4] sm:$0x1]  ;;  %v8241_v6 = vld [vmem:[#allocation4 + $0x104] sm:$0x1] }
 0x390   : > { %v9285_v36 = vsel %vm6414_vm6, %v9284_v25, %v9283_v60  ;;  %v9295_v58 = vsel %vm6408_vm0, %v9294_v15, %v9293_v44  ;;  %v8555_v7 = vshll.u32 %v8482_v35, 16  ;;  %v8562_v46 = vrot.slane %v8560_v34, 4  ;;  %v8487_v35 = vld [vmem:[#allocation4 + $0x80] sm:$0xf]  ;;  %vm13503_vm0 = vmmov %vm13497_vm4 }
 0x391   : > { %v9297_v40 = vsel %vm6411_vm7, %v9296_v39, %v9295_v58  ;;  %v8552_v51 = vor.u32 %v8551_v23, %v8548_v37  ;;  %v8563_v20 = vshll.u32 %v8483_v14, 16  ;;  %v8569_v45 = vshll.u32 %v8484_v53, 16  ;;  %vm13504_vm7 = vmmov %vm13498_vm12 }
 0x392   : > { %v9299_v57 = vsel %vm6414_vm6, %v9298_v63, %v9297_v40  ;;  %vm9411_vm14 = vcmask 588800   ;;  %v8080_v32 = vshrl.u32 %v7991_v2, 16  ;;  %v8083_v54 = vshll.u32 %v7991_v2, 16 }
 0x393   : > { %v9303_v55 = vpack.c.b16 %v9299_v57, %v9285_v36  ;;  %v8553_v24 = vrot.slane %v8552_v51, 4  ;;  %v8565_v48 = vrot.slane %v8563_v20, 5  ;;  %v8089_v3 = vshll.u32 %v7992_v4, 16  ;;  %v10186_v4 = vld [vmem:[%s13413_s6 + $0x20] ss:$0 sps:$4 sm:$0xff]  }
 0x394   : > { %v8557_v0 = vrot.slane %v8555_v7, 5  ;;  %v8082_v27 = vrot.slane %v8080_v32, 4  ;;  %v8085_v59 = vrot.slane %v8083_v54, 5  ;;  %v8094_v38 = vshrl.u32 %v7993_v17, 16  ;;  %v8486_v7 = vld [vmem:[#allocation4 + $0x74] sm:$0x1] }
 0x395   : > { %10013 = vmatmul.mubr.msk.bf16.gmra.mrb[8].mxu1 %vm13500_vm15, %v9303_v55  ;;  %v8566_v19 = vor.u32 %v8565_v48, %v8562_v46  ;;  %v8571_v29 = vrot.slane %v8569_v45, 5  ;;  %v8097_v28 = vshll.u32 %v7993_v17, 16  ;;  %v8103_v61 = vshll.u32 %v7994_v11, 16  ;;  %v8488_v20 = vld [vmem:[#allocation4 + $0x84] sm:$0x1] }
 0x396   : > { %10026 = vmatprep.mubr.msk.bf16.mxu1 %vm9411_vm14, %v8630_v12  ;;  %v8086_v30 = vor.u32 %v8085_v59, %v8082_v27  ;;  %v8096_v1 = vrot.slane %v8094_v38, 4  ;;  %v8327_v31 = vshrl.u32 %v8238_v22, 16  ;;  %v8330_v5 = vshll.u32 %v8238_v22, 16  ;;  %v8631_v27 = vld [vmem:[#allocation5 + $0x8] sm:$0xff] }
 0x397   : > { %v8558_v10 = vsel %vm10461_vm13, %v8553_v24, %v8557_v0  ;;  %v8567_v41 = vrot.slane %v8566_v19, 4  ;;  %v8091_v9 = vrot.slane %v8089_v3, 5  ;;  %v8099_v43 = vrot.slane %v8097_v28, 5 }
 0x398   : > { %v8105_v25 = vrot.slane %v8103_v61, 5  ;;  %v8329_v14 = vrot.slane %v8327_v31, 4  ;;  %v8332_v16 = vrot.slane %v8330_v5, 5  ;;  %v8341_v8 = vshrl.u32 %v8240_v13, 16 }
 0x399   : > { %v8572_v15 = vsel %vm10461_vm13, %v8567_v41, %v8571_v29  ;;  %v8087_v39 = vrot.slane %v8086_v30, 4  ;;  %v8100_v26 = vor.u32 %v8099_v43, %v8096_v1  ;;  %v8344_v33 = vshll.u32 %v8240_v13, 16 }
 0x39a   : > { %v9881_v42 = vcombine.low %v8558_v10, %v8572_v15  ;;  %v8333_v52 = vor.u32 %v8332_v16, %v8329_v14  ;;  %v8336_v18 = vshll.u32 %v8239_v47, 16  ;;  %v8343_v62 = vrot.slane %v8341_v8, 4 }
 0x39b   : > { %v8101_v63 = vrot.slane %v8100_v26, 4  ;;  %v8346_v53 = vrot.slane %v8344_v33, 5  ;;  %v8350_v34 = vshll.u32 %v8241_v6, 16  ;;  %v8574_v60 = vshrl.u32 %v8485_v21, 16 }
 0x39c   : > { %8617 = vrot.lane.b32.xlu0 %v9881_v42, %s10295_s17  ;;  %v8334_v44 = vrot.slane %v8333_v52, 4  ;;  %v8577_v37 = vshll.u32 %v8485_v21, 16  ;;  %v8588_v23 = vshrl.u32 %v8487_v35, 16  ;;  %v8092_v2 = vsel %vm10461_vm13, %v8087_v39, %v8091_v9 }
 0x39d   : > { %v8106_v36 = vsel %vm10461_vm13, %v8101_v63, %v8105_v25  ;;  %v8347_v58 = vor.u32 %v8346_v53, %v8343_v62  ;;  %v8576_v46 = vrot.slane %v8574_v60, 4  ;;  %v8338_v51 = vrot.slane %v8336_v18, 5 }
 0x39e   : > { %v9858_v40 = vcombine.low %v8092_v2, %v8106_v36  ;;  %v8579_v45 = vrot.slane %v8577_v37, 5  ;;  %v8352_v57 = vrot.slane %v8350_v34, 5  ;;  %v8590_v11 = vrot.slane %v8588_v23, 4 }
 0x39f   : > { %v8348_v17 = vrot.slane %v8347_v58, 4  ;;  %v8591_v32 = vshll.u32 %v8487_v35, 16  ;;  %v8339_v54 = vsel %vm10461_vm13, %v8334_v44, %v8338_v51  ;;  %v8583_v12 = vshll.u32 %v8486_v7, 16 }
 0x3a0   : > { %8125 = vrot.lane.b32.xlu1 %v9858_v40, %s10289_s19  ;;  %v8580_v55 = vor.u32 %v8579_v45, %v8576_v46  ;;  %vm9424_vm10 = vcmask 1043456   ;;  %v8597_v3 = vshll.u32 %v8488_v20, 16  ;;  %vm13501_vm1 = vcmask 130112   ;;  %s9581_s19 = sshll.u32 %s296_s18, 6 }
 0x3a1   : > { %v8353_v24 = vsel %vm10461_vm13, %v8348_v17, %v8352_v57  ;;  %v8593_v48 = vrot.slane %v8591_v32, 5  ;;  %10051 = vmatprep.subr.msk.bf16.mxu1 %vm9424_vm10, %v10186_v4  ;;  %v9426_v22 = vsel %vm9424_vm10, %v10186_v4, 0  ;;  %v8585_v19 = vrot.slane %v8583_v12, 5  ;;  %s298_s24 = scalar_lea.vmem [#allocation6], %s9581_s19 }
 0x3a2   : > { %v9870_v0 = vcombine.low %v8339_v54, %v8353_v24  ;;  %10025 = vmatpush3.bf16.msra.mxu1 %v9426_v22  ;;  %v8581_v59 = vrot.slane %v8580_v55, 4  ;;  %v8599_v28 = vrot.slane %v8597_v3, 5 }
 0x3a3   : > { %v8594_v38 = vor.u32 %v8593_v48, %v8590_v11 }
 0x3a4   : > { %8372 = vrot.lane.b32.xlu1 %v9870_v0, %s10296_s23  ;;  %v8586_v61 = vsel %vm10461_vm13, %v8581_v59, %v8585_v19 }
 0x3a5   : > { %v8595_v29 = vrot.slane %v8594_v38, 4  ;;  %10027 = vmatmul.mubr.msk.bf16.vlgmr.msra.gmra.mrb[4].mxu1 %vm9411_vm14, %v8631_v27 }
 0x3a7   : > { %v8600_v13 = vsel %vm10461_vm13, %v8595_v29, %v8599_v28  ;;  %vm13502_vm13 = vcmask 589312  }
 0x3a8   : > { %v9882_v30 = vcombine.low %v8586_v61, %v8600_v13  ;;  %vm13505_vm6 = vmmov %vm13502_vm13 }
 0x3aa   : > { %8619 = vrot.lane.b32.xlu1 %v9882_v30, %s10295_s17  ;;  %s9515_s17 = sshll.u32 %s298_s24, 4  ;;  %s13361_s17 = int_to_ptr.vmem [resolvable:$true] %s9515_s17 }
 0x3ab   : > { %s10218_s10 = scalar_lea.vmem %s13361_s17, 1024  ;;  %p10225_p0 = scmp.lt.s32.totalorder %s13361_s17, %s10223_s21 }
 0x3ac   : > { %p10219_p11 = scmp.ne.s32.totalorder %s13361_s17, %s10218_s10  ;;  %p10226_p1 = scmp.lt.s32.totalorder %s10224_s13, %s10218_s10 }
 0x3ae   : > { %p10220_p12 = pnand %p10219_p11, %p10383_p5  ;;  %p10227_p2 = por %p10226_p1, %p10225_p0 }
 0x3b0   : > { %p10221_p13 = pneg %p10220_p12 }
 0x3b2   : > { %p10228_p3 = pnand %p10227_p2, %p10221_p13 }
 0x3b7   : > { %v7969_v1 = vpop.permute.xlu1 %7968 }
 0x3b8   : > { %7978 = vst.msk [vmem:[#allocation5 + $0x18] sm:$0xff] %vm13501_vm1, %v7969_v1 }
 0x3d3   : > { %v8418_v5 = vpop.permute.xlu1 %8417 }
 0x3d8   : > { %v8463_v21 = vpop.permute.xlu1 %8462 }
 0x3e2   : > { %v8171_v10 = vpop.permute.xlu1 %8170 }
 0x3e6   : > { %v8216_v50 = vpop.permute.xlu1 %8215 }
 0x3f3   : > { %v8371_v31 = vpop.permute.xlu0 %8370 }
 0x3f4   : > { %8381 = vst.msk [vmem:[#allocation5 + $0x10] sm:$0xff] %vm8378_vm3, %v8371_v31 }
 0x3f5   : > { %8426 = vst.msk [vmem:[#allocation5 + $0x10] sm:$0xff] %vm8423_vm8, %v13193_v49 }
 0x3f6   : > { %8471 = vst.msk [vmem:[#allocation5 + $0x10] sm:$0xff] %vm8468_vm5, %v13232_v56 }
 0x40e   : > { %v8618_v41 = vpop.permute.xlu0 %8617 }
 0x40f   : > { %8628 = vst.msk [vmem:[#allocation5 + $0x10] sm:$0xff] %vm13502_vm13, %v8618_v41 }
 0x412   : > { %v8126_v9 = vpop.permute.xlu1 %8125 }
 0x413   : > { %8135 = vst.msk [vmem:[#allocation5 + $0x18] sm:$0xff] %vm8131_vm2, %v8126_v9  ;;  %vm13506_vm2 = vmmov %vm13496_vm11 }
 0x414   : > { %8180 = vst.msk [vmem:[#allocation5 + $0x18] sm:$0xff] %vm13503_vm0, %v8171_v10  ;;  %vm13507_vm11 = vmmov %vm13506_vm2 }
 0x415   : > { %8225 = vst.msk [vmem:[#allocation5 + $0x18] sm:$0xff] %vm13504_vm7, %v8216_v50  ;;  %vm13511_vm4 = vmmov %vm13506_vm2 }
 0x416   : > { %v8632_v43 = vld [vmem:[#allocation5 + $0x10] sm:$0xff]  ;;  %v8373_v49 = vpop.permute.xlu1 %8372  ;;  %vm13512_vm12 = vmmov %vm13506_vm2 }
 0x417   : > { %10030 = vmatprep.mubr.msk.bf16.mxu1 %vm9411_vm14, %v8632_v43  ;;  %8382 = vst.msk [vmem:[#allocation5 + $0x18] sm:$0xff] %vm8378_vm3, %v8373_v49  ;;  %vm13510_vm3 = vmmov %vm13506_vm2 }
 0x418   : > { %8427 = vst.msk [vmem:[#allocation5 + $0x18] sm:$0xff] %vm8423_vm8, %v8418_v5  ;;  %vm13508_vm8 = vmmov %vm13506_vm2 }
 0x419   : > { %8472 = vst.msk [vmem:[#allocation5 + $0x18] sm:$0xff] %vm8468_vm5, %v8463_v21  ;;  %vm13509_vm5 = vmmov %vm13506_vm2 }
 0x41a   : > { %vm13513_vm9 = vmmov %vm13506_vm2 }
 0x41c   : > { %v8620_v56 = vpop.permute.xlu1 %8619 }
 0x41d   : > { %8629 = vst.msk [vmem:[#allocation5 + $0x18] sm:$0xff] %vm13505_vm6, %v8620_v56 }
 0x424   : > { %v8633_v47 = vld [vmem:[#allocation5 + $0x18] sm:$0xff] }
 0x425   : > { %10031 = vmatmul.mubr.msk.bf16.gmra.mrb[8].mxu1 %vm9411_vm14, %v8633_v47 }
 0x478   : > { %v10028_v25 = vpop.f32.mrb[4].mxu1 }
 0x479   : > { %9495 = vst.msk [vmem:[%s298_s24 + $0x10] sm:$0xff] %vm13506_vm2, %v10028_v25  ;;  %v9462_v6 = vpop.f32.mrb[5].mxu1 }
 0x47a   : > { %9493 = vst.msk [vmem:[%s298_s24] sm:$0xff] %vm13507_vm11, %v9462_v6  ;;  %v10029_v14 = vpop.f32.mrb[6].mxu1 }
 0x47b   : > { %9496 = vst.msk [vmem:[%s298_s24 + $0x18] sm:$0xff] %vm13508_vm8, %v10029_v14  ;;  %v9465_v16 = vpop.f32.mrb[7].mxu1 }
 0x47c   : > { %9494 = vst.msk [vmem:[%s298_s24 + $0x8] sm:$0xff] %vm13509_vm5, %v9465_v16 }
 0x4f8   : > { %v10032_v8 = vpop.f32.mrb[8].mxu1 }
 0x4f9   : > { %9499 = vst.msk [vmem:[%s298_s24 + $0x30] sm:$0xff] %vm13510_vm3, %v10032_v8  ;;  %v9478_v15 = vpop.f32.mrb[9].mxu1 }
 0x4fa   : > { %9497 = vst.msk [vmem:[%s298_s24 + $0x20] sm:$0xff] %vm13511_vm4, %v9478_v15  ;;  %v10033_v39 = vpop.f32.mrb[10].mxu1 }
 0x4fb   : > { %9500 = vst.msk [vmem:[%s298_s24 + $0x38] sm:$0xff] %vm13512_vm12, %v10033_v39  ;;  %v9481_v26 = vpop.f32.mrb[11].mxu1 }
 0x4fc   : > { %9498 = vst.msk [vmem:[%s298_s24 + $0x28] sm:$0xff] %vm13513_vm9, %v9481_v26 }
 0x4fd   : > { %10231 = shalt.err (!%p10228_p3)
}
 0x4fe   : > { %s10232_s18 = scalar_lea.hbm %s13358_s22, 1024  ;;  %s10236_s25 = scalar_lea.hbm %s13415_s8, 2048 }
 0x4ff   : > { %p10233_p4 = scmp.ne.s32.totalorder %s13358_s22, %s10232_s18  ;;  %p10237_p9 = scmp.lt.u32.totalorder %s13358_s22, %s13415_s8 }
 0x500   : > { %p10238_p10 = scmp.lt.u32.totalorder %s10236_s25, %s10232_s18  ;;  %p10240_p12 = scmp.lt.u32.totalorder %s10232_s18, %s13358_s22 }
 0x501   : > { %p10234_p7 = pnand %p10233_p4, %p10383_p5 }
 0x502   : > { %p10239_p11 = por %p10238_p10, %p10237_p9 }
 0x503   : > { %p10235_p8 = pneg %p10234_p7 }
 0x504   : > { %p10241_p13 = por %p10240_p12, %p10239_p11 }
 0x506   : > { %p10242_p0 = pnand %p10241_p13, %p10235_p8 }
 0x508   : > { %10245 = shalt.err (!%p10242_p0)
}
 0x509   : > { %s10299_s10 = smov 128  }
 0x50a   : > { %10052 = dma.vmem_to_hbm [thread:$0]  (%p10383_p5), %s13361_s17, 1024, %s13358_s22, %s13365_s9, %s10299_s10, %s10299_s10, %s10283_s26  }
 0x50b PF: > { %p10058_p1 = scmp.ge.s32.totalorder %s10280_s30, 2  ;;  %s9530_s12 = sand.u32 1, %s10268_s27  }
 0x50c   : > { %s9531_s21 = scalar_lea.sflag [#allocation7], %s9530_s12 }
 0x50d   : > { %p10055_p2 = pnand %p10058_p1, %p10387_p6 }
 0x50f   : > { %10263 = dma.done.wait (!%p10055_p2), %s9531_s21, 1024  }
 0x510   : > { %10265 = vsyncadd (!%p10055_p2), %s9531_s21, 4294966272  ;;  %p18_p3 = scmp.ge.s32.totalorder %s10370_s11, 4   ;;  %s13514_s27 = smov %s10272_s28 }
 0x511   : > { %s13515_s28 = smov %s10276_s29  ;;  %s13516_s29 = smov %s10381_s14 }
 0x512   : > { %s13517_s30 = smov %s10370_s11  ;;  %20 = sbr.rel (!%p18_p3) target bundleno = 3 (0x3), region = 95 }
 0x519   :  { %9536 = vsyncpa [#allocation7], 1 }
 0x51a   :  { %9538 = vsyncpa [#allocation7 + $0x1], 1 }

</bundles_post_ra>
